<compile_context>
chip_gen: v5e
topology: v5e:2x2
jax: 0.10.0
libtpu: 0.0.40
codegen_flags: <defaults>
</compile_context>

<pallas_src>
import jax
import jax.numpy as jnp
from jax.experimental import pallas as pl
from jax.experimental.pallas import tpu as pltpu

IN_FEATS = 3 * 100 * 100   # 30000
HID = 512
OUT = 113
EPS = 1e-5

# Contraction dim padded to a multiple of 128 (only 80 zero rows of padding).
K_PAD = 30080              # 235 * 128
TK = 6016                  # 47 * 128 -> 5 reduction steps; full-width bf16 tile ~6.2 MB
VMEM_LIMIT = 32 << 20      # > 2x the largest double-buffered working set, < v7x physical


def _detect_hid_split():
    """Shard the hidden dim (512) across TensorCores only on dual-core chips.

    v5e / v6e have a single TensorCore: splitting there just adds strided DMAs
    and extra grid steps.  (v4 / v5p megacore could also return 2; kept
    conservative so an undetected dual-core chip still runs correctly.)
    """
    try:
        kind = jax.devices()[0].device_kind.lower()
    except Exception:
        return 1
    return 2 if "v7" in kind else 1


def _dense1hidden_kernel(x_ref, w1_ref, sc1_ref, sh1_ref, w2_ref,
                         o_ref, acc_ref):
    """One HID shard: accumulate x@W1 over K tiles, then BN1 + partial layer-2 logits."""
    k = pl.program_id(1)

    @pl.when(k == 0)
    def _():
        acc_ref[...] = jnp.zeros_like(acc_ref)

    # x is VMEM-resident; slice this step's K tile (offset is 128-aligned).
    k_off = pl.multiple_of(k * TK, 128)
    x_tile = x_ref[:, pl.ds(k_off, TK)]

    # bf16 x bf16 -> f32 accumulate on the MXU.
    acc_ref[...] += jnp.dot(x_tile, w1_ref[0],
                            preferred_element_type=jnp.float32)

    @pl.when(k == pl.num_programs(1) - 1)
    def _():
        # layer 1: fused Linear-bias + BatchNorm1d (eval) as per-channel scale/shift
        h = acc_ref[...] * sc1_ref[...] + sh1_ref[...]
        # partial logits from this hidden shard (combine + BN2 + softmax outside)
        o_ref[0] = jnp.dot(h, w2_ref[...], preferred_element_type=jnp.float32)


def dense1hidden_tiny(x_flat, params):
    """x_flat: (B, 30000) f32.  params from prepare_params().  Returns (B, 113) softmax."""
    w1_sharded, sc1, sh1, w2, sc2, sh2 = params
    n_split, k_pad, hid_shard = w1_sharded.shape
    B = x_flat.shape[0]

    # Only the tiny activation gets padded/cast per call; W1 was prepped once.
    x_pad = jnp.pad(x_flat, ((0, 0), (0, k_pad - IN_FEATS))).astype(jnp.bfloat16)

    partial = pl.pallas_call(
        _dense1hidden_kernel,
        out_shape=jax.ShapeDtypeStruct((n_split, B, OUT), jnp.float32),
        grid_spec=pltpu.PrefetchScalarGridSpec(
            num_scalar_prefetch=0,
            grid=(n_split, k_pad // TK),
            in_specs=[
                # x: single VMEM-resident block (same index every step -> no re-DMA)
                pl.BlockSpec((B, k_pad), lambda h, k: (0, 0)),
                # W1: shard-major, contiguous (TK, hid_shard) slab per step
                pl.BlockSpec((1, TK, hid_shard), lambda h, k: (h, k, 0)),
                pl.BlockSpec((1, hid_shard), lambda h, k: (0, h)),    # scale1 shard
                pl.BlockSpec((1, hid_shard), lambda h, k: (0, h)),    # shift1 shard
                pl.BlockSpec((hid_shard, OUT), lambda h, k: (h, 0)),  # W2 shard (f32)
            ],
            out_specs=pl.BlockSpec((1, B, OUT), lambda h, k: (h, 0, 0)),
            scratch_shapes=[pltpu.VMEM((B, hid_shard), jnp.float32)],
        ),
        compiler_params=pltpu.CompilerParams(
            dimension_semantics=("parallel", "arbitrary"),
            vmem_limit_bytes=VMEM_LIMIT),
    )(x_pad, w1_sharded, sc1, sh1, w2)

    # Tiny epilogue in plain JAX: combine hidden shards, BN2 scale/shift, softmax.
    logits = partial.sum(axis=0) * sc2 + sh2
    return jax.nn.softmax(logits, axis=1)


def _init_linear_bn(key, fan_in, fan_out):
    """Deterministic params for Linear(fan_in, fan_out) + BatchNorm1d(fan_out) (eval)."""
    k_w, k_b, k_g, k_be, k_m, k_v = jax.random.split(key, 6)
    bound = 1.0 / jnp.sqrt(fan_in)
    w = jax.random.uniform(k_w, (fan_in, fan_out), jnp.float32, -bound, bound)
    b = jax.random.uniform(k_b, (fan_out,), jnp.float32, -bound, bound)
    gamma = 1.0 + 0.1 * jax.random.normal(k_g, (fan_out,), jnp.float32)
    beta = 0.1 * jax.random.normal(k_be, (fan_out,), jnp.float32)
    run_mean = 0.1 * jax.random.normal(k_m, (fan_out,), jnp.float32)
    run_var = jax.random.uniform(k_v, (fan_out,), jnp.float32, 0.5, 1.5)
    # Fold bias + BN into per-channel scale/shift:
    #   y = (x@W + b - mean) * gamma / sqrt(var+eps) + beta = (x@W)*scale + shift
    scale = gamma / jnp.sqrt(run_var + EPS)
    shift = (b - run_mean) * scale + beta
    return w, scale.reshape(1, fan_out), shift.reshape(1, fan_out)


def prepare_params(key, n_hid_split):
    """One-time parameter prep: layout + dtype conversion done OUTSIDE the call path."""
    assert HID % n_hid_split == 0
    hid_shard = HID // n_hid_split
    k_l1, k_l2 = jax.random.split(key)
    w1, sc1, sh1 = _init_linear_bn(k_l1, IN_FEATS, HID)
    w2, sc2, sh2 = _init_linear_bn(k_l2, HID, OUT)
    # Pre-pad W1's contraction dim to K_PAD, pre-cast to bf16, and re-layout to
    # shard-major (n_split, K_PAD, hid_shard) so each core's K tiles are
    # contiguous HBM slabs.  w1_sharded[h, k, j] == w1_pad[k, h*hid_shard + j].
    w1_pad = jnp.pad(w1, ((0, K_PAD - IN_FEATS), (0, 0))).astype(jnp.bfloat16)
    w1_sharded = w1_pad.reshape(K_PAD, n_hid_split, hid_shard).transpose(1, 0, 2)
    w1_sharded = jax.block_until_ready(w1_sharded)   # materialize contiguous layout once
    kernel_params = (w1_sharded, sc1, sh1, w2, sc2, sh2)
    ref_params = (w1, sc1, sh1, w2, sc2, sh2)
    return kernel_params, ref_params


if __name__ == "__main__":
    root = jax.random.PRNGKey(0)
    k_x, k_p = jax.random.split(root)

    B = 2
    x = jax.random.normal(k_x, (B, 3, 100, 100), jnp.float32)   # NCHW, as in PyTorch
    x_flat = x.reshape(B, IN_FEATS)

    n_split = _detect_hid_split()
    kernel_params, (w1, sc1, sh1, w2, sc2, sh2) = prepare_params(k_p, n_split)

    out = dense1hidden_tiny(x_flat, kernel_params)
    out = jax.block_until_ready(out)

    assert out.shape == (B, OUT)
    assert jnp.allclose(jnp.sum(out, axis=1), 1.0, atol=1e-5)

    # Reference 1: same bf16-rounded x/W1 as the kernel streams (f32 accumulate).
    hp = jax.lax.Precision.HIGHEST
    x_b = x_flat.astype(jnp.bfloat16).astype(jnp.float32)
    w1_b = w1.astype(jnp.bfloat16).astype(jnp.float32)
    h_ref = jnp.dot(x_b, w1_b, precision=hp) * sc1 + sh1
    logits_ref = jnp.dot(h_ref, w2, precision=hp) * sc2 + sh2
    ref = jax.nn.softmax(logits_ref, axis=1)
    assert jnp.allclose(out, ref, atol=2e-4, rtol=2e-3)

    # Reference 2: full-f32 weights (looser tolerance due to bf16 weight streaming).
    h32 = jnp.dot(x_flat, w1, precision=hp) * sc1 + sh1
    ref32 = jax.nn.softmax(jnp.dot(h32, w2, precision=hp) * sc2 + sh2, axis=1)
    assert jnp.allclose(out, ref32, atol=5e-3)

    print("KERNEL_OK")
</pallas_src>

<mosaic_0001>
module attributes {stable_mosaic.version = 11 : i64} {
  func.func @_dense1hidden_kernel(%arg0: i32, %arg1: i32, %arg2: memref<2x30080xbf16, #tpu.memory_space<vmem>>, %arg3: memref<1x6016x512xbf16, #tpu.memory_space<vmem>>, %arg4: memref<1x512xf32, #tpu.memory_space<vmem>>, %arg5: memref<1x512xf32, #tpu.memory_space<vmem>>, %arg6: memref<512x113xf32, #tpu.memory_space<vmem>>, %arg7: memref<1x2x113xf32, #tpu.memory_space<vmem>>, %arg8: memref<2x512xf32, #tpu.memory_space<vmem>>) attributes {dimension_semantics = [#tpu.dimension_semantics<parallel>, #tpu.dimension_semantics<arbitrary>], iteration_bounds = array<i64: 1, 5>, scalar_prefetch = 0 : i64, scratch_operands = 1 : i64, tpu.core_type = #tpu.core_type<tc>, window_params = [{pipeline_mode = #tpu.pipeline_mode<synchronous>, transform_indices = @transform_0, window_bounds = array<i64: 2, 30080>}, {transform_indices = @transform_1, window_bounds = array<i64: 1, 6016, 512>}, {transform_indices = @transform_2, window_bounds = array<i64: 1, 512>}, {transform_indices = @transform_3, window_bounds = array<i64: 1, 512>}, {transform_indices = @transform_4, window_bounds = array<i64: 512, 113>}, {transform_indices = @transform_5, window_bounds = array<i64: 1, 2, 113>}]} {
    %c0_i32 = arith.constant 0 : i32
    %0 = arith.cmpi eq, %arg1, %c0_i32 : i32
    %1 = arith.extui %0 : i1 to i32
    %c0_i32_0 = arith.constant 0 : i32
    %2 = arith.cmpi ne, %1, %c0_i32_0 : i32
    scf.if %2 {
      %cst_9 = arith.constant 0.000000e+00 : f32
      %16 = vector.broadcast %cst_9 : f32 to vector<2x512xf32>
      %c0_10 = arith.constant 0 : index
      %c0_11 = arith.constant 0 : index
      %17 = vector.load %arg8[%c0_10, %c0_11] : memref<2x512xf32, #tpu.memory_space<vmem>>, vector<2x512xf32>
      tpu.vector_store %arg8[%c0_10, %c0_11], %16 {strides = array<i32>} : memref<2x512xf32, #tpu.memory_space<vmem>>, vector<2x512xf32>,
    } else {
    }
    %c6016_i32 = arith.constant 6016 : i32
    %3 = arith.muli %arg1, %c6016_i32 : i32
    %4 = tpu.assume_multiple %3, 128 : i32
    %c0 = arith.constant 0 : index
    %5 = arith.index_cast %4 : i32 to index
    %6 = vector.load %arg2[%c0, %5] : memref<2x30080xbf16, #tpu.memory_space<vmem>>, vector<2x6016xbf16>
    %c0_1 = arith.constant 0 : index
    %c0_2 = arith.constant 0 : index
    %7 = vector.load %arg8[%c0_1, %c0_2] : memref<2x512xf32, #tpu.memory_space<vmem>>, vector<2x512xf32>
    %c0_3 = arith.constant 0 : index
    %c0_4 = arith.constant 0 : index
    %c0_5 = arith.constant 0 : index
    %8 = vector.load %arg3[%c0_3, %c0_4, %c0_5] : memref<1x6016x512xbf16, #tpu.memory_space<vmem>>, vector<1x6016x512xbf16>
    %9 = vector.shape_cast %8 : vector<1x6016x512xbf16> to vector<6016x512xbf16>
    %cst = arith.constant dense<0.000000e+00> : vector<2x512xf32>
    %10 = tpu.matmul %6, %9, %cst {dimension_numbers = #tpu.dot_dimension_numbers<[1], [0], [0], [1], [0, 0, 1, 1], [], []>} : vector<2x6016xbf16>, vector<6016x512xbf16>, vector<2x512xf32> -> vector<2x512xf32>
    %11 = arith.addf %7, %10 : vector<2x512xf32>
    %c0_6 = arith.constant 0 : index
    %c0_7 = arith.constant 0 : index
    %12 = vector.load %arg8[%c0_6, %c0_7] : memref<2x512xf32, #tpu.memory_space<vmem>>, vector<2x512xf32>
    tpu.vector_store %arg8[%c0_6, %c0_7], %11 {strides = array<i32>} : memref<2x512xf32, #tpu.memory_space<vmem>>, vector<2x512xf32>,
    %c4_i32 = arith.constant 4 : i32
    %13 = arith.cmpi eq, %arg1, %c4_i32 : i32
    %14 = arith.extui %13 : i1 to i32
    %c0_i32_8 = arith.constant 0 : i32
    %15 = arith.cmpi ne, %14, %c0_i32_8 : i32
    scf.if %15 {
      %c0_9 = arith.constant 0 : index
      %c0_10 = arith.constant 0 : index
      %16 = vector.load %arg8[%c0_9, %c0_10] : memref<2x512xf32, #tpu.memory_space<vmem>>, vector<2x512xf32>
      %c0_11 = arith.constant 0 : index
      %c0_12 = arith.constant 0 : index
      %17 = vector.load %arg4[%c0_11, %c0_12] : memref<1x512xf32, #tpu.memory_space<vmem>>, vector<1x512xf32>
      %18 = vector.broadcast %17 : vector<1x512xf32> to vector<2x512xf32>
      %19 = arith.mulf %16, %18 : vector<2x512xf32>
      %c0_13 = arith.constant 0 : index
      %c0_14 = arith.constant 0 : index
      %20 = vector.load %arg5[%c0_13, %c0_14] : memref<1x512xf32, #tpu.memory_space<vmem>>, vector<1x512xf32>
      %21 = vector.broadcast %20 : vector<1x512xf32> to vector<2x512xf32>
      %22 = arith.addf %19, %21 : vector<2x512xf32>
      %c0_15 = arith.constant 0 : index
      %c0_16 = arith.constant 0 : index
      %23 = vector.load %arg6[%c0_15, %c0_16] : memref<512x113xf32, #tpu.memory_space<vmem>>, vector<512x113xf32>
      %cst_17 = arith.constant dense<0.000000e+00> : vector<2x113xf32>
      %24 = tpu.matmul %22, %23, %cst_17 {dimension_numbers = #tpu.dot_dimension_numbers<[1], [0], [0], [1], [0, 0, 1, 1], [], []>} : vector<2x512xf32>, vector<512x113xf32>, vector<2x113xf32> -> vector<2x113xf32>
      %c0_18 = arith.constant 0 : index
      %c0_19 = arith.constant 0 : index
      %c0_20 = arith.constant 0 : index
      %25 = vector.load %arg7[%c0_18, %c0_19, %c0_20] : memref<1x2x113xf32, #tpu.memory_space<vmem>>, vector<1x2x113xf32>
      %26 = vector.shape_cast %25 : vector<1x2x113xf32> to vector<2x113xf32>
      %27 = vector.shape_cast %24 : vector<2x113xf32> to vector<1x2x113xf32>
      tpu.vector_store %arg7[%c0_18, %c0_19, %c0_20], %27 {strides = array<i32>} : memref<1x2x113xf32, #tpu.memory_space<vmem>>, vector<1x2x113xf32>,
    } else {
    }
    return
  }
  func.func @transform_0(%arg0: i32, %arg1: i32) -> (i32, i32) {
    %c0_i32 = arith.constant 0 : i32
    %c0_i32_0 = arith.constant 0 : i32
    %c0_i32_1 = arith.constant 0 : i32
    return %c0_i32, %c0_i32_0 : i32, i32
  }
  func.func @transform_1(%arg0: i32, %arg1: i32) -> (i32, i32, i32) {
    %c0_i32 = arith.constant 0 : i32
    %c0_i32_0 = arith.constant 0 : i32
    return %arg0, %arg1, %c0_i32 : i32, i32, i32
  }
  func.func @transform_2(%arg0: i32, %arg1: i32) -> (i32, i32) {
    %c0_i32 = arith.constant 0 : i32
    %c0_i32_0 = arith.constant 0 : i32
    return %c0_i32, %arg0 : i32, i32
  }
  func.func @transform_3(%arg0: i32, %arg1: i32) -> (i32, i32) {
    %c0_i32 = arith.constant 0 : i32
    %c0_i32_0 = arith.constant 0 : i32
    return %c0_i32, %arg0 : i32, i32
  }
  func.func @transform_4(%arg0: i32, %arg1: i32) -> (i32, i32) {
    %c0_i32 = arith.constant 0 : i32
    %c0_i32_0 = arith.constant 0 : i32
    return %arg0, %c0_i32 : i32, i32
  }
  func.func @transform_5(%arg0: i32, %arg1: i32) -> (i32, i32, i32) {
    %c0_i32 = arith.constant 0 : i32
    %c0_i32_0 = arith.constant 0 : i32
    %c0_i32_1 = arith.constant 0 : i32
    return %arg0, %c0_i32, %c0_i32_0 : i32, i32, i32
  }
}

</mosaic_0001>

<bundles_post_ra>
// kernel: tpu_custom_call.1
= control target key start
LH: loop header
LB: loop body
LE: loop exit
PB: predicated region body
PF: predicated region fallthrough
CT: control target
= control target key end

     0   :  { %s23907_s0 = inlined_call_operand.hbm [shape: bf16[2,30080], index: 0, kind: input, shape index: {}]   ;;  %s23908_s1 = inlined_call_operand.hbm [shape: bf16[1,30080,512], index: 1, kind: input, shape index: {}]   ;;  %s23909_s2 = inlined_call_operand.hbm [shape: f32[1,512], index: 2, kind: input, shape index: {}]   ;;  %s23910_s3 = inlined_call_operand.hbm [shape: f32[1,512], index: 3, kind: input, shape index: {}]   ;;  %s23911_s4 = inlined_call_operand.vmem [shape: f32[512,113], index: 4, kind: input, shape index: {}]   ;;  %s23912_s5 = inlined_call_operand.hbm [shape: f32[1,2,113], index: 5, kind: output, shape index: {}]  }
   0x1   :  { %23928 = sst [smem:[#allocation25_spill]] %s23907_s0 }
   0x2   :  { %10 = vsyncpa [#allocation4], 0 }
   0x3   :  { %11 = vsyncpa [#allocation7], 0 }
   0x4   :  { %13 = vsyncpa [#allocation7 + $0x1], 0 }
   0x5   :  { %14 = vsyncpa [#allocation10], 0 }
   0x6   :  { %15 = vsyncpa [#allocation5], 0  ;;  %s20173_s18 = smov 0   ;;  %s20175_s19 = smov 0  }
   0x7   :  { %s20177_s20 = smov 0   ;;  %s20179_s21 = smov 0  }
   0x8   :  { %s20181_s22 = smov 0   ;;  %s20183_s23 = smov 0  }
   0x9 LB: > { %s20202_s24 = sadd.s32 4294967295, %s20134_s23   ;;  %s63_s25 = sadd.s32 1, %s20122_s20  ;;  %s20134_s23 = sphi %s20183_s23, %s21_s23   ;;  %s20130_s22 = sphi %s20181_s22, %s23965_s22   ;;  %s20126_s21 = sphi %s20179_s21, %s23964_s21   ;;  %s20122_s20 = sphi %s20177_s20, %s23963_s20   ;;  %s20118_s19 = sphi %s20175_s19, %s23962_s19   ;;  %s20114_s18 = sphi %s20173_s18, %s23961_s18  }
   0xa   : > { %p70_p0 = scmp.ne.s32.totalorder %s20122_s20, %s20118_s19  ;;  %p71_p1 = scmp.eq.s32.totalorder %s20134_s23, 0 }
   0xb   : > { %p76_p2 = scmp.ne.s32.totalorder %s20118_s19, %s20114_s18  ;;  %p77_p3 = scmp.eq.s32.totalorder %s20202_s24, 0 }
   0xc   : > { %p20210_p4 = por %p71_p1, %p70_p0  ;;  %p12260_p5 = scmp.ge.s32.totalorder %s20134_s23, 1 }
   0xd   : > { %p20217_p6 = por %p77_p3, %p76_p2  ;;  %p191_p7 = scmp.lt.s32.totalorder %s20134_s23, 6 }
   0xe   : > { %s217_s30 = sshll.u32 %s23909_s2, 4  ;;  %s20136_s7 = smov [#allocation8]   ;;  %s218_s30 = int_to_ptr.hbm [resolvable:$true] %s217_s30 }
   0xf   : > { %p20225_p8 = pnand %p12260_p5, %p191_p7  ;;  %s219_s8 = sshll.u32 %s20136_s7, 4  ;;  %s220_s8 = int_to_ptr.vmem [resolvable:$true] %s219_s8 }
  0x10   : > { %p19838_p10 = scmp.lt.s32.totalorder %s20134_s23, 5  ;;  %s23934_s0 = sld [smem:[#allocation25_spill]] }
  0x11   : > { %p19821_p9 = pneg %p20225_p8  ;;  %s231_s16 = sshll.u32 %s23910_s3, 4  ;;  %s232_s16 = int_to_ptr.hbm [resolvable:$true] %s231_s16 }
  0x12   : > { %p20240_p12 = pnand %p19838_p10, %p20210_p4  ;;  %s20137_s17 = smov [#allocation3]  }
  0x13   : > { %p20234_p11 = pnand %p19821_p9, %p77_p3  ;;  %s205_s18 = sshll.u32 %s20137_s17, 4  ;;  %s206_s18 = int_to_ptr.vmem [resolvable:$true] %s205_s18 }
  0x14   : > { %s20138_s26 = smov [#allocation9]   ;;  %s30_s29 = sadd.s32 1, %s20130_s22 }
  0x15   : > { %19827 = dma.hbm_to_vmem [thread:$0]  (!%p20234_p11), %s218_s30, 64, %s220_s8, [#allocation7]  }
  0x16   : > { %s203_s13 = sshll.u32 %s23934_s0, 4  ;;  %s233_s28 = sshll.u32 %s20138_s26, 4  ;;  %s204_s13 = int_to_ptr.hbm [resolvable:$true] %s203_s13  ;;  %s234_s28 = int_to_ptr.vmem [resolvable:$true] %s233_s28 }
  0x17   : > { %19824 = dma.hbm_to_vmem [thread:$0]  (!%p20234_p11), %s204_s13, 3760, %s206_s18, [#allocation4]  }
  0x18   : > { %19830 = dma.hbm_to_vmem [thread:$0]  (!%p20234_p11), %s232_s16, 64, %s234_s28, [#allocation10]  }
  0x19   : > { %s253_s30 = sand.u32 1, %s20134_s23   ;;  %p31_p13 = scmp.ge.s32.totalorder %s30_s29, 5 }
  0x1a   : > { %s255_s7 = sand.u32 1, %s20122_s20   ;;  %s19800_s8 = smul.u32 12032, %s20130_s22 }
  0x1b   : > { %s23967_s29 = smov (%p31_p13, %s30_s29), 0  ;;  %s19801_s11 = smul.u32 12032, %s255_s7 }
  0x1c   : > { %s265_s13 = scalar_lea.hbm %s23908_s1, %s19800_s8  ;;  %s59_s15 = ssub.s32 %s20130_s22, %s23967_s29 }
  0x1d   : > { %s266_s17 = sshll.u32 %s265_s13, 4  ;;  %p61_p0 = scmp.eq.s32.totalorder %s59_s15, 0  ;;  %s267_s17 = int_to_ptr.hbm [resolvable:$true] %s266_s17 }
  0x1e   : > { %s257_s9 = scalar_lea.vmem [#allocation6], %s19801_s11  ;;  %s254_s26 = scalar_lea.sflag [#allocation7], %s253_s30 }
  0x1f   : > { %s268_s16 = sshll.u32 %s257_s9, 4  ;;  %s20139_s28 = smov 256   ;;  %s269_s16 = int_to_ptr.vmem [resolvable:$true] %s268_s16 }
  0x20   : > { %s20270_s18 = scalar_select %p61_p0, %s20122_s20, %s63_s25  }
  0x21   : > { %s20140_s0 = smov 16   ;;  %280 = sbr.rel (%p20225_p8) target bundleno = 1897 (0x769), region = 40 }
  0x22   : > { %19834 = dma.hbm_to_vmem [thread:$0]  (!%p20240_p12), %s267_s17, 192512, %s269_s16, %s254_s26, %s20139_s28, %s20139_s28, %s20140_s0  }
  0x26   : > { %20093 = dma.done.wait (%p77_p3), [#allocation4], 3760  }
  0x27   : > { %20095 = vsyncadd (%p77_p3), [#allocation4], 4294963536  ;;  %s287_s25 = sand.u32 1, %s20202_s24   ;;  %s289_s7 = sand.u32 1, %s20118_s19  }
  0x28   : > { %s19802_s8 = smul.u32 12032, %s289_s7  ;;  %s288_s30 = scalar_lea.sflag [#allocation7], %s287_s25 }
  0x2a   : > { %s20282_s11 = scalar_lea.vmem [#allocation6], %s19802_s8 }
  0x2b   : > { %20097 = dma.done.wait (%p20217_p6), %s288_s30, 192512  }
  0x2c   : > { %20099 = vsyncadd (%p20217_p6), %s288_s30, 4294774784 }
  0x2d   : > { %20101 = dma.done.wait (%p77_p3), [#allocation7], 64  }
  0x2e   : > { %20103 = vsyncadd (%p77_p3), [#allocation7], 4294967232 }
  0x2f   : > { %20105 = dma.done.wait (%p77_p3), [#allocation10], 64  }
  0x30   : > { %20107 = vsyncadd (%p77_p3), [#allocation10], 4294967232  ;;  %p12272_p1 = scmp.ne.s32.totalorder %s20126_s21, 0 }
  0x32   : > { %341 = sbr.rel (%p12272_p1) target bundleno = 57 (0x39), region = 60 }
  0x37   : > { %v20141_v0 = vmov 0.0  }
  0x38   : > { %342 = vst [vmem:[#allocation2] sm:$0xff] %v20141_v0 }
  0x39 PF: > { %v12387_v1 = vld [vmem:[%s20282_s11 + $0xe0] sm:$0xf]  ;;  %v18326_v2 = vld [vmem:[%s20282_s11 + $0xec] sm:$0xf0]  ;;  %s343_s0 = smul.u32 6016, %s20126_s21  ;;  %vm11935_vm0 = vcmask 1041408  }
  0x3a   : > { %v12515_v3 = vld [vmem:[%s20282_s11 + $0x1e0] sm:$0xf]  ;;  %v12388_v4 = vor.u32 %v18326_v2, %v12387_v1  ;;  %v18358_v5 = vld [vmem:[%s20282_s11 + $0x1ec] sm:$0xf0]  ;;  %vm11937_vm1 = vcmask 1045508   ;;  %vm11939_vm2 = vcmask 1043456  }
  0x3b   : > { %v12643_v6 = vld [vmem:[%s20282_s11 + $0x2e0] sm:$0xf]  ;;  %v18390_v7 = vld [vmem:[%s20282_s11 + $0x2ec] sm:$0xf0]  ;;  %v12516_v8 = vor.u32 %v18358_v5, %v12515_v3  ;;  %s344_s27 = sshra.s32 %s343_s0, 7  ;;  %p18289_p2 = scmp.ne.s32.totalorder %s20126_s21, 4 }
  0x3c   : > { %v12644_v9 = vor.u32 %v18390_v7, %v12643_v6  ;;  %v12771_v10 = vld [vmem:[%s20282_s11 + $0x3e0] sm:$0xf]  ;;  %v18422_v11 = vld [vmem:[%s20282_s11 + $0x3ec] sm:$0xf0]  ;;  %9484 = vmatpush.bf16.msra.mxu0 %v12388_v4  ;;  %s20390_s6 = scalar_lea.vmem [#allocation3], %s344_s27 }
  0x3d   : > { %v12371_v12 = vld [vmem:[%s20282_s11 + $0xc0] sm:$0xf]  ;;  %v12772_v13 = vor.u32 %v18422_v11, %v12771_v10  ;;  %v18322_v14 = vld [vmem:[%s20282_s11 + $0xcc] sm:$0xf0]  ;;  %9497 = vmatpush.bf16.msra.mxu1 %v12516_v8 }
  0x3e   : > { %v12499_v15 = vld [vmem:[%s20282_s11 + $0x1c0] sm:$0xf]  ;;  %v18354_v16 = vld [vmem:[%s20282_s11 + $0x1cc] sm:$0xf0]  ;;  %9510 = vmatpush.bf16.msra.mxu2 %v12644_v9  ;;  %v12372_v17 = vor.u32 %v18322_v14, %v12371_v12 }
  0x3f   : > { %v12500_v18 = vor.u32 %v18354_v16, %v12499_v15  ;;  %v12627_v19 = vld [vmem:[%s20282_s11 + $0x2c0] sm:$0xf]  ;;  %v18386_v20 = vld [vmem:[%s20282_s11 + $0x2cc] sm:$0xf0]  ;;  %9523 = vmatpush.bf16.msra.mxu3 %v12772_v13 }
  0x40   : > { %v12755_v21 = vld [vmem:[%s20282_s11 + $0x3c0] sm:$0xf]  ;;  %v12628_v22 = vor.u32 %v18386_v20, %v12627_v19  ;;  %v18418_v23 = vld [vmem:[%s20282_s11 + $0x3cc] sm:$0xf0]  ;;  %9485 = vmatpush.bf16.msra.mxu0 %v12372_v17 }
  0x41   : > { %v12355_v24 = vld [vmem:[%s20282_s11 + $0xa0] sm:$0xf]  ;;  %v18318_v25 = vld [vmem:[%s20282_s11 + $0xac] sm:$0xf0]  ;;  %v12756_v26 = vor.u32 %v18418_v23, %v12755_v21  ;;  %9498 = vmatpush.bf16.msra.mxu1 %v12500_v18 }
  0x42   : > { %v12483_v27 = vld [vmem:[%s20282_s11 + $0x1a0] sm:$0xf]  ;;  %v18350_v28 = vld [vmem:[%s20282_s11 + $0x1ac] sm:$0xf0]  ;;  %v12356_v30 = vor.u32 %v18318_v25, %v12355_v24  ;;  %9511 = vmatpush.bf16.msra.mxu2 %v12628_v22 }
  0x43   : > { %v12611_v29 = vld [vmem:[%s20282_s11 + $0x2a0] sm:$0xf]  ;;  %v18382_v31 = vld [vmem:[%s20282_s11 + $0x2ac] sm:$0xf0]  ;;  %v12484_v34 = vor.u32 %v18350_v28, %v12483_v27  ;;  %9524 = vmatpush.bf16.msra.mxu3 %v12756_v26 }
  0x44   : > { %v12739_v32 = vld [vmem:[%s20282_s11 + $0x3a0] sm:$0xf]  ;;  %v18414_v33 = vld [vmem:[%s20282_s11 + $0x3ac] sm:$0xf0]  ;;  %v12612_v35 = vor.u32 %v18382_v31, %v12611_v29  ;;  %9486 = vmatpush.bf16.msra.mxu0 %v12356_v30 }
  0x45   : > { %v12339_v36 = vld [vmem:[%s20282_s11 + $0x80] sm:$0xf]  ;;  %v18314_v37 = vld [vmem:[%s20282_s11 + $0x8c] sm:$0xf0]  ;;  %v12740_v39 = vor.u32 %v18414_v33, %v12739_v32  ;;  %9499 = vmatpush.bf16.msra.mxu1 %v12484_v34 }
  0x46   : > { %v12467_v38 = vld [vmem:[%s20282_s11 + $0x180] sm:$0xf]  ;;  %v18346_v40 = vld [vmem:[%s20282_s11 + $0x18c] sm:$0xf0]  ;;  %v12340_v45 = vor.u32 %v18314_v37, %v12339_v36  ;;  %9512 = vmatpush.bf16.msra.mxu2 %v12612_v35 }
  0x47   : > { %v12595_v41 = vld [vmem:[%s20282_s11 + $0x280] sm:$0xf]  ;;  %v18378_v42 = vld [vmem:[%s20282_s11 + $0x28c] sm:$0xf0]  ;;  %v12468_v46 = vor.u32 %v18346_v40, %v12467_v38  ;;  %9525 = vmatpush.bf16.msra.mxu3 %v12740_v39 }
  0x48   : > { %v12723_v43 = vld [vmem:[%s20282_s11 + $0x380] sm:$0xf]  ;;  %v18410_v44 = vld [vmem:[%s20282_s11 + $0x38c] sm:$0xf0]  ;;  %v12596_v47 = vor.u32 %v18378_v42, %v12595_v41  ;;  %9487 = vmatpush.bf16.msra.mxu0 %v12340_v45 }
  0x49   : > { %v12323_v48 = vld [vmem:[%s20282_s11 + $0x60] sm:$0xf]  ;;  %v18310_v49 = vld [vmem:[%s20282_s11 + $0x6c] sm:$0xf0]  ;;  %v12724_v51 = vor.u32 %v18410_v44, %v12723_v43  ;;  %9500 = vmatpush.bf16.msra.mxu1 %v12468_v46 }
  0x4a   : > { %v12451_v50 = vld [vmem:[%s20282_s11 + $0x160] sm:$0xf]  ;;  %v18342_v52 = vld [vmem:[%s20282_s11 + $0x16c] sm:$0xf0]  ;;  %v12324_v57 = vor.u32 %v18310_v49, %v12323_v48  ;;  %9513 = vmatpush.bf16.msra.mxu2 %v12596_v47 }
  0x4b   : > { %v12579_v53 = vld [vmem:[%s20282_s11 + $0x260] sm:$0xf]  ;;  %v18374_v54 = vld [vmem:[%s20282_s11 + $0x26c] sm:$0xf0]  ;;  %v12452_v58 = vor.u32 %v18342_v52, %v12451_v50  ;;  %9526 = vmatpush.bf16.msra.mxu3 %v12724_v51 }
  0x4c   : > { %v12707_v55 = vld [vmem:[%s20282_s11 + $0x360] sm:$0xf]  ;;  %v18406_v56 = vld [vmem:[%s20282_s11 + $0x36c] sm:$0xf0]  ;;  %v12580_v59 = vor.u32 %v18374_v54, %v12579_v53  ;;  %9488 = vmatpush.bf16.msra.mxu0 %v12324_v57 }
  0x4d   : > { %v12307_v60 = vld [vmem:[%s20282_s11 + $0x40] sm:$0xf]  ;;  %v18306_v61 = vld [vmem:[%s20282_s11 + $0x4c] sm:$0xf0]  ;;  %v12708_v63 = vor.u32 %v18406_v56, %v12707_v55  ;;  %9501 = vmatpush.bf16.msra.mxu1 %v12452_v58 }
  0x4e   : > { %v12435_v62 = vld [vmem:[%s20282_s11 + $0x140] sm:$0xf]  ;;  %v18338_v0 = vld [vmem:[%s20282_s11 + $0x14c] sm:$0xf0]  ;;  %v12308_v5 = vor.u32 %v18306_v61, %v12307_v60  ;;  %9514 = vmatpush.bf16.msra.mxu2 %v12580_v59 }
  0x4f   : > { %v12563_v1 = vld [vmem:[%s20282_s11 + $0x240] sm:$0xf]  ;;  %v18370_v2 = vld [vmem:[%s20282_s11 + $0x24c] sm:$0xf0]  ;;  %v12436_v6 = vor.u32 %v18338_v0, %v12435_v62  ;;  %9527 = vmatpush.bf16.msra.mxu3 %v12708_v63 }
  0x50   : > { %v12691_v3 = vld [vmem:[%s20282_s11 + $0x340] sm:$0xf]  ;;  %v18402_v4 = vld [vmem:[%s20282_s11 + $0x34c] sm:$0xf0]  ;;  %v12564_v7 = vor.u32 %v18370_v2, %v12563_v1  ;;  %9489 = vmatpush.bf16.msra.mxu0 %v12308_v5 }
  0x51   : > { %v12291_v8 = vld [vmem:[%s20282_s11 + $0x20] sm:$0xf]  ;;  %v18302_v9 = vld [vmem:[%s20282_s11 + $0x2c] sm:$0xf0]  ;;  %v12692_v11 = vor.u32 %v18402_v4, %v12691_v3  ;;  %9502 = vmatpush.bf16.msra.mxu1 %v12436_v6 }
  0x52   : > { %v12419_v10 = vld [vmem:[%s20282_s11 + $0x120] sm:$0xf]  ;;  %v18334_v12 = vld [vmem:[%s20282_s11 + $0x12c] sm:$0xf0]  ;;  %v12292_v17 = vor.u32 %v18302_v9, %v12291_v8  ;;  %9515 = vmatpush.bf16.msra.mxu2 %v12564_v7  ;;  %v347_v8 = vld [vmem:[%s20390_s6] sm:$0xff] }
  0x53   : > { %v12547_v13 = vld [vmem:[%s20282_s11 + $0x220] sm:$0xf]  ;;  %v18366_v14 = vld [vmem:[%s20282_s11 + $0x22c] sm:$0xf0]  ;;  %v12420_v20 = vor.u32 %v18334_v12, %v12419_v10  ;;  %9528 = vmatpush.bf16.msra.mxu3 %v12692_v11  ;;  %1859 = vst [vmem:[#allocation1] ss:$9 sm:$0xff] %v347_v8 }
  0x54   : > { %v12675_v15 = vld [vmem:[%s20282_s11 + $0x320] sm:$0xf]  ;;  %v18398_v16 = vld [vmem:[%s20282_s11 + $0x32c] sm:$0xf0]  ;;  %v12548_v21 = vor.u32 %v18366_v14, %v12547_v13  ;;  %9490 = vmatpush.bf16.msra.mxu0 %v12292_v17 }
  0x55   : > { %v12275_v18 = vld [vmem:[%s20282_s11] sm:$0xf]  ;;  %v18298_v19 = vld [vmem:[%s20282_s11 + $0xc] sm:$0xf0]  ;;  %v12676_v25 = vor.u32 %v18398_v16, %v12675_v15  ;;  %9503 = vmatpush.bf16.msra.mxu1 %v12420_v20 }
  0x56   : > { %v12403_v22 = vld [vmem:[%s20282_s11 + $0x100] sm:$0xf]  ;;  %v18330_v23 = vld [vmem:[%s20282_s11 + $0x10c] sm:$0xf0]  ;;  %v12276_v32 = vor.u32 %v18298_v19, %v12275_v18  ;;  %9516 = vmatpush.bf16.msra.mxu2 %v12548_v21 }
  0x57   : > { %v12531_v24 = vld [vmem:[%s20282_s11 + $0x200] sm:$0xf]  ;;  %v18362_v26 = vld [vmem:[%s20282_s11 + $0x20c] sm:$0xf0]  ;;  %v12404_v36 = vor.u32 %v18330_v23, %v12403_v22  ;;  %9529 = vmatpush.bf16.msra.mxu3 %v12676_v25 }
  0x58   : > { %v12659_v27 = vld [vmem:[%s20282_s11 + $0x300] sm:$0xf]  ;;  %v18394_v28 = vld [vmem:[%s20282_s11 + $0x30c] sm:$0xf0]  ;;  %v12532_v37 = vor.u32 %v18362_v26, %v12531_v24  ;;  %9491 = vmatpush.bf16.msra.mxu0 %v12276_v32 }
  0x59   : > { %v12899_v29 = vld [vmem:[%s20282_s11 + $0x4e0] sm:$0xf]  ;;  %v18454_v30 = vld [vmem:[%s20282_s11 + $0x4ec] sm:$0xf0]  ;;  %v12660_v40 = vor.u32 %v18394_v28, %v12659_v27  ;;  %9504 = vmatpush.bf16.msra.mxu1 %v12404_v36 }
  0x5a   : > { %v13027_v31 = vld [vmem:[%s20282_s11 + $0x5e0] sm:$0xf]  ;;  %v18486_v33 = vld [vmem:[%s20282_s11 + $0x5ec] sm:$0xf0]  ;;  %v12900_v41 = vor.u32 %v18454_v30, %v12899_v29  ;;  %9517 = vmatpush.bf16.msra.mxu2 %v12532_v37 }
  0x5b   : > { %v13155_v34 = vld [vmem:[%s20282_s11 + $0x6e0] sm:$0xf]  ;;  %v18518_v35 = vld [vmem:[%s20282_s11 + $0x6ec] sm:$0xf0]  ;;  %v13028_v42 = vor.u32 %v18486_v33, %v13027_v31  ;;  %9530 = vmatpush.bf16.msra.mxu3 %v12660_v40  ;;  %v20409_v33 = vld [vmem:[#allocation1 + $0x12] sm:$0xff] }
  0x5c   : > { %v13283_v38 = vld [vmem:[%s20282_s11 + $0x7e0] sm:$0xf]  ;;  %v18550_v39 = vld [vmem:[%s20282_s11 + $0x7ec] sm:$0xf0]  ;;  %v13156_v43 = vor.u32 %v18518_v35, %v13155_v34  ;;  %9536 = vmatpush.bf16.msrb.mxu0 %v12900_v41  ;;  %v20411_v34 = vld [vmem:[#allocation1] sm:$0xff] }
  0x5d   : > { %v12883_v44 = vld [vmem:[%s20282_s11 + $0x4c0] sm:$0xf]  ;;  %v18450_v45 = vld [vmem:[%s20282_s11 + $0x4cc] sm:$0xf0]  ;;  %v13284_v47 = vor.u32 %v18550_v39, %v13283_v38  ;;  %9549 = vmatpush.bf16.msrb.mxu1 %v13028_v42  ;;  %9518 = vmatmul.bf16.vlgmr.msra.gmra.mxu2 %v20409_v33 }
  0x5e   : > { %v13011_v46 = vld [vmem:[%s20282_s11 + $0x5c0] sm:$0xf]  ;;  %v18482_v48 = vld [vmem:[%s20282_s11 + $0x5cc] sm:$0xf0]  ;;  %v12884_v53 = vor.u32 %v18450_v45, %v12883_v44  ;;  %9562 = vmatpush.bf16.msrb.mxu2 %v13156_v43  ;;  %9492 = vmatmul.bf16.vlgmr.msra.gmra.mxu0 %v20411_v34 }
  0x5f   : > { %v13139_v49 = vld [vmem:[%s20282_s11 + $0x6c0] sm:$0xf]  ;;  %v18514_v50 = vld [vmem:[%s20282_s11 + $0x6cc] sm:$0xf0]  ;;  %v13012_v55 = vor.u32 %v18482_v48, %v13011_v46  ;;  %9575 = vmatpush.bf16.msrb.mxu3 %v13284_v47 }
  0x60   : > { %v13267_v51 = vld [vmem:[%s20282_s11 + $0x7c0] sm:$0xf]  ;;  %v18546_v52 = vld [vmem:[%s20282_s11 + $0x7cc] sm:$0xf0]  ;;  %v13140_v56 = vor.u32 %v18514_v50, %v13139_v49  ;;  %9537 = vmatpush.bf16.msrb.mxu0 %v12884_v53 }
  0x61   : > { %v12867_v54 = vld [vmem:[%s20282_s11 + $0x4a0] sm:$0xf]  ;;  %v18446_v57 = vld [vmem:[%s20282_s11 + $0x4ac] sm:$0xf0]  ;;  %v13268_v59 = vor.u32 %v18546_v52, %v13267_v51  ;;  %9550 = vmatpush.bf16.msrb.mxu1 %v13012_v55 }
  0x62   : > { %v12995_v58 = vld [vmem:[%s20282_s11 + $0x5a0] sm:$0xf]  ;;  %v18478_v60 = vld [vmem:[%s20282_s11 + $0x5ac] sm:$0xf0]  ;;  %v12868_v1 = vor.u32 %v18446_v57, %v12867_v54  ;;  %9563 = vmatpush.bf16.msrb.mxu2 %v13140_v56 }
  0x63   : > { %v13123_v61 = vld [vmem:[%s20282_s11 + $0x6a0] sm:$0xf]  ;;  %v18510_v62 = vld [vmem:[%s20282_s11 + $0x6ac] sm:$0xf0]  ;;  %v12996_v4 = vor.u32 %v18478_v60, %v12995_v58  ;;  %9576 = vmatpush.bf16.msrb.mxu3 %v13268_v59 }
  0x64   : > { %v13251_v63 = vld [vmem:[%s20282_s11 + $0x7a0] sm:$0xf]  ;;  %v18542_v0 = vld [vmem:[%s20282_s11 + $0x7ac] sm:$0xf0]  ;;  %v13124_v5 = vor.u32 %v18510_v62, %v13123_v61  ;;  %9538 = vmatpush.bf16.msrb.mxu0 %v12868_v1 }
  0x65   : > { %v12851_v2 = vld [vmem:[%s20282_s11 + $0x480] sm:$0xf]  ;;  %v18442_v3 = vld [vmem:[%s20282_s11 + $0x48c] sm:$0xf0]  ;;  %v13252_v9 = vor.u32 %v18542_v0, %v13251_v63  ;;  %9551 = vmatpush.bf16.msrb.mxu1 %v12996_v4 }
  0x66   : > { %v12979_v6 = vld [vmem:[%s20282_s11 + $0x580] sm:$0xf]  ;;  %v18474_v7 = vld [vmem:[%s20282_s11 + $0x58c] sm:$0xf0]  ;;  %v12852_v14 = vor.u32 %v18442_v3, %v12851_v2  ;;  %9564 = vmatpush.bf16.msrb.mxu2 %v13124_v5 }
  0x67   : > { %v13107_v10 = vld [vmem:[%s20282_s11 + $0x680] sm:$0xf]  ;;  %v18506_v11 = vld [vmem:[%s20282_s11 + $0x68c] sm:$0xf0]  ;;  %v12980_v15 = vor.u32 %v18474_v7, %v12979_v6  ;;  %9577 = vmatpush.bf16.msrb.mxu3 %v13252_v9  ;;  %v20447_v7 = vld [vmem:[#allocation1 + $0x24] sm:$0xff] }
  0x68   : > { %v13235_v12 = vld [vmem:[%s20282_s11 + $0x780] sm:$0xf]  ;;  %v18538_v13 = vld [vmem:[%s20282_s11 + $0x78c] sm:$0xf0]  ;;  %v13108_v16 = vor.u32 %v18506_v11, %v13107_v10  ;;  %9539 = vmatpush.bf16.msrb.mxu0 %v12852_v14 }
  0x69   : > { %v12835_v17 = vld [vmem:[%s20282_s11 + $0x460] sm:$0xf]  ;;  %v18438_v18 = vld [vmem:[%s20282_s11 + $0x46c] sm:$0xf0]  ;;  %v13236_v20 = vor.u32 %v18538_v13, %v13235_v12  ;;  %9552 = vmatpush.bf16.msrb.mxu1 %v12980_v15 }
  0x6a   : > { %v12963_v19 = vld [vmem:[%s20282_s11 + $0x560] sm:$0xf]  ;;  %v18470_v21 = vld [vmem:[%s20282_s11 + $0x56c] sm:$0xf0]  ;;  %v12836_v27 = vor.u32 %v18438_v18, %v12835_v17  ;;  %9565 = vmatpush.bf16.msrb.mxu2 %v13108_v16 }
  0x6b   : > { %v13091_v22 = vld [vmem:[%s20282_s11 + $0x660] sm:$0xf]  ;;  %v18502_v23 = vld [vmem:[%s20282_s11 + $0x66c] sm:$0xf0]  ;;  %v12964_v31 = vor.u32 %v18470_v21, %v12963_v19  ;;  %9578 = vmatpush.bf16.msrb.mxu3 %v13236_v20 }
  0x6c   : > { %v13219_v24 = vld [vmem:[%s20282_s11 + $0x760] sm:$0xf]  ;;  %v18534_v25 = vld [vmem:[%s20282_s11 + $0x76c] sm:$0xf0]  ;;  %v13092_v32 = vor.u32 %v18502_v23, %v13091_v22  ;;  %9540 = vmatpush.bf16.msrb.mxu0 %v12836_v27 }
  0x6d   : > { %v12819_v26 = vld [vmem:[%s20282_s11 + $0x440] sm:$0xf]  ;;  %v18434_v28 = vld [vmem:[%s20282_s11 + $0x44c] sm:$0xf0]  ;;  %v13220_v36 = vor.u32 %v18534_v25, %v13219_v24  ;;  %9553 = vmatpush.bf16.msrb.mxu1 %v12964_v31 }
  0x6e   : > { %v12947_v29 = vld [vmem:[%s20282_s11 + $0x540] sm:$0xf]  ;;  %v18466_v30 = vld [vmem:[%s20282_s11 + $0x54c] sm:$0xf0]  ;;  %v12820_v42 = vor.u32 %v18434_v28, %v12819_v26  ;;  %9566 = vmatpush.bf16.msrb.mxu2 %v13092_v32 }
  0x6f   : > { %v20413_v35 = vld [vmem:[#allocation1 + $0x1b] sm:$0xff]  ;;  %v18498_v38 = vld [vmem:[%s20282_s11 + $0x64c] sm:$0xf0]  ;;  %v12948_v44 = vor.u32 %v18466_v30, %v12947_v29  ;;  %9579 = vmatpush.bf16.msrb.mxu3 %v13220_v36 }
  0x70   : > { %v13075_v37 = vld [vmem:[%s20282_s11 + $0x640] sm:$0xf]  ;;  %v20418_v39 = vld [vmem:[#allocation1 + $0x9] sm:$0xff]  ;;  %9531 = vmatmul.bf16.vlgmr.msra.gmra.mxu3 %v20413_v35  ;;  %9541 = vmatpush.bf16.msrb.mxu0 %v12820_v42 }
  0x71   : > { %v13203_v40 = vld [vmem:[%s20282_s11 + $0x740] sm:$0xf]  ;;  %v18530_v41 = vld [vmem:[%s20282_s11 + $0x74c] sm:$0xf0]  ;;  %9505 = vmatmul.bf16.vlgmr.msra.gmra.mxu1 %v20418_v39  ;;  %v13076_v45 = vor.u32 %v18498_v38, %v13075_v37 }
  0x72   : > { %v12803_v43 = vld [vmem:[%s20282_s11 + $0x420] sm:$0xf]  ;;  %v18430_v46 = vld [vmem:[%s20282_s11 + $0x42c] sm:$0xf0]  ;;  %v13204_v49 = vor.u32 %v18530_v41, %v13203_v40  ;;  %9554 = vmatpush.bf16.msrb.mxu1 %v12948_v44 }
  0x73   : > { %v12931_v47 = vld [vmem:[%s20282_s11 + $0x520] sm:$0xf]  ;;  %v18462_v48 = vld [vmem:[%s20282_s11 + $0x52c] sm:$0xf0]  ;;  %v12804_v56 = vor.u32 %v18430_v46, %v12803_v43  ;;  %9567 = vmatpush.bf16.msrb.mxu2 %v13076_v45 }
  0x74   : > { %v13059_v50 = vld [vmem:[%s20282_s11 + $0x620] sm:$0xf]  ;;  %v18494_v51 = vld [vmem:[%s20282_s11 + $0x62c] sm:$0xf0]  ;;  %v12932_v61 = vor.u32 %v18462_v48, %v12931_v47  ;;  %9580 = vmatpush.bf16.msrb.mxu3 %v13204_v49 }
  0x75   : > { %v13187_v52 = vld [vmem:[%s20282_s11 + $0x720] sm:$0xf]  ;;  %v18526_v53 = vld [vmem:[%s20282_s11 + $0x72c] sm:$0xf0]  ;;  %v13060_v62 = vor.u32 %v18494_v51, %v13059_v50  ;;  %9542 = vmatpush.bf16.msrb.mxu0 %v12804_v56 }
  0x76   : > { %v12787_v54 = vld [vmem:[%s20282_s11 + $0x400] sm:$0xf]  ;;  %v18426_v55 = vld [vmem:[%s20282_s11 + $0x40c] sm:$0xf0]  ;;  %v13188_v3 = vor.u32 %v18526_v53, %v13187_v52  ;;  %9555 = vmatpush.bf16.msrb.mxu1 %v12932_v61 }
  0x77   : > { %v12915_v57 = vld [vmem:[%s20282_s11 + $0x500] sm:$0xf]  ;;  %v18458_v58 = vld [vmem:[%s20282_s11 + $0x50c] sm:$0xf0]  ;;  %v12788_v11 = vor.u32 %v18426_v55, %v12787_v54  ;;  %9568 = vmatpush.bf16.msrb.mxu2 %v13060_v62 }
  0x78   : > { %v13043_v59 = vld [vmem:[%s20282_s11 + $0x600] sm:$0xf]  ;;  %v18490_v60 = vld [vmem:[%s20282_s11 + $0x60c] sm:$0xf0]  ;;  %v12916_v14 = vor.u32 %v18458_v58, %v12915_v57  ;;  %9581 = vmatpush.bf16.msrb.mxu3 %v13188_v3 }
  0x79   : > { %v13171_v63 = vld [vmem:[%s20282_s11 + $0x700] sm:$0xf]  ;;  %v18522_v0 = vld [vmem:[%s20282_s11 + $0x70c] sm:$0xf0]  ;;  %v13044_v15 = vor.u32 %v18490_v60, %v13043_v59  ;;  %9543 = vmatpush.bf16.msrb.mxu0 %v12788_v11 }
  0x7a   : > { %v13411_v1 = vld [vmem:[%s20282_s11 + $0x8e0] sm:$0xf]  ;;  %v18582_v2 = vld [vmem:[%s20282_s11 + $0x8ec] sm:$0xf0]  ;;  %v13172_v18 = vor.u32 %v18522_v0, %v13171_v63  ;;  %9556 = vmatpush.bf16.msrb.mxu1 %v12916_v14 }
  0x7b   : > { %v13539_v4 = vld [vmem:[%s20282_s11 + $0x9e0] sm:$0xf]  ;;  %v18614_v5 = vld [vmem:[%s20282_s11 + $0x9ec] sm:$0xf0]  ;;  %v13412_v19 = vor.u32 %v18582_v2, %v13411_v1  ;;  %9569 = vmatpush.bf16.msrb.mxu2 %v13044_v15 }
  0x7c   : > { %v20445_v6 = vld [vmem:[#allocation1 + $0x36] sm:$0xff]  ;;  %v20449_v8 = vld [vmem:[#allocation1 + $0x3f] sm:$0xff]  ;;  %v348_v9 = vld [vmem:[%s20390_s6 + $0x8] sm:$0xff]  ;;  %v13540_v20 = vor.u32 %v18614_v5, %v13539_v4  ;;  %9582 = vmatpush.bf16.msrb.mxu3 %v13172_v18  ;;  %9544 = vmatmul.bf16.vlgmr.msrb.gmra.mxu0 %v20447_v7 }
  0x7d   : > { %v20452_v10 = vld [vmem:[#allocation1 + $0x2d] sm:$0xff]  ;;  %v13667_v12 = vld [vmem:[%s20282_s11 + $0xae0] sm:$0xf]  ;;  %9588 = vmatpush.bf16.msra.mxu0 %v13412_v19 }
  0x7e   : > { %v18646_v13 = vld [vmem:[%s20282_s11 + $0xaec] sm:$0xf0]  ;;  %1869 = vst [vmem:[#allocation1] ss:$9 sm:$0xff] %v348_v9  ;;  %v13795_v16 = vld [vmem:[%s20282_s11 + $0xbe0] sm:$0xf]  ;;  %9601 = vmatpush.bf16.msra.mxu1 %v13540_v20  ;;  %9570 = vmatmul.bf16.vlgmr.msrb.gmra.mxu2 %v20445_v6 }
  0x7f   : > { %v18678_v17 = vld [vmem:[%s20282_s11 + $0xbec] sm:$0xf0]  ;;  %v13668_v21 = vor.u32 %v18646_v13, %v13667_v12  ;;  %v13395_v22 = vld [vmem:[%s20282_s11 + $0x8c0] sm:$0xf] }
  0x80   : > { %v18578_v23 = vld [vmem:[%s20282_s11 + $0x8cc] sm:$0xf0]  ;;  %v13523_v24 = vld [vmem:[%s20282_s11 + $0x9c0] sm:$0xf]  ;;  %v13796_v25 = vor.u32 %v18678_v17, %v13795_v16  ;;  %9583 = vmatmul.bf16.vlgmr.msrb.gmra.mxu3 %v20449_v8 }
  0x81   : > { %v18610_v26 = vld [vmem:[%s20282_s11 + $0x9cc] sm:$0xf0]  ;;  %v13651_v27 = vld [vmem:[%s20282_s11 + $0xac0] sm:$0xf]  ;;  %v13396_v31 = vor.u32 %v18578_v23, %v13395_v22  ;;  %9614 = vmatpush.bf16.msra.mxu2 %v13668_v21  ;;  %9557 = vmatmul.bf16.vlgmr.msrb.gmra.mxu1 %v20452_v10 }
  0x82   : > { %v18642_v28 = vld [vmem:[%s20282_s11 + $0xacc] sm:$0xf0]  ;;  %v13779_v29 = vld [vmem:[%s20282_s11 + $0xbc0] sm:$0xf]  ;;  %v13524_v32 = vor.u32 %v18610_v26, %v13523_v24  ;;  %9627 = vmatpush.bf16.msra.mxu3 %v13796_v25 }
  0x83   : > { %v18674_v30 = vld [vmem:[%s20282_s11 + $0xbcc] sm:$0xf0]  ;;  %v13652_v36 = vor.u32 %v18642_v28, %v13651_v27  ;;  %v13379_v37 = vld [vmem:[%s20282_s11 + $0x8a0] sm:$0xf]  ;;  %9589 = vmatpush.bf16.msra.mxu0 %v13396_v31 }
  0x84   : > { %v18574_v38 = vld [vmem:[%s20282_s11 + $0x8ac] sm:$0xf0]  ;;  %v13507_v40 = vld [vmem:[%s20282_s11 + $0x9a0] sm:$0xf]  ;;  %v13780_v41 = vor.u32 %v18674_v30, %v13779_v29  ;;  %9602 = vmatpush.bf16.msra.mxu1 %v13524_v32 }
  0x85   : > { %v18606_v42 = vld [vmem:[%s20282_s11 + $0x9ac] sm:$0xf0]  ;;  %v13635_v43 = vld [vmem:[%s20282_s11 + $0xaa0] sm:$0xf]  ;;  %v13380_v47 = vor.u32 %v18574_v38, %v13379_v37  ;;  %9615 = vmatpush.bf16.msra.mxu2 %v13652_v36 }
  0x86   : > { %v18638_v44 = vld [vmem:[%s20282_s11 + $0xaac] sm:$0xf0]  ;;  %v13763_v45 = vld [vmem:[%s20282_s11 + $0xba0] sm:$0xf]  ;;  %v13508_v48 = vor.u32 %v18606_v42, %v13507_v40  ;;  %9628 = vmatpush.bf16.msra.mxu3 %v13780_v41 }
  0x87   : > { %v18670_v46 = vld [vmem:[%s20282_s11 + $0xbac] sm:$0xf0]  ;;  %v13636_v49 = vor.u32 %v18638_v44, %v13635_v43  ;;  %v13363_v50 = vld [vmem:[%s20282_s11 + $0x880] sm:$0xf]  ;;  %9590 = vmatpush.bf16.msra.mxu0 %v13380_v47 }
  0x88   : > { %v18570_v51 = vld [vmem:[%s20282_s11 + $0x88c] sm:$0xf0]  ;;  %v13491_v52 = vld [vmem:[%s20282_s11 + $0x980] sm:$0xf]  ;;  %v13764_v53 = vor.u32 %v18670_v46, %v13763_v45  ;;  %9603 = vmatpush.bf16.msra.mxu1 %v13508_v48 }
  0x89   : > { %v18602_v54 = vld [vmem:[%s20282_s11 + $0x98c] sm:$0xf0]  ;;  %v13619_v55 = vld [vmem:[%s20282_s11 + $0xa80] sm:$0xf]  ;;  %v13364_v59 = vor.u32 %v18570_v51, %v13363_v50  ;;  %9616 = vmatpush.bf16.msra.mxu2 %v13636_v49 }
  0x8a   : > { %v18634_v56 = vld [vmem:[%s20282_s11 + $0xa8c] sm:$0xf0]  ;;  %v13747_v57 = vld [vmem:[%s20282_s11 + $0xb80] sm:$0xf]  ;;  %v13492_v60 = vor.u32 %v18602_v54, %v13491_v52  ;;  %9629 = vmatpush.bf16.msra.mxu3 %v13764_v53 }
  0x8b   : > { %v18666_v58 = vld [vmem:[%s20282_s11 + $0xb8c] sm:$0xf0]  ;;  %v13620_v61 = vor.u32 %v18634_v56, %v13619_v55  ;;  %v13347_v62 = vld [vmem:[%s20282_s11 + $0x860] sm:$0xf]  ;;  %9591 = vmatpush.bf16.msra.mxu0 %v13364_v59 }
  0x8c   : > { %v18566_v63 = vld [vmem:[%s20282_s11 + $0x86c] sm:$0xf0]  ;;  %v13475_v0 = vld [vmem:[%s20282_s11 + $0x960] sm:$0xf]  ;;  %v13748_v1 = vor.u32 %v18666_v58, %v13747_v57  ;;  %9604 = vmatpush.bf16.msra.mxu1 %v13492_v60 }
  0x8d   : > { %v18598_v2 = vld [vmem:[%s20282_s11 + $0x96c] sm:$0xf0]  ;;  %v13603_v3 = vld [vmem:[%s20282_s11 + $0xa60] sm:$0xf]  ;;  %v13348_v11 = vor.u32 %v18566_v63, %v13347_v62  ;;  %9617 = vmatpush.bf16.msra.mxu2 %v13620_v61 }
  0x8e   : > { %v18630_v4 = vld [vmem:[%s20282_s11 + $0xa6c] sm:$0xf0]  ;;  %v13731_v5 = vld [vmem:[%s20282_s11 + $0xb60] sm:$0xf]  ;;  %v13476_v12 = vor.u32 %v18598_v2, %v13475_v0  ;;  %9630 = vmatpush.bf16.msra.mxu3 %v13748_v1  ;;  %v20526_v2 = vld [vmem:[#allocation1] sm:$0xff] }
  0x8f   : > { %v18662_v9 = vld [vmem:[%s20282_s11 + $0xb6c] sm:$0xf0]  ;;  %v13604_v13 = vor.u32 %v18630_v4, %v13603_v3  ;;  %v13331_v14 = vld [vmem:[%s20282_s11 + $0x840] sm:$0xf]  ;;  %9592 = vmatpush.bf16.msra.mxu0 %v13348_v11  ;;  %v20531_v11 = vld [vmem:[#allocation1 + $0x12] sm:$0xff] }
  0x90   : > { %v18562_v15 = vld [vmem:[%s20282_s11 + $0x84c] sm:$0xf0]  ;;  %v13459_v16 = vld [vmem:[%s20282_s11 + $0x940] sm:$0xf]  ;;  %v13732_v17 = vor.u32 %v18662_v9, %v13731_v5  ;;  %9605 = vmatpush.bf16.msra.mxu1 %v13476_v12 }
  0x91   : > { %v18594_v18 = vld [vmem:[%s20282_s11 + $0x94c] sm:$0xf0]  ;;  %v13587_v19 = vld [vmem:[%s20282_s11 + $0xa40] sm:$0xf]  ;;  %v13332_v23 = vor.u32 %v18562_v15, %v13331_v14  ;;  %9618 = vmatpush.bf16.msra.mxu2 %v13604_v13 }
  0x92   : > { %v18626_v20 = vld [vmem:[%s20282_s11 + $0xa4c] sm:$0xf0]  ;;  %v13715_v21 = vld [vmem:[%s20282_s11 + $0xb40] sm:$0xf]  ;;  %v13460_v24 = vor.u32 %v18594_v18, %v13459_v16  ;;  %9631 = vmatpush.bf16.msra.mxu3 %v13732_v17  ;;  %v349_v16 = vld [vmem:[%s20390_s6 + $0x10] sm:$0xff] }
  0x93   : > { %v18658_v22 = vld [vmem:[%s20282_s11 + $0xb4c] sm:$0xf0]  ;;  %v13588_v25 = vor.u32 %v18626_v20, %v13587_v19  ;;  %v13315_v26 = vld [vmem:[%s20282_s11 + $0x820] sm:$0xf]  ;;  %9593 = vmatpush.bf16.msra.mxu0 %v13332_v23 }
  0x94   : > { %v18558_v27 = vld [vmem:[%s20282_s11 + $0x82c] sm:$0xf0]  ;;  %v13443_v28 = vld [vmem:[%s20282_s11 + $0x920] sm:$0xf]  ;;  %v13716_v29 = vor.u32 %v18658_v22, %v13715_v21  ;;  %9606 = vmatpush.bf16.msra.mxu1 %v13460_v24 }
  0x95   : > { %v18590_v30 = vld [vmem:[%s20282_s11 + $0x92c] sm:$0xf0]  ;;  %v13571_v31 = vld [vmem:[%s20282_s11 + $0xa20] sm:$0xf]  ;;  %v13316_v38 = vor.u32 %v18558_v27, %v13315_v26  ;;  %9619 = vmatpush.bf16.msra.mxu2 %v13588_v25 }
  0x96   : > { %v18622_v32 = vld [vmem:[%s20282_s11 + $0xa2c] sm:$0xf0]  ;;  %v13699_v36 = vld [vmem:[%s20282_s11 + $0xb20] sm:$0xf]  ;;  %v13444_v42 = vor.u32 %v18590_v30, %v13443_v28  ;;  %9632 = vmatpush.bf16.msra.mxu3 %v13716_v29 }
  0x97   : > { %v18654_v37 = vld [vmem:[%s20282_s11 + $0xb2c] sm:$0xf0]  ;;  %v13299_v40 = vld [vmem:[%s20282_s11 + $0x800] sm:$0xf]  ;;  %v13572_v43 = vor.u32 %v18622_v32, %v13571_v31  ;;  %9594 = vmatpush.bf16.msra.mxu0 %v13316_v38  ;;  %v20552_v32 = vld [vmem:[#allocation1 + $0x24] sm:$0xff] }
  0x98   : > { %v18554_v41 = vld [vmem:[%s20282_s11 + $0x80c] sm:$0xf0]  ;;  %v13427_v44 = vld [vmem:[%s20282_s11 + $0x900] sm:$0xf]  ;;  %v13700_v47 = vor.u32 %v18654_v37, %v13699_v36  ;;  %9607 = vmatpush.bf16.msra.mxu1 %v13444_v42 }
  0x99   : > { %v18586_v45 = vld [vmem:[%s20282_s11 + $0x90c] sm:$0xf0]  ;;  %v13555_v46 = vld [vmem:[%s20282_s11 + $0xa00] sm:$0xf]  ;;  %v13300_v54 = vor.u32 %v18554_v41, %v13299_v40  ;;  %9620 = vmatpush.bf16.msra.mxu2 %v13572_v43 }
  0x9a   : > { %v18618_v48 = vld [vmem:[%s20282_s11 + $0xa0c] sm:$0xf0]  ;;  %v13683_v49 = vld [vmem:[%s20282_s11 + $0xb00] sm:$0xf]  ;;  %v13428_v58 = vor.u32 %v18586_v45, %v13427_v44  ;;  %9633 = vmatpush.bf16.msra.mxu3 %v13700_v47 }
  0x9b   : > { %v18650_v50 = vld [vmem:[%s20282_s11 + $0xb0c] sm:$0xf0]  ;;  %v13923_v51 = vld [vmem:[%s20282_s11 + $0xce0] sm:$0xf]  ;;  %v13556_v59 = vor.u32 %v18618_v48, %v13555_v46  ;;  %9595 = vmatpush.bf16.msra.mxu0 %v13300_v54 }
  0x9c   : > { %v18710_v52 = vld [vmem:[%s20282_s11 + $0xcec] sm:$0xf0]  ;;  %v14051_v53 = vld [vmem:[%s20282_s11 + $0xde0] sm:$0xf]  ;;  %v13684_v62 = vor.u32 %v18650_v50, %v13683_v49  ;;  %9608 = vmatpush.bf16.msra.mxu1 %v13428_v58 }
  0x9d   : > { %v18742_v55 = vld [vmem:[%s20282_s11 + $0xdec] sm:$0xf0]  ;;  %v14179_v56 = vld [vmem:[%s20282_s11 + $0xee0] sm:$0xf]  ;;  %v13924_v63 = vor.u32 %v18710_v52, %v13923_v51  ;;  %9621 = vmatpush.bf16.msra.mxu2 %v13556_v59 }
  0x9e   : > { %v18774_v57 = vld [vmem:[%s20282_s11 + $0xeec] sm:$0xf0]  ;;  %v14307_v60 = vld [vmem:[%s20282_s11 + $0xfe0] sm:$0xf]  ;;  %v14052_v0 = vor.u32 %v18742_v55, %v14051_v53  ;;  %9634 = vmatpush.bf16.msra.mxu3 %v13684_v62  ;;  %9596 = vmatmul.bf16.vlgmr.msra.gmra.mxu0 %v20526_v2 }
  0x9f   : > { %v18806_v61 = vld [vmem:[%s20282_s11 + $0xfec] sm:$0xf0]  ;;  %v14180_v1 = vor.u32 %v18774_v57, %v14179_v56  ;;  %v13907_v3 = vld [vmem:[%s20282_s11 + $0xcc0] sm:$0xf]  ;;  %9640 = vmatpush.bf16.msrb.mxu0 %v13924_v63 }
  0xa0   : > { %v18706_v4 = vld [vmem:[%s20282_s11 + $0xccc] sm:$0xf0]  ;;  %v14035_v5 = vld [vmem:[%s20282_s11 + $0xdc0] sm:$0xf]  ;;  %v14308_v9 = vor.u32 %v18806_v61, %v14307_v60  ;;  %9653 = vmatpush.bf16.msrb.mxu1 %v14052_v0  ;;  %9622 = vmatmul.bf16.vlgmr.msra.gmra.mxu2 %v20531_v11 }
  0xa1   : > { %v20533_v12 = vld [vmem:[#allocation1 + $0x9] sm:$0xff]  ;;  %v14163_v14 = vld [vmem:[%s20282_s11 + $0xec0] sm:$0xf]  ;;  %v13908_v20 = vor.u32 %v18706_v4, %v13907_v3  ;;  %9666 = vmatpush.bf16.msrb.mxu2 %v14180_v1 }
  0xa2   : > { %v18738_v13 = vld [vmem:[%s20282_s11 + $0xdcc] sm:$0xf0]  ;;  %v20539_v17 = vld [vmem:[#allocation1 + $0x1b] sm:$0xff]  ;;  %9679 = vmatpush.bf16.msrb.mxu3 %v14308_v9  ;;  %9609 = vmatmul.bf16.vlgmr.msra.gmra.mxu1 %v20533_v12 }
  0xa3   : > { %v18770_v15 = vld [vmem:[%s20282_s11 + $0xecc] sm:$0xf0]  ;;  %v14291_v18 = vld [vmem:[%s20282_s11 + $0xfc0] sm:$0xf]  ;;  %v14036_v24 = vor.u32 %v18738_v13, %v14035_v5  ;;  %9635 = vmatmul.bf16.vlgmr.msra.gmra.mxu3 %v20539_v17  ;;  %9641 = vmatpush.bf16.msrb.mxu0 %v13908_v20 }
  0xa4   : > { %v18802_v19 = vld [vmem:[%s20282_s11 + $0xfcc] sm:$0xf0]  ;;  %v13891_v21 = vld [vmem:[%s20282_s11 + $0xca0] sm:$0xf]  ;;  %v14164_v25 = vor.u32 %v18770_v15, %v14163_v14 }
  0xa5   : > { %v18702_v22 = vld [vmem:[%s20282_s11 + $0xcac] sm:$0xf0]  ;;  %v14019_v23 = vld [vmem:[%s20282_s11 + $0xda0] sm:$0xf]  ;;  %v14292_v29 = vor.u32 %v18802_v19, %v14291_v18  ;;  %9654 = vmatpush.bf16.msrb.mxu1 %v14036_v24 }
  0xa6   : > { %v18734_v26 = vld [vmem:[%s20282_s11 + $0xdac] sm:$0xf0]  ;;  %v14147_v27 = vld [vmem:[%s20282_s11 + $0xea0] sm:$0xf]  ;;  %v13892_v40 = vor.u32 %v18702_v22, %v13891_v21  ;;  %9667 = vmatpush.bf16.msrb.mxu2 %v14164_v25 }
  0xa7   : > { %v18766_v28 = vld [vmem:[%s20282_s11 + $0xeac] sm:$0xf0]  ;;  %v14275_v30 = vld [vmem:[%s20282_s11 + $0xfa0] sm:$0xf]  ;;  %v14020_v41 = vor.u32 %v18734_v26, %v14019_v23  ;;  %9680 = vmatpush.bf16.msrb.mxu3 %v14292_v29 }
  0xa8   : > { %v18798_v31 = vld [vmem:[%s20282_s11 + $0xfac] sm:$0xf0]  ;;  %v20556_v36 = vld [vmem:[#allocation1 + $0x36] sm:$0xff]  ;;  %v20560_v38 = vld [vmem:[#allocation1 + $0x3f] sm:$0xff]  ;;  %v14148_v42 = vor.u32 %v18766_v28, %v14147_v27  ;;  %9642 = vmatpush.bf16.msrb.mxu0 %v13892_v40 }
  0xa9   : > { %v20558_v37 = vld [vmem:[#allocation1 + $0x2d] sm:$0xff]  ;;  %v13875_v43 = vld [vmem:[%s20282_s11 + $0xc80] sm:$0xf]  ;;  %v14276_v46 = vor.u32 %v18798_v31, %v14275_v30  ;;  %9655 = vmatpush.bf16.msrb.mxu1 %v14020_v41 }
  0xaa   : > { %1879 = vst [vmem:[#allocation1] ss:$9 sm:$0xff] %v349_v16  ;;  %v18698_v44 = vld [vmem:[%s20282_s11 + $0xc8c] sm:$0xf0]  ;;  %v14003_v45 = vld [vmem:[%s20282_s11 + $0xd80] sm:$0xf]  ;;  %9668 = vmatpush.bf16.msrb.mxu2 %v14148_v42 }
  0xab   : > { %v18730_v47 = vld [vmem:[%s20282_s11 + $0xd8c] sm:$0xf0]  ;;  %v14131_v48 = vld [vmem:[%s20282_s11 + $0xe80] sm:$0xf]  ;;  %v13876_v52 = vor.u32 %v18698_v44, %v13875_v43  ;;  %9681 = vmatpush.bf16.msrb.mxu3 %v14276_v46 }
  0xac   : > { %v18762_v49 = vld [vmem:[%s20282_s11 + $0xe8c] sm:$0xf0]  ;;  %v14259_v50 = vld [vmem:[%s20282_s11 + $0xf80] sm:$0xf]  ;;  %v14004_v53 = vor.u32 %v18730_v47, %v14003_v45 }
  0xad   : > { %v18794_v51 = vld [vmem:[%s20282_s11 + $0xf8c] sm:$0xf0]  ;;  %v14132_v54 = vor.u32 %v18762_v49, %v14131_v48  ;;  %v13859_v55 = vld [vmem:[%s20282_s11 + $0xc60] sm:$0xf]  ;;  %9643 = vmatpush.bf16.msrb.mxu0 %v13876_v52 }
  0xae   : > { %v18694_v56 = vld [vmem:[%s20282_s11 + $0xc6c] sm:$0xf0]  ;;  %v13987_v57 = vld [vmem:[%s20282_s11 + $0xd60] sm:$0xf]  ;;  %v14260_v58 = vor.u32 %v18794_v51, %v14259_v50  ;;  %9656 = vmatpush.bf16.msrb.mxu1 %v14004_v53 }
  0xaf   : > { %v18726_v59 = vld [vmem:[%s20282_s11 + $0xd6c] sm:$0xf0]  ;;  %v14115_v60 = vld [vmem:[%s20282_s11 + $0xe60] sm:$0xf]  ;;  %v13860_v0 = vor.u32 %v18694_v56, %v13859_v55  ;;  %9669 = vmatpush.bf16.msrb.mxu2 %v14132_v54 }
  0xb0   : > { %v18758_v61 = vld [vmem:[%s20282_s11 + $0xe6c] sm:$0xf0]  ;;  %v14243_v62 = vld [vmem:[%s20282_s11 + $0xf60] sm:$0xf]  ;;  %v13988_v1 = vor.u32 %v18726_v59, %v13987_v57  ;;  %9682 = vmatpush.bf16.msrb.mxu3 %v14260_v58 }
  0xb1   : > { %v18790_v63 = vld [vmem:[%s20282_s11 + $0xf6c] sm:$0xf0]  ;;  %v14116_v3 = vor.u32 %v18758_v61, %v14115_v60  ;;  %v13843_v4 = vld [vmem:[%s20282_s11 + $0xc40] sm:$0xf]  ;;  %9644 = vmatpush.bf16.msrb.mxu0 %v13860_v0 }
  0xb2   : > { %v18690_v5 = vld [vmem:[%s20282_s11 + $0xc4c] sm:$0xf0]  ;;  %v13971_v9 = vld [vmem:[%s20282_s11 + $0xd40] sm:$0xf]  ;;  %v14244_v13 = vor.u32 %v18790_v63, %v14243_v62  ;;  %9657 = vmatpush.bf16.msrb.mxu1 %v13988_v1 }
  0xb3   : > { %v18722_v14 = vld [vmem:[%s20282_s11 + $0xd4c] sm:$0xf0]  ;;  %v14099_v15 = vld [vmem:[%s20282_s11 + $0xe40] sm:$0xf]  ;;  %v13844_v20 = vor.u32 %v18690_v5, %v13843_v4  ;;  %9670 = vmatpush.bf16.msrb.mxu2 %v14116_v3 }
  0xb4   : > { %v18754_v16 = vld [vmem:[%s20282_s11 + $0xe4c] sm:$0xf0]  ;;  %v14227_v18 = vld [vmem:[%s20282_s11 + $0xf40] sm:$0xf]  ;;  %v13972_v21 = vor.u32 %v18722_v14, %v13971_v9  ;;  %9683 = vmatpush.bf16.msrb.mxu3 %v14244_v13 }
  0xb5   : > { %v18786_v19 = vld [vmem:[%s20282_s11 + $0xf4c] sm:$0xf0]  ;;  %v14100_v22 = vor.u32 %v18754_v16, %v14099_v15  ;;  %v13827_v23 = vld [vmem:[%s20282_s11 + $0xc20] sm:$0xf]  ;;  %9645 = vmatpush.bf16.msrb.mxu0 %v13844_v20 }
  0xb6   : > { %v18686_v24 = vld [vmem:[%s20282_s11 + $0xc2c] sm:$0xf0]  ;;  %v13955_v25 = vld [vmem:[%s20282_s11 + $0xd20] sm:$0xf]  ;;  %v14228_v26 = vor.u32 %v18786_v19, %v14227_v18  ;;  %9658 = vmatpush.bf16.msrb.mxu1 %v13972_v21 }
  0xb7   : > { %v18718_v27 = vld [vmem:[%s20282_s11 + $0xd2c] sm:$0xf0]  ;;  %v14083_v28 = vld [vmem:[%s20282_s11 + $0xe20] sm:$0xf]  ;;  %v13828_v40 = vor.u32 %v18686_v24, %v13827_v23  ;;  %9671 = vmatpush.bf16.msrb.mxu2 %v14100_v22 }
  0xb8   : > { %v18750_v29 = vld [vmem:[%s20282_s11 + $0xe2c] sm:$0xf0]  ;;  %v14211_v30 = vld [vmem:[%s20282_s11 + $0xf20] sm:$0xf]  ;;  %v13956_v43 = vor.u32 %v18718_v27, %v13955_v25  ;;  %9684 = vmatpush.bf16.msrb.mxu3 %v14228_v26 }
  0xb9   : > { %v18782_v31 = vld [vmem:[%s20282_s11 + $0xf2c] sm:$0xf0]  ;;  %v13811_v41 = vld [vmem:[%s20282_s11 + $0xc00] sm:$0xf]  ;;  %v14084_v44 = vor.u32 %v18750_v29, %v14083_v28  ;;  %9646 = vmatpush.bf16.msrb.mxu0 %v13828_v40 }
  0xba   : > { %v18682_v42 = vld [vmem:[%s20282_s11 + $0xc0c] sm:$0xf0]  ;;  %v13939_v45 = vld [vmem:[%s20282_s11 + $0xd00] sm:$0xf]  ;;  %v14212_v48 = vor.u32 %v18782_v31, %v14211_v30  ;;  %9659 = vmatpush.bf16.msrb.mxu1 %v13956_v43 }
  0xbb   : > { %v18714_v46 = vld [vmem:[%s20282_s11 + $0xd0c] sm:$0xf0]  ;;  %v14067_v47 = vld [vmem:[%s20282_s11 + $0xe00] sm:$0xf]  ;;  %v13812_v55 = vor.u32 %v18682_v42, %v13811_v41  ;;  %9672 = vmatpush.bf16.msrb.mxu2 %v14084_v44 }
  0xbc   : > { %v18746_v49 = vld [vmem:[%s20282_s11 + $0xe0c] sm:$0xf0]  ;;  %v14195_v50 = vld [vmem:[%s20282_s11 + $0xf00] sm:$0xf]  ;;  %v13940_v59 = vor.u32 %v18714_v46, %v13939_v45  ;;  %9685 = vmatpush.bf16.msrb.mxu3 %v14212_v48 }
  0xbd   : > { %v18778_v51 = vld [vmem:[%s20282_s11 + $0xf0c] sm:$0xf0]  ;;  %v14435_v52 = vld [vmem:[%s20282_s11 + $0x10e0] sm:$0xf]  ;;  %v14068_v60 = vor.u32 %v18746_v49, %v14067_v47  ;;  %9647 = vmatpush.bf16.msrb.mxu0 %v13812_v55 }
  0xbe   : > { %v18838_v53 = vld [vmem:[%s20282_s11 + $0x10ec] sm:$0xf0]  ;;  %v14563_v54 = vld [vmem:[%s20282_s11 + $0x11e0] sm:$0xf]  ;;  %v14196_v63 = vor.u32 %v18778_v51, %v14195_v50  ;;  %9660 = vmatpush.bf16.msrb.mxu1 %v13940_v59 }
  0xbf   : > { %v18870_v56 = vld [vmem:[%s20282_s11 + $0x11ec] sm:$0xf0]  ;;  %v14691_v57 = vld [vmem:[%s20282_s11 + $0x12e0] sm:$0xf]  ;;  %v14436_v0 = vor.u32 %v18838_v53, %v14435_v52  ;;  %9673 = vmatpush.bf16.msrb.mxu2 %v14068_v60 }
  0xc0   : > { %v18902_v58 = vld [vmem:[%s20282_s11 + $0x12ec] sm:$0xf0]  ;;  %v14819_v61 = vld [vmem:[%s20282_s11 + $0x13e0] sm:$0xf]  ;;  %v14564_v1 = vor.u32 %v18870_v56, %v14563_v54  ;;  %9686 = vmatpush.bf16.msrb.mxu3 %v14196_v63  ;;  %9648 = vmatmul.bf16.vlgmr.msrb.gmra.mxu0 %v20552_v32 }
  0xc1   : > { %v18934_v62 = vld [vmem:[%s20282_s11 + $0x13ec] sm:$0xf0]  ;;  %v14692_v3 = vor.u32 %v18902_v58, %v14691_v57  ;;  %v14419_v4 = vld [vmem:[%s20282_s11 + $0x10c0] sm:$0xf]  ;;  %9692 = vmatpush.bf16.msra.mxu0 %v14436_v0  ;;  %9661 = vmatmul.bf16.vlgmr.msrb.gmra.mxu1 %v20558_v37 }
  0xc2   : > { %v18834_v5 = vld [vmem:[%s20282_s11 + $0x10cc] sm:$0xf0]  ;;  %v14547_v9 = vld [vmem:[%s20282_s11 + $0x11c0] sm:$0xf]  ;;  %v14820_v13 = vor.u32 %v18934_v62, %v14819_v61  ;;  %9705 = vmatpush.bf16.msra.mxu1 %v14564_v1  ;;  %9674 = vmatmul.bf16.vlgmr.msrb.gmra.mxu2 %v20556_v36 }
  0xc3   : > { %v18866_v14 = vld [vmem:[%s20282_s11 + $0x11cc] sm:$0xf0]  ;;  %v14675_v15 = vld [vmem:[%s20282_s11 + $0x12c0] sm:$0xf]  ;;  %v14420_v20 = vor.u32 %v18834_v5, %v14419_v4  ;;  %9718 = vmatpush.bf16.msra.mxu2 %v14692_v3  ;;  %9687 = vmatmul.bf16.vlgmr.msrb.gmra.mxu3 %v20560_v38 }
  0xc4   : > { %v18898_v16 = vld [vmem:[%s20282_s11 + $0x12cc] sm:$0xf0]  ;;  %v14803_v18 = vld [vmem:[%s20282_s11 + $0x13c0] sm:$0xf]  ;;  %v14548_v21 = vor.u32 %v18866_v14, %v14547_v9  ;;  %9731 = vmatpush.bf16.msra.mxu3 %v14820_v13 }
  0xc5   : > { %v18930_v19 = vld [vmem:[%s20282_s11 + $0x13cc] sm:$0xf0]  ;;  %v14676_v22 = vor.u32 %v18898_v16, %v14675_v15  ;;  %v14403_v23 = vld [vmem:[%s20282_s11 + $0x10a0] sm:$0xf]  ;;  %9693 = vmatpush.bf16.msra.mxu0 %v14420_v20 }
  0xc6   : > { %v18830_v24 = vld [vmem:[%s20282_s11 + $0x10ac] sm:$0xf0]  ;;  %v14531_v25 = vld [vmem:[%s20282_s11 + $0x11a0] sm:$0xf]  ;;  %v14804_v26 = vor.u32 %v18930_v19, %v14803_v18  ;;  %9706 = vmatpush.bf16.msra.mxu1 %v14548_v21 }
  0xc7   : > { %v18862_v27 = vld [vmem:[%s20282_s11 + $0x11ac] sm:$0xf0]  ;;  %v14659_v28 = vld [vmem:[%s20282_s11 + $0x12a0] sm:$0xf]  ;;  %v14404_v40 = vor.u32 %v18830_v24, %v14403_v23  ;;  %9719 = vmatpush.bf16.msra.mxu2 %v14676_v22 }
  0xc8   : > { %v18894_v29 = vld [vmem:[%s20282_s11 + $0x12ac] sm:$0xf0]  ;;  %v14787_v30 = vld [vmem:[%s20282_s11 + $0x13a0] sm:$0xf]  ;;  %v14532_v41 = vor.u32 %v18862_v27, %v14531_v25  ;;  %9732 = vmatpush.bf16.msra.mxu3 %v14804_v26 }
  0xc9   : > { %v18926_v31 = vld [vmem:[%s20282_s11 + $0x13ac] sm:$0xf0]  ;;  %v14660_v42 = vor.u32 %v18894_v29, %v14659_v28  ;;  %v14387_v43 = vld [vmem:[%s20282_s11 + $0x1080] sm:$0xf]  ;;  %9694 = vmatpush.bf16.msra.mxu0 %v14404_v40 }
  0xca   : > { %v18826_v44 = vld [vmem:[%s20282_s11 + $0x108c] sm:$0xf0]  ;;  %v14515_v45 = vld [vmem:[%s20282_s11 + $0x1180] sm:$0xf]  ;;  %v14788_v46 = vor.u32 %v18926_v31, %v14787_v30  ;;  %9707 = vmatpush.bf16.msra.mxu1 %v14532_v41 }
  0xcb   : > { %v18858_v47 = vld [vmem:[%s20282_s11 + $0x118c] sm:$0xf0]  ;;  %v14643_v48 = vld [vmem:[%s20282_s11 + $0x1280] sm:$0xf]  ;;  %v14388_v52 = vor.u32 %v18826_v44, %v14387_v43  ;;  %9720 = vmatpush.bf16.msra.mxu2 %v14660_v42 }
  0xcc   : > { %v18890_v49 = vld [vmem:[%s20282_s11 + $0x128c] sm:$0xf0]  ;;  %v14771_v50 = vld [vmem:[%s20282_s11 + $0x1380] sm:$0xf]  ;;  %v14516_v53 = vor.u32 %v18858_v47, %v14515_v45  ;;  %9733 = vmatpush.bf16.msra.mxu3 %v14788_v46 }
  0xcd   : > { %v18922_v51 = vld [vmem:[%s20282_s11 + $0x138c] sm:$0xf0]  ;;  %v14644_v54 = vor.u32 %v18890_v49, %v14643_v48  ;;  %v14371_v55 = vld [vmem:[%s20282_s11 + $0x1060] sm:$0xf]  ;;  %9695 = vmatpush.bf16.msra.mxu0 %v14388_v52 }
  0xce   : > { %v18822_v56 = vld [vmem:[%s20282_s11 + $0x106c] sm:$0xf0]  ;;  %v14499_v57 = vld [vmem:[%s20282_s11 + $0x1160] sm:$0xf]  ;;  %v14772_v58 = vor.u32 %v18922_v51, %v14771_v50  ;;  %9708 = vmatpush.bf16.msra.mxu1 %v14516_v53 }
  0xcf   : > { %v18854_v59 = vld [vmem:[%s20282_s11 + $0x116c] sm:$0xf0]  ;;  %v14627_v60 = vld [vmem:[%s20282_s11 + $0x1260] sm:$0xf]  ;;  %v14372_v0 = vor.u32 %v18822_v56, %v14371_v55  ;;  %9721 = vmatpush.bf16.msra.mxu2 %v14644_v54 }
  0xd0   : > { %v18886_v61 = vld [vmem:[%s20282_s11 + $0x126c] sm:$0xf0]  ;;  %v14755_v62 = vld [vmem:[%s20282_s11 + $0x1360] sm:$0xf]  ;;  %v14500_v1 = vor.u32 %v18854_v59, %v14499_v57  ;;  %9734 = vmatpush.bf16.msra.mxu3 %v14772_v58 }
  0xd1   : > { %v18918_v63 = vld [vmem:[%s20282_s11 + $0x136c] sm:$0xf0]  ;;  %v14628_v3 = vor.u32 %v18886_v61, %v14627_v60  ;;  %v14355_v4 = vld [vmem:[%s20282_s11 + $0x1040] sm:$0xf]  ;;  %9696 = vmatpush.bf16.msra.mxu0 %v14372_v0 }
  0xd2   : > { %v18818_v5 = vld [vmem:[%s20282_s11 + $0x104c] sm:$0xf0]  ;;  %v14483_v9 = vld [vmem:[%s20282_s11 + $0x1140] sm:$0xf]  ;;  %v14756_v13 = vor.u32 %v18918_v63, %v14755_v62  ;;  %9709 = vmatpush.bf16.msra.mxu1 %v14500_v1 }
  0xd3   : > { %v18850_v14 = vld [vmem:[%s20282_s11 + $0x114c] sm:$0xf0]  ;;  %v14611_v15 = vld [vmem:[%s20282_s11 + $0x1240] sm:$0xf]  ;;  %v14356_v20 = vor.u32 %v18818_v5, %v14355_v4  ;;  %9722 = vmatpush.bf16.msra.mxu2 %v14628_v3 }
  0xd4   : > { %v18882_v16 = vld [vmem:[%s20282_s11 + $0x124c] sm:$0xf0]  ;;  %v14739_v18 = vld [vmem:[%s20282_s11 + $0x1340] sm:$0xf]  ;;  %v14484_v21 = vor.u32 %v18850_v14, %v14483_v9  ;;  %9735 = vmatpush.bf16.msra.mxu3 %v14756_v13  ;;  %v20681_v9 = vld [vmem:[#allocation1] sm:$0xff] }
  0xd5   : > { %v18914_v19 = vld [vmem:[%s20282_s11 + $0x134c] sm:$0xf0]  ;;  %v14612_v22 = vor.u32 %v18882_v16, %v14611_v15  ;;  %v14339_v23 = vld [vmem:[%s20282_s11 + $0x1020] sm:$0xf]  ;;  %9697 = vmatpush.bf16.msra.mxu0 %v14356_v20 }
  0xd6   : > { %v18814_v24 = vld [vmem:[%s20282_s11 + $0x102c] sm:$0xf0]  ;;  %v14467_v25 = vld [vmem:[%s20282_s11 + $0x1120] sm:$0xf]  ;;  %v14740_v26 = vor.u32 %v18914_v19, %v14739_v18  ;;  %9710 = vmatpush.bf16.msra.mxu1 %v14484_v21  ;;  %v20686_v18 = vld [vmem:[#allocation1 + $0x12] sm:$0xff] }
  0xd7   : > { %v18846_v27 = vld [vmem:[%s20282_s11 + $0x112c] sm:$0xf0]  ;;  %v14595_v28 = vld [vmem:[%s20282_s11 + $0x1220] sm:$0xf]  ;;  %v14340_v40 = vor.u32 %v18814_v24, %v14339_v23  ;;  %9723 = vmatpush.bf16.msra.mxu2 %v14612_v22 }
  0xd8   : > { %v18878_v29 = vld [vmem:[%s20282_s11 + $0x122c] sm:$0xf0]  ;;  %v14723_v30 = vld [vmem:[%s20282_s11 + $0x1320] sm:$0xf]  ;;  %v14468_v43 = vor.u32 %v18846_v27, %v14467_v25  ;;  %9736 = vmatpush.bf16.msra.mxu3 %v14740_v26 }
  0xd9   : > { %v18910_v31 = vld [vmem:[%s20282_s11 + $0x132c] sm:$0xf0]  ;;  %v14323_v41 = vld [vmem:[%s20282_s11 + $0x1000] sm:$0xf]  ;;  %v14596_v44 = vor.u32 %v18878_v29, %v14595_v28  ;;  %9698 = vmatpush.bf16.msra.mxu0 %v14340_v40 }
  0xda   : > { %v18810_v42 = vld [vmem:[%s20282_s11 + $0x100c] sm:$0xf0]  ;;  %v14451_v45 = vld [vmem:[%s20282_s11 + $0x1100] sm:$0xf]  ;;  %v14724_v48 = vor.u32 %v18910_v31, %v14723_v30  ;;  %9711 = vmatpush.bf16.msra.mxu1 %v14468_v43  ;;  %v20700_v30 = vld [vmem:[#allocation1 + $0x24] sm:$0xff] }
  0xdb   : > { %v18842_v46 = vld [vmem:[%s20282_s11 + $0x110c] sm:$0xf0]  ;;  %v14579_v47 = vld [vmem:[%s20282_s11 + $0x1200] sm:$0xf]  ;;  %v14324_v55 = vor.u32 %v18810_v42, %v14323_v41  ;;  %9724 = vmatpush.bf16.msra.mxu2 %v14596_v44 }
  0xdc   : > { %v18874_v49 = vld [vmem:[%s20282_s11 + $0x120c] sm:$0xf0]  ;;  %v14707_v50 = vld [vmem:[%s20282_s11 + $0x1300] sm:$0xf]  ;;  %v14452_v59 = vor.u32 %v18842_v46, %v14451_v45  ;;  %9737 = vmatpush.bf16.msra.mxu3 %v14724_v48 }
  0xdd   : > { %v18906_v51 = vld [vmem:[%s20282_s11 + $0x130c] sm:$0xf0]  ;;  %v14947_v52 = vld [vmem:[%s20282_s11 + $0x14e0] sm:$0xf]  ;;  %v14580_v60 = vor.u32 %v18874_v49, %v14579_v47  ;;  %9699 = vmatpush.bf16.msra.mxu0 %v14324_v55 }
  0xde   : > { %v18966_v53 = vld [vmem:[%s20282_s11 + $0x14ec] sm:$0xf0]  ;;  %v15075_v54 = vld [vmem:[%s20282_s11 + $0x15e0] sm:$0xf]  ;;  %v14708_v63 = vor.u32 %v18906_v51, %v14707_v50  ;;  %9712 = vmatpush.bf16.msra.mxu1 %v14452_v59 }
  0xdf   : > { %v18998_v56 = vld [vmem:[%s20282_s11 + $0x15ec] sm:$0xf0]  ;;  %v15203_v57 = vld [vmem:[%s20282_s11 + $0x16e0] sm:$0xf]  ;;  %v14948_v0 = vor.u32 %v18966_v53, %v14947_v52  ;;  %9725 = vmatpush.bf16.msra.mxu2 %v14580_v60 }
  0xe0   : > { %v19030_v58 = vld [vmem:[%s20282_s11 + $0x16ec] sm:$0xf0]  ;;  %v15331_v61 = vld [vmem:[%s20282_s11 + $0x17e0] sm:$0xf]  ;;  %v15076_v4 = vor.u32 %v18998_v56, %v15075_v54  ;;  %9738 = vmatpush.bf16.msra.mxu3 %v14708_v63  ;;  %9700 = vmatmul.bf16.vlgmr.msra.gmra.mxu0 %v20681_v9 }
  0xe1   : > { %v19062_v62 = vld [vmem:[%s20282_s11 + $0x17ec] sm:$0xf0]  ;;  %v14931_v1 = vld [vmem:[%s20282_s11 + $0x14c0] sm:$0xf]  ;;  %v15204_v5 = vor.u32 %v19030_v58, %v15203_v57  ;;  %9744 = vmatpush.bf16.msrb.mxu0 %v14948_v0 }
  0xe2   : > { %v350_v3 = vld [vmem:[%s20390_s6 + $0x18] sm:$0xff]  ;;  %v18962_v13 = vld [vmem:[%s20282_s11 + $0x14cc] sm:$0xf0]  ;;  %v15332_v16 = vor.u32 %v19062_v62, %v15331_v61  ;;  %9757 = vmatpush.bf16.msrb.mxu1 %v15076_v4  ;;  %9726 = vmatmul.bf16.vlgmr.msra.gmra.mxu2 %v20686_v18 }
  0xe3   : > { %v15059_v14 = vld [vmem:[%s20282_s11 + $0x15c0] sm:$0xf]  ;;  %v18994_v15 = vld [vmem:[%s20282_s11 + $0x15cc] sm:$0xf0]  ;;  %v14932_v27 = vor.u32 %v18962_v13, %v14931_v1  ;;  %9770 = vmatpush.bf16.msrb.mxu2 %v15204_v5 }
  0xe4   : > { %v20688_v19 = vld [vmem:[#allocation1 + $0x9] sm:$0xff]  ;;  %v15187_v20 = vld [vmem:[%s20282_s11 + $0x16c0] sm:$0xf]  ;;  %v15060_v31 = vor.u32 %v18994_v15, %v15059_v14  ;;  %9783 = vmatpush.bf16.msrb.mxu3 %v15332_v16 }
  0xe5   : > { %v19026_v21 = vld [vmem:[%s20282_s11 + $0x16cc] sm:$0xf0]  ;;  %v15315_v22 = vld [vmem:[%s20282_s11 + $0x17c0] sm:$0xf]  ;;  %9713 = vmatmul.bf16.vlgmr.msra.gmra.mxu1 %v20688_v19  ;;  %9745 = vmatpush.bf16.msrb.mxu0 %v14932_v27 }
  0xe6   : > { %v20693_v23 = vld [vmem:[#allocation1 + $0x1b] sm:$0xff]  ;;  %v19058_v24 = vld [vmem:[%s20282_s11 + $0x17cc] sm:$0xf0]  ;;  %v15188_v40 = vor.u32 %v19026_v21, %v15187_v20  ;;  %9758 = vmatpush.bf16.msrb.mxu1 %v15060_v31 }
  0xe7   : > { %v14915_v25 = vld [vmem:[%s20282_s11 + $0x14a0] sm:$0xf]  ;;  %v18958_v26 = vld [vmem:[%s20282_s11 + $0x14ac] sm:$0xf0]  ;;  %v15316_v44 = vor.u32 %v19058_v24, %v15315_v22  ;;  %9739 = vmatmul.bf16.vlgmr.msra.gmra.mxu3 %v20693_v23 }
  0xe8   : > { %v15043_v28 = vld [vmem:[%s20282_s11 + $0x15a0] sm:$0xf]  ;;  %v18990_v29 = vld [vmem:[%s20282_s11 + $0x15ac] sm:$0xf0]  ;;  %v14916_v49 = vor.u32 %v18958_v26, %v14915_v25  ;;  %9771 = vmatpush.bf16.msrb.mxu2 %v15188_v40 }
  0xe9   : > { %v20702_v41 = vld [vmem:[#allocation1 + $0x36] sm:$0xff]  ;;  %v20704_v42 = vld [vmem:[#allocation1 + $0x2d] sm:$0xff]  ;;  %v20706_v43 = vld [vmem:[#allocation1 + $0x3f] sm:$0xff]  ;;  %v15044_v50 = vor.u32 %v18990_v29, %v15043_v28  ;;  %9784 = vmatpush.bf16.msrb.mxu3 %v15316_v44 }
  0xea   : > { %v15171_v45 = vld [vmem:[%s20282_s11 + $0x16a0] sm:$0xf]  ;;  %v19022_v46 = vld [vmem:[%s20282_s11 + $0x16ac] sm:$0xf0]  ;;  %1889 = vst [vmem:[#allocation1] ss:$9 sm:$0xff] %v350_v3  ;;  %9746 = vmatpush.bf16.msrb.mxu0 %v14916_v49 }
  0xeb   : > { %v15299_v47 = vld [vmem:[%s20282_s11 + $0x17a0] sm:$0xf]  ;;  %v19054_v48 = vld [vmem:[%s20282_s11 + $0x17ac] sm:$0xf0]  ;;  %v15172_v51 = vor.u32 %v19022_v46, %v15171_v45  ;;  %9759 = vmatpush.bf16.msrb.mxu1 %v15044_v50 }
  0xec   : > { %v14899_v52 = vld [vmem:[%s20282_s11 + $0x1480] sm:$0xf]  ;;  %v18954_v53 = vld [vmem:[%s20282_s11 + $0x148c] sm:$0xf0]  ;;  %v15300_v55 = vor.u32 %v19054_v48, %v15299_v47 }
  0xed   : > { %v15027_v54 = vld [vmem:[%s20282_s11 + $0x1580] sm:$0xf]  ;;  %v18986_v56 = vld [vmem:[%s20282_s11 + $0x158c] sm:$0xf0]  ;;  %v14900_v61 = vor.u32 %v18954_v53, %v14899_v52  ;;  %9772 = vmatpush.bf16.msrb.mxu2 %v15172_v51 }
  0xee   : > { %v15155_v57 = vld [vmem:[%s20282_s11 + $0x1680] sm:$0xf]  ;;  %v19018_v58 = vld [vmem:[%s20282_s11 + $0x168c] sm:$0xf0]  ;;  %v15028_v62 = vor.u32 %v18986_v56, %v15027_v54  ;;  %9785 = vmatpush.bf16.msrb.mxu3 %v15300_v55 }
  0xef   : > { %v15283_v59 = vld [vmem:[%s20282_s11 + $0x1780] sm:$0xf]  ;;  %v19050_v60 = vld [vmem:[%s20282_s11 + $0x178c] sm:$0xf0]  ;;  %v15156_v63 = vor.u32 %v19018_v58, %v15155_v57  ;;  %9747 = vmatpush.bf16.msrb.mxu0 %v14900_v61 }
  0xf0   : > { %v14883_v0 = vld [vmem:[%s20282_s11 + $0x1460] sm:$0xf]  ;;  %v18950_v1 = vld [vmem:[%s20282_s11 + $0x146c] sm:$0xf0]  ;;  %v15284_v4 = vor.u32 %v19050_v60, %v15283_v59  ;;  %9760 = vmatpush.bf16.msrb.mxu1 %v15028_v62  ;;  %v9493_v60 = vpop.f32.mrf.mxu0 }
  0xf1   : > { %v15011_v3 = vld [vmem:[%s20282_s11 + $0x1560] sm:$0xf]  ;;  %v18982_v5 = vld [vmem:[%s20282_s11 + $0x156c] sm:$0xf0]  ;;  %v14884_v20 = vor.u32 %v18950_v1, %v14883_v0  ;;  %9773 = vmatpush.bf16.msrb.mxu2 %v15156_v63 }
  0xf2   : > { %v15139_v13 = vld [vmem:[%s20282_s11 + $0x1660] sm:$0xf]  ;;  %v19014_v14 = vld [vmem:[%s20282_s11 + $0x166c] sm:$0xf0]  ;;  %v15012_v21 = vor.u32 %v18982_v5, %v15011_v3  ;;  %9786 = vmatpush.bf16.msrb.mxu3 %v15284_v4  ;;  %v9506_v3 = vpop.f32.mrf.mxu1 }
  0xf3   : > { %v15267_v15 = vld [vmem:[%s20282_s11 + $0x1760] sm:$0xf]  ;;  %v19046_v16 = vld [vmem:[%s20282_s11 + $0x176c] sm:$0xf0]  ;;  %v15140_v22 = vor.u32 %v19014_v14, %v15139_v13  ;;  %9748 = vmatpush.bf16.msrb.mxu0 %v14884_v20 }
  0xf4   : > { %v14867_v24 = vld [vmem:[%s20282_s11 + $0x1440] sm:$0xf]  ;;  %v18946_v25 = vld [vmem:[%s20282_s11 + $0x144c] sm:$0xf0]  ;;  %v15268_v27 = vor.u32 %v19046_v16, %v15267_v15  ;;  %9761 = vmatpush.bf16.msrb.mxu1 %v15012_v21  ;;  %v9507_v15 = vadd.f32 %v9506_v3, %v9493_v60 }
  0xf5   : > { %v14995_v26 = vld [vmem:[%s20282_s11 + $0x1540] sm:$0xf]  ;;  %v18978_v28 = vld [vmem:[%s20282_s11 + $0x154c] sm:$0xf0]  ;;  %v14868_v45 = vor.u32 %v18946_v25, %v14867_v24  ;;  %9774 = vmatpush.bf16.msrb.mxu2 %v15140_v22 }
  0xf6   : > { %v15123_v29 = vld [vmem:[%s20282_s11 + $0x1640] sm:$0xf]  ;;  %v19010_v31 = vld [vmem:[%s20282_s11 + $0x164c] sm:$0xf0]  ;;  %v14996_v46 = vor.u32 %v18978_v28, %v14995_v26  ;;  %9787 = vmatpush.bf16.msrb.mxu3 %v15268_v27 }
  0xf7   : > { %v15251_v40 = vld [vmem:[%s20282_s11 + $0x1740] sm:$0xf]  ;;  %v19042_v44 = vld [vmem:[%s20282_s11 + $0x174c] sm:$0xf0]  ;;  %v15124_v47 = vor.u32 %v19010_v31, %v15123_v29  ;;  %9749 = vmatpush.bf16.msrb.mxu0 %v14868_v45 }
  0xf8   : > { %v14851_v48 = vld [vmem:[%s20282_s11 + $0x1420] sm:$0xf]  ;;  %v18942_v49 = vld [vmem:[%s20282_s11 + $0x142c] sm:$0xf0]  ;;  %v15252_v51 = vor.u32 %v19042_v44, %v15251_v40  ;;  %9762 = vmatpush.bf16.msrb.mxu1 %v14996_v46  ;;  %v9519_v40 = vpop.f32.mrf.mxu2 }
  0xf9   : > { %v14979_v50 = vld [vmem:[%s20282_s11 + $0x1520] sm:$0xf]  ;;  %v18974_v52 = vld [vmem:[%s20282_s11 + $0x152c] sm:$0xf0]  ;;  %v14852_v57 = vor.u32 %v18942_v49, %v14851_v48  ;;  %9775 = vmatpush.bf16.msrb.mxu2 %v15124_v47  ;;  %v9520_v46 = vadd.f32 %v9519_v40, %v9507_v15  ;;  %v9532_v47 = vpop.f32.mrf.mxu3 }
  0xfa   : > { %v15107_v53 = vld [vmem:[%s20282_s11 + $0x1620] sm:$0xf]  ;;  %v19006_v54 = vld [vmem:[%s20282_s11 + $0x162c] sm:$0xf0]  ;;  %v14980_v61 = vor.u32 %v18974_v52, %v14979_v50  ;;  %9788 = vmatpush.bf16.msrb.mxu3 %v15252_v51 }
  0xfb   : > { %v15235_v55 = vld [vmem:[%s20282_s11 + $0x1720] sm:$0xf]  ;;  %v19038_v56 = vld [vmem:[%s20282_s11 + $0x172c] sm:$0xf0]  ;;  %v15108_v62 = vor.u32 %v19006_v54, %v15107_v53  ;;  %9750 = vmatpush.bf16.msrb.mxu0 %v14852_v57  ;;  %v9533_v57 = vadd.f32 %v9532_v47, %v9520_v46 }
  0xfc   : > { %v14835_v58 = vld [vmem:[%s20282_s11 + $0x1400] sm:$0xf]  ;;  %v18938_v59 = vld [vmem:[%s20282_s11 + $0x140c] sm:$0xf0]  ;;  %v15236_v4 = vor.u32 %v19038_v56, %v15235_v55  ;;  %9763 = vmatpush.bf16.msrb.mxu1 %v14980_v61  ;;  %v9508_v61 = vpop.f32.mrf.mxu1 }
  0xfd   : > { %v14963_v63 = vld [vmem:[%s20282_s11 + $0x1500] sm:$0xf]  ;;  %v18970_v0 = vld [vmem:[%s20282_s11 + $0x150c] sm:$0xf0]  ;;  %v14836_v22 = vor.u32 %v18938_v59, %v14835_v58  ;;  %9776 = vmatpush.bf16.msrb.mxu2 %v15108_v62  ;;  %v9495_v58 = vpop.f32.mrf.mxu0 }
  0xfe   : > { %v15091_v1 = vld [vmem:[%s20282_s11 + $0x1600] sm:$0xf]  ;;  %v19002_v5 = vld [vmem:[%s20282_s11 + $0x160c] sm:$0xf0]  ;;  %v14964_v27 = vor.u32 %v18970_v0, %v14963_v63  ;;  %9789 = vmatpush.bf16.msrb.mxu3 %v15236_v4 }
  0xff   : > { %v15219_v13 = vld [vmem:[%s20282_s11 + $0x1700] sm:$0xf]  ;;  %v19034_v14 = vld [vmem:[%s20282_s11 + $0x170c] sm:$0xf0]  ;;  %v15092_v28 = vor.u32 %v19002_v5, %v15091_v1  ;;  %9751 = vmatpush.bf16.msrb.mxu0 %v14836_v22 }
 0x100   : > { %v15459_v16 = vld [vmem:[%s20282_s11 + $0x18e0] sm:$0xf]  ;;  %v19094_v20 = vld [vmem:[%s20282_s11 + $0x18ec] sm:$0xf0]  ;;  %v15220_v44 = vor.u32 %v19034_v14, %v15219_v13  ;;  %9764 = vmatpush.bf16.msrb.mxu1 %v14964_v27 }
 0x101   : > { %v15587_v21 = vld [vmem:[%s20282_s11 + $0x19e0] sm:$0xf]  ;;  %v19126_v24 = vld [vmem:[%s20282_s11 + $0x19ec] sm:$0xf0]  ;;  %v15460_v45 = vor.u32 %v19094_v20, %v15459_v16  ;;  %9777 = vmatpush.bf16.msrb.mxu2 %v15092_v28 }
 0x102   : > { %v15715_v25 = vld [vmem:[%s20282_s11 + $0x1ae0] sm:$0xf]  ;;  %v19158_v26 = vld [vmem:[%s20282_s11 + $0x1aec] sm:$0xf0]  ;;  %v15588_v48 = vor.u32 %v19126_v24, %v15587_v21  ;;  %9790 = vmatpush.bf16.msrb.mxu3 %v15220_v44  ;;  %9752 = vmatmul.bf16.vlgmr.msrb.gmra.mxu0 %v20700_v30  ;;  %v9521_v21 = vpop.f32.mrf.mxu2  ;;  %v9534_v24 = vpop.f32.mrf.mxu3 }
 0x103   : > { %v15843_v29 = vld [vmem:[%s20282_s11 + $0x1be0] sm:$0xf]  ;;  %v19190_v31 = vld [vmem:[%s20282_s11 + $0x1bec] sm:$0xf0]  ;;  %v15716_v49 = vor.u32 %v19158_v26, %v15715_v25  ;;  %9796 = vmatpush.bf16.msra.mxu0 %v15460_v45  ;;  %9765 = vmatmul.bf16.vlgmr.msrb.gmra.mxu1 %v20704_v42 }
 0x104   : > { %v15443_v50 = vld [vmem:[%s20282_s11 + $0x18c0] sm:$0xf]  ;;  %v19090_v51 = vld [vmem:[%s20282_s11 + $0x18cc] sm:$0xf0]  ;;  %v15844_v53 = vor.u32 %v19190_v31, %v15843_v29  ;;  %9809 = vmatpush.bf16.msra.mxu1 %v15588_v48  ;;  %9778 = vmatmul.bf16.vlgmr.msrb.gmra.mxu2 %v20702_v41 }
 0x105   : > { %v15571_v52 = vld [vmem:[%s20282_s11 + $0x19c0] sm:$0xf]  ;;  %v19122_v54 = vld [vmem:[%s20282_s11 + $0x19cc] sm:$0xf0]  ;;  %v15444_v62 = vor.u32 %v19090_v51, %v15443_v50  ;;  %9822 = vmatpush.bf16.msra.mxu2 %v15716_v49  ;;  %9791 = vmatmul.bf16.vlgmr.msrb.gmra.mxu3 %v20706_v43  ;;  %v9545_v49 = vpop.f32.mrf.mxu0 }
 0x106   : > { %v15699_v55 = vld [vmem:[%s20282_s11 + $0x1ac0] sm:$0xf]  ;;  %v19154_v56 = vld [vmem:[%s20282_s11 + $0x1acc] sm:$0xf0]  ;;  %v15572_v63 = vor.u32 %v19122_v54, %v15571_v52  ;;  %9835 = vmatpush.bf16.msra.mxu3 %v15844_v53 }
 0x107   : > { %v15827_v59 = vld [vmem:[%s20282_s11 + $0x1bc0] sm:$0xf]  ;;  %v19186_v60 = vld [vmem:[%s20282_s11 + $0x1bcc] sm:$0xf0]  ;;  %v15700_v0 = vor.u32 %v19154_v56, %v15699_v55  ;;  %9797 = vmatpush.bf16.msra.mxu0 %v15444_v62  ;;  %v9546_v55 = vadd.f32 %v9545_v49, %v9533_v57  ;;  %v9558_v56 = vpop.f32.mrf.mxu1 }
 0x108   : > { %v15427_v1 = vld [vmem:[%s20282_s11 + $0x18a0] sm:$0xf]  ;;  %v19086_v3 = vld [vmem:[%s20282_s11 + $0x18ac] sm:$0xf0]  ;;  %v15828_v5 = vor.u32 %v19186_v60, %v15827_v59  ;;  %9810 = vmatpush.bf16.msra.mxu1 %v15572_v63 }
 0x109   : > { %v15555_v4 = vld [vmem:[%s20282_s11 + $0x19a0] sm:$0xf]  ;;  %v19118_v13 = vld [vmem:[%s20282_s11 + $0x19ac] sm:$0xf0]  ;;  %v15428_v22 = vor.u32 %v19086_v3, %v15427_v1  ;;  %9823 = vmatpush.bf16.msra.mxu2 %v15700_v0  ;;  %v9559_v0 = vadd.f32 %v9558_v56, %v9546_v55 }
 0x10a   : > { %v15683_v14 = vld [vmem:[%s20282_s11 + $0x1aa0] sm:$0xf]  ;;  %v19150_v15 = vld [vmem:[%s20282_s11 + $0x1aac] sm:$0xf0]  ;;  %v15556_v25 = vor.u32 %v19118_v13, %v15555_v4  ;;  %9836 = vmatpush.bf16.msra.mxu3 %v15828_v5  ;;  %v9584_v24 = vpop.f32.mrf.mxu3 }
 0x10b   : > { %v15811_v16 = vld [vmem:[%s20282_s11 + $0x1ba0] sm:$0xf]  ;;  %v19182_v20 = vld [vmem:[%s20282_s11 + $0x1bac] sm:$0xf0]  ;;  %v15684_v26 = vor.u32 %v19150_v15, %v15683_v14  ;;  %9798 = vmatpush.bf16.msra.mxu0 %v15428_v22  ;;  %v9571_v14 = vpop.f32.mrf.mxu2 }
 0x10c   : > { %v15411_v27 = vld [vmem:[%s20282_s11 + $0x1880] sm:$0xf]  ;;  %v19082_v28 = vld [vmem:[%s20282_s11 + $0x188c] sm:$0xf0]  ;;  %v15812_v31 = vor.u32 %v19182_v20, %v15811_v16  ;;  %9811 = vmatpush.bf16.msra.mxu1 %v15556_v25  ;;  %v9572_v22 = vadd.f32 %v9571_v14, %v9559_v0 }
 0x10d   : > { %v15539_v29 = vld [vmem:[%s20282_s11 + $0x1980] sm:$0xf]  ;;  %v19114_v40 = vld [vmem:[%s20282_s11 + $0x198c] sm:$0xf0]  ;;  %v15412_v48 = vor.u32 %v19082_v28, %v15411_v27  ;;  %9824 = vmatpush.bf16.msra.mxu2 %v15684_v26 }
 0x10e   : > { %v15667_v44 = vld [vmem:[%s20282_s11 + $0x1a80] sm:$0xf]  ;;  %v19146_v45 = vld [vmem:[%s20282_s11 + $0x1a8c] sm:$0xf0]  ;;  %v15540_v50 = vor.u32 %v19114_v40, %v15539_v29  ;;  %9837 = vmatpush.bf16.msra.mxu3 %v15812_v31  ;;  %v20808_v28 = vadd.f32 %v9584_v24, %v9572_v22  ;;  %v9547_v29 = vpop.f32.mrf.mxu0 }
 0x10f   : > { %v15795_v46 = vld [vmem:[%s20282_s11 + $0x1b80] sm:$0xf]  ;;  %v19178_v47 = vld [vmem:[%s20282_s11 + $0x1b8c] sm:$0xf0]  ;;  %v15668_v51 = vor.u32 %v19146_v45, %v15667_v44  ;;  %9799 = vmatpush.bf16.msra.mxu0 %v15412_v48 }
 0x110   : > { %v15395_v52 = vld [vmem:[%s20282_s11 + $0x1860] sm:$0xf]  ;;  %v19078_v53 = vld [vmem:[%s20282_s11 + $0x186c] sm:$0xf0]  ;;  %v15796_v58 = vor.u32 %v19178_v47, %v15795_v46  ;;  %9812 = vmatpush.bf16.msra.mxu1 %v15540_v50  ;;  %v9560_v47 = vpop.f32.mrf.mxu1 }
 0x111   : > { %v15523_v54 = vld [vmem:[%s20282_s11 + $0x1960] sm:$0xf]  ;;  %v19110_v59 = vld [vmem:[%s20282_s11 + $0x196c] sm:$0xf0]  ;;  %v15396_v1 = vor.u32 %v19078_v53, %v15395_v52  ;;  %9825 = vmatpush.bf16.msra.mxu2 %v15668_v51 }
 0x112   : > { %v15651_v60 = vld [vmem:[%s20282_s11 + $0x1a60] sm:$0xf]  ;;  %v19142_v61 = vld [vmem:[%s20282_s11 + $0x1a6c] sm:$0xf0]  ;;  %v15524_v57 = vor.u32 %v19110_v59, %v15523_v54  ;;  %9838 = vmatpush.bf16.msra.mxu3 %v15796_v58 }
 0x113   : > { %v15779_v62 = vld [vmem:[%s20282_s11 + $0x1b60] sm:$0xf]  ;;  %v19174_v63 = vld [vmem:[%s20282_s11 + $0x1b6c] sm:$0xf0]  ;;  %v15652_v3 = vor.u32 %v19142_v61, %v15651_v60  ;;  %9800 = vmatpush.bf16.msra.mxu0 %v15396_v1 }
 0x114   : > { %v15379_v4 = vld [vmem:[%s20282_s11 + $0x1840] sm:$0xf]  ;;  %v19074_v5 = vld [vmem:[%s20282_s11 + $0x184c] sm:$0xf0]  ;;  %v15780_v15 = vor.u32 %v19174_v63, %v15779_v62  ;;  %9813 = vmatpush.bf16.msra.mxu1 %v15524_v57  ;;  %v9573_v63 = vpop.f32.mrf.mxu2 }
 0x115   : > { %v15507_v13 = vld [vmem:[%s20282_s11 + $0x1940] sm:$0xf]  ;;  %v19106_v16 = vld [vmem:[%s20282_s11 + $0x194c] sm:$0xf0]  ;;  %v15380_v27 = vor.u32 %v19074_v5, %v15379_v4  ;;  %9826 = vmatpush.bf16.msra.mxu2 %v15652_v3  ;;  %v9586_v4 = vpop.f32.mrf.mxu3 }
 0x116   : > { %v15635_v20 = vld [vmem:[%s20282_s11 + $0x1a40] sm:$0xf]  ;;  %v19138_v21 = vld [vmem:[%s20282_s11 + $0x1a4c] sm:$0xf0]  ;;  %v15508_v31 = vor.u32 %v19106_v16, %v15507_v13  ;;  %9839 = vmatpush.bf16.msra.mxu3 %v15780_v15 }
 0x117   : > { %v15763_v25 = vld [vmem:[%s20282_s11 + $0x1b40] sm:$0xf]  ;;  %v19170_v26 = vld [vmem:[%s20282_s11 + $0x1b4c] sm:$0xf0]  ;;  %v15636_v40 = vor.u32 %v19138_v21, %v15635_v20  ;;  %9801 = vmatpush.bf16.msra.mxu0 %v15380_v27 }
 0x118   : > { %v15363_v44 = vld [vmem:[%s20282_s11 + $0x1820] sm:$0xf]  ;;  %v19070_v45 = vld [vmem:[%s20282_s11 + $0x182c] sm:$0xf0]  ;;  %v15764_v48 = vor.u32 %v19170_v26, %v15763_v25  ;;  %9814 = vmatpush.bf16.msra.mxu1 %v15508_v31 }
 0x119   : > { %v15491_v46 = vld [vmem:[%s20282_s11 + $0x1920] sm:$0xf]  ;;  %v19102_v49 = vld [vmem:[%s20282_s11 + $0x192c] sm:$0xf0]  ;;  %v15364_v54 = vor.u32 %v19070_v45, %v15363_v44  ;;  %9827 = vmatpush.bf16.msra.mxu2 %v15636_v40  ;;  %v351_v40 = vld [vmem:[%s20390_s6 + $0x20] sm:$0xff] }
 0x11a   : > { %v15619_v50 = vld [vmem:[%s20282_s11 + $0x1a20] sm:$0xf]  ;;  %v19134_v51 = vld [vmem:[%s20282_s11 + $0x1a2c] sm:$0xf0]  ;;  %v15492_v58 = vor.u32 %v19102_v49, %v15491_v46  ;;  %9840 = vmatpush.bf16.msra.mxu3 %v15764_v48  ;;  %v20836_v46 = vld [vmem:[#allocation1] sm:$0xff] }
 0x11b   : > { %v15747_v52 = vld [vmem:[%s20282_s11 + $0x1b20] sm:$0xf]  ;;  %v19166_v53 = vld [vmem:[%s20282_s11 + $0x1b2c] sm:$0xf0]  ;;  %v15620_v59 = vor.u32 %v19134_v51, %v15619_v50  ;;  %9802 = vmatpush.bf16.msra.mxu0 %v15364_v54  ;;  %v20841_v51 = vld [vmem:[#allocation1 + $0x12] sm:$0xff] }
 0x11c   : > { %v15347_v55 = vld [vmem:[%s20282_s11 + $0x1800] sm:$0xf]  ;;  %v19066_v56 = vld [vmem:[%s20282_s11 + $0x180c] sm:$0xf0]  ;;  %v15748_v0 = vor.u32 %v19166_v53, %v15747_v52  ;;  %9815 = vmatpush.bf16.msra.mxu1 %v15492_v58 }
 0x11d   : > { %v15475_v60 = vld [vmem:[%s20282_s11 + $0x1900] sm:$0xf]  ;;  %v19098_v61 = vld [vmem:[%s20282_s11 + $0x190c] sm:$0xf0]  ;;  %v15348_v15 = vor.u32 %v19066_v56, %v15347_v55  ;;  %9828 = vmatpush.bf16.msra.mxu2 %v15620_v59 }
 0x11e   : > { %v15603_v62 = vld [vmem:[%s20282_s11 + $0x1a00] sm:$0xf]  ;;  %v19130_v1 = vld [vmem:[%s20282_s11 + $0x1a0c] sm:$0xf0]  ;;  %v15476_v22 = vor.u32 %v19098_v61, %v15475_v60  ;;  %9841 = vmatpush.bf16.msra.mxu3 %v15748_v0  ;;  %v20855_v0 = vld [vmem:[#allocation1 + $0x24] sm:$0xff] }
 0x11f   : > { %v15731_v57 = vld [vmem:[%s20282_s11 + $0x1b00] sm:$0xf]  ;;  %v19162_v3 = vld [vmem:[%s20282_s11 + $0x1b0c] sm:$0xf0]  ;;  %v15604_v24 = vor.u32 %v19130_v1, %v15603_v62  ;;  %9803 = vmatpush.bf16.msra.mxu0 %v15348_v15 }
 0x120   : > { %v15971_v5 = vld [vmem:[%s20282_s11 + $0x1ce0] sm:$0xf]  ;;  %v19222_v13 = vld [vmem:[%s20282_s11 + $0x1cec] sm:$0xf0]  ;;  %v15732_v27 = vor.u32 %v19162_v3, %v15731_v57  ;;  %9816 = vmatpush.bf16.msra.mxu1 %v15476_v22 }
 0x121   : > { %v16099_v14 = vld [vmem:[%s20282_s11 + $0x1de0] sm:$0xf]  ;;  %v19254_v16 = vld [vmem:[%s20282_s11 + $0x1dec] sm:$0xf0]  ;;  %v15972_v29 = vor.u32 %v19222_v13, %v15971_v5  ;;  %9829 = vmatpush.bf16.msra.mxu2 %v15604_v24 }
 0x122   : > { %v16227_v20 = vld [vmem:[%s20282_s11 + $0x1ee0] sm:$0xf]  ;;  %v19286_v21 = vld [vmem:[%s20282_s11 + $0x1eec] sm:$0xf0]  ;;  %v16100_v44 = vor.u32 %v19254_v16, %v16099_v14  ;;  %9842 = vmatpush.bf16.msra.mxu3 %v15732_v27  ;;  %9804 = vmatmul.bf16.vlgmr.msra.gmra.mxu0 %v20836_v46 }
 0x123   : > { %v16355_v25 = vld [vmem:[%s20282_s11 + $0x1fe0] sm:$0xf]  ;;  %v19318_v26 = vld [vmem:[%s20282_s11 + $0x1fec] sm:$0xf0]  ;;  %v16228_v45 = vor.u32 %v19286_v21, %v16227_v20  ;;  %9848 = vmatpush.bf16.msrb.mxu0 %v15972_v29 }
 0x124   : > { %v15955_v31 = vld [vmem:[%s20282_s11 + $0x1cc0] sm:$0xf]  ;;  %v19218_v47 = vld [vmem:[%s20282_s11 + $0x1ccc] sm:$0xf0]  ;;  %v16356_v50 = vor.u32 %v19318_v26, %v16355_v25  ;;  %9861 = vmatpush.bf16.msrb.mxu1 %v16100_v44  ;;  %9830 = vmatmul.bf16.vlgmr.msra.gmra.mxu2 %v20841_v51 }
 0x125   : > { %v16083_v48 = vld [vmem:[%s20282_s11 + $0x1dc0] sm:$0xf]  ;;  %v19250_v49 = vld [vmem:[%s20282_s11 + $0x1dcc] sm:$0xf0]  ;;  %v15956_v61 = vor.u32 %v19218_v47, %v15955_v31  ;;  %9874 = vmatpush.bf16.msrb.mxu2 %v16228_v45  ;;  %v9597_v45 = vpop.f32.mrf.mxu0 }
 0x126   : > { %v20843_v52 = vld [vmem:[#allocation1 + $0x9] sm:$0xff]  ;;  %v16211_v53 = vld [vmem:[%s20282_s11 + $0x1ec0] sm:$0xf]  ;;  %v16084_v1 = vor.u32 %v19250_v49, %v16083_v48  ;;  %9887 = vmatpush.bf16.msrb.mxu3 %v16356_v50  ;;  %v9598_v49 = vadd.f32 %v9597_v45, %v20808_v28 }
 0x127   : > { %v19282_v54 = vld [vmem:[%s20282_s11 + $0x1ecc] sm:$0xf0]  ;;  %v16339_v55 = vld [vmem:[%s20282_s11 + $0x1fc0] sm:$0xf]  ;;  %9817 = vmatmul.bf16.vlgmr.msra.gmra.mxu1 %v20843_v52  ;;  %9849 = vmatpush.bf16.msrb.mxu0 %v15956_v61 }
 0x128   : > { %v20848_v56 = vld [vmem:[#allocation1 + $0x1b] sm:$0xff]  ;;  %v19314_v58 = vld [vmem:[%s20282_s11 + $0x1fcc] sm:$0xf0]  ;;  %v16212_v57 = vor.u32 %v19282_v54, %v16211_v53  ;;  %9862 = vmatpush.bf16.msrb.mxu1 %v16084_v1  ;;  %v9610_v53 = vpop.f32.mrf.mxu1 }
 0x129   : > { %v15939_v59 = vld [vmem:[%s20282_s11 + $0x1ca0] sm:$0xf]  ;;  %v19214_v60 = vld [vmem:[%s20282_s11 + $0x1cac] sm:$0xf0]  ;;  %v16340_v13 = vor.u32 %v19314_v58, %v16339_v55  ;;  %9843 = vmatmul.bf16.vlgmr.msra.gmra.mxu3 %v20848_v56 }
 0x12a   : > { %v16067_v62 = vld [vmem:[%s20282_s11 + $0x1da0] sm:$0xf]  ;;  %v19246_v63 = vld [vmem:[%s20282_s11 + $0x1dac] sm:$0xf0]  ;;  %v15940_v21 = vor.u32 %v19214_v60, %v15939_v59  ;;  %9875 = vmatpush.bf16.msrb.mxu2 %v16212_v57 }
 0x12b   : > { %v20857_v3 = vld [vmem:[#allocation1 + $0x36] sm:$0xff]  ;;  %v20859_v4 = vld [vmem:[#allocation1 + $0x2d] sm:$0xff]  ;;  %v20861_v5 = vld [vmem:[#allocation1 + $0x3f] sm:$0xff]  ;;  %v16068_v22 = vor.u32 %v19246_v63, %v16067_v62  ;;  %9888 = vmatpush.bf16.msrb.mxu3 %v16340_v13  ;;  %v9611_v62 = vadd.f32 %v9610_v53, %v9598_v49 }
 0x12c   : > { %v16195_v14 = vld [vmem:[%s20282_s11 + $0x1ea0] sm:$0xf]  ;;  %v19278_v15 = vld [vmem:[%s20282_s11 + $0x1eac] sm:$0xf0]  ;;  %1899 = vst [vmem:[#allocation1] ss:$9 sm:$0xff] %v351_v40  ;;  %9850 = vmatpush.bf16.msrb.mxu0 %v15940_v21 }
 0x12d   : > { %v16323_v16 = vld [vmem:[%s20282_s11 + $0x1fa0] sm:$0xf]  ;;  %v19310_v20 = vld [vmem:[%s20282_s11 + $0x1fac] sm:$0xf0]  ;;  %v16196_v24 = vor.u32 %v19278_v15, %v16195_v14  ;;  %9863 = vmatpush.bf16.msrb.mxu1 %v16068_v22 }
 0x12e   : > { %v15923_v25 = vld [vmem:[%s20282_s11 + $0x1c80] sm:$0xf]  ;;  %v19210_v26 = vld [vmem:[%s20282_s11 + $0x1c8c] sm:$0xf0]  ;;  %v16324_v29 = vor.u32 %v19310_v20, %v16323_v16 }
 0x12f   : > { %v16051_v27 = vld [vmem:[%s20282_s11 + $0x1d80] sm:$0xf]  ;;  %v19242_v31 = vld [vmem:[%s20282_s11 + $0x1d8c] sm:$0xf0]  ;;  %v15924_v50 = vor.u32 %v19210_v26, %v15923_v25  ;;  %9876 = vmatpush.bf16.msrb.mxu2 %v16196_v24  ;;  %v9623_v25 = vpop.f32.mrf.mxu2 }
 0x130   : > { %v16179_v40 = vld [vmem:[%s20282_s11 + $0x1e80] sm:$0xf]  ;;  %v19274_v44 = vld [vmem:[%s20282_s11 + $0x1e8c] sm:$0xf0]  ;;  %v16052_v54 = vor.u32 %v19242_v31, %v16051_v27  ;;  %9889 = vmatpush.bf16.msrb.mxu3 %v16324_v29  ;;  %v9624_v31 = vadd.f32 %v9623_v25, %v9611_v62  ;;  %v9612_v49 = vpop.f32.mrf.mxu1 }
 0x131   : > { %v16307_v47 = vld [vmem:[%s20282_s11 + $0x1f80] sm:$0xf]  ;;  %v19306_v48 = vld [vmem:[%s20282_s11 + $0x1f8c] sm:$0xf0]  ;;  %v16180_v55 = vor.u32 %v19274_v44, %v16179_v40  ;;  %9851 = vmatpush.bf16.msrb.mxu0 %v15924_v50  ;;  %v9636_v40 = vpop.f32.mrf.mxu3 }
 0x132   : > { %v15907_v58 = vld [vmem:[%s20282_s11 + $0x1c60] sm:$0xf]  ;;  %v19206_v59 = vld [vmem:[%s20282_s11 + $0x1c6c] sm:$0xf0]  ;;  %v16308_v61 = vor.u32 %v19306_v48, %v16307_v47  ;;  %9864 = vmatpush.bf16.msrb.mxu1 %v16052_v54  ;;  %v9599_v47 = vpop.f32.mrf.mxu0  ;;  %v20896_v50 = vadd.f32 %v9636_v40, %v9624_v31 }
 0x133   : > { %v16035_v60 = vld [vmem:[%s20282_s11 + $0x1d60] sm:$0xf]  ;;  %v19238_v63 = vld [vmem:[%s20282_s11 + $0x1d6c] sm:$0xf0]  ;;  %v15908_v14 = vor.u32 %v19206_v59, %v15907_v58  ;;  %9877 = vmatpush.bf16.msrb.mxu2 %v16180_v55 }
 0x134   : > { %v16163_v1 = vld [vmem:[%s20282_s11 + $0x1e60] sm:$0xf]  ;;  %v19270_v28 = vld [vmem:[%s20282_s11 + $0x1e6c] sm:$0xf0]  ;;  %v16036_v15 = vor.u32 %v19238_v63, %v16035_v60  ;;  %9890 = vmatpush.bf16.msrb.mxu3 %v16308_v61 }
 0x135   : > { %v16291_v57 = vld [vmem:[%s20282_s11 + $0x1f60] sm:$0xf]  ;;  %v19302_v13 = vld [vmem:[%s20282_s11 + $0x1f6c] sm:$0xf0]  ;;  %v16164_v16 = vor.u32 %v19270_v28, %v16163_v1  ;;  %9852 = vmatpush.bf16.msrb.mxu0 %v15908_v14 }
 0x136   : > { %v15891_v20 = vld [vmem:[%s20282_s11 + $0x1c40] sm:$0xf]  ;;  %v19202_v21 = vld [vmem:[%s20282_s11 + $0x1c4c] sm:$0xf0]  ;;  %v16292_v24 = vor.u32 %v19302_v13, %v16291_v57  ;;  %9865 = vmatpush.bf16.msrb.mxu1 %v16036_v15 }
 0x137   : > { %v16019_v22 = vld [vmem:[%s20282_s11 + $0x1d40] sm:$0xf]  ;;  %v19234_v26 = vld [vmem:[%s20282_s11 + $0x1d4c] sm:$0xf0]  ;;  %v15892_v48 = vor.u32 %v19202_v21, %v15891_v20  ;;  %9878 = vmatpush.bf16.msrb.mxu2 %v16164_v16 }
 0x138   : > { %v16147_v27 = vld [vmem:[%s20282_s11 + $0x1e40] sm:$0xf]  ;;  %v19266_v29 = vld [vmem:[%s20282_s11 + $0x1e4c] sm:$0xf0]  ;;  %v16020_v53 = vor.u32 %v19234_v26, %v16019_v22  ;;  %9891 = vmatpush.bf16.msrb.mxu3 %v16292_v24 }
 0x139   : > { %v16275_v44 = vld [vmem:[%s20282_s11 + $0x1f40] sm:$0xf]  ;;  %v19298_v45 = vld [vmem:[%s20282_s11 + $0x1f4c] sm:$0xf0]  ;;  %v16148_v54 = vor.u32 %v19266_v29, %v16147_v27  ;;  %9853 = vmatpush.bf16.msrb.mxu0 %v15892_v48  ;;  %v9625_v29 = vpop.f32.mrf.mxu2 }
 0x13a   : > { %v15875_v55 = vld [vmem:[%s20282_s11 + $0x1c20] sm:$0xf]  ;;  %v19198_v58 = vld [vmem:[%s20282_s11 + $0x1c2c] sm:$0xf0]  ;;  %v16276_v60 = vor.u32 %v19298_v45, %v16275_v44  ;;  %9866 = vmatpush.bf16.msrb.mxu1 %v16020_v53  ;;  %v9638_v45 = vpop.f32.mrf.mxu3 }
 0x13b   : > { %v16003_v59 = vld [vmem:[%s20282_s11 + $0x1d20] sm:$0xf]  ;;  %v19230_v61 = vld [vmem:[%s20282_s11 + $0x1d2c] sm:$0xf0]  ;;  %v15876_v57 = vor.u32 %v19198_v58, %v15875_v55  ;;  %9879 = vmatpush.bf16.msrb.mxu2 %v16148_v54 }
 0x13c   : > { %v16131_v62 = vld [vmem:[%s20282_s11 + $0x1e20] sm:$0xf]  ;;  %v19262_v63 = vld [vmem:[%s20282_s11 + $0x1e2c] sm:$0xf0]  ;;  %v16004_v15 = vor.u32 %v19230_v61, %v16003_v59  ;;  %9892 = vmatpush.bf16.msrb.mxu3 %v16276_v60 }
 0x13d   : > { %v16259_v1 = vld [vmem:[%s20282_s11 + $0x1f20] sm:$0xf]  ;;  %v19294_v28 = vld [vmem:[%s20282_s11 + $0x1f2c] sm:$0xf0]  ;;  %v16132_v16 = vor.u32 %v19262_v63, %v16131_v62  ;;  %9854 = vmatpush.bf16.msrb.mxu0 %v15876_v57 }
 0x13e   : > { %v15859_v13 = vld [vmem:[%s20282_s11 + $0x1c00] sm:$0xf]  ;;  %v19194_v14 = vld [vmem:[%s20282_s11 + $0x1c0c] sm:$0xf0]  ;;  %v16260_v24 = vor.u32 %v19294_v28, %v16259_v1  ;;  %9867 = vmatpush.bf16.msrb.mxu1 %v16004_v15 }
 0x13f   : > { %v15987_v20 = vld [vmem:[%s20282_s11 + $0x1d00] sm:$0xf]  ;;  %v19226_v21 = vld [vmem:[%s20282_s11 + $0x1d0c] sm:$0xf0]  ;;  %v15860_v47 = vor.u32 %v19194_v14, %v15859_v13  ;;  %9880 = vmatpush.bf16.msrb.mxu2 %v16132_v16 }
 0x140   : > { %v16115_v22 = vld [vmem:[%s20282_s11 + $0x1e00] sm:$0xf]  ;;  %v19258_v25 = vld [vmem:[%s20282_s11 + $0x1e0c] sm:$0xf0]  ;;  %v15988_v54 = vor.u32 %v19226_v21, %v15987_v20  ;;  %9893 = vmatpush.bf16.msrb.mxu3 %v16260_v24 }
 0x141   : > { %v16243_v26 = vld [vmem:[%s20282_s11 + $0x1f00] sm:$0xf]  ;;  %v19290_v27 = vld [vmem:[%s20282_s11 + $0x1f0c] sm:$0xf0]  ;;  %v16116_v55 = vor.u32 %v19258_v25, %v16115_v22  ;;  %9855 = vmatpush.bf16.msrb.mxu0 %v15860_v47 }
 0x142   : > { %v16483_v31 = vld [vmem:[%s20282_s11 + $0x20e0] sm:$0xf]  ;;  %v19350_v40 = vld [vmem:[%s20282_s11 + $0x20ec] sm:$0xf0]  ;;  %v16244_v60 = vor.u32 %v19290_v27, %v16243_v26  ;;  %9868 = vmatpush.bf16.msrb.mxu1 %v15988_v54 }
 0x143   : > { %v16611_v44 = vld [vmem:[%s20282_s11 + $0x21e0] sm:$0xf]  ;;  %v19382_v48 = vld [vmem:[%s20282_s11 + $0x21ec] sm:$0xf0]  ;;  %v16484_v61 = vor.u32 %v19350_v40, %v16483_v31  ;;  %9881 = vmatpush.bf16.msrb.mxu2 %v16116_v55 }
 0x144   : > { %v16739_v49 = vld [vmem:[%s20282_s11 + $0x22e0] sm:$0xf]  ;;  %v19414_v53 = vld [vmem:[%s20282_s11 + $0x22ec] sm:$0xf0]  ;;  %v16612_v62 = vor.u32 %v19382_v48, %v16611_v44  ;;  %9894 = vmatpush.bf16.msrb.mxu3 %v16244_v60  ;;  %9856 = vmatmul.bf16.vlgmr.msrb.gmra.mxu0 %v20855_v0 }
 0x145   : > { %v16867_v58 = vld [vmem:[%s20282_s11 + $0x23e0] sm:$0xf]  ;;  %v19446_v59 = vld [vmem:[%s20282_s11 + $0x23ec] sm:$0xf0]  ;;  %v16740_v63 = vor.u32 %v19414_v53, %v16739_v49  ;;  %9900 = vmatpush.bf16.msra.mxu0 %v16484_v61  ;;  %9869 = vmatmul.bf16.vlgmr.msrb.gmra.mxu1 %v20859_v4 }
 0x146   : > { %v16467_v1 = vld [vmem:[%s20282_s11 + $0x20c0] sm:$0xf]  ;;  %v19346_v28 = vld [vmem:[%s20282_s11 + $0x20cc] sm:$0xf0]  ;;  %v16868_v13 = vor.u32 %v19446_v59, %v16867_v58  ;;  %9913 = vmatpush.bf16.msra.mxu1 %v16612_v62  ;;  %9882 = vmatmul.bf16.vlgmr.msrb.gmra.mxu2 %v20857_v3 }
 0x147   : > { %v16595_v57 = vld [vmem:[%s20282_s11 + $0x21c0] sm:$0xf]  ;;  %v19378_v14 = vld [vmem:[%s20282_s11 + $0x21cc] sm:$0xf0]  ;;  %v16468_v22 = vor.u32 %v19346_v28, %v16467_v1  ;;  %9926 = vmatpush.bf16.msra.mxu2 %v16740_v63  ;;  %9895 = vmatmul.bf16.vlgmr.msrb.gmra.mxu3 %v20861_v5  ;;  %v9649_v1 = vpop.f32.mrf.mxu0 }
 0x148   : > { %v16723_v15 = vld [vmem:[%s20282_s11 + $0x22c0] sm:$0xf]  ;;  %v19410_v16 = vld [vmem:[%s20282_s11 + $0x22cc] sm:$0xf0]  ;;  %v16596_v24 = vor.u32 %v19378_v14, %v16595_v57  ;;  %9939 = vmatpush.bf16.msra.mxu3 %v16868_v13  ;;  %v9650_v13 = vadd.f32 %v9649_v1, %v20896_v50 }
 0x149   : > { %v16851_v20 = vld [vmem:[%s20282_s11 + $0x23c0] sm:$0xf]  ;;  %v19442_v21 = vld [vmem:[%s20282_s11 + $0x23cc] sm:$0xf0]  ;;  %v16724_v25 = vor.u32 %v19410_v16, %v16723_v15  ;;  %9901 = vmatpush.bf16.msra.mxu0 %v16468_v22  ;;  %v9662_v15 = vpop.f32.mrf.mxu1 }
 0x14a   : > { %v16451_v26 = vld [vmem:[%s20282_s11 + $0x20a0] sm:$0xf]  ;;  %v19342_v27 = vld [vmem:[%s20282_s11 + $0x20ac] sm:$0xf0]  ;;  %v16852_v31 = vor.u32 %v19442_v21, %v16851_v20  ;;  %9914 = vmatpush.bf16.msra.mxu1 %v16596_v24 }
 0x14b   : > { %v16579_v29 = vld [vmem:[%s20282_s11 + $0x21a0] sm:$0xf]  ;;  %v19374_v40 = vld [vmem:[%s20282_s11 + $0x21ac] sm:$0xf0]  ;;  %v16452_v49 = vor.u32 %v19342_v27, %v16451_v26  ;;  %9927 = vmatpush.bf16.msra.mxu2 %v16724_v25  ;;  %v9663_v26 = vadd.f32 %v9662_v15, %v9650_v13 }
 0x14c   : > { %v16707_v44 = vld [vmem:[%s20282_s11 + $0x22a0] sm:$0xf]  ;;  %v19406_v45 = vld [vmem:[%s20282_s11 + $0x22ac] sm:$0xf0]  ;;  %v16580_v53 = vor.u32 %v19374_v40, %v16579_v29  ;;  %9940 = vmatpush.bf16.msra.mxu3 %v16852_v31 }
 0x14d   : > { %v16835_v47 = vld [vmem:[%s20282_s11 + $0x23a0] sm:$0xf]  ;;  %v19438_v48 = vld [vmem:[%s20282_s11 + $0x23ac] sm:$0xf0]  ;;  %v16708_v54 = vor.u32 %v19406_v45, %v16707_v44  ;;  %9902 = vmatpush.bf16.msra.mxu0 %v16452_v49 }
 0x14e   : > { %v16435_v55 = vld [vmem:[%s20282_s11 + $0x2080] sm:$0xf]  ;;  %v19338_v58 = vld [vmem:[%s20282_s11 + $0x208c] sm:$0xf0]  ;;  %v16836_v60 = vor.u32 %v19438_v48, %v16835_v47  ;;  %9915 = vmatpush.bf16.msra.mxu1 %v16580_v53 }
 0x14f   : > { %v16563_v59 = vld [vmem:[%s20282_s11 + $0x2180] sm:$0xf]  ;;  %v19370_v61 = vld [vmem:[%s20282_s11 + $0x218c] sm:$0xf0]  ;;  %v16436_v14 = vor.u32 %v19338_v58, %v16435_v55  ;;  %9928 = vmatpush.bf16.msra.mxu2 %v16708_v54  ;;  %v9675_v55 = vpop.f32.mrf.mxu2 }
 0x150   : > { %v16691_v62 = vld [vmem:[%s20282_s11 + $0x2280] sm:$0xf]  ;;  %v19402_v63 = vld [vmem:[%s20282_s11 + $0x228c] sm:$0xf0]  ;;  %v16564_v16 = vor.u32 %v19370_v61, %v16563_v59  ;;  %9941 = vmatpush.bf16.msra.mxu3 %v16836_v60  ;;  %v9676_v61 = vadd.f32 %v9675_v55, %v9663_v26 }
 0x151   : > { %v16819_v28 = vld [vmem:[%s20282_s11 + $0x2380] sm:$0xf]  ;;  %v19434_v57 = vld [vmem:[%s20282_s11 + $0x238c] sm:$0xf0]  ;;  %v16692_v20 = vor.u32 %v19402_v63, %v16691_v62  ;;  %9903 = vmatpush.bf16.msra.mxu0 %v16436_v14  ;;  %v9688_v62 = vpop.f32.mrf.mxu3  ;;  %v9664_v13 = vpop.f32.mrf.mxu1 }
 0x152   : > { %v16419_v21 = vld [vmem:[%s20282_s11 + $0x2060] sm:$0xf]  ;;  %v19334_v22 = vld [vmem:[%s20282_s11 + $0x206c] sm:$0xf0]  ;;  %v16820_v25 = vor.u32 %v19434_v57, %v16819_v28  ;;  %9916 = vmatpush.bf16.msra.mxu1 %v16564_v16  ;;  %v9651_v28 = vpop.f32.mrf.mxu0  ;;  %v20967_v14 = vadd.f32 %v9688_v62, %v9676_v61 }
 0x153   : > { %v16547_v24 = vld [vmem:[%s20282_s11 + $0x2160] sm:$0xf]  ;;  %v19366_v27 = vld [vmem:[%s20282_s11 + $0x216c] sm:$0xf0]  ;;  %v16420_v44 = vor.u32 %v19334_v22, %v16419_v21  ;;  %9929 = vmatpush.bf16.msra.mxu2 %v16692_v20 }
 0x154   : > { %v16675_v29 = vld [vmem:[%s20282_s11 + $0x2260] sm:$0xf]  ;;  %v19398_v50 = vld [vmem:[%s20282_s11 + $0x226c] sm:$0xf0]  ;;  %v16548_v45 = vor.u32 %v19366_v27, %v16547_v24  ;;  %9942 = vmatpush.bf16.msra.mxu3 %v16820_v25 }
 0x155   : > { %v16803_v31 = vld [vmem:[%s20282_s11 + $0x2360] sm:$0xf]  ;;  %v19430_v40 = vld [vmem:[%s20282_s11 + $0x236c] sm:$0xf0]  ;;  %v16676_v47 = vor.u32 %v19398_v50, %v16675_v29  ;;  %9904 = vmatpush.bf16.msra.mxu0 %v16420_v44 }
 0x156   : > { %v16403_v48 = vld [vmem:[%s20282_s11 + $0x2040] sm:$0xf]  ;;  %v19330_v49 = vld [vmem:[%s20282_s11 + $0x204c] sm:$0xf0]  ;;  %v16804_v54 = vor.u32 %v19430_v40, %v16803_v31  ;;  %9917 = vmatpush.bf16.msra.mxu1 %v16548_v45 }
 0x157   : > { %v16531_v53 = vld [vmem:[%s20282_s11 + $0x2140] sm:$0xf]  ;;  %v19362_v58 = vld [vmem:[%s20282_s11 + $0x214c] sm:$0xf0]  ;;  %v16404_v57 = vor.u32 %v19330_v49, %v16403_v48  ;;  %9930 = vmatpush.bf16.msra.mxu2 %v16676_v47 }
 0x158   : > { %v16659_v59 = vld [vmem:[%s20282_s11 + $0x2240] sm:$0xf]  ;;  %v19394_v60 = vld [vmem:[%s20282_s11 + $0x224c] sm:$0xf0]  ;;  %v16532_v15 = vor.u32 %v19362_v58, %v16531_v53  ;;  %9943 = vmatpush.bf16.msra.mxu3 %v16804_v54 }
 0x159   : > { %v16787_v63 = vld [vmem:[%s20282_s11 + $0x2340] sm:$0xf]  ;;  %v19426_v1 = vld [vmem:[%s20282_s11 + $0x234c] sm:$0xf0]  ;;  %v16660_v16 = vor.u32 %v19394_v60, %v16659_v59  ;;  %9905 = vmatpush.bf16.msra.mxu0 %v16404_v57  ;;  %v9677_v60 = vpop.f32.mrf.mxu2 }
 0x15a   : > { %v16387_v20 = vld [vmem:[%s20282_s11 + $0x2020] sm:$0xf]  ;;  %v19326_v21 = vld [vmem:[%s20282_s11 + $0x202c] sm:$0xf0]  ;;  %v16788_v24 = vor.u32 %v19426_v1, %v16787_v63  ;;  %9918 = vmatpush.bf16.msra.mxu1 %v16532_v15  ;;  %v9690_v1 = vpop.f32.mrf.mxu3 }
 0x15b   : > { %v16515_v22 = vld [vmem:[%s20282_s11 + $0x2120] sm:$0xf]  ;;  %v19358_v25 = vld [vmem:[%s20282_s11 + $0x212c] sm:$0xf0]  ;;  %v16388_v31 = vor.u32 %v19326_v21, %v16387_v20  ;;  %9931 = vmatpush.bf16.msra.mxu2 %v16660_v16 }
 0x15c   : > { %v16643_v26 = vld [vmem:[%s20282_s11 + $0x2220] sm:$0xf]  ;;  %v19390_v27 = vld [vmem:[%s20282_s11 + $0x222c] sm:$0xf0]  ;;  %v16516_v45 = vor.u32 %v19358_v25, %v16515_v22  ;;  %9944 = vmatpush.bf16.msra.mxu3 %v16788_v24 }
 0x15d   : > { %v16771_v29 = vld [vmem:[%s20282_s11 + $0x2320] sm:$0xf]  ;;  %v19422_v50 = vld [vmem:[%s20282_s11 + $0x232c] sm:$0xf0]  ;;  %v16644_v47 = vor.u32 %v19390_v27, %v16643_v26  ;;  %9906 = vmatpush.bf16.msra.mxu0 %v16388_v31  ;;  %v20995_v31 = vld [vmem:[#allocation1] sm:$0xff] }
 0x15e   : > { %v16371_v40 = vld [vmem:[%s20282_s11 + $0x2000] sm:$0xf]  ;;  %v19322_v44 = vld [vmem:[%s20282_s11 + $0x200c] sm:$0xf0]  ;;  %v16772_v54 = vor.u32 %v19422_v50, %v16771_v29  ;;  %9919 = vmatpush.bf16.msra.mxu1 %v16516_v45  ;;  %23935 = vst [vmem:[#allocation17_spill] sm:$0xff] %v20995_v31 }
 0x15f   : > { %v16499_v48 = vld [vmem:[%s20282_s11 + $0x2100] sm:$0xf]  ;;  %v19354_v49 = vld [vmem:[%s20282_s11 + $0x210c] sm:$0xf0]  ;;  %v16372_v28 = vor.u32 %v19322_v44, %v16371_v40  ;;  %9932 = vmatpush.bf16.msra.mxu2 %v16644_v47 }
 0x160   : > { %v16627_v53 = vld [vmem:[%s20282_s11 + $0x2200] sm:$0xf]  ;;  %v19386_v55 = vld [vmem:[%s20282_s11 + $0x220c] sm:$0xf0]  ;;  %v16500_v16 = vor.u32 %v19354_v49, %v16499_v48  ;;  %9945 = vmatpush.bf16.msra.mxu3 %v16772_v54  ;;  %v21000_v48 = vld [vmem:[#allocation1 + $0x12] sm:$0xff] }
 0x161   : > { %v16755_v58 = vld [vmem:[%s20282_s11 + $0x2300] sm:$0xf]  ;;  %v19418_v59 = vld [vmem:[%s20282_s11 + $0x230c] sm:$0xf0]  ;;  %v16628_v20 = vor.u32 %v19386_v55, %v16627_v53  ;;  %9907 = vmatpush.bf16.msra.mxu0 %v16372_v28  ;;  %23936 = vst [vmem:[#allocation18_spill] sm:$0xff] %v21000_v48  ;;  %v21014_v28 = vld [vmem:[#allocation1 + $0x24] sm:$0xff] }
 0x162   : > { %v16995_v61 = vld [vmem:[%s20282_s11 + $0x24e0] sm:$0xf]  ;;  %v19478_v62 = vld [vmem:[%s20282_s11 + $0x24ec] sm:$0xf0]  ;;  %v16756_v24 = vor.u32 %v19418_v59, %v16755_v58  ;;  %9920 = vmatpush.bf16.msra.mxu1 %v16500_v16  ;;  %23939 = vst [vmem:[#allocation21_spill] sm:$0xff] %v21014_v28 }
 0x163   : > { %v17123_v63 = vld [vmem:[%s20282_s11 + $0x25e0] sm:$0xf]  ;;  %v19510_v57 = vld [vmem:[%s20282_s11 + $0x25ec] sm:$0xf0]  ;;  %v16996_v25 = vor.u32 %v19478_v62, %v16995_v61  ;;  %9933 = vmatpush.bf16.msra.mxu2 %v16628_v20 }
 0x164   : > { %v17251_v13 = vld [vmem:[%s20282_s11 + $0x26e0] sm:$0xf]  ;;  %v19542_v15 = vld [vmem:[%s20282_s11 + $0x26ec] sm:$0xf0]  ;;  %v17124_v29 = vor.u32 %v19510_v57, %v17123_v63  ;;  %9946 = vmatpush.bf16.msra.mxu3 %v16756_v24  ;;  %9908 = vmatmul.bf16.vlgmr.msra.gmra.mxu0 %v20995_v31 }
 0x165   : > { %v17379_v21 = vld [vmem:[%s20282_s11 + $0x27e0] sm:$0xf]  ;;  %v19574_v22 = vld [vmem:[%s20282_s11 + $0x27ec] sm:$0xf0]  ;;  %v17252_v50 = vor.u32 %v19542_v15, %v17251_v13  ;;  %9952 = vmatpush.bf16.msrb.mxu0 %v16996_v25 }
 0x166   : > { %v16979_v26 = vld [vmem:[%s20282_s11 + $0x24c0] sm:$0xf]  ;;  %v352_v27 = vld [vmem:[%s20390_s6 + $0x28] sm:$0x7f]  ;;  %v17380_v47 = vor.u32 %v19574_v22, %v17379_v21  ;;  %9965 = vmatpush.bf16.msrb.mxu1 %v17124_v29  ;;  %9934 = vmatmul.bf16.vlgmr.msra.gmra.mxu2 %v21000_v48 }
 0x167   : > { %v19474_v40 = vld [vmem:[%s20282_s11 + $0x24cc] sm:$0xf0]  ;;  %v17107_v44 = vld [vmem:[%s20282_s11 + $0x25c0] sm:$0xf]  ;;  %9978 = vmatpush.bf16.msrb.mxu2 %v17252_v50 }
 0x168   : > { %v19506_v45 = vld [vmem:[%s20282_s11 + $0x25cc] sm:$0xf0]  ;;  %v17235_v53 = vld [vmem:[%s20282_s11 + $0x26c0] sm:$0xf]  ;;  %v16980_v62 = vor.u32 %v19474_v40, %v16979_v26  ;;  %9991 = vmatpush.bf16.msrb.mxu3 %v17380_v47 }
 0x169   : > { %v21002_v49 = vld [vmem:[#allocation1 + $0x9] sm:$0xff]  ;;  %v17363_v55 = vld [vmem:[%s20282_s11 + $0x27c0] sm:$0xf]  ;;  %v17108_v57 = vor.u32 %v19506_v45, %v17107_v44 }
 0x16a   : > { %23937 = vst [vmem:[#allocation19_spill] sm:$0xff] %v21002_v49  ;;  %v19538_v54 = vld [vmem:[%s20282_s11 + $0x26cc] sm:$0xf0]  ;;  %v21007_v58 = vld [vmem:[#allocation1 + $0x1b] sm:$0xff]  ;;  %9921 = vmatmul.bf16.vlgmr.msra.gmra.mxu1 %v21002_v49  ;;  %9953 = vmatpush.bf16.msrb.mxu0 %v16980_v62 }
 0x16b   : > { %23938 = vst [vmem:[#allocation20_spill] sm:$0xff] %v21007_v58  ;;  %v19570_v59 = vld [vmem:[%s20282_s11 + $0x27cc] sm:$0xf0]  ;;  %v16963_v60 = vld [vmem:[%s20282_s11 + $0x24a0] sm:$0xf]  ;;  %v17236_v13 = vor.u32 %v19538_v54, %v17235_v53  ;;  %9947 = vmatmul.bf16.vlgmr.msra.gmra.mxu3 %v21007_v58  ;;  %9966 = vmatpush.bf16.msrb.mxu1 %v17108_v57 }
 0x16c   : > { %v19470_v61 = vld [vmem:[%s20282_s11 + $0x24ac] sm:$0xf0]  ;;  %v17091_v63 = vld [vmem:[%s20282_s11 + $0x25a0] sm:$0xf]  ;;  %v17364_v21 = vor.u32 %v19570_v59, %v17363_v55  ;;  %v9701_v59 = vpop.f32.mrf.mxu0 }
 0x16d   : > { %v19502_v1 = vld [vmem:[%s20282_s11 + $0x25ac] sm:$0xf0]  ;;  %v21016_v15 = vld [vmem:[#allocation1 + $0x36] sm:$0xff]  ;;  %v21020_v20 = vld [vmem:[#allocation1 + $0x3f] sm:$0xff]  ;;  %v16964_v29 = vor.u32 %v19470_v61, %v16963_v60  ;;  %9979 = vmatpush.bf16.msrb.mxu2 %v17236_v13  ;;  %v9702_v60 = vadd.f32 %v9701_v59, %v20967_v14 }
 0x16e   : > { %23940 = vst [vmem:[#allocation22_spill] sm:$0xff] %v21016_v15  ;;  %v21018_v16 = vld [vmem:[#allocation1 + $0x2d] sm:$0xff]  ;;  %v17219_v22 = vld [vmem:[%s20282_s11 + $0x26a0] sm:$0xf]  ;;  %v17092_v50 = vor.u32 %v19502_v1, %v17091_v63  ;;  %9992 = vmatpush.bf16.msrb.mxu3 %v17364_v21  ;;  %v9714_v63 = vpop.f32.mrf.mxu1 }
 0x16f   : > { %23941 = vst [vmem:[#allocation23_spill] sm:$0xff] %v21018_v16  ;;  %v19534_v24 = vld [vmem:[%s20282_s11 + $0x26ac] sm:$0xf0]  ;;  %v17347_v25 = vld [vmem:[%s20282_s11 + $0x27a0] sm:$0xf]  ;;  %9954 = vmatpush.bf16.msrb.mxu0 %v16964_v29 }
 0x170   : > { %23942 = vst [vmem:[#allocation24_spill] sm:$0xff] %v21020_v20  ;;  %v19566_v26 = vld [vmem:[%s20282_s11 + $0x27ac] sm:$0xf0]  ;;  %v17220_v40 = vor.u32 %v19534_v24, %v17219_v22  ;;  %v17075_v45 = vld [vmem:[%s20282_s11 + $0x2580] sm:$0xf]  ;;  %9967 = vmatpush.bf16.msrb.mxu1 %v17092_v50 }
 0x171   : > { %1909 = vst [vmem:[#allocation1] ss:$9 sm:$0xff] %v352_v27  ;;  %v16947_v27 = vld [vmem:[%s20282_s11 + $0x2480] sm:$0xf]  ;;  %v19466_v44 = vld [vmem:[%s20282_s11 + $0x248c] sm:$0xf0]  ;;  %v17348_v47 = vor.u32 %v19566_v26, %v17347_v25  ;;  %v9715_v25 = vadd.f32 %v9714_v63, %v9702_v60  ;;  %v9740_v63 = vpop.f32.mrf.mxu3 }
 0x172   : > { %v19498_v53 = vld [vmem:[%s20282_s11 + $0x258c] sm:$0xf0]  ;;  %v17203_v54 = vld [vmem:[%s20282_s11 + $0x2680] sm:$0xf]  ;;  %v16948_v61 = vor.u32 %v19466_v44, %v16947_v27  ;;  %9980 = vmatpush.bf16.msrb.mxu2 %v17220_v40 }
 0x173   : > { %v19530_v55 = vld [vmem:[%s20282_s11 + $0x268c] sm:$0xf0]  ;;  %v17331_v48 = vld [vmem:[%s20282_s11 + $0x2780] sm:$0xf]  ;;  %v17076_v1 = vor.u32 %v19498_v53, %v17075_v45  ;;  %9993 = vmatpush.bf16.msrb.mxu3 %v17348_v47 }
 0x174   : > { %v19562_v62 = vld [vmem:[%s20282_s11 + $0x278c] sm:$0xf0]  ;;  %v17204_v57 = vor.u32 %v19530_v55, %v17203_v54  ;;  %v16931_v13 = vld [vmem:[%s20282_s11 + $0x2460] sm:$0xf]  ;;  %9955 = vmatpush.bf16.msrb.mxu0 %v16948_v61  ;;  %v9727_v55 = vpop.f32.mrf.mxu2 }
 0x175   : > { %v19462_v21 = vld [vmem:[%s20282_s11 + $0x246c] sm:$0xf0]  ;;  %v17059_v22 = vld [vmem:[%s20282_s11 + $0x2560] sm:$0xf]  ;;  %v17332_v24 = vor.u32 %v19562_v62, %v17331_v48  ;;  %9968 = vmatpush.bf16.msrb.mxu1 %v17076_v1  ;;  %v9728_v61 = vadd.f32 %v9727_v55, %v9715_v25 }
 0x176   : > { %v19494_v26 = vld [vmem:[%s20282_s11 + $0x256c] sm:$0xf0]  ;;  %v17187_v29 = vld [vmem:[%s20282_s11 + $0x2660] sm:$0xf]  ;;  %v16932_v40 = vor.u32 %v19462_v21, %v16931_v13  ;;  %9981 = vmatpush.bf16.msrb.mxu2 %v17204_v57  ;;  %v9703_v57 = vpop.f32.mrf.mxu0 }
 0x177   : > { %v19526_v14 = vld [vmem:[%s20282_s11 + $0x266c] sm:$0xf0]  ;;  %v17315_v27 = vld [vmem:[%s20282_s11 + $0x2760] sm:$0xf]  ;;  %v17060_v44 = vor.u32 %v19494_v26, %v17059_v22  ;;  %9994 = vmatpush.bf16.msrb.mxu3 %v17332_v24  ;;  %v9716_v22 = vpop.f32.mrf.mxu1  ;;  %v21055_v24 = vadd.f32 %v9740_v63, %v9728_v61 }
 0x178   : > { %v19558_v50 = vld [vmem:[%s20282_s11 + $0x276c] sm:$0xf0]  ;;  %v17188_v45 = vor.u32 %v19526_v14, %v17187_v29  ;;  %v16915_v47 = vld [vmem:[%s20282_s11 + $0x2440] sm:$0xf]  ;;  %9956 = vmatpush.bf16.msrb.mxu0 %v16932_v40 }
 0x179   : > { %v19458_v53 = vld [vmem:[%s20282_s11 + $0x244c] sm:$0xf0]  ;;  %v17043_v48 = vld [vmem:[%s20282_s11 + $0x2540] sm:$0xf]  ;;  %v17316_v54 = vor.u32 %v19558_v50, %v17315_v27  ;;  %9969 = vmatpush.bf16.msrb.mxu1 %v17060_v44 }
 0x17a   : > { %v19490_v59 = vld [vmem:[%s20282_s11 + $0x254c] sm:$0xf0]  ;;  %v17171_v62 = vld [vmem:[%s20282_s11 + $0x2640] sm:$0xf]  ;;  %v16916_v21 = vor.u32 %v19458_v53, %v16915_v47  ;;  %9982 = vmatpush.bf16.msrb.mxu2 %v17188_v45 }
 0x17b   : > { %v19522_v60 = vld [vmem:[%s20282_s11 + $0x264c] sm:$0xf0]  ;;  %v17299_v13 = vld [vmem:[%s20282_s11 + $0x2740] sm:$0xf]  ;;  %v17044_v26 = vor.u32 %v19490_v59, %v17043_v48  ;;  %9995 = vmatpush.bf16.msrb.mxu3 %v17316_v54 }
 0x17c   : > { %v19554_v1 = vld [vmem:[%s20282_s11 + $0x274c] sm:$0xf0]  ;;  %v17172_v25 = vor.u32 %v19522_v60, %v17171_v62  ;;  %v16899_v29 = vld [vmem:[%s20282_s11 + $0x2420] sm:$0xf]  ;;  %9957 = vmatpush.bf16.msrb.mxu0 %v16916_v21  ;;  %v9729_v22 = vpop.f32.mrf.mxu2 }
 0x17d   : > { %v19454_v14 = vld [vmem:[%s20282_s11 + $0x242c] sm:$0xf0]  ;;  %v17027_v27 = vld [vmem:[%s20282_s11 + $0x2520] sm:$0xf]  ;;  %v17300_v50 = vor.u32 %v19554_v1, %v17299_v13  ;;  %9970 = vmatpush.bf16.msrb.mxu1 %v17044_v26 }
 0x17e   : > { %v19486_v40 = vld [vmem:[%s20282_s11 + $0x252c] sm:$0xf0]  ;;  %v17155_v47 = vld [vmem:[%s20282_s11 + $0x2620] sm:$0xf]  ;;  %v16900_v55 = vor.u32 %v19454_v14, %v16899_v29  ;;  %9983 = vmatpush.bf16.msrb.mxu2 %v17172_v25  ;;  %v9742_v25 = vpop.f32.mrf.mxu3 }
 0x17f   : > { %v19518_v53 = vld [vmem:[%s20282_s11 + $0x262c] sm:$0xf0]  ;;  %v17283_v44 = vld [vmem:[%s20282_s11 + $0x2720] sm:$0xf]  ;;  %v17028_v54 = vor.u32 %v19486_v40, %v17027_v27  ;;  %9996 = vmatpush.bf16.msrb.mxu3 %v17300_v50 }
 0x180   : > { %v19550_v45 = vld [vmem:[%s20282_s11 + $0x272c] sm:$0xf0]  ;;  %v16883_v48 = vld [vmem:[%s20282_s11 + $0x2400] sm:$0xf]  ;;  %v17156_v62 = vor.u32 %v19518_v53, %v17155_v47  ;;  %9958 = vmatpush.bf16.msrb.mxu0 %v16900_v55 }
 0x181   : > { %v19450_v59 = vld [vmem:[%s20282_s11 + $0x240c] sm:$0xf0]  ;;  %v17011_v60 = vld [vmem:[%s20282_s11 + $0x2500] sm:$0xf]  ;;  %v17284_v13 = vor.u32 %v19550_v45, %v17283_v44  ;;  %9971 = vmatpush.bf16.msrb.mxu1 %v17028_v54 }
 0x182   : > { %v19482_v61 = vld [vmem:[%s20282_s11 + $0x250c] sm:$0xf0]  ;;  %v17139_v63 = vld [vmem:[%s20282_s11 + $0x2600] sm:$0xf]  ;;  %v16884_v27 = vor.u32 %v19450_v59, %v16883_v48  ;;  %9984 = vmatpush.bf16.msrb.mxu2 %v17156_v62 }
 0x183   : > { %v19514_v1 = vld [vmem:[%s20282_s11 + $0x260c] sm:$0xf0]  ;;  %v17267_v57 = vld [vmem:[%s20282_s11 + $0x2700] sm:$0xf]  ;;  %v17012_v50 = vor.u32 %v19482_v61, %v17011_v60  ;;  %9997 = vmatpush.bf16.msrb.mxu3 %v17284_v13 }
 0x184   : > { %v19546_v21 = vld [vmem:[%s20282_s11 + $0x270c] sm:$0xf0]  ;;  %v17507_v29 = vld [vmem:[%s20282_s11 + $0x28e0] sm:$0xf]  ;;  %v17140_v44 = vor.u32 %v19514_v1, %v17139_v63  ;;  %9959 = vmatpush.bf16.msrb.mxu0 %v16884_v27 }
 0x185   : > { %v19606_v14 = vld [vmem:[%s20282_s11 + $0x28ec] sm:$0xf0]  ;;  %v17635_v26 = vld [vmem:[%s20282_s11 + $0x29e0] sm:$0xf]  ;;  %v17268_v55 = vor.u32 %v19546_v21, %v17267_v57  ;;  %9972 = vmatpush.bf16.msrb.mxu1 %v17012_v50 }
 0x186   : > { %v19638_v40 = vld [vmem:[%s20282_s11 + $0x29ec] sm:$0xf0]  ;;  %v17763_v47 = vld [vmem:[%s20282_s11 + $0x2ae0] sm:$0xf]  ;;  %v17508_v25 = vor.u32 %v19606_v14, %v17507_v29  ;;  %9985 = vmatpush.bf16.msrb.mxu2 %v17140_v44 }
 0x187   : > { %v19670_v53 = vld [vmem:[%s20282_s11 + $0x2aec] sm:$0xf0]  ;;  %v17891_v45 = vld [vmem:[%s20282_s11 + $0x2be0] sm:$0xf]  ;;  %v17636_v48 = vor.u32 %v19638_v40, %v17635_v26  ;;  %9998 = vmatpush.bf16.msrb.mxu3 %v17268_v55  ;;  %9960 = vmatmul.bf16.vlgmr.msrb.gmra.mxu0 %v21014_v28 }
 0x188   : > { %v19702_v22 = vld [vmem:[%s20282_s11 + $0x2bec] sm:$0xf0]  ;;  %v17764_v59 = vor.u32 %v19670_v53, %v17763_v47  ;;  %v17491_v58 = vld [vmem:[%s20282_s11 + $0x28c0] sm:$0xf]  ;;  %10004 = vmatpush.bf16.msra.mxu0 %v17508_v25  ;;  %9973 = vmatmul.bf16.vlgmr.msrb.gmra.mxu1 %v21018_v16 }
 0x189   : > { %v19602_v49 = vld [vmem:[%s20282_s11 + $0x28cc] sm:$0xf0]  ;;  %v17619_v31 = vld [vmem:[%s20282_s11 + $0x29c0] sm:$0xf]  ;;  %v17892_v54 = vor.u32 %v19702_v22, %v17891_v45  ;;  %10017 = vmatpush.bf16.msra.mxu1 %v17636_v48  ;;  %9986 = vmatmul.bf16.vlgmr.msrb.gmra.mxu2 %v21016_v15 }
 0x18a   : > { %v19634_v62 = vld [vmem:[%s20282_s11 + $0x29cc] sm:$0xf0]  ;;  %v17747_v60 = vld [vmem:[%s20282_s11 + $0x2ac0] sm:$0xf]  ;;  %v17492_v1 = vor.u32 %v19602_v49, %v17491_v58  ;;  %10030 = vmatpush.bf16.msra.mxu2 %v17764_v59  ;;  %9999 = vmatmul.bf16.vlgmr.msrb.gmra.mxu3 %v21020_v20 }
 0x18b   : > { %v19666_v61 = vld [vmem:[%s20282_s11 + $0x2acc] sm:$0xf0]  ;;  %v17875_v63 = vld [vmem:[%s20282_s11 + $0x2bc0] sm:$0xf]  ;;  %v17620_v57 = vor.u32 %v19634_v62, %v17619_v31  ;;  %10043 = vmatpush.bf16.msra.mxu3 %v17892_v54  ;;  %v9753_v62 = vpop.f32.mrf.mxu0 }
 0x18c   : > { %v19698_v13 = vld [vmem:[%s20282_s11 + $0x2bcc] sm:$0xf0]  ;;  %v17748_v21 = vor.u32 %v19666_v61, %v17747_v60  ;;  %v17475_v29 = vld [vmem:[%s20282_s11 + $0x28a0] sm:$0xf]  ;;  %10005 = vmatpush.bf16.msra.mxu0 %v17492_v1  ;;  %v9766_v1 = vpop.f32.mrf.mxu1 }
 0x18d   : > { %v19598_v14 = vld [vmem:[%s20282_s11 + $0x28ac] sm:$0xf0]  ;;  %v17603_v26 = vld [vmem:[%s20282_s11 + $0x29a0] sm:$0xf]  ;;  %v17876_v27 = vor.u32 %v19698_v13, %v17875_v63  ;;  %10018 = vmatpush.bf16.msra.mxu1 %v17620_v57  ;;  %v9754_v63 = vadd.f32 %v9753_v62, %v21055_v24 }
 0x18e   : > { %v19630_v40 = vld [vmem:[%s20282_s11 + $0x29ac] sm:$0xf0]  ;;  %v17731_v47 = vld [vmem:[%s20282_s11 + $0x2aa0] sm:$0xf]  ;;  %v17476_v58 = vor.u32 %v19598_v14, %v17475_v29  ;;  %10031 = vmatpush.bf16.msra.mxu2 %v17748_v21 }
 0x18f   : > { %v19662_v53 = vld [vmem:[%s20282_s11 + $0x2aac] sm:$0xf0]  ;;  %v17859_v31 = vld [vmem:[%s20282_s11 + $0x2ba0] sm:$0xf]  ;;  %v17604_v50 = vor.u32 %v19630_v40, %v17603_v26  ;;  %10044 = vmatpush.bf16.msra.mxu3 %v17876_v27  ;;  %v9767_v40 = vadd.f32 %v9766_v1, %v9754_v63 }
 0x190   : > { %v19694_v49 = vld [vmem:[%s20282_s11 + $0x2bac] sm:$0xf0]  ;;  %v17732_v44 = vor.u32 %v19662_v53, %v17731_v47  ;;  %v17459_v45 = vld [vmem:[%s20282_s11 + $0x2880] sm:$0xf]  ;;  %10006 = vmatpush.bf16.msra.mxu0 %v17476_v58 }
 0x191   : > { %v19594_v22 = vld [vmem:[%s20282_s11 + $0x288c] sm:$0xf0]  ;;  %v17587_v55 = vld [vmem:[%s20282_s11 + $0x2980] sm:$0xf]  ;;  %v17860_v25 = vor.u32 %v19694_v49, %v17859_v31  ;;  %10019 = vmatpush.bf16.msra.mxu1 %v17604_v50 }
 0x192   : > { %v19626_v48 = vld [vmem:[%s20282_s11 + $0x298c] sm:$0xf0]  ;;  %v17715_v59 = vld [vmem:[%s20282_s11 + $0x2a80] sm:$0xf]  ;;  %v17460_v13 = vor.u32 %v19594_v22, %v17459_v45  ;;  %10032 = vmatpush.bf16.msra.mxu2 %v17732_v44 }
 0x193   : > { %v19658_v54 = vld [vmem:[%s20282_s11 + $0x2a8c] sm:$0xf0]  ;;  %v17843_v60 = vld [vmem:[%s20282_s11 + $0x2b80] sm:$0xf]  ;;  %v17588_v57 = vor.u32 %v19626_v48, %v17587_v55  ;;  %10045 = vmatpush.bf16.msra.mxu3 %v17860_v25  ;;  %v9779_v48 = vpop.f32.mrf.mxu2  ;;  %v9755_v1 = vpop.f32.mrf.mxu0 }
 0x194   : > { %v19690_v61 = vld [vmem:[%s20282_s11 + $0x2b8c] sm:$0xf0]  ;;  %v17716_v21 = vor.u32 %v19658_v54, %v17715_v59  ;;  %v17443_v29 = vld [vmem:[%s20282_s11 + $0x2860] sm:$0xf]  ;;  %10007 = vmatpush.bf16.msra.mxu0 %v17460_v13 }
 0x195   : > { %v19590_v14 = vld [vmem:[%s20282_s11 + $0x286c] sm:$0xf0]  ;;  %v17571_v26 = vld [vmem:[%s20282_s11 + $0x2960] sm:$0xf]  ;;  %v17844_v27 = vor.u32 %v19690_v61, %v17843_v60  ;;  %10020 = vmatpush.bf16.msra.mxu1 %v17588_v57  ;;  %v9780_v60 = vadd.f32 %v9779_v48, %v9767_v40  ;;  %v9792_v61 = vpop.f32.mrf.mxu3 }
 0x196   : > { %v19622_v47 = vld [vmem:[%s20282_s11 + $0x296c] sm:$0xf0]  ;;  %v17699_v53 = vld [vmem:[%s20282_s11 + $0x2a60] sm:$0xf]  ;;  %v17444_v58 = vor.u32 %v19590_v14, %v17443_v29  ;;  %10033 = vmatpush.bf16.msra.mxu2 %v17716_v21  ;;  %v9768_v21 = vpop.f32.mrf.mxu1 }
 0x197   : > { %v19654_v24 = vld [vmem:[%s20282_s11 + $0x2a6c] sm:$0xf0]  ;;  %v17827_v31 = vld [vmem:[%s20282_s11 + $0x2b60] sm:$0xf]  ;;  %v17572_v50 = vor.u32 %v19622_v47, %v17571_v26  ;;  %10046 = vmatpush.bf16.msra.mxu3 %v17844_v27  ;;  %v21126_v29 = vadd.f32 %v9792_v61, %v9780_v60 }
 0x198   : > { %v19686_v49 = vld [vmem:[%s20282_s11 + $0x2b6c] sm:$0xf0]  ;;  %v17700_v44 = vor.u32 %v19654_v24, %v17699_v53  ;;  %v17427_v45 = vld [vmem:[%s20282_s11 + $0x2840] sm:$0xf]  ;;  %10008 = vmatpush.bf16.msra.mxu0 %v17444_v58 }
 0x199   : > { %v19586_v22 = vld [vmem:[%s20282_s11 + $0x284c] sm:$0xf0]  ;;  %v17555_v55 = vld [vmem:[%s20282_s11 + $0x2940] sm:$0xf]  ;;  %v17828_v25 = vor.u32 %v19686_v49, %v17827_v31  ;;  %10021 = vmatpush.bf16.msra.mxu1 %v17572_v50 }
 0x19a   : > { %v19618_v59 = vld [vmem:[%s20282_s11 + $0x294c] sm:$0xf0]  ;;  %v17683_v54 = vld [vmem:[%s20282_s11 + $0x2a40] sm:$0xf]  ;;  %v17428_v57 = vor.u32 %v19586_v22, %v17427_v45  ;;  %10034 = vmatpush.bf16.msra.mxu2 %v17700_v44 }
 0x19b   : > { %v19650_v62 = vld [vmem:[%s20282_s11 + $0x2a4c] sm:$0xf0]  ;;  %v17811_v63 = vld [vmem:[%s20282_s11 + $0x2b40] sm:$0xf]  ;;  %v17556_v14 = vor.u32 %v19618_v59, %v17555_v55  ;;  %10047 = vmatpush.bf16.msra.mxu3 %v17828_v25 }
 0x19c   : > { %v19682_v13 = vld [vmem:[%s20282_s11 + $0x2b4c] sm:$0xf0]  ;;  %v17684_v26 = vor.u32 %v19650_v62, %v17683_v54  ;;  %v17411_v27 = vld [vmem:[%s20282_s11 + $0x2820] sm:$0xf]  ;;  %10009 = vmatpush.bf16.msra.mxu0 %v17428_v57 }
 0x19d   : > { %v19582_v40 = vld [vmem:[%s20282_s11 + $0x282c] sm:$0xf0]  ;;  %v17539_v47 = vld [vmem:[%s20282_s11 + $0x2920] sm:$0xf]  ;;  %v17812_v53 = vor.u32 %v19682_v13, %v17811_v63  ;;  %10022 = vmatpush.bf16.msra.mxu1 %v17556_v14  ;;  %v9781_v13 = vpop.f32.mrf.mxu2  ;;  %v9794_v14 = vpop.f32.mrf.mxu3 }
 0x19e   : > { %v19614_v24 = vld [vmem:[%s20282_s11 + $0x292c] sm:$0xf0]  ;;  %v17667_v31 = vld [vmem:[%s20282_s11 + $0x2a20] sm:$0xf]  ;;  %v17412_v44 = vor.u32 %v19582_v40, %v17411_v27  ;;  %10035 = vmatpush.bf16.msra.mxu2 %v17684_v26 }
 0x19f   : > { %v19646_v49 = vld [vmem:[%s20282_s11 + $0x2a2c] sm:$0xf0]  ;;  %v17795_v58 = vld [vmem:[%s20282_s11 + $0x2b20] sm:$0xf]  ;;  %v17540_v55 = vor.u32 %v19614_v24, %v17539_v47  ;;  %10048 = vmatpush.bf16.msra.mxu3 %v17812_v53 }
 0x1a0   : > { %v19678_v50 = vld [vmem:[%s20282_s11 + $0x2b2c] sm:$0xf0]  ;;  %v17395_v45 = vld [vmem:[%s20282_s11 + $0x2800] sm:$0xf]  ;;  %v17668_v25 = vor.u32 %v19646_v49, %v17667_v31  ;;  %10010 = vmatpush.bf16.msra.mxu0 %v17412_v44  ;;  %v18324_v31 = vld [vmem:[%s20282_s11 + $0xe4] sm:$0xf] }
 0x1a1   : > { %v19578_v22 = vld [vmem:[%s20282_s11 + $0x280c] sm:$0xf0]  ;;  %v17523_v48 = vld [vmem:[%s20282_s11 + $0x2900] sm:$0xf]  ;;  %v17796_v62 = vor.u32 %v19678_v50, %v17795_v58  ;;  %10023 = vmatpush.bf16.msra.mxu1 %v17540_v55  ;;  %v12389_v49 = vld [vmem:[%s20282_s11 + $0xf0] sm:$0xf0] }
 0x1a2   : > { %v19610_v59 = vld [vmem:[%s20282_s11 + $0x290c] sm:$0xf0]  ;;  %v17651_v54 = vld [vmem:[%s20282_s11 + $0x2a00] sm:$0xf]  ;;  %v17396_v26 = vor.u32 %v19578_v22, %v17395_v45  ;;  %10036 = vmatpush.bf16.msra.mxu2 %v17668_v25  ;;  %v12392_v55 = vor.u32 %v18324_v31, %v12389_v49  ;;  %v18316_v31 = vld [vmem:[%s20282_s11 + $0xa4] sm:$0xf] }
 0x1a3   : > { %v19642_v60 = vld [vmem:[%s20282_s11 + $0x2a0c] sm:$0xf0]  ;;  %v17779_v61 = vld [vmem:[%s20282_s11 + $0x2b00] sm:$0xf]  ;;  %v17524_v53 = vor.u32 %v19610_v59, %v17523_v48  ;;  %10049 = vmatpush.bf16.msra.mxu3 %v17796_v62  ;;  %v1910_v48 = vld [vmem:[#allocation1] sm:$0xff] }
 0x1a4   : > { %v19674_v63 = vld [vmem:[%s20282_s11 + $0x2b0c] sm:$0xf0]  ;;  %v18019_v1 = vld [vmem:[%s20282_s11 + $0x2ce0] sm:$0xf]  ;;  %v17652_v24 = vor.u32 %v19642_v60, %v17651_v54  ;;  %10011 = vmatpush.bf16.msra.mxu0 %v17396_v26  ;;  %v18320_v59 = vld [vmem:[%s20282_s11 + $0xc4] sm:$0xf] }
 0x1a5   : > { %v19734_v57 = vld [vmem:[%s20282_s11 + $0x2cec] sm:$0xf0]  ;;  %v18147_v21 = vld [vmem:[%s20282_s11 + $0x2de0] sm:$0xf]  ;;  %v17780_v58 = vor.u32 %v19674_v63, %v17779_v61  ;;  %10024 = vmatpush.bf16.msra.mxu1 %v17524_v53  ;;  %v12373_v54 = vld [vmem:[%s20282_s11 + $0xd0] sm:$0xf0] }
 0x1a6   : > { %v19766_v27 = vld [vmem:[%s20282_s11 + $0x2dec] sm:$0xf0]  ;;  %v18275_v40 = vld [vmem:[%s20282_s11 + $0x2ee0] sm:$0xf]  ;;  %v18020_v50 = vor.u32 %v19734_v57, %v18019_v1  ;;  %10037 = vmatpush.bf16.msra.mxu2 %v17652_v24  ;;  %v1912_v62 = vld [vmem:[#allocation1 + $0x12] sm:$0xff] }
 0x1a7   : > { %v19798_v47 = vld [vmem:[%s20282_s11 + $0x2eec] sm:$0xf0]  ;;  %v18148_v44 = vor.u32 %v19766_v27, %v18147_v21  ;;  %v18003_v22 = vld [vmem:[%s20282_s11 + $0x2cc0] sm:$0xf]  ;;  %10050 = vmatpush.bf16.msra.mxu3 %v17780_v58  ;;  %10012 = vmatmul.bf16.vlgmr.msra.gmra.mxu0 %v1910_v48  ;;  %v18312_v48 = vld [vmem:[%s20282_s11 + $0x84] sm:$0xf] }
 0x1a8   : > { %v18276_v45 = vor.u32 %v19798_v47, %v18275_v40  ;;  %v19730_v13 = vld [vmem:[%s20282_s11 + $0x2ccc] sm:$0xf0]  ;;  %v18131_v14 = vld [vmem:[%s20282_s11 + $0x2dc0] sm:$0xf]  ;;  %10056 = vmatpush.bf16.msrb.mxu0 %v18020_v50  ;;  %v12376_v40 = vor.u32 %v18320_v59, %v12373_v54  ;;  %v12341_v59 = vld [vmem:[%s20282_s11 + $0x90] sm:$0xf0] }
 0x1a9   : > { %v19762_v15 = vld [vmem:[%s20282_s11 + $0x2dcc] sm:$0xf0]  ;;  %v18259_v25 = vld [vmem:[%s20282_s11 + $0x2ec0] sm:$0xf]  ;;  %v18004_v63 = vor.u32 %v19730_v13, %v18003_v22  ;;  %10069 = vmatpush.bf16.msrb.mxu1 %v18148_v44  ;;  %10038 = vmatmul.bf16.vlgmr.msra.gmra.mxu2 %v1912_v62 }
 0x1aa   : > { %v19794_v20 = vld [vmem:[%s20282_s11 + $0x2ecc] sm:$0xf0]  ;;  %v1913_v61 = vld [vmem:[#allocation1 + $0x1b] sm:$0xff]  ;;  %10082 = vmatpush.bf16.msrb.mxu2 %v18276_v45  ;;  %v18132_v1 = vor.u32 %v19762_v15, %v18131_v14  ;;  %v12357_v15 = vld [vmem:[%s20282_s11 + $0xb0] sm:$0xf0] }
 0x1ab   : > { %v1911_v60 = vld [vmem:[#allocation1 + $0x9] sm:$0xff]  ;;  %v18260_v57 = vor.u32 %v19794_v20, %v18259_v25  ;;  %v17987_v21 = vld [vmem:[%s20282_s11 + $0x2ca0] sm:$0xf]  ;;  %10095 = vmatpush.bf16.msrb.mxu3 %v12392_v55  ;;  %v12360_v22 = vor.u32 %v18316_v31, %v12357_v15  ;;  %v9805_v25 = vpop.f32.mrf.mxu0 }
 0x1ac   : > { %v19726_v26 = vld [vmem:[%s20282_s11 + $0x2cac] sm:$0xf0]  ;;  %v18115_v27 = vld [vmem:[%s20282_s11 + $0x2da0] sm:$0xf]  ;;  %10025 = vmatmul.bf16.vlgmr.msra.gmra.mxu1 %v1911_v60  ;;  %10051 = vmatmul.bf16.vlgmr.msra.gmra.mxu3 %v1913_v61  ;;  %v9806_v54 = vadd.f32 %v9805_v25, %v21126_v29  ;;  %v9818_v60 = vpop.f32.mrf.mxu1  ;;  %v9844_v25 = vpop.f32.mrf.mxu3 }
 0x1ad   : > { %v19758_v47 = vld [vmem:[%s20282_s11 + $0x2dac] sm:$0xf0]  ;;  %v18243_v53 = vld [vmem:[%s20282_s11 + $0x2ea0] sm:$0xf]  ;;  %10057 = vmatpush.bf16.msrb.mxu0 %v18004_v63  ;;  %v17988_v20 = vor.u32 %v19726_v26, %v17987_v21  ;;  %10070 = vmatpush.bf16.msrb.mxu1 %v18132_v1  ;;  %v12344_v26 = vor.u32 %v18312_v48, %v12341_v59  ;;  %v18304_v48 = vld [vmem:[%s20282_s11 + $0x44] sm:$0xf] }
 0x1ae   : > { %v19790_v24 = vld [vmem:[%s20282_s11 + $0x2eac] sm:$0xf0]  ;;  %10083 = vmatpush.bf16.msrb.mxu2 %v18260_v57  ;;  %v18116_v49 = vor.u32 %v19758_v47, %v18115_v27  ;;  %v17971_v50 = vld [vmem:[%s20282_s11 + $0x2c80] sm:$0xf]  ;;  %v9819_v27 = vadd.f32 %v9818_v60, %v9806_v54  ;;  %v12309_v59 = vld [vmem:[%s20282_s11 + $0x50] sm:$0xf0] }
 0x1af   : > { %v18244_v58 = vor.u32 %v19790_v24, %v18243_v53  ;;  %v19722_v44 = vld [vmem:[%s20282_s11 + $0x2c8c] sm:$0xf0]  ;;  %v18099_v45 = vld [vmem:[%s20282_s11 + $0x2d80] sm:$0xf]  ;;  %10096 = vmatpush.bf16.msrb.mxu3 %v12376_v40  ;;  %v18308_v53 = vld [vmem:[%s20282_s11 + $0x64] sm:$0xf] }
 0x1b0   : > { %v19754_v13 = vld [vmem:[%s20282_s11 + $0x2d8c] sm:$0xf0]  ;;  %v18227_v14 = vld [vmem:[%s20282_s11 + $0x2e80] sm:$0xf]  ;;  %v17972_v62 = vor.u32 %v19722_v44, %v17971_v50  ;;  %v12325_v24 = vld [vmem:[%s20282_s11 + $0x70] sm:$0xf0] }
 0x1b1   : > { %v19786_v55 = vld [vmem:[%s20282_s11 + $0x2e8c] sm:$0xf0]  ;;  %10058 = vmatpush.bf16.msrb.mxu0 %v17988_v20  ;;  %10071 = vmatpush.bf16.msrb.mxu1 %v18116_v49  ;;  %v18100_v61 = vor.u32 %v19754_v13, %v18099_v45  ;;  %v17955_v1 = vld [vmem:[%s20282_s11 + $0x2c60] sm:$0xf]  ;;  %v12328_v44 = vor.u32 %v18308_v53, %v12325_v24  ;;  %v9831_v45 = vpop.f32.mrf.mxu2  ;;  %v18300_v53 = vld [vmem:[%s20282_s11 + $0x24] sm:$0xf] }
 0x1b2   : > { %10084 = vmatpush.bf16.msrb.mxu2 %v18244_v58  ;;  %v18228_v63 = vor.u32 %v19786_v55, %v18227_v14  ;;  %v19718_v57 = vld [vmem:[%s20282_s11 + $0x2c6c] sm:$0xf0]  ;;  %v18083_v21 = vld [vmem:[%s20282_s11 + $0x2d60] sm:$0xf]  ;;  %v9832_v55 = vadd.f32 %v9831_v45, %v9819_v27  ;;  %v12312_v27 = vor.u32 %v18304_v48, %v12309_v59  ;;  %v12293_v24 = vld [vmem:[%s20282_s11 + $0x30] sm:$0xf0] }
 0x1b3   : > { %10097 = vmatpush.bf16.msrb.mxu3 %v12360_v22  ;;  %v19750_v40 = vld [vmem:[%s20282_s11 + $0x2d6c] sm:$0xf0]  ;;  %v18211_v47 = vld [vmem:[%s20282_s11 + $0x2e60] sm:$0xf]  ;;  %v17956_v31 = vor.u32 %v19718_v57, %v17955_v1  ;;  %v9807_v54 = vpop.f32.mrf.mxu0  ;;  %v18356_v48 = vld [vmem:[%s20282_s11 + $0x1e4] sm:$0xf] }
 0x1b4   : > { %v19782_v29 = vld [vmem:[%s20282_s11 + $0x2e6c] sm:$0xf0]  ;;  %v18084_v15 = vor.u32 %v19750_v40, %v18083_v21  ;;  %v17939_v49 = vld [vmem:[%s20282_s11 + $0x2c40] sm:$0xf]  ;;  %v9820_v60 = vpop.f32.mrf.mxu1  ;;  %v12517_v59 = vld [vmem:[%s20282_s11 + $0x1f0] sm:$0xf0] }
 0x1b5   : > { %10059 = vmatpush.bf16.msrb.mxu0 %v17972_v62  ;;  %10072 = vmatpush.bf16.msrb.mxu1 %v18100_v61  ;;  %v18212_v20 = vor.u32 %v19782_v29, %v18211_v47  ;;  %v19714_v58 = vld [vmem:[%s20282_s11 + $0x2c4c] sm:$0xf0]  ;;  %v18067_v50 = vld [vmem:[%s20282_s11 + $0x2d40] sm:$0xf]  ;;  %v21193_v61 = vadd.f32 %v9844_v25, %v9832_v55  ;;  %v12277_v55 = vld [vmem:[%s20282_s11 + $0x10] sm:$0xf0] }
 0x1b6   : > { %10085 = vmatpush.bf16.msrb.mxu2 %v18228_v63  ;;  %v19746_v22 = vld [vmem:[%s20282_s11 + $0x2d4c] sm:$0xf0]  ;;  %v18195_v13 = vld [vmem:[%s20282_s11 + $0x2e40] sm:$0xf]  ;;  %v17940_v62 = vor.u32 %v19714_v58, %v17939_v49  ;;  %v18388_v54 = vld [vmem:[%s20282_s11 + $0x2e4] sm:$0xf] }
 0x1b7   : > { %10098 = vmatpush.bf16.msrb.mxu3 %v12344_v26  ;;  %v19778_v14 = vld [vmem:[%s20282_s11 + $0x2e4c] sm:$0xf0]  ;;  %v18068_v63 = vor.u32 %v19746_v22, %v18067_v50  ;;  %v17923_v57 = vld [vmem:[%s20282_s11 + $0x2c20] sm:$0xf]  ;;  %v12296_v22 = vor.u32 %v18300_v53, %v12293_v24 }
 0x1b8   : > { %v18196_v1 = vor.u32 %v19778_v14, %v18195_v13  ;;  %v19710_v21 = vld [vmem:[%s20282_s11 + $0x2c2c] sm:$0xf0]  ;;  %v18051_v26 = vld [vmem:[%s20282_s11 + $0x2d20] sm:$0xf]  ;;  %v18296_v14 = vld [vmem:[%s20282_s11 + $0x4] sm:$0xf] }
 0x1b9   : > { %10060 = vmatpush.bf16.msrb.mxu0 %v17956_v31  ;;  %10073 = vmatpush.bf16.msrb.mxu1 %v18084_v15  ;;  %v19742_v40 = vld [vmem:[%s20282_s11 + $0x2d2c] sm:$0xf0]  ;;  %v18179_v47 = vld [vmem:[%s20282_s11 + $0x2e20] sm:$0xf]  ;;  %v17924_v31 = vor.u32 %v19710_v21, %v17923_v57  ;;  %v9833_v25 = vpop.f32.mrf.mxu2  ;;  %v12773_v57 = vld [vmem:[%s20282_s11 + $0x3f0] sm:$0xf0] }
 0x1ba   : > { %10086 = vmatpush.bf16.msrb.mxu2 %v18212_v20  ;;  %v19774_v29 = vld [vmem:[%s20282_s11 + $0x2e2c] sm:$0xf0]  ;;  %v17907_v15 = vld [vmem:[%s20282_s11 + $0x2c00] sm:$0xf]  ;;  %v18052_v49 = vor.u32 %v19742_v40, %v18051_v26  ;;  %v12901_v40 = vld [vmem:[%s20282_s11 + $0x4f0] sm:$0xf0] }
 0x1bb   : > { %10099 = vmatpush.bf16.msrb.mxu3 %v12328_v44  ;;  %v19706_v20 = vld [vmem:[%s20282_s11 + $0x2c0c] sm:$0xf0]  ;;  %v18180_v58 = vor.u32 %v19774_v29, %v18179_v47  ;;  %v18035_v50 = vld [vmem:[%s20282_s11 + $0x2d00] sm:$0xf]  ;;  %v12280_v47 = vor.u32 %v18296_v14, %v12277_v55  ;;  %v12520_v29 = vor.u32 %v18356_v48, %v12517_v59  ;;  %v12629_v25 = vld [vmem:[%s20282_s11 + $0x2d0] sm:$0xf0] }
 0x1bc   : > { %v19738_v44 = vld [vmem:[%s20282_s11 + $0x2d0c] sm:$0xf0]  ;;  %v18163_v45 = vld [vmem:[%s20282_s11 + $0x2e00] sm:$0xf]  ;;  %v17908_v60 = vor.u32 %v19706_v20, %v17907_v15  ;;  %v12501_v15 = vld [vmem:[%s20282_s11 + $0x1d0] sm:$0xf0] }
 0x1bd   : > { %10061 = vmatpush.bf16.msrb.mxu0 %v17940_v62  ;;  %10074 = vmatpush.bf16.msrb.mxu1 %v18068_v63  ;;  %v19770_v13 = vld [vmem:[%s20282_s11 + $0x2e0c] sm:$0xf0]  ;;  %v9846_v62 = vpop.f32.mrf.mxu3  ;;  %v12645_v63 = vld [vmem:[%s20282_s11 + $0x2f0] sm:$0xf0]  ;;  %v18036_v21 = vor.u32 %v19738_v44, %v18035_v50  ;;  %v18384_v20 = vld [vmem:[%s20282_s11 + $0x2c4] sm:$0xf] }
 0x1be   : > { %10087 = vmatpush.bf16.msrb.mxu2 %v18196_v1  ;;  %v18420_v1 = vld [vmem:[%s20282_s11 + $0x3e4] sm:$0xf]  ;;  %v18164_v26 = vor.u32 %v19770_v13, %v18163_v45  ;;  %v12648_v53 = vor.u32 %v18388_v54, %v12645_v63  ;;  %v12757_v50 = vld [vmem:[%s20282_s11 + $0x3d0] sm:$0xf0]  ;;  %v1914_v44 = vld [vmem:[#allocation1 + $0x24] sm:$0xff]  ;;  %v12632_v48 = vor.u32 %v18384_v20, %v12629_v25 }
 0x1bf   : > { %10100 = vmatpush.bf16.msrb.mxu3 %v12312_v27  ;;  %v18452_v27 = vld [vmem:[%s20282_s11 + $0x4e4] sm:$0xf]  ;;  %v12776_v24 = vor.u32 %v18420_v1, %v12773_v57  ;;  %v1916_v13 = vld [vmem:[#allocation1 + $0x36] sm:$0xff]  ;;  %v1915_v14 = vld [vmem:[#allocation1 + $0x2d] sm:$0xff] }
 0x1c0   : > { %v18448_v45 = vld [vmem:[%s20282_s11 + $0x4c4] sm:$0xf]  ;;  %v12485_v62 = vld [vmem:[%s20282_s11 + $0x1b0] sm:$0xf0] }
 0x1c1   : > { %10062 = vmatpush.bf16.msrb.mxu0 %v17924_v31  ;;  %10075 = vmatpush.bf16.msrb.mxu1 %v18052_v49  ;;  %v18352_v31 = vld [vmem:[%s20282_s11 + $0x1c4] sm:$0xf]  ;;  %v12904_v49 = vor.u32 %v18452_v27, %v12901_v40  ;;  %v12613_v1 = vld [vmem:[%s20282_s11 + $0x2b0] sm:$0xf0] }
 0x1c2   : > { %10088 = vmatpush.bf16.msrb.mxu2 %v18180_v58  ;;  %v18416_v58 = vld [vmem:[%s20282_s11 + $0x3c4] sm:$0xf]  ;;  %v12504_v55 = vor.u32 %v18352_v31, %v12501_v15  ;;  %v12869_v27 = vld [vmem:[%s20282_s11 + $0x4b0] sm:$0xf0] }
 0x1c3   : > { %10101 = vmatpush.bf16.msrb.mxu3 %v12296_v22  ;;  %v12885_v22 = vld [vmem:[%s20282_s11 + $0x4d0] sm:$0xf0]  ;;  %v12760_v59 = vor.u32 %v18416_v58, %v12757_v50  ;;  %v18348_v54 = vld [vmem:[%s20282_s11 + $0x1a4] sm:$0xf]  ;;  %v9857_v58 = vpop.f32.mrf.mxu0 }
 0x1c4   : > { %v12888_v63 = vor.u32 %v18448_v45, %v12885_v22  ;;  %v18412_v57 = vld [vmem:[%s20282_s11 + $0x3a4] sm:$0xf]  ;;  %v12488_v40 = vor.u32 %v18348_v54, %v12485_v62  ;;  %v12597_v20 = vld [vmem:[%s20282_s11 + $0x290] sm:$0xf0]  ;;  %v9858_v45 = vadd.f32 %v9857_v58, %v21193_v61 }
 0x1c5   : > { %10063 = vmatpush.bf16.msrb.mxu0 %v17908_v60  ;;  %10076 = vmatpush.bf16.msrb.mxu1 %v18036_v21  ;;  %v18380_v60 = vld [vmem:[%s20282_s11 + $0x2a4] sm:$0xf]  ;;  %v12741_v21 = vld [vmem:[%s20282_s11 + $0x3b0] sm:$0xf0] }
 0x1c6   : > { %10089 = vmatpush.bf16.msrb.mxu2 %v18164_v26  ;;  %v18444_v26 = vld [vmem:[%s20282_s11 + $0x4a4] sm:$0xf]  ;;  %v12725_v25 = vld [vmem:[%s20282_s11 + $0x390] sm:$0xf0] }
 0x1c7   : > { %10102 = vmatpush.bf16.msrb.mxu3 %v12280_v47  ;;  %v12616_v47 = vor.u32 %v18380_v60, %v12613_v1  ;;  %v18376_v31 = vld [vmem:[%s20282_s11 + $0x284] sm:$0xf]  ;;  %v12872_v15 = vor.u32 %v18444_v26, %v12869_v27  ;;  %v12709_v61 = vld [vmem:[%s20282_s11 + $0x370] sm:$0xf0] }
 0x1c8   : > { %10064 = vmatmul.bf16.vlgmr.msrb.gmra.mxu0 %v1914_v44  ;;  %10077 = vmatmul.bf16.vlgmr.msrb.gmra.mxu1 %v1915_v14  ;;  %v18440_v50 = vld [vmem:[%s20282_s11 + $0x484] sm:$0xf]  ;;  %v12853_v44 = vld [vmem:[%s20282_s11 + $0x490] sm:$0xf0]  ;;  %v12600_v14 = vor.u32 %v18376_v31, %v12597_v20 }
 0x1c9   : > { %10108 = vmatpush.bf16.msra.mxu0 %v12520_v29  ;;  %10121 = vmatpush.bf16.msra.mxu1 %v12648_v53  ;;  %v12744_v29 = vor.u32 %v18412_v57, %v12741_v21  ;;  %v18344_v53 = vld [vmem:[%s20282_s11 + $0x184] sm:$0xf]  ;;  %v12856_v62 = vor.u32 %v18440_v50, %v12853_v44  ;;  %v12837_v21 = vld [vmem:[%s20282_s11 + $0x470] sm:$0xf0]  ;;  %v9883_v31 = vpop.f32.mrf.mxu2 }
 0x1ca   : > { %10134 = vmatpush.bf16.msra.mxu2 %v12776_v24  ;;  %10103 = vmatmul.bf16.vlgmr.msrb.gmra.mxu3 %v20411_v34  ;;  %v12469_v24 = vld [vmem:[%s20282_s11 + $0x190] sm:$0xf0]  ;;  %v18372_v54 = vld [vmem:[%s20282_s11 + $0x264] sm:$0xf]  ;;  %v9896_v58 = vpop.f32.mrf.mxu3 }
 0x1cb   : > { %10147 = vmatpush.bf16.msra.mxu3 %v12904_v49  ;;  %10090 = vmatmul.bf16.vlgmr.msrb.gmra.mxu2 %v1916_v13  ;;  %v18408_v49 = vld [vmem:[%s20282_s11 + $0x384] sm:$0xf]  ;;  %v12472_v22 = vor.u32 %v18344_v53, %v12469_v24  ;;  %v9870_v13 = vpop.f32.mrf.mxu1  ;;  %v12821_v44 = vld [vmem:[%s20282_s11 + $0x450] sm:$0xf0] }
 0x1cc   : > { %v9871_v60 = vadd.f32 %v9870_v13, %v9858_v45  ;;  %v18404_v1 = vld [vmem:[%s20282_s11 + $0x364] sm:$0xf]  ;;  %v9859_v45 = vpop.f32.mrf.mxu0 }
 0x1cd   : > { %10109 = vmatpush.bf16.msra.mxu0 %v12504_v55  ;;  %10122 = vmatpush.bf16.msra.mxu1 %v12632_v48  ;;  %v12728_v55 = vor.u32 %v18408_v49, %v12725_v25  ;;  %v18340_v48 = vld [vmem:[%s20282_s11 + $0x164] sm:$0xf]  ;;  %v12693_v49 = vld [vmem:[%s20282_s11 + $0x350] sm:$0xf0] }
 0x1ce   : > { %10135 = vmatpush.bf16.msra.mxu2 %v12760_v59  ;;  %v12453_v59 = vld [vmem:[%s20282_s11 + $0x170] sm:$0xf0]  ;;  %v18436_v57 = vld [vmem:[%s20282_s11 + $0x464] sm:$0xf]  ;;  %v9884_v25 = vadd.f32 %v9883_v31, %v9871_v60 }
 0x1cf   : > { %10148 = vmatpush.bf16.msra.mxu3 %v12888_v63  ;;  %v12581_v63 = vld [vmem:[%s20282_s11 + $0x270] sm:$0xf0]  ;;  %v12456_v26 = vor.u32 %v18340_v48, %v12453_v59  ;;  %v18368_v53 = vld [vmem:[%s20282_s11 + $0x244] sm:$0xf]  ;;  %v12840_v24 = vor.u32 %v18436_v57, %v12837_v21 }
 0x1d0   : > { %v12584_v27 = vor.u32 %v18372_v54, %v12581_v63  ;;  %v18400_v20 = vld [vmem:[%s20282_s11 + $0x344] sm:$0xf]  ;;  %v12421_v54 = vld [vmem:[%s20282_s11 + $0x130] sm:$0xf0] }
 0x1d1   : > { %10110 = vmatpush.bf16.msra.mxu0 %v12488_v40  ;;  %10123 = vmatpush.bf16.msra.mxu1 %v12616_v47  ;;  %v12712_v40 = vor.u32 %v18404_v1, %v12709_v61  ;;  %v18336_v47 = vld [vmem:[%s20282_s11 + $0x144] sm:$0xf]  ;;  %v12696_v48 = vor.u32 %v18400_v20, %v12693_v49  ;;  %v12549_v63 = vld [vmem:[%s20282_s11 + $0x230] sm:$0xf0] }
 0x1d2   : > { %10136 = vmatpush.bf16.msra.mxu2 %v12744_v29  ;;  %v12437_v29 = vld [vmem:[%s20282_s11 + $0x150] sm:$0xf0]  ;;  %v18432_v50 = vld [vmem:[%s20282_s11 + $0x444] sm:$0xf] }
 0x1d3   : > { %10149 = vmatpush.bf16.msra.mxu3 %v12872_v15  ;;  %v12565_v15 = vld [vmem:[%s20282_s11 + $0x250] sm:$0xf0]  ;;  %v9872_v13 = vpop.f32.mrf.mxu1  ;;  %v18332_v59 = vld [vmem:[%s20282_s11 + $0x124] sm:$0xf]  ;;  %v12824_v60 = vor.u32 %v18432_v50, %v12821_v44 }
 0x1d4   : > { %v18396_v1 = vld [vmem:[%s20282_s11 + $0x324] sm:$0xf]  ;;  %v12677_v61 = vld [vmem:[%s20282_s11 + $0x330] sm:$0xf0] }
 0x1d5   : > { %10111 = vmatpush.bf16.msra.mxu0 %v12472_v22  ;;  %10124 = vmatpush.bf16.msra.mxu1 %v12600_v14  ;;  %v12440_v22 = vor.u32 %v18336_v47, %v12437_v29  ;;  %v21261_v14 = vadd.f32 %v9896_v58, %v9884_v25  ;;  %v18428_v57 = vld [vmem:[%s20282_s11 + $0x424] sm:$0xf]  ;;  %v12805_v21 = vld [vmem:[%s20282_s11 + $0x430] sm:$0xf0]  ;;  %v12680_v29 = vor.u32 %v18396_v1, %v12677_v61  ;;  %v9885_v58 = vpop.f32.mrf.mxu2 }
 0x1d6   : > { %10137 = vmatpush.bf16.msra.mxu2 %v12728_v55  ;;  %v12568_v55 = vor.u32 %v18368_v53, %v12565_v15  ;;  %v18360_v53 = vld [vmem:[%s20282_s11 + $0x204] sm:$0xf]  ;;  %v12808_v15 = vor.u32 %v18428_v57, %v12805_v21  ;;  %v12661_v20 = vld [vmem:[%s20282_s11 + $0x310] sm:$0xf0] }
 0x1d7   : > { %10150 = vmatpush.bf16.msra.mxu3 %v12856_v62  ;;  %v18364_v62 = vld [vmem:[%s20282_s11 + $0x224] sm:$0xf]  ;;  %v12789_v25 = vld [vmem:[%s20282_s11 + $0x410] sm:$0xf0] }
 0x1d8   : > { %v12552_v47 = vor.u32 %v18364_v62, %v12549_v63  ;;  %v18392_v31 = vld [vmem:[%s20282_s11 + $0x304] sm:$0xf]  ;;  %v13029_v44 = vld [vmem:[%s20282_s11 + $0x5f0] sm:$0xf0] }
 0x1d9   : > { %10112 = vmatpush.bf16.msra.mxu0 %v12456_v26  ;;  %10125 = vmatpush.bf16.msra.mxu1 %v12584_v27  ;;  %v12424_v26 = vor.u32 %v18332_v59, %v12421_v54  ;;  %v18328_v27 = vld [vmem:[%s20282_s11 + $0x104] sm:$0xf]  ;;  %v13285_v59 = vld [vmem:[%s20282_s11 + $0x7f0] sm:$0xf0]  ;;  %v12664_v62 = vor.u32 %v18392_v31, %v12661_v20 }
 0x1da   : > { %10138 = vmatpush.bf16.msra.mxu2 %v12712_v40  ;;  %v12405_v40 = vld [vmem:[%s20282_s11 + $0x110] sm:$0xf0]  ;;  %v18424_v49 = vld [vmem:[%s20282_s11 + $0x404] sm:$0xf] }
 0x1db   : > { %10151 = vmatpush.bf16.msra.mxu3 %v12840_v24  ;;  %v12533_v24 = vld [vmem:[%s20282_s11 + $0x210] sm:$0xf0]  ;;  %v18484_v50 = vld [vmem:[%s20282_s11 + $0x5e4] sm:$0xf]  ;;  %v12408_v13 = vor.u32 %v18328_v27, %v12405_v40  ;;  %v12792_v1 = vor.u32 %v18424_v49, %v12789_v25 }
 0x1dc   : > { %v18516_v45 = vld [vmem:[%s20282_s11 + $0x6e4] sm:$0xf]  ;;  %v12536_v54 = vor.u32 %v18360_v53, %v12533_v24  ;;  %v13413_v63 = vld [vmem:[%s20282_s11 + $0x8f0] sm:$0xf0]  ;;  %v13032_v61 = vor.u32 %v18484_v50, %v13029_v44 }
 0x1dd   : > { %10113 = vmatpush.bf16.msra.mxu0 %v12440_v22  ;;  %10126 = vmatpush.bf16.msra.mxu1 %v12568_v55  ;;  %v9898_v22 = vpop.f32.mrf.mxu3  ;;  %v13157_v55 = vld [vmem:[%s20282_s11 + $0x6f0] sm:$0xf0]  ;;  %v18512_v40 = vld [vmem:[%s20282_s11 + $0x6c4] sm:$0xf] }
 0x1de   : > { %10139 = vmatpush.bf16.msra.mxu2 %v12696_v48  ;;  %v18548_v48 = vld [vmem:[%s20282_s11 + $0x7e4] sm:$0xf]  ;;  %v13160_v57 = vor.u32 %v18516_v45, %v13157_v55  ;;  %v13013_v27 = vld [vmem:[%s20282_s11 + $0x5d0] sm:$0xf0] }
 0x1df   : > { %10152 = vmatpush.bf16.msra.mxu3 %v12824_v60  ;;  %v18580_v60 = vld [vmem:[%s20282_s11 + $0x8e4] sm:$0xf]  ;;  %v13288_v21 = vor.u32 %v18548_v48, %v13285_v59  ;;  %v13269_v24 = vld [vmem:[%s20282_s11 + $0x7d0] sm:$0xf0] }
 0x1e0   : > { %v18544_v53 = vld [vmem:[%s20282_s11 + $0x7c4] sm:$0xf]  ;;  %v12997_v50 = vld [vmem:[%s20282_s11 + $0x5b0] sm:$0xf0] }
 0x1e1   : > { %10114 = vmatpush.bf16.msra.mxu0 %v12424_v26  ;;  %10127 = vmatpush.bf16.msra.mxu1 %v12552_v47  ;;  %v18480_v26 = vld [vmem:[%s20282_s11 + $0x5c4] sm:$0xf]  ;;  %v13416_v47 = vor.u32 %v18580_v60, %v13413_v63  ;;  %v13272_v25 = vor.u32 %v18544_v53, %v13269_v24  ;;  %v13125_v22 = vld [vmem:[%s20282_s11 + $0x6b0] sm:$0xf0] }
 0x1e2   : > { %10140 = vmatpush.bf16.msra.mxu2 %v12680_v29  ;;  %v13141_v29 = vld [vmem:[%s20282_s11 + $0x6d0] sm:$0xf0]  ;;  %v18576_v31 = vld [vmem:[%s20282_s11 + $0x8c4] sm:$0xf]  ;;  %v13016_v20 = vor.u32 %v18480_v26, %v13013_v27 }
 0x1e3   : > { %10153 = vmatpush.bf16.msra.mxu3 %v12808_v15  ;;  %v13397_v15 = vld [vmem:[%s20282_s11 + $0x8d0] sm:$0xf0]  ;;  %v13144_v49 = vor.u32 %v18512_v40, %v13141_v29  ;;  %v18476_v58 = vld [vmem:[%s20282_s11 + $0x5a4] sm:$0xf]  ;;  %v9909_v40 = vpop.f32.mrf.mxu0 }
 0x1e4   : > { %v18508_v44 = vld [vmem:[%s20282_s11 + $0x6a4] sm:$0xf]  ;;  %v13400_v45 = vor.u32 %v18576_v31, %v13397_v15  ;;  %v13253_v55 = vld [vmem:[%s20282_s11 + $0x7b0] sm:$0xf0]  ;;  %v9910_v53 = vadd.f32 %v9909_v40, %v21261_v14 }
 0x1e5   : > { %10115 = vmatpush.bf16.msra.mxu0 %v12408_v13  ;;  %10128 = vmatpush.bf16.msra.mxu1 %v12536_v54  ;;  %v18540_v13 = vld [vmem:[%s20282_s11 + $0x7a4] sm:$0xf]  ;;  %v13381_v59 = vld [vmem:[%s20282_s11 + $0x8b0] sm:$0xf0]  ;;  %v13000_v54 = vor.u32 %v18476_v58, %v12997_v50 }
 0x1e6   : > { %10141 = vmatpush.bf16.msra.mxu2 %v12664_v62  ;;  %v18572_v48 = vld [vmem:[%s20282_s11 + $0x8a4] sm:$0xf]  ;;  %v13128_v62 = vor.u32 %v18508_v44, %v13125_v22  ;;  %v13256_v60 = vor.u32 %v18540_v13, %v13253_v55  ;;  %v13237_v27 = vld [vmem:[%s20282_s11 + $0x790] sm:$0xf0] }
 0x1e7   : > { %10154 = vmatpush.bf16.msra.mxu3 %v12792_v1  ;;  %v18472_v63 = vld [vmem:[%s20282_s11 + $0x584] sm:$0xf]  ;;  %v12981_v1 = vld [vmem:[%s20282_s11 + $0x590] sm:$0xf0]  ;;  %v9922_v31 = vpop.f32.mrf.mxu1 }
 0x1e8   : > { %10116 = vmatmul.bf16.vlgmr.msra.gmra.mxu0 %v20418_v39  ;;  %10129 = vmatmul.bf16.vlgmr.msra.gmra.mxu1 %v20409_v33  ;;  %v18536_v26 = vld [vmem:[%s20282_s11 + $0x784] sm:$0xf]  ;;  %v13365_v29 = vld [vmem:[%s20282_s11 + $0x890] sm:$0xf0]  ;;  %v12984_v24 = vor.u32 %v18472_v63, %v12981_v1  ;;  %v9923_v44 = vadd.f32 %v9922_v31, %v9910_v53 }
 0x1e9   : > { %10160 = vmatpush.bf16.msrb.mxu0 %v13032_v61  ;;  %10173 = vmatpush.bf16.msrb.mxu1 %v13160_v57  ;;  %v18504_v61 = vld [vmem:[%s20282_s11 + $0x684] sm:$0xf]  ;;  %v13384_v57 = vor.u32 %v18572_v48, %v13381_v59  ;;  %v13221_v14 = vld [vmem:[%s20282_s11 + $0x770] sm:$0xf0] }
 0x1ea   : > { %10186 = vmatpush.bf16.msrb.mxu2 %v13288_v21  ;;  %10155 = vmatmul.bf16.vlgmr.msra.gmra.mxu3 %v20447_v7  ;;  %v13109_v21 = vld [vmem:[%s20282_s11 + $0x690] sm:$0xf0]  ;;  %v18500_v58 = vld [vmem:[%s20282_s11 + $0x664] sm:$0xf] }
 0x1eb   : > { %10199 = vmatpush.bf16.msrb.mxu3 %v13416_v47  ;;  %10142 = vmatmul.bf16.vlgmr.msra.gmra.mxu2 %v20413_v35  ;;  %v18568_v47 = vld [vmem:[%s20282_s11 + $0x884] sm:$0xf]  ;;  %v13112_v15 = vor.u32 %v18504_v61, %v13109_v21  ;;  %v13349_v55 = vld [vmem:[%s20282_s11 + $0x870] sm:$0xf0]  ;;  %v9935_v61 = vpop.f32.mrf.mxu2  ;;  %v9911_v53 = vpop.f32.mrf.mxu0 }
 0x1ec   : > { %v13368_v50 = vor.u32 %v18568_v47, %v13365_v29  ;;  %v18532_v22 = vld [vmem:[%s20282_s11 + $0x764] sm:$0xf]  ;;  %v13333_v29 = vld [vmem:[%s20282_s11 + $0x850] sm:$0xf0] }
 0x1ed   : > { %10161 = vmatpush.bf16.msrb.mxu0 %v13016_v20  ;;  %10174 = vmatpush.bf16.msrb.mxu1 %v13144_v49  ;;  %v13240_v20 = vor.u32 %v18536_v26, %v13237_v27  ;;  %v18468_v49 = vld [vmem:[%s20282_s11 + $0x564] sm:$0xf]  ;;  %v13205_v26 = vld [vmem:[%s20282_s11 + $0x750] sm:$0xf0]  ;;  %v9936_v27 = vadd.f32 %v9935_v61, %v9923_v44 }
 0x1ee   : > { %10187 = vmatpush.bf16.msrb.mxu2 %v13272_v25  ;;  %v12965_v25 = vld [vmem:[%s20282_s11 + $0x570] sm:$0xf0]  ;;  %v18564_v13 = vld [vmem:[%s20282_s11 + $0x864] sm:$0xf]  ;;  %v9948_v40 = vpop.f32.mrf.mxu3 }
 0x1ef   : > { %10200 = vmatpush.bf16.msrb.mxu3 %v13400_v45  ;;  %v13093_v45 = vld [vmem:[%s20282_s11 + $0x670] sm:$0xf0]  ;;  %v12968_v48 = vor.u32 %v18468_v49, %v12965_v25  ;;  %v18496_v63 = vld [vmem:[%s20282_s11 + $0x644] sm:$0xf]  ;;  %v13352_v1 = vor.u32 %v18564_v13, %v13349_v55  ;;  %v9924_v31 = vpop.f32.mrf.mxu1 }
 0x1f0   : > { %v13096_v59 = vor.u32 %v18500_v58, %v13093_v45  ;;  %v18528_v21 = vld [vmem:[%s20282_s11 + $0x744] sm:$0xf]  ;;  %v12933_v58 = vld [vmem:[%s20282_s11 + $0x530] sm:$0xf0] }
 0x1f1   : > { %10162 = vmatpush.bf16.msrb.mxu0 %v13000_v54  ;;  %10175 = vmatpush.bf16.msrb.mxu1 %v13128_v62  ;;  %v13224_v54 = vor.u32 %v18532_v22, %v13221_v14  ;;  %v18464_v62 = vld [vmem:[%s20282_s11 + $0x544] sm:$0xf]  ;;  %v13208_v49 = vor.u32 %v18528_v21, %v13205_v26  ;;  %v13061_v45 = vld [vmem:[%s20282_s11 + $0x630] sm:$0xf0] }
 0x1f2   : > { %10188 = vmatpush.bf16.msrb.mxu2 %v13256_v60  ;;  %v12949_v60 = vld [vmem:[%s20282_s11 + $0x550] sm:$0xf0]  ;;  %v18560_v47 = vld [vmem:[%s20282_s11 + $0x844] sm:$0xf] }
 0x1f3   : > { %10201 = vmatpush.bf16.msrb.mxu3 %v13384_v57  ;;  %v13077_v57 = vld [vmem:[%s20282_s11 + $0x650] sm:$0xf0]  ;;  %v18460_v25 = vld [vmem:[%s20282_s11 + $0x524] sm:$0xf]  ;;  %v13336_v44 = vor.u32 %v18560_v47, %v13333_v29 }
 0x1f4   : > { %v18524_v22 = vld [vmem:[%s20282_s11 + $0x724] sm:$0xf]  ;;  %v13189_v14 = vld [vmem:[%s20282_s11 + $0x730] sm:$0xf0] }
 0x1f5   : > { %10163 = vmatpush.bf16.msrb.mxu0 %v12984_v24  ;;  %10176 = vmatpush.bf16.msrb.mxu1 %v13112_v15  ;;  %v12952_v24 = vor.u32 %v18464_v62, %v12949_v60  ;;  %v21332_v15 = vadd.f32 %v9948_v40, %v9936_v27  ;;  %v18556_v13 = vld [vmem:[%s20282_s11 + $0x824] sm:$0xf]  ;;  %v13317_v55 = vld [vmem:[%s20282_s11 + $0x830] sm:$0xf0]  ;;  %v13192_v60 = vor.u32 %v18524_v22, %v13189_v14  ;;  %v9937_v40 = vpop.f32.mrf.mxu2 }
 0x1f6   : > { %10189 = vmatpush.bf16.msrb.mxu2 %v13240_v20  ;;  %v13080_v20 = vor.u32 %v18496_v63, %v13077_v57  ;;  %v18488_v63 = vld [vmem:[%s20282_s11 + $0x604] sm:$0xf]  ;;  %v13320_v57 = vor.u32 %v18556_v13, %v13317_v55  ;;  %v13173_v21 = vld [vmem:[%s20282_s11 + $0x710] sm:$0xf0] }
 0x1f7   : > { %10202 = vmatpush.bf16.msrb.mxu3 %v13368_v50  ;;  %v18492_v50 = vld [vmem:[%s20282_s11 + $0x624] sm:$0xf]  ;;  %v13301_v27 = vld [vmem:[%s20282_s11 + $0x810] sm:$0xf0] }
 0x1f8   : > { %v13064_v62 = vor.u32 %v18492_v50, %v13061_v45  ;;  %v18520_v61 = vld [vmem:[%s20282_s11 + $0x704] sm:$0xf]  ;;  %v13541_v29 = vld [vmem:[%s20282_s11 + $0x9f0] sm:$0xf0] }
 0x1f9   : > { %10164 = vmatpush.bf16.msrb.mxu0 %v12968_v48  ;;  %10177 = vmatpush.bf16.msrb.mxu1 %v13096_v59  ;;  %v12936_v48 = vor.u32 %v18460_v25, %v12933_v58  ;;  %v18456_v59 = vld [vmem:[%s20282_s11 + $0x504] sm:$0xf]  ;;  %v13797_v25 = vld [vmem:[%s20282_s11 + $0xbf0] sm:$0xf0]  ;;  %v13176_v50 = vor.u32 %v18520_v61, %v13173_v21 }
 0x1fa   : > { %10190 = vmatpush.bf16.msrb.mxu2 %v13224_v54  ;;  %v12917_v54 = vld [vmem:[%s20282_s11 + $0x510] sm:$0xf0]  ;;  %v18552_v26 = vld [vmem:[%s20282_s11 + $0x804] sm:$0xf] }
 0x1fb   : > { %10203 = vmatpush.bf16.msrb.mxu3 %v13352_v1  ;;  %v13045_v1 = vld [vmem:[%s20282_s11 + $0x610] sm:$0xf0]  ;;  %v18612_v47 = vld [vmem:[%s20282_s11 + $0x9e4] sm:$0xf]  ;;  %v12920_v31 = vor.u32 %v18456_v59, %v12917_v54  ;;  %v13304_v22 = vor.u32 %v18552_v26, %v13301_v27 }
 0x1fc   : > { %v18644_v53 = vld [vmem:[%s20282_s11 + $0xae4] sm:$0xf]  ;;  %v13048_v58 = vor.u32 %v18488_v63, %v13045_v1  ;;  %v13925_v45 = vld [vmem:[%s20282_s11 + $0xcf0] sm:$0xf0]  ;;  %v13544_v14 = vor.u32 %v18612_v47, %v13541_v29 }
 0x1fd   : > { %10165 = vmatpush.bf16.msrb.mxu0 %v12952_v24  ;;  %10178 = vmatpush.bf16.msrb.mxu1 %v13080_v20  ;;  %v9950_v24 = vpop.f32.mrf.mxu3  ;;  %v13669_v20 = vld [vmem:[%s20282_s11 + $0xaf0] sm:$0xf0]  ;;  %v18640_v54 = vld [vmem:[%s20282_s11 + $0xac4] sm:$0xf] }
 0x1fe   : > { %10191 = vmatpush.bf16.msrb.mxu2 %v13208_v49  ;;  %v18676_v49 = vld [vmem:[%s20282_s11 + $0xbe4] sm:$0xf]  ;;  %v13672_v13 = vor.u32 %v18644_v53, %v13669_v20  ;;  %v13525_v59 = vld [vmem:[%s20282_s11 + $0x9d0] sm:$0xf0] }
 0x1ff   : > { %10204 = vmatpush.bf16.msrb.mxu3 %v13336_v44  ;;  %v18708_v44 = vld [vmem:[%s20282_s11 + $0xce4] sm:$0xf]  ;;  %v13800_v55 = vor.u32 %v18676_v49, %v13797_v25  ;;  %v13781_v1 = vld [vmem:[%s20282_s11 + $0xbd0] sm:$0xf0] }
 0x200   : > { %v18672_v63 = vld [vmem:[%s20282_s11 + $0xbc4] sm:$0xf]  ;;  %v13509_v47 = vld [vmem:[%s20282_s11 + $0x9b0] sm:$0xf0] }
 0x201   : > { %10166 = vmatpush.bf16.msrb.mxu0 %v12936_v48  ;;  %10179 = vmatpush.bf16.msrb.mxu1 %v13064_v62  ;;  %v18608_v48 = vld [vmem:[%s20282_s11 + $0x9c4] sm:$0xf]  ;;  %v13928_v62 = vor.u32 %v18708_v44, %v13925_v45  ;;  %v13784_v27 = vor.u32 %v18672_v63, %v13781_v1  ;;  %v13637_v24 = vld [vmem:[%s20282_s11 + $0xab0] sm:$0xf0] }
 0x202   : > { %10192 = vmatpush.bf16.msrb.mxu2 %v13192_v60  ;;  %v13653_v60 = vld [vmem:[%s20282_s11 + $0xad0] sm:$0xf0]  ;;  %v18704_v61 = vld [vmem:[%s20282_s11 + $0xcc4] sm:$0xf]  ;;  %v13528_v21 = vor.u32 %v18608_v48, %v13525_v59 }
 0x203   : > { %10205 = vmatpush.bf16.msrb.mxu3 %v13320_v57  ;;  %v13909_v57 = vld [vmem:[%s20282_s11 + $0xcd0] sm:$0xf0]  ;;  %v13656_v26 = vor.u32 %v18640_v54, %v13653_v60  ;;  %v18604_v40 = vld [vmem:[%s20282_s11 + $0x9a4] sm:$0xf] }
 0x204   : > { %v18636_v29 = vld [vmem:[%s20282_s11 + $0xaa4] sm:$0xf]  ;;  %v13912_v53 = vor.u32 %v18704_v61, %v13909_v57  ;;  %v13765_v20 = vld [vmem:[%s20282_s11 + $0xbb0] sm:$0xf0]  ;;  %v9961_v54 = vpop.f32.mrf.mxu0 }
 0x205   : > { %10167 = vmatpush.bf16.msrb.mxu0 %v12920_v31  ;;  %10180 = vmatpush.bf16.msrb.mxu1 %v13048_v58  ;;  %v18668_v31 = vld [vmem:[%s20282_s11 + $0xba4] sm:$0xf]  ;;  %v13893_v25 = vld [vmem:[%s20282_s11 + $0xcb0] sm:$0xf0]  ;;  %v13512_v58 = vor.u32 %v18604_v40, %v13509_v47  ;;  %v9962_v63 = vadd.f32 %v9961_v54, %v21332_v15  ;;  %v9974_v61 = vpop.f32.mrf.mxu1 }
 0x206   : > { %10193 = vmatpush.bf16.msrb.mxu2 %v13176_v50  ;;  %v18700_v49 = vld [vmem:[%s20282_s11 + $0xca4] sm:$0xf]  ;;  %v13640_v50 = vor.u32 %v18636_v29, %v13637_v24  ;;  %v13768_v44 = vor.u32 %v18668_v31, %v13765_v20  ;;  %v13749_v59 = vld [vmem:[%s20282_s11 + $0xb90] sm:$0xf0] }
 0x207   : > { %10206 = vmatpush.bf16.msrb.mxu3 %v13304_v22  ;;  %v18600_v45 = vld [vmem:[%s20282_s11 + $0x984] sm:$0xf]  ;;  %v13493_v22 = vld [vmem:[%s20282_s11 + $0x990] sm:$0xf0]  ;;  %v9975_v29 = vadd.f32 %v9974_v61, %v9962_v63 }
 0x208   : > { %10168 = vmatmul.bf16.vlgmr.msrb.gmra.mxu0 %v20452_v10  ;;  %10181 = vmatmul.bf16.vlgmr.msrb.gmra.mxu1 %v20445_v6  ;;  %v18664_v48 = vld [vmem:[%s20282_s11 + $0xb84] sm:$0xf]  ;;  %v13877_v60 = vld [vmem:[%s20282_s11 + $0xc90] sm:$0xf0]  ;;  %v13496_v1 = vor.u32 %v18600_v45, %v13493_v22 }
 0x209   : > { %10212 = vmatpush.bf16.msra.mxu0 %v13544_v14  ;;  %10225 = vmatpush.bf16.msra.mxu1 %v13672_v13  ;;  %v18632_v14 = vld [vmem:[%s20282_s11 + $0xa84] sm:$0xf]  ;;  %v13896_v13 = vor.u32 %v18700_v49, %v13893_v25  ;;  %v13733_v15 = vld [vmem:[%s20282_s11 + $0xb70] sm:$0xf0] }
 0x20a   : > { %10238 = vmatpush.bf16.msra.mxu2 %v13800_v55  ;;  %10207 = vmatmul.bf16.vlgmr.msrb.gmra.mxu3 %v20526_v2  ;;  %v13621_v55 = vld [vmem:[%s20282_s11 + $0xa90] sm:$0xf0]  ;;  %v18628_v40 = vld [vmem:[%s20282_s11 + $0xa64] sm:$0xf] }
 0x20b   : > { %10251 = vmatpush.bf16.msra.mxu3 %v13928_v62  ;;  %10194 = vmatmul.bf16.vlgmr.msrb.gmra.mxu2 %v20449_v8  ;;  %v18696_v62 = vld [vmem:[%s20282_s11 + $0xc84] sm:$0xf]  ;;  %v13624_v57 = vor.u32 %v18632_v14, %v13621_v55  ;;  %v13861_v20 = vld [vmem:[%s20282_s11 + $0xc70] sm:$0xf0] }
 0x20c   : > { %v13880_v47 = vor.u32 %v18696_v62, %v13877_v60  ;;  %v18660_v24 = vld [vmem:[%s20282_s11 + $0xb64] sm:$0xf]  ;;  %v9987_v14 = vpop.f32.mrf.mxu2  ;;  %v13845_v60 = vld [vmem:[%s20282_s11 + $0xc50] sm:$0xf0]  ;;  %v9963_v63 = vpop.f32.mrf.mxu0 }
 0x20d   : > { %10213 = vmatpush.bf16.msra.mxu0 %v13528_v21  ;;  %10226 = vmatpush.bf16.msra.mxu1 %v13656_v26  ;;  %v13752_v21 = vor.u32 %v18664_v48, %v13749_v59  ;;  %v18596_v26 = vld [vmem:[%s20282_s11 + $0x964] sm:$0xf]  ;;  %v13717_v48 = vld [vmem:[%s20282_s11 + $0xb50] sm:$0xf0]  ;;  %v9988_v59 = vadd.f32 %v9987_v14, %v9975_v29  ;;  %v10000_v54 = vpop.f32.mrf.mxu3  ;;  %v9976_v61 = vpop.f32.mrf.mxu1 }
 0x20e   : > { %10239 = vmatpush.bf16.msra.mxu2 %v13784_v27  ;;  %v13477_v27 = vld [vmem:[%s20282_s11 + $0x970] sm:$0xf0]  ;;  %v18692_v31 = vld [vmem:[%s20282_s11 + $0xc64] sm:$0xf] }
 0x20f   : > { %10252 = vmatpush.bf16.msra.mxu3 %v13912_v53  ;;  %v13605_v53 = vld [vmem:[%s20282_s11 + $0xa70] sm:$0xf0]  ;;  %v13480_v49 = vor.u32 %v18596_v26, %v13477_v27  ;;  %v18624_v45 = vld [vmem:[%s20282_s11 + $0xa44] sm:$0xf]  ;;  %v13864_v22 = vor.u32 %v18692_v31, %v13861_v20 }
 0x210   : > { %v13608_v25 = vor.u32 %v18628_v40, %v13605_v53  ;;  %v18656_v55 = vld [vmem:[%s20282_s11 + $0xb44] sm:$0xf]  ;;  %v13445_v40 = vld [vmem:[%s20282_s11 + $0x930] sm:$0xf0] }
 0x211   : > { %10214 = vmatpush.bf16.msra.mxu0 %v13512_v58  ;;  %10227 = vmatpush.bf16.msra.mxu1 %v13640_v50  ;;  %v13736_v58 = vor.u32 %v18660_v24, %v13733_v15  ;;  %v18592_v50 = vld [vmem:[%s20282_s11 + $0x944] sm:$0xf]  ;;  %v13720_v26 = vor.u32 %v18656_v55, %v13717_v48  ;;  %v13573_v53 = vld [vmem:[%s20282_s11 + $0xa30] sm:$0xf0] }
 0x212   : > { %10240 = vmatpush.bf16.msra.mxu2 %v13768_v44  ;;  %v13461_v44 = vld [vmem:[%s20282_s11 + $0x950] sm:$0xf0]  ;;  %v18688_v62 = vld [vmem:[%s20282_s11 + $0xc44] sm:$0xf] }
 0x213   : > { %10253 = vmatpush.bf16.msra.mxu3 %v13896_v13  ;;  %v13589_v13 = vld [vmem:[%s20282_s11 + $0xa50] sm:$0xf0]  ;;  %v18588_v27 = vld [vmem:[%s20282_s11 + $0x924] sm:$0xf]  ;;  %v13848_v29 = vor.u32 %v18688_v62, %v13845_v60 }
 0x214   : > { %v18652_v24 = vld [vmem:[%s20282_s11 + $0xb24] sm:$0xf]  ;;  %v13701_v15 = vld [vmem:[%s20282_s11 + $0xb30] sm:$0xf0] }
 0x215   : > { %10215 = vmatpush.bf16.msra.mxu0 %v13496_v1  ;;  %10228 = vmatpush.bf16.msra.mxu1 %v13624_v57  ;;  %v13464_v1 = vor.u32 %v18592_v50, %v13461_v44  ;;  %v21403_v57 = vadd.f32 %v10000_v54, %v9988_v59  ;;  %v18684_v31 = vld [vmem:[%s20282_s11 + $0xc24] sm:$0xf]  ;;  %v13829_v20 = vld [vmem:[%s20282_s11 + $0xc30] sm:$0xf0]  ;;  %v13704_v44 = vor.u32 %v18652_v24, %v13701_v15  ;;  %v9989_v54 = vpop.f32.mrf.mxu2 }
 0x216   : > { %10241 = vmatpush.bf16.msra.mxu2 %v13752_v21  ;;  %v13592_v21 = vor.u32 %v18624_v45, %v13589_v13  ;;  %v18616_v45 = vld [vmem:[%s20282_s11 + $0xa04] sm:$0xf]  ;;  %v13832_v13 = vor.u32 %v18684_v31, %v13829_v20  ;;  %v13685_v55 = vld [vmem:[%s20282_s11 + $0xb10] sm:$0xf0] }
 0x217   : > { %10254 = vmatpush.bf16.msra.mxu3 %v13880_v47  ;;  %v18620_v47 = vld [vmem:[%s20282_s11 + $0xa24] sm:$0xf]  ;;  %v13813_v59 = vld [vmem:[%s20282_s11 + $0xc10] sm:$0xf0] }
 0x218   : > { %v13576_v50 = vor.u32 %v18620_v47, %v13573_v53  ;;  %v18648_v14 = vld [vmem:[%s20282_s11 + $0xb04] sm:$0xf]  ;;  %v14053_v60 = vld [vmem:[%s20282_s11 + $0xdf0] sm:$0xf0] }
 0x219   : > { %10216 = vmatpush.bf16.msra.mxu0 %v13480_v49  ;;  %10229 = vmatpush.bf16.msra.mxu1 %v13608_v25  ;;  %v13448_v49 = vor.u32 %v18588_v27, %v13445_v40  ;;  %v18584_v25 = vld [vmem:[%s20282_s11 + $0x904] sm:$0xf]  ;;  %v14309_v27 = vld [vmem:[%s20282_s11 + $0xff0] sm:$0xf0]  ;;  %v13688_v47 = vor.u32 %v18648_v14, %v13685_v55 }
 0x21a   : > { %10242 = vmatpush.bf16.msra.mxu2 %v13736_v58  ;;  %v13429_v58 = vld [vmem:[%s20282_s11 + $0x910] sm:$0xf0]  ;;  %v18680_v48 = vld [vmem:[%s20282_s11 + $0xc04] sm:$0xf] }
 0x21b   : > { %10255 = vmatpush.bf16.msra.mxu3 %v13864_v22  ;;  %v13557_v22 = vld [vmem:[%s20282_s11 + $0xa10] sm:$0xf0]  ;;  %v18740_v62 = vld [vmem:[%s20282_s11 + $0xde4] sm:$0xf]  ;;  %v13432_v61 = vor.u32 %v18584_v25, %v13429_v58  ;;  %v13816_v24 = vor.u32 %v18680_v48, %v13813_v59 }
 0x21c   : > { %v18772_v63 = vld [vmem:[%s20282_s11 + $0xee4] sm:$0xf]  ;;  %v13560_v40 = vor.u32 %v18616_v45, %v13557_v22  ;;  %v14437_v53 = vld [vmem:[%s20282_s11 + $0x10f0] sm:$0xf0]  ;;  %v14056_v15 = vor.u32 %v18740_v62, %v14053_v60 }
 0x21d   : > { %10217 = vmatpush.bf16.msra.mxu0 %v13464_v1  ;;  %10230 = vmatpush.bf16.msra.mxu1 %v13592_v21  ;;  %v10002_v1 = vpop.f32.mrf.mxu3  ;;  %v14181_v21 = vld [vmem:[%s20282_s11 + $0xef0] sm:$0xf0]  ;;  %v18768_v58 = vld [vmem:[%s20282_s11 + $0xec4] sm:$0xf] }
 0x21e   : > { %10243 = vmatpush.bf16.msra.mxu2 %v13720_v26  ;;  %v18804_v26 = vld [vmem:[%s20282_s11 + $0xfe4] sm:$0xf]  ;;  %v14184_v31 = vor.u32 %v18772_v63, %v14181_v21  ;;  %v14037_v25 = vld [vmem:[%s20282_s11 + $0xdd0] sm:$0xf0] }
 0x21f   : > { %10256 = vmatpush.bf16.msra.mxu3 %v13848_v29  ;;  %v18836_v29 = vld [vmem:[%s20282_s11 + $0x10e4] sm:$0xf]  ;;  %v14312_v20 = vor.u32 %v18804_v26, %v14309_v27  ;;  %v14293_v22 = vld [vmem:[%s20282_s11 + $0xfd0] sm:$0xf0] }
 0x220   : > { %v18800_v45 = vld [vmem:[%s20282_s11 + $0xfc4] sm:$0xf]  ;;  %v14021_v62 = vld [vmem:[%s20282_s11 + $0xdb0] sm:$0xf0] }
 0x221   : > { %10218 = vmatpush.bf16.msra.mxu0 %v13448_v49  ;;  %10231 = vmatpush.bf16.msra.mxu1 %v13576_v50  ;;  %v18736_v49 = vld [vmem:[%s20282_s11 + $0xdc4] sm:$0xf]  ;;  %v14440_v50 = vor.u32 %v18836_v29, %v14437_v53  ;;  %v14296_v59 = vor.u32 %v18800_v45, %v14293_v22  ;;  %v14149_v1 = vld [vmem:[%s20282_s11 + $0xeb0] sm:$0xf0] }
 0x222   : > { %10244 = vmatpush.bf16.msra.mxu2 %v13704_v44  ;;  %v14165_v44 = vld [vmem:[%s20282_s11 + $0xed0] sm:$0xf0]  ;;  %v18832_v14 = vld [vmem:[%s20282_s11 + $0x10c4] sm:$0xf]  ;;  %v14040_v55 = vor.u32 %v18736_v49, %v14037_v25 }
 0x223   : > { %10257 = vmatpush.bf16.msra.mxu3 %v13832_v13  ;;  %v14421_v13 = vld [vmem:[%s20282_s11 + $0x10d0] sm:$0xf0]  ;;  %v14168_v48 = vor.u32 %v18768_v58, %v14165_v44  ;;  %v18732_v54 = vld [vmem:[%s20282_s11 + $0xda4] sm:$0xf] }
 0x224   : > { %v18764_v60 = vld [vmem:[%s20282_s11 + $0xea4] sm:$0xf]  ;;  %v14424_v63 = vor.u32 %v18832_v14, %v14421_v13  ;;  %v14277_v21 = vld [vmem:[%s20282_s11 + $0xfb0] sm:$0xf0]  ;;  %v10013_v58 = vpop.f32.mrf.mxu0 }
 0x225   : > { %10219 = vmatpush.bf16.msra.mxu0 %v13432_v61  ;;  %10232 = vmatpush.bf16.msra.mxu1 %v13560_v40  ;;  %v18796_v61 = vld [vmem:[%s20282_s11 + $0xfa4] sm:$0xf]  ;;  %v14405_v27 = vld [vmem:[%s20282_s11 + $0x10b0] sm:$0xf0]  ;;  %v14024_v40 = vor.u32 %v18732_v54, %v14021_v62  ;;  %v10014_v45 = vadd.f32 %v10013_v58, %v21403_v57 }
 0x226   : > { %10245 = vmatpush.bf16.msra.mxu2 %v13688_v47  ;;  %v18828_v26 = vld [vmem:[%s20282_s11 + $0x10a4] sm:$0xf]  ;;  %v14152_v47 = vor.u32 %v18764_v60, %v14149_v1  ;;  %v14280_v29 = vor.u32 %v18796_v61, %v14277_v21  ;;  %v14261_v25 = vld [vmem:[%s20282_s11 + $0xf90] sm:$0xf0] }
 0x227   : > { %10258 = vmatpush.bf16.msra.mxu3 %v13816_v24  ;;  %v18728_v53 = vld [vmem:[%s20282_s11 + $0xd84] sm:$0xf]  ;;  %v14005_v24 = vld [vmem:[%s20282_s11 + $0xd90] sm:$0xf0] }
 0x228   : > { %10220 = vmatmul.bf16.vlgmr.msra.gmra.mxu0 %v20533_v12  ;;  %10233 = vmatmul.bf16.vlgmr.msra.gmra.mxu1 %v20531_v11  ;;  %v18792_v49 = vld [vmem:[%s20282_s11 + $0xf84] sm:$0xf]  ;;  %v14389_v44 = vld [vmem:[%s20282_s11 + $0x1090] sm:$0xf0]  ;;  %v14008_v22 = vor.u32 %v18728_v53, %v14005_v24 }
 0x229   : > { %10264 = vmatpush.bf16.msrb.mxu0 %v14056_v15  ;;  %10277 = vmatpush.bf16.msrb.mxu1 %v14184_v31  ;;  %v18760_v15 = vld [vmem:[%s20282_s11 + $0xe84] sm:$0xf]  ;;  %v14408_v31 = vor.u32 %v18828_v26, %v14405_v27  ;;  %v10026_v14 = vpop.f32.mrf.mxu1  ;;  %v14245_v57 = vld [vmem:[%s20282_s11 + $0xf70] sm:$0xf0] }
 0x22a   : > { %10290 = vmatpush.bf16.msrb.mxu2 %v14312_v20  ;;  %10259 = vmatmul.bf16.vlgmr.msra.gmra.mxu3 %v20552_v32  ;;  %v14133_v20 = vld [vmem:[%s20282_s11 + $0xe90] sm:$0xf0]  ;;  %v18756_v54 = vld [vmem:[%s20282_s11 + $0xe64] sm:$0xf]  ;;  %v10027_v60 = vadd.f32 %v10026_v14, %v10014_v45 }
 0x22b   : > { %10303 = vmatpush.bf16.msrb.mxu3 %v14440_v50  ;;  %10246 = vmatmul.bf16.vlgmr.msra.gmra.mxu2 %v20539_v17  ;;  %v18824_v50 = vld [vmem:[%s20282_s11 + $0x1084] sm:$0xf]  ;;  %v14136_v13 = vor.u32 %v18760_v15, %v14133_v20  ;;  %v14373_v21 = vld [vmem:[%s20282_s11 + $0x1070] sm:$0xf0] }
 0x22c   : > { %v14392_v62 = vor.u32 %v18824_v50, %v14389_v44  ;;  %v18788_v1 = vld [vmem:[%s20282_s11 + $0xf64] sm:$0xf]  ;;  %v10039_v15 = vpop.f32.mrf.mxu2  ;;  %v14357_v44 = vld [vmem:[%s20282_s11 + $0x1050] sm:$0xf0]  ;;  %v10015_v45 = vpop.f32.mrf.mxu0 }
 0x22d   : > { %10265 = vmatpush.bf16.msrb.mxu0 %v14040_v55  ;;  %10278 = vmatpush.bf16.msrb.mxu1 %v14168_v48  ;;  %v14264_v55 = vor.u32 %v18792_v49, %v14261_v25  ;;  %v18724_v48 = vld [vmem:[%s20282_s11 + $0xd64] sm:$0xf]  ;;  %v14229_v49 = vld [vmem:[%s20282_s11 + $0xf50] sm:$0xf0]  ;;  %v10040_v25 = vadd.f32 %v10039_v15, %v10027_v60 }
 0x22e   : > { %10291 = vmatpush.bf16.msrb.mxu2 %v14296_v59  ;;  %v13989_v59 = vld [vmem:[%s20282_s11 + $0xd70] sm:$0xf0]  ;;  %v18820_v61 = vld [vmem:[%s20282_s11 + $0x1064] sm:$0xf] }
 0x22f   : > { %10304 = vmatpush.bf16.msrb.mxu3 %v14424_v63  ;;  %v14117_v63 = vld [vmem:[%s20282_s11 + $0xe70] sm:$0xf0]  ;;  %v13992_v26 = vor.u32 %v18724_v48, %v13989_v59  ;;  %v18752_v53 = vld [vmem:[%s20282_s11 + $0xe44] sm:$0xf]  ;;  %v14376_v24 = vor.u32 %v18820_v61, %v14373_v21  ;;  %v10052_v58 = vpop.f32.mrf.mxu3 }
 0x230   : > { %v14120_v27 = vor.u32 %v18756_v54, %v14117_v63  ;;  %v18784_v20 = vld [vmem:[%s20282_s11 + $0xf44] sm:$0xf]  ;;  %v13957_v54 = vld [vmem:[%s20282_s11 + $0xd30] sm:$0xf0] }
 0x231   : > { %10266 = vmatpush.bf16.msrb.mxu0 %v14024_v40  ;;  %10279 = vmatpush.bf16.msrb.mxu1 %v14152_v47  ;;  %v14248_v40 = vor.u32 %v18788_v1, %v14245_v57  ;;  %v18720_v47 = vld [vmem:[%s20282_s11 + $0xd44] sm:$0xf]  ;;  %v10028_v14 = vpop.f32.mrf.mxu1  ;;  %v14232_v48 = vor.u32 %v18784_v20, %v14229_v49  ;;  %v14085_v63 = vld [vmem:[%s20282_s11 + $0xe30] sm:$0xf0] }
 0x232   : > { %10292 = vmatpush.bf16.msrb.mxu2 %v14280_v29  ;;  %v13973_v29 = vld [vmem:[%s20282_s11 + $0xd50] sm:$0xf0]  ;;  %v18816_v50 = vld [vmem:[%s20282_s11 + $0x1044] sm:$0xf] }
 0x233   : > { %10305 = vmatpush.bf16.msrb.mxu3 %v14408_v31  ;;  %v14101_v31 = vld [vmem:[%s20282_s11 + $0xe50] sm:$0xf0]  ;;  %v18716_v59 = vld [vmem:[%s20282_s11 + $0xd24] sm:$0xf]  ;;  %v14360_v60 = vor.u32 %v18816_v50, %v14357_v44 }
 0x234   : > { %v18780_v1 = vld [vmem:[%s20282_s11 + $0xf24] sm:$0xf]  ;;  %v14213_v57 = vld [vmem:[%s20282_s11 + $0xf30] sm:$0xf0] }
 0x235   : > { %10267 = vmatpush.bf16.msrb.mxu0 %v14008_v22  ;;  %10280 = vmatpush.bf16.msrb.mxu1 %v14136_v13  ;;  %v13976_v22 = vor.u32 %v18720_v47, %v13973_v29  ;;  %v21474_v13 = vadd.f32 %v10052_v58, %v10040_v25  ;;  %v18812_v61 = vld [vmem:[%s20282_s11 + $0x1024] sm:$0xf]  ;;  %v14341_v21 = vld [vmem:[%s20282_s11 + $0x1030] sm:$0xf0]  ;;  %v14216_v29 = vor.u32 %v18780_v1, %v14213_v57  ;;  %v10041_v58 = vpop.f32.mrf.mxu2 }
 0x236   : > { %10293 = vmatpush.bf16.msrb.mxu2 %v14264_v55  ;;  %v14104_v55 = vor.u32 %v18752_v53, %v14101_v31  ;;  %v18744_v53 = vld [vmem:[%s20282_s11 + $0xe04] sm:$0xf]  ;;  %v14344_v31 = vor.u32 %v18812_v61, %v14341_v21  ;;  %v14197_v20 = vld [vmem:[%s20282_s11 + $0xf10] sm:$0xf0] }
 0x237   : > { %10306 = vmatpush.bf16.msrb.mxu3 %v14392_v62  ;;  %v18748_v62 = vld [vmem:[%s20282_s11 + $0xe24] sm:$0xf]  ;;  %v14325_v25 = vld [vmem:[%s20282_s11 + $0x1010] sm:$0xf0] }
 0x238   : > { %v14088_v47 = vor.u32 %v18748_v62, %v14085_v63  ;;  %v18776_v15 = vld [vmem:[%s20282_s11 + $0xf04] sm:$0xf]  ;;  %v14565_v44 = vld [vmem:[%s20282_s11 + $0x11f0] sm:$0xf0] }
 0x239   : > { %10268 = vmatpush.bf16.msrb.mxu0 %v13992_v26  ;;  %10281 = vmatpush.bf16.msrb.mxu1 %v14120_v27  ;;  %v13960_v26 = vor.u32 %v18716_v59, %v13957_v54  ;;  %v18712_v27 = vld [vmem:[%s20282_s11 + $0xd04] sm:$0xf]  ;;  %v14821_v59 = vld [vmem:[%s20282_s11 + $0x13f0] sm:$0xf0]  ;;  %v14200_v62 = vor.u32 %v18776_v15, %v14197_v20 }
 0x23a   : > { %10294 = vmatpush.bf16.msrb.mxu2 %v14248_v40  ;;  %v13941_v40 = vld [vmem:[%s20282_s11 + $0xd10] sm:$0xf0]  ;;  %v18808_v49 = vld [vmem:[%s20282_s11 + $0x1004] sm:$0xf] }
 0x23b   : > { %10307 = vmatpush.bf16.msrb.mxu3 %v14376_v24  ;;  %v14069_v24 = vld [vmem:[%s20282_s11 + $0xe10] sm:$0xf0]  ;;  %v18868_v50 = vld [vmem:[%s20282_s11 + $0x11e4] sm:$0xf]  ;;  %v13944_v14 = vor.u32 %v18712_v27, %v13941_v40  ;;  %v14328_v1 = vor.u32 %v18808_v49, %v14325_v25 }
 0x23c   : > { %v18900_v45 = vld [vmem:[%s20282_s11 + $0x12e4] sm:$0xf]  ;;  %v14072_v54 = vor.u32 %v18744_v53, %v14069_v24  ;;  %v14949_v63 = vld [vmem:[%s20282_s11 + $0x14f0] sm:$0xf0]  ;;  %v14568_v57 = vor.u32 %v18868_v50, %v14565_v44 }
 0x23d   : > { %10269 = vmatpush.bf16.msrb.mxu0 %v13976_v22  ;;  %10282 = vmatpush.bf16.msrb.mxu1 %v14104_v55  ;;  %v10054_v22 = vpop.f32.mrf.mxu3  ;;  %v14693_v55 = vld [vmem:[%s20282_s11 + $0x12f0] sm:$0xf0]  ;;  %v18896_v40 = vld [vmem:[%s20282_s11 + $0x12c4] sm:$0xf] }
 0x23e   : > { %10295 = vmatpush.bf16.msrb.mxu2 %v14232_v48  ;;  %v18932_v48 = vld [vmem:[%s20282_s11 + $0x13e4] sm:$0xf]  ;;  %v14696_v61 = vor.u32 %v18900_v45, %v14693_v55  ;;  %v14549_v27 = vld [vmem:[%s20282_s11 + $0x11d0] sm:$0xf0] }
 0x23f   : > { %10308 = vmatpush.bf16.msrb.mxu3 %v14360_v60  ;;  %v18964_v60 = vld [vmem:[%s20282_s11 + $0x14e4] sm:$0xf]  ;;  %v14824_v21 = vor.u32 %v18932_v48, %v14821_v59  ;;  %v14805_v24 = vld [vmem:[%s20282_s11 + $0x13d0] sm:$0xf0] }
 0x240   : > { %v18928_v53 = vld [vmem:[%s20282_s11 + $0x13c4] sm:$0xf]  ;;  %v14533_v50 = vld [vmem:[%s20282_s11 + $0x11b0] sm:$0xf0] }
 0x241   : > { %10270 = vmatpush.bf16.msrb.mxu0 %v13960_v26  ;;  %10283 = vmatpush.bf16.msrb.mxu1 %v14088_v47  ;;  %v18864_v26 = vld [vmem:[%s20282_s11 + $0x11c4] sm:$0xf]  ;;  %v14952_v47 = vor.u32 %v18964_v60, %v14949_v63  ;;  %v14808_v25 = vor.u32 %v18928_v53, %v14805_v24  ;;  %v14661_v22 = vld [vmem:[%s20282_s11 + $0x12b0] sm:$0xf0] }
 0x242   : > { %10296 = vmatpush.bf16.msrb.mxu2 %v14216_v29  ;;  %v14677_v29 = vld [vmem:[%s20282_s11 + $0x12d0] sm:$0xf0]  ;;  %v18960_v15 = vld [vmem:[%s20282_s11 + $0x14c4] sm:$0xf]  ;;  %v14552_v20 = vor.u32 %v18864_v26, %v14549_v27 }
 0x243   : > { %10309 = vmatpush.bf16.msrb.mxu3 %v14344_v31  ;;  %v14933_v31 = vld [vmem:[%s20282_s11 + $0x14d0] sm:$0xf0]  ;;  %v14680_v49 = vor.u32 %v18896_v40, %v14677_v29  ;;  %v18860_v58 = vld [vmem:[%s20282_s11 + $0x11a4] sm:$0xf] }
 0x244   : > { %v18892_v44 = vld [vmem:[%s20282_s11 + $0x12a4] sm:$0xf]  ;;  %v14936_v45 = vor.u32 %v18960_v15, %v14933_v31  ;;  %v14789_v55 = vld [vmem:[%s20282_s11 + $0x13b0] sm:$0xf0] }
 0x245   : > { %10271 = vmatpush.bf16.msrb.mxu0 %v13944_v14  ;;  %10284 = vmatpush.bf16.msrb.mxu1 %v14072_v54  ;;  %v18924_v14 = vld [vmem:[%s20282_s11 + $0x13a4] sm:$0xf]  ;;  %v14917_v59 = vld [vmem:[%s20282_s11 + $0x14b0] sm:$0xf0]  ;;  %v14536_v54 = vor.u32 %v18860_v58, %v14533_v50  ;;  %v10065_v40 = vpop.f32.mrf.mxu0  ;;  %v10078_v15 = vpop.f32.mrf.mxu1 }
 0x246   : > { %10297 = vmatpush.bf16.msrb.mxu2 %v14200_v62  ;;  %v18956_v48 = vld [vmem:[%s20282_s11 + $0x14a4] sm:$0xf]  ;;  %v14664_v62 = vor.u32 %v18892_v44, %v14661_v22  ;;  %v14792_v60 = vor.u32 %v18924_v14, %v14789_v55  ;;  %v14773_v27 = vld [vmem:[%s20282_s11 + $0x1390] sm:$0xf0]  ;;  %v10066_v53 = vadd.f32 %v10065_v40, %v21474_v13 }
 0x247   : > { %10310 = vmatpush.bf16.msrb.mxu3 %v14328_v1  ;;  %v18856_v63 = vld [vmem:[%s20282_s11 + $0x1184] sm:$0xf]  ;;  %v14517_v1 = vld [vmem:[%s20282_s11 + $0x1190] sm:$0xf0] }
 0x248   : > { %10272 = vmatmul.bf16.vlgmr.msrb.gmra.mxu0 %v20558_v37  ;;  %10285 = vmatmul.bf16.vlgmr.msrb.gmra.mxu1 %v20556_v36  ;;  %v18920_v26 = vld [vmem:[%s20282_s11 + $0x1384] sm:$0xf]  ;;  %v14901_v29 = vld [vmem:[%s20282_s11 + $0x1490] sm:$0xf0]  ;;  %v14520_v24 = vor.u32 %v18856_v63, %v14517_v1  ;;  %v10079_v44 = vadd.f32 %v10078_v15, %v10066_v53 }
 0x249   : > { %10316 = vmatpush.bf16.msra.mxu0 %v14568_v57  ;;  %10329 = vmatpush.bf16.msra.mxu1 %v14696_v61  ;;  %v18888_v57 = vld [vmem:[%s20282_s11 + $0x1284] sm:$0xf]  ;;  %v14920_v61 = vor.u32 %v18956_v48, %v14917_v59  ;;  %v14757_v13 = vld [vmem:[%s20282_s11 + $0x1370] sm:$0xf0] }
 0x24a   : > { %10342 = vmatpush.bf16.msra.mxu2 %v14824_v21  ;;  %10311 = vmatmul.bf16.vlgmr.msrb.gmra.mxu3 %v20681_v9  ;;  %v14645_v21 = vld [vmem:[%s20282_s11 + $0x1290] sm:$0xf0]  ;;  %v18884_v58 = vld [vmem:[%s20282_s11 + $0x1264] sm:$0xf] }
 0x24b   : > { %10355 = vmatpush.bf16.msra.mxu3 %v14952_v47  ;;  %10298 = vmatmul.bf16.vlgmr.msrb.gmra.mxu2 %v20560_v38  ;;  %v18952_v47 = vld [vmem:[%s20282_s11 + $0x1484] sm:$0xf]  ;;  %v14648_v31 = vor.u32 %v18888_v57, %v14645_v21  ;;  %v14885_v55 = vld [vmem:[%s20282_s11 + $0x1470] sm:$0xf0] }
 0x24c   : > { %v14904_v50 = vor.u32 %v18952_v47, %v14901_v29  ;;  %v18916_v22 = vld [vmem:[%s20282_s11 + $0x1364] sm:$0xf]  ;;  %v14869_v47 = vld [vmem:[%s20282_s11 + $0x1450] sm:$0xf0] }
 0x24d   : > { %10317 = vmatpush.bf16.msra.mxu0 %v14552_v20  ;;  %10330 = vmatpush.bf16.msra.mxu1 %v14680_v49  ;;  %v14776_v20 = vor.u32 %v18920_v26, %v14773_v27  ;;  %v18852_v49 = vld [vmem:[%s20282_s11 + $0x1164] sm:$0xf]  ;;  %v14741_v26 = vld [vmem:[%s20282_s11 + $0x1350] sm:$0xf0]  ;;  %v21547_v29 = vpop.f32.mrf.mxu3  ;;  %v10067_v53 = vpop.f32.mrf.mxu0 }
 0x24e   : > { %10343 = vmatpush.bf16.msra.mxu2 %v14808_v25  ;;  %v14501_v25 = vld [vmem:[%s20282_s11 + $0x1170] sm:$0xf0]  ;;  %v18948_v14 = vld [vmem:[%s20282_s11 + $0x1464] sm:$0xf]  ;;  %v10091_v57 = vpop.f32.mrf.mxu2  ;;  %v10080_v15 = vpop.f32.mrf.mxu1 }
 0x24f   : > { %10356 = vmatpush.bf16.msra.mxu3 %v14936_v45  ;;  %v14629_v45 = vld [vmem:[%s20282_s11 + $0x1270] sm:$0xf0]  ;;  %v14504_v48 = vor.u32 %v18852_v49, %v14501_v25  ;;  %v18880_v63 = vld [vmem:[%s20282_s11 + $0x1244] sm:$0xf]  ;;  %v14888_v1 = vor.u32 %v18948_v14, %v14885_v55  ;;  %v21543_v27 = vadd.f32 %v10091_v57, %v10079_v44 }
 0x250   : > { %v14632_v59 = vor.u32 %v18884_v58, %v14629_v45  ;;  %v18912_v21 = vld [vmem:[%s20282_s11 + $0x1344] sm:$0xf]  ;;  %v14469_v25 = vld [vmem:[%s20282_s11 + $0x1130] sm:$0xf0] }
 0x251   : > { %10318 = vmatpush.bf16.msra.mxu0 %v14536_v54  ;;  %10331 = vmatpush.bf16.msra.mxu1 %v14664_v62  ;;  %v14760_v54 = vor.u32 %v18916_v22, %v14757_v13  ;;  %v18848_v62 = vld [vmem:[%s20282_s11 + $0x1144] sm:$0xf]  ;;  %v14597_v44 = vld [vmem:[%s20282_s11 + $0x1230] sm:$0xf0] }
 0x252   : > { %10344 = vmatpush.bf16.msra.mxu2 %v14792_v60  ;;  %v14485_v60 = vld [vmem:[%s20282_s11 + $0x1150] sm:$0xf0]  ;;  %v18944_v40 = vld [vmem:[%s20282_s11 + $0x1444] sm:$0xf] }
 0x253   : > { %10357 = vmatpush.bf16.msra.mxu3 %v14920_v61  ;;  %v14613_v61 = vld [vmem:[%s20282_s11 + $0x1250] sm:$0xf0]  ;;  %v18844_v49 = vld [vmem:[%s20282_s11 + $0x1124] sm:$0xf] }
 0x254   : > { %v18876_v58 = vld [vmem:[%s20282_s11 + $0x1224] sm:$0xf]  ;;  %v14725_v22 = vld [vmem:[%s20282_s11 + $0x1330] sm:$0xf0]  ;;  %v14472_v55 = vor.u32 %v18844_v49, %v14469_v25 }
 0x255   : > { %10319 = vmatpush.bf16.msra.mxu0 %v14520_v24  ;;  %10332 = vmatpush.bf16.msra.mxu1 %v14648_v31  ;;  %v14488_v24 = vor.u32 %v18848_v62, %v14485_v60  ;;  %v14616_v31 = vor.u32 %v18880_v63, %v14613_v61  ;;  %v18908_v45 = vld [vmem:[%s20282_s11 + $0x1324] sm:$0xf]  ;;  %v14853_v14 = vld [vmem:[%s20282_s11 + $0x1430] sm:$0xf0]  ;;  %v10106_v15 = vpop.f32.mrf.mxu3 }
 0x256   : > { %10345 = vmatpush.bf16.msra.mxu2 %v14776_v20  ;;  %v14744_v20 = vor.u32 %v18912_v21, %v14741_v26  ;;  %v18940_v13 = vld [vmem:[%s20282_s11 + $0x1424] sm:$0xf]  ;;  %v14728_v62 = vor.u32 %v18908_v45, %v14725_v22  ;;  %v14581_v63 = vld [vmem:[%s20282_s11 + $0x1210] sm:$0xf0] }
 0x257   : > { %10358 = vmatpush.bf16.msra.mxu3 %v14904_v50  ;;  %v14872_v50 = vor.u32 %v18944_v40, %v14869_v47  ;;  %v18872_v60 = vld [vmem:[%s20282_s11 + $0x1204] sm:$0xf]  ;;  %v14856_v57 = vor.u32 %v18940_v13, %v14853_v14  ;;  %v14709_v61 = vld [vmem:[%s20282_s11 + $0x1310] sm:$0xf0]  ;;  %v10093_v40 = vpop.f32.mrf.mxu2 }
 0x258   : > { %v18936_v21 = vld [vmem:[%s20282_s11 + $0x1404] sm:$0xf]  ;;  %v14837_v26 = vld [vmem:[%s20282_s11 + $0x1410] sm:$0xf0] }
 0x259   : > { %10320 = vmatpush.bf16.msra.mxu0 %v14504_v48  ;;  %10333 = vmatpush.bf16.msra.mxu1 %v14632_v59  ;;  %v18840_v48 = vld [vmem:[%s20282_s11 + $0x1104] sm:$0xf]  ;;  %v14453_v59 = vld [vmem:[%s20282_s11 + $0x1110] sm:$0xf0]  ;;  %v14840_v22 = vor.u32 %v18936_v21, %v14837_v26 }
 0x25a   : > { %10346 = vmatpush.bf16.msra.mxu2 %v14760_v54  ;;  %v14600_v54 = vor.u32 %v18876_v58, %v14597_v44  ;;  %v18996_v47 = vld [vmem:[%s20282_s11 + $0x15e4] sm:$0xf]  ;;  %v15077_v53 = vld [vmem:[%s20282_s11 + $0x15f0] sm:$0xf0]  ;;  %v14584_v58 = vor.u32 %v18872_v60, %v14581_v63 }
 0x25b   : > { %10359 = vmatpush.bf16.msra.mxu3 %v14888_v1  ;;  %v18904_v1 = vld [vmem:[%s20282_s11 + $0x1304] sm:$0xf]  ;;  %v15333_v25 = vld [vmem:[%s20282_s11 + $0x17f0] sm:$0xf0]  ;;  %v15080_v13 = vor.u32 %v18996_v47, %v15077_v53 }
 0x25c   : > { %v19060_v49 = vld [vmem:[%s20282_s11 + $0x17e4] sm:$0xf]  ;;  %v15461_v45 = vld [vmem:[%s20282_s11 + $0x18f0] sm:$0xf0] }
 0x25d   : > { %10321 = vmatpush.bf16.msra.mxu0 %v14488_v24  ;;  %10334 = vmatpush.bf16.msra.mxu1 %v14616_v31  ;;  %v19028_v24 = vld [vmem:[%s20282_s11 + $0x16e4] sm:$0xf]  ;;  %v14456_v31 = vor.u32 %v18840_v48, %v14453_v59  ;;  %v15061_v59 = vld [vmem:[%s20282_s11 + $0x15d0] sm:$0xf0] }
 0x25e   : > { %10347 = vmatpush.bf16.msra.mxu2 %v14744_v20  ;;  %v15205_v20 = vld [vmem:[%s20282_s11 + $0x16f0] sm:$0xf0]  ;;  %v19092_v44 = vld [vmem:[%s20282_s11 + $0x18e4] sm:$0xf] }
 0x25f   : > { %10360 = vmatpush.bf16.msra.mxu3 %v14872_v50  ;;  %v14712_v50 = vor.u32 %v18904_v1, %v14709_v61  ;;  %v15208_v14 = vor.u32 %v19028_v24, %v15205_v20  ;;  %v18992_v48 = vld [vmem:[%s20282_s11 + $0x15c4] sm:$0xf]  ;;  %v15317_v63 = vld [vmem:[%s20282_s11 + $0x17d0] sm:$0xf0] }
 0x260   : > { %v19024_v40 = vld [vmem:[%s20282_s11 + $0x16c4] sm:$0xf]  ;;  %v15064_v61 = vor.u32 %v18992_v48, %v15061_v59  ;;  %v15045_v53 = vld [vmem:[%s20282_s11 + $0x15b0] sm:$0xf0] }
 0x261   : > { %10322 = vmatpush.bf16.msra.mxu0 %v14472_v55  ;;  %10335 = vmatpush.bf16.msra.mxu1 %v14600_v54  ;;  %v15336_v55 = vor.u32 %v19060_v49, %v15333_v25  ;;  %v15464_v54 = vor.u32 %v19092_v44, %v15461_v45  ;;  %v19056_v60 = vld [vmem:[%s20282_s11 + $0x17c4] sm:$0xf]  ;;  %v15301_v49 = vld [vmem:[%s20282_s11 + $0x17b0] sm:$0xf0] }
 0x262   : > { %10348 = vmatpush.bf16.msra.mxu2 %v14728_v62  ;;  %v15189_v62 = vld [vmem:[%s20282_s11 + $0x16d0] sm:$0xf0]  ;;  %v19088_v1 = vld [vmem:[%s20282_s11 + $0x18c4] sm:$0xf]  ;;  %v15320_v26 = vor.u32 %v19056_v60, %v15317_v63 }
 0x263   : > { %10361 = vmatpush.bf16.msra.mxu3 %v14856_v57  ;;  %v15445_v57 = vld [vmem:[%s20282_s11 + $0x18d0] sm:$0xf0]  ;;  %v15192_v21 = vor.u32 %v19024_v40, %v15189_v62  ;;  %v18988_v47 = vld [vmem:[%s20282_s11 + $0x15a4] sm:$0xf] }
 0x264   : > { %v19020_v24 = vld [vmem:[%s20282_s11 + $0x16a4] sm:$0xf]  ;;  %v15448_v15 = vor.u32 %v19088_v1, %v15445_v57  ;;  %v15157_v48 = vld [vmem:[%s20282_s11 + $0x1690] sm:$0xf0] }
 0x265   : > { %10323 = vmatpush.bf16.msra.mxu0 %v14456_v31  ;;  %10336 = vmatpush.bf16.msra.mxu1 %v14584_v58  ;;  %v15173_v31 = vld [vmem:[%s20282_s11 + $0x16b0] sm:$0xf0]  ;;  %v19052_v20 = vld [vmem:[%s20282_s11 + $0x17a4] sm:$0xf]  ;;  %v10117_v63 = vpop.f32.mrf.mxu0 }
 0x266   : > { %10349 = vmatpush.bf16.msra.mxu2 %v14712_v50  ;;  %v19084_v25 = vld [vmem:[%s20282_s11 + $0x18a4] sm:$0xf]  ;;  %v15429_v58 = vld [vmem:[%s20282_s11 + $0x18b0] sm:$0xf0]  ;;  %v15048_v50 = vor.u32 %v18988_v47, %v15045_v53  ;;  %v15176_v44 = vor.u32 %v19020_v24, %v15173_v31  ;;  %v15304_v45 = vor.u32 %v19052_v20, %v15301_v49  ;;  %v10118_v47 = vadd.f32 %v10117_v63, %v21547_v29  ;;  %v10130_v53 = vpop.f32.mrf.mxu1 }
 0x267   : > { %10362 = vmatpush.bf16.msra.mxu3 %v14840_v22  ;;  %v18984_v22 = vld [vmem:[%s20282_s11 + $0x1584] sm:$0xf]  ;;  %v15285_v40 = vld [vmem:[%s20282_s11 + $0x1790] sm:$0xf0] }
 0x268   : > { %10324 = vmatmul.bf16.vlgmr.msra.gmra.mxu0 %v20688_v19  ;;  %10337 = vmatmul.bf16.vlgmr.msra.gmra.mxu1 %v20686_v18  ;;  %v19048_v59 = vld [vmem:[%s20282_s11 + $0x1784] sm:$0xf]  ;;  %v15413_v62 = vld [vmem:[%s20282_s11 + $0x1890] sm:$0xf0] }
 0x269   : > { %10368 = vmatpush.bf16.msrb.mxu0 %v15080_v13  ;;  %10381 = vmatpush.bf16.msrb.mxu1 %v15208_v14  ;;  %v15029_v13 = vld [vmem:[%s20282_s11 + $0x1590] sm:$0xf0]  ;;  %v19016_v14 = vld [vmem:[%s20282_s11 + $0x1684] sm:$0xf]  ;;  %v15288_v57 = vor.u32 %v19048_v59, %v15285_v40 }
 0x26a   : > { %10394 = vmatpush.bf16.msrb.mxu2 %v15336_v55  ;;  %10363 = vmatmul.bf16.vlgmr.msra.gmra.mxu3 %v20700_v30  ;;  %v15432_v55 = vor.u32 %v19084_v25, %v15429_v58  ;;  %v15032_v60 = vor.u32 %v18984_v22, %v15029_v13  ;;  %v15160_v1 = vor.u32 %v19016_v14, %v15157_v48  ;;  %v19044_v31 = vld [vmem:[%s20282_s11 + $0x1764] sm:$0xf]  ;;  %v15269_v20 = vld [vmem:[%s20282_s11 + $0x1770] sm:$0xf0] }
 0x26b   : > { %10407 = vmatpush.bf16.msrb.mxu3 %v15464_v54  ;;  %10350 = vmatmul.bf16.vlgmr.msra.gmra.mxu2 %v20693_v23  ;;  %v19080_v54 = vld [vmem:[%s20282_s11 + $0x1884] sm:$0xf]  ;;  %v15397_v25 = vld [vmem:[%s20282_s11 + $0x1870] sm:$0xf0]  ;;  %v10131_v58 = vadd.f32 %v10130_v53, %v10118_v47 }
 0x26c   : > { %v15416_v24 = vor.u32 %v19080_v54, %v15413_v62  ;;  %v19076_v49 = vld [vmem:[%s20282_s11 + $0x1864] sm:$0xf]  ;;  %v14997_v22 = vld [vmem:[%s20282_s11 + $0x1550] sm:$0xf0] }
 0x26d   : > { %10369 = vmatpush.bf16.msrb.mxu0 %v15064_v61  ;;  %10382 = vmatpush.bf16.msrb.mxu1 %v15192_v21  ;;  %v18980_v61 = vld [vmem:[%s20282_s11 + $0x1564] sm:$0xf]  ;;  %v15013_v21 = vld [vmem:[%s20282_s11 + $0x1570] sm:$0xf0]  ;;  %v10156_v62 = vpop.f32.mrf.mxu3 }
 0x26e   : > { %10395 = vmatpush.bf16.msrb.mxu2 %v15320_v26  ;;  %v19012_v26 = vld [vmem:[%s20282_s11 + $0x1664] sm:$0xf]  ;;  %v10143_v14 = vpop.f32.mrf.mxu2  ;;  %v15125_v48 = vld [vmem:[%s20282_s11 + $0x1650] sm:$0xf0] }
 0x26f   : > { %10408 = vmatpush.bf16.msrb.mxu3 %v15448_v15  ;;  %v15141_v15 = vld [vmem:[%s20282_s11 + $0x1670] sm:$0xf0]  ;;  %v19008_v13 = vld [vmem:[%s20282_s11 + $0x1644] sm:$0xf]  ;;  %v10144_v54 = vadd.f32 %v10143_v14, %v10131_v58 }
 0x270   : > { %v15144_v29 = vor.u32 %v19012_v26, %v15141_v15  ;;  %v19040_v59 = vld [vmem:[%s20282_s11 + $0x1744] sm:$0xf]  ;;  %v15253_v40 = vld [vmem:[%s20282_s11 + $0x1750] sm:$0xf0]  ;;  %v10132_v15 = vpop.f32.mrf.mxu1 }
 0x271   : > { %10370 = vmatpush.bf16.msrb.mxu0 %v15048_v50  ;;  %10383 = vmatpush.bf16.msrb.mxu1 %v15176_v44  ;;  %v15016_v50 = vor.u32 %v18980_v61, %v15013_v21  ;;  %v15272_v44 = vor.u32 %v19044_v31, %v15269_v20  ;;  %v15381_v63 = vld [vmem:[%s20282_s11 + $0x1850] sm:$0xf0]  ;;  %v10119_v61 = vpop.f32.mrf.mxu0  ;;  %v15128_v21 = vor.u32 %v19008_v13, %v15125_v48  ;;  %v18972_v47 = vld [vmem:[%s20282_s11 + $0x1524] sm:$0xf] }
 0x272   : > { %10396 = vmatpush.bf16.msrb.mxu2 %v15304_v45  ;;  %v18976_v45 = vld [vmem:[%s20282_s11 + $0x1544] sm:$0xf]  ;;  %v15256_v26 = vor.u32 %v19040_v59, %v15253_v40  ;;  %v14981_v53 = vld [vmem:[%s20282_s11 + $0x1530] sm:$0xf0] }
 0x273   : > { %10409 = vmatpush.bf16.msrb.mxu3 %v15432_v55  ;;  %v15400_v55 = vor.u32 %v19076_v49, %v15397_v25  ;;  %v15109_v20 = vld [vmem:[%s20282_s11 + $0x1630] sm:$0xf0]  ;;  %v19036_v49 = vld [vmem:[%s20282_s11 + $0x1724] sm:$0xf] }
 0x274   : > { %v15237_v25 = vld [vmem:[%s20282_s11 + $0x1730] sm:$0xf0]  ;;  %v19068_v58 = vld [vmem:[%s20282_s11 + $0x1824] sm:$0xf] }
 0x275   : > { %10371 = vmatpush.bf16.msrb.mxu0 %v15032_v60  ;;  %10384 = vmatpush.bf16.msrb.mxu1 %v15160_v1  ;;  %v19072_v60 = vld [vmem:[%s20282_s11 + $0x1844] sm:$0xf]  ;;  %v15000_v1 = vor.u32 %v18976_v45, %v14997_v22  ;;  %v14965_v45 = vld [vmem:[%s20282_s11 + $0x1510] sm:$0xf0]  ;;  %v15240_v13 = vor.u32 %v19036_v49, %v15237_v25 }
 0x276   : > { %10397 = vmatpush.bf16.msrb.mxu2 %v15288_v57  ;;  %v21618_v57 = vadd.f32 %v10156_v62, %v10144_v54  ;;  %v15384_v31 = vor.u32 %v19072_v60, %v15381_v63  ;;  %v19000_v14 = vld [vmem:[%s20282_s11 + $0x1604] sm:$0xf]  ;;  %v10145_v59 = vpop.f32.mrf.mxu2  ;;  %v15221_v54 = vld [vmem:[%s20282_s11 + $0x1710] sm:$0xf0]  ;;  %v10158_v63 = vpop.f32.mrf.mxu3 }
 0x277   : > { %10410 = vmatpush.bf16.msrb.mxu3 %v15416_v24  ;;  %v19004_v24 = vld [vmem:[%s20282_s11 + $0x1624] sm:$0xf]  ;;  %v15349_v60 = vld [vmem:[%s20282_s11 + $0x1810] sm:$0xf0] }
 0x278   : > { %v15112_v22 = vor.u32 %v19004_v24, %v15109_v20  ;;  %v19032_v48 = vld [vmem:[%s20282_s11 + $0x1704] sm:$0xf]  ;;  %v15589_v61 = vld [vmem:[%s20282_s11 + $0x19f0] sm:$0xf0] }
 0x279   : > { %10372 = vmatpush.bf16.msrb.mxu0 %v15016_v50  ;;  %10385 = vmatpush.bf16.msrb.mxu1 %v15144_v29  ;;  %v15365_v50 = vld [vmem:[%s20282_s11 + $0x1830] sm:$0xf0]  ;;  %v14984_v29 = vor.u32 %v18972_v47, %v14981_v53  ;;  %v19064_v62 = vld [vmem:[%s20282_s11 + $0x1804] sm:$0xf] }
 0x27a   : > { %10398 = vmatpush.bf16.msrb.mxu2 %v15272_v44  ;;  %v18968_v44 = vld [vmem:[%s20282_s11 + $0x1504] sm:$0xf]  ;;  %v15368_v40 = vor.u32 %v19068_v58, %v15365_v50  ;;  %v15717_v47 = vld [vmem:[%s20282_s11 + $0x1af0] sm:$0xf0]  ;;  %v15352_v25 = vor.u32 %v19064_v62, %v15349_v60 }
 0x27b   : > { %10411 = vmatpush.bf16.msrb.mxu3 %v15400_v55  ;;  %v15093_v55 = vld [vmem:[%s20282_s11 + $0x1610] sm:$0xf0]  ;;  %v19188_v53 = vld [vmem:[%s20282_s11 + $0x1be4] sm:$0xf] }
 0x27c   : > { %v15845_v24 = vld [vmem:[%s20282_s11 + $0x1bf0] sm:$0xf0]  ;;  %v15096_v15 = vor.u32 %v19000_v14, %v15093_v55  ;;  %v19220_v20 = vld [vmem:[%s20282_s11 + $0x1ce4] sm:$0xf] }
 0x27d   : > { %10373 = vmatpush.bf16.msrb.mxu0 %v15000_v1  ;;  %10386 = vmatpush.bf16.msrb.mxu1 %v15128_v21  ;;  %v19124_v1 = vld [vmem:[%s20282_s11 + $0x19e4] sm:$0xf]  ;;  %v15973_v49 = vld [vmem:[%s20282_s11 + $0x1cf0] sm:$0xf0] }
 0x27e   : > { %10399 = vmatpush.bf16.msrb.mxu2 %v15256_v26  ;;  %v19156_v21 = vld [vmem:[%s20282_s11 + $0x1ae4] sm:$0xf]  ;;  %v14968_v26 = vor.u32 %v18968_v44, %v14965_v45  ;;  %v15592_v58 = vor.u32 %v19124_v1, %v15589_v61  ;;  %v15573_v45 = vld [vmem:[%s20282_s11 + $0x19d0] sm:$0xf0] }
 0x27f   : > { %10412 = vmatpush.bf16.msrb.mxu3 %v15384_v31  ;;  %v15224_v31 = vor.u32 %v19032_v48, %v15221_v54  ;;  %v15720_v50 = vor.u32 %v19156_v21, %v15717_v47  ;;  %v19120_v44 = vld [vmem:[%s20282_s11 + $0x19c4] sm:$0xf]  ;;  %v15829_v55 = vld [vmem:[%s20282_s11 + $0x1bd0] sm:$0xf0] }
 0x280   : > { %v19152_v59 = vld [vmem:[%s20282_s11 + $0x1ac4] sm:$0xf]  ;;  %v15576_v54 = vor.u32 %v19120_v44, %v15573_v45  ;;  %v15557_v1 = vld [vmem:[%s20282_s11 + $0x19b0] sm:$0xf0] }
 0x281   : > { %10374 = vmatpush.bf16.msrb.mxu0 %v14984_v29  ;;  %10387 = vmatpush.bf16.msrb.mxu1 %v15112_v22  ;;  %v15848_v29 = vor.u32 %v19188_v53, %v15845_v24  ;;  %v15976_v22 = vor.u32 %v19220_v20, %v15973_v49  ;;  %v19184_v14 = vld [vmem:[%s20282_s11 + $0x1bc4] sm:$0xf]  ;;  %v15813_v53 = vld [vmem:[%s20282_s11 + $0x1bb0] sm:$0xf0] }
 0x282   : > { %10400 = vmatpush.bf16.msrb.mxu2 %v15240_v13  ;;  %v15701_v13 = vld [vmem:[%s20282_s11 + $0x1ad0] sm:$0xf0]  ;;  %v19216_v48 = vld [vmem:[%s20282_s11 + $0x1cc4] sm:$0xf]  ;;  %v15832_v60 = vor.u32 %v19184_v14, %v15829_v55 }
 0x283   : > { %10413 = vmatpush.bf16.msrb.mxu3 %v15368_v40  ;;  %v15957_v40 = vld [vmem:[%s20282_s11 + $0x1cd0] sm:$0xf0]  ;;  %v15704_v62 = vor.u32 %v19152_v59, %v15701_v13  ;;  %v19116_v63 = vld [vmem:[%s20282_s11 + $0x19a4] sm:$0xf] }
 0x284   : > { %v19148_v61 = vld [vmem:[%s20282_s11 + $0x1aa4] sm:$0xf]  ;;  %v15960_v21 = vor.u32 %v19216_v48, %v15957_v40  ;;  %v15669_v44 = vld [vmem:[%s20282_s11 + $0x1a90] sm:$0xf0] }
 0x285   : > { %10375 = vmatpush.bf16.msrb.mxu0 %v14968_v26  ;;  %10388 = vmatpush.bf16.msrb.mxu1 %v15096_v15  ;;  %v15685_v26 = vld [vmem:[%s20282_s11 + $0x1ab0] sm:$0xf0]  ;;  %v19180_v47 = vld [vmem:[%s20282_s11 + $0x1ba4] sm:$0xf]  ;;  %v10182_v40 = vpop.f32.mrf.mxu1 }
 0x286   : > { %10401 = vmatpush.bf16.msrb.mxu2 %v15224_v31  ;;  %v19212_v24 = vld [vmem:[%s20282_s11 + $0x1ca4] sm:$0xf]  ;;  %v15941_v15 = vld [vmem:[%s20282_s11 + $0x1cb0] sm:$0xf0]  ;;  %v15560_v31 = vor.u32 %v19116_v63, %v15557_v1  ;;  %v15688_v20 = vor.u32 %v19148_v61, %v15685_v26  ;;  %v15816_v49 = vor.u32 %v19180_v47, %v15813_v53 }
 0x287   : > { %10414 = vmatpush.bf16.msrb.mxu3 %v15352_v25  ;;  %v19112_v25 = vld [vmem:[%s20282_s11 + $0x1984] sm:$0xf]  ;;  %v15797_v59 = vld [vmem:[%s20282_s11 + $0x1b90] sm:$0xf0] }
 0x288   : > { %10376 = vmatmul.bf16.vlgmr.msrb.gmra.mxu0 %v20704_v42  ;;  %10389 = vmatmul.bf16.vlgmr.msrb.gmra.mxu1 %v20702_v41  ;;  %v19176_v45 = vld [vmem:[%s20282_s11 + $0x1b84] sm:$0xf]  ;;  %v15925_v14 = vld [vmem:[%s20282_s11 + $0x1c90] sm:$0xf0] }
 0x289   : > { %10420 = vmatpush.bf16.msra.mxu0 %v15592_v58  ;;  %10433 = vmatpush.bf16.msra.mxu1 %v15720_v50  ;;  %v15541_v58 = vld [vmem:[%s20282_s11 + $0x1990] sm:$0xf0]  ;;  %v19144_v50 = vld [vmem:[%s20282_s11 + $0x1a84] sm:$0xf] }
 0x28a   : > { %10446 = vmatpush.bf16.msra.mxu2 %v15848_v29  ;;  %10415 = vmatmul.bf16.vlgmr.msrb.gmra.mxu3 %v20836_v46  ;;  %v15944_v29 = vor.u32 %v19212_v24, %v15941_v15  ;;  %v19208_v13 = vld [vmem:[%s20282_s11 + $0x1c84] sm:$0xf]  ;;  %v15544_v48 = vor.u32 %v19112_v25, %v15541_v58  ;;  %v15525_v63 = vld [vmem:[%s20282_s11 + $0x1970] sm:$0xf0] }
 0x28b   : > { %10459 = vmatpush.bf16.msra.mxu3 %v15976_v22  ;;  %10402 = vmatmul.bf16.vlgmr.msrb.gmra.mxu2 %v20706_v43  ;;  %v10169_v22 = vpop.f32.mrf.mxu0  ;;  %v19140_v1 = vld [vmem:[%s20282_s11 + $0x1a64] sm:$0xf]  ;;  %v15928_v61 = vor.u32 %v19208_v13, %v15925_v14  ;;  %v15653_v26 = vld [vmem:[%s20282_s11 + $0x1a70] sm:$0xf0] }
 0x28c   : > { %v10170_v55 = vadd.f32 %v10169_v22, %v21618_v57  ;;  %v19172_v47 = vld [vmem:[%s20282_s11 + $0x1b64] sm:$0xf]  ;;  %v15781_v57 = vld [vmem:[%s20282_s11 + $0x1b70] sm:$0xf0] }
 0x28d   : > { %10421 = vmatpush.bf16.msra.mxu0 %v15576_v54  ;;  %10434 = vmatpush.bf16.msra.mxu1 %v15704_v62  ;;  %v15672_v54 = vor.u32 %v19144_v50, %v15669_v44  ;;  %v15800_v62 = vor.u32 %v19176_v45, %v15797_v59  ;;  %v19204_v53 = vld [vmem:[%s20282_s11 + $0x1c64] sm:$0xf]  ;;  %v15909_v24 = vld [vmem:[%s20282_s11 + $0x1c70] sm:$0xf0]  ;;  %v10208_v13 = vpop.f32.mrf.mxu3 }
 0x28e   : > { %10447 = vmatpush.bf16.msra.mxu2 %v15832_v60  ;;  %v19108_v60 = vld [vmem:[%s20282_s11 + $0x1964] sm:$0xf]  ;;  %v15509_v25 = vld [vmem:[%s20282_s11 + $0x1950] sm:$0xf0]  ;;  %v15912_v50 = vor.u32 %v19204_v53, %v15909_v24 }
 0x28f   : > { %10460 = vmatpush.bf16.msra.mxu3 %v15960_v21  ;;  %v10183_v21 = vadd.f32 %v10182_v40, %v10170_v55  ;;  %v15528_v15 = vor.u32 %v19108_v60, %v15525_v63  ;;  %v19136_v58 = vld [vmem:[%s20282_s11 + $0x1a44] sm:$0xf]  ;;  %v15637_v44 = vld [vmem:[%s20282_s11 + $0x1a50] sm:$0xf0] }
 0x290   : > { %v19168_v45 = vld [vmem:[%s20282_s11 + $0x1b44] sm:$0xf]  ;;  %v15765_v59 = vld [vmem:[%s20282_s11 + $0x1b50] sm:$0xf0]  ;;  %v15640_v60 = vor.u32 %v19136_v58, %v15637_v44 }
 0x291   : > { %10422 = vmatpush.bf16.msra.mxu0 %v15560_v31  ;;  %10435 = vmatpush.bf16.msra.mxu1 %v15688_v20  ;;  %v15656_v31 = vor.u32 %v19140_v1, %v15653_v26  ;;  %v15784_v20 = vor.u32 %v19172_v47, %v15781_v57  ;;  %v19200_v14 = vld [vmem:[%s20282_s11 + $0x1c44] sm:$0xf]  ;;  %v15893_v55 = vld [vmem:[%s20282_s11 + $0x1c50] sm:$0xf0]  ;;  %v15768_v63 = vor.u32 %v19168_v45, %v15765_v59 }
 0x292   : > { %10448 = vmatpush.bf16.msra.mxu2 %v15816_v49  ;;  %v19104_v49 = vld [vmem:[%s20282_s11 + $0x1944] sm:$0xf]  ;;  %v15896_v26 = vor.u32 %v19200_v14, %v15893_v55  ;;  %v15621_v47 = vld [vmem:[%s20282_s11 + $0x1a30] sm:$0xf0] }
 0x293   : > { %10461 = vmatpush.bf16.msra.mxu3 %v15944_v29  ;;  %v10195_v29 = vpop.f32.mrf.mxu2  ;;  %v15512_v40 = vor.u32 %v19104_v49, %v15509_v25  ;;  %v19100_v1 = vld [vmem:[%s20282_s11 + $0x1924] sm:$0xf]  ;;  %v15749_v53 = vld [vmem:[%s20282_s11 + $0x1b30] sm:$0xf0] }
 0x294   : > { %v10196_v22 = vadd.f32 %v10195_v29, %v10183_v21  ;;  %v19132_v21 = vld [vmem:[%s20282_s11 + $0x1a24] sm:$0xf]  ;;  %v15477_v49 = vld [vmem:[%s20282_s11 + $0x1910] sm:$0xf0] }
 0x295   : > { %10423 = vmatpush.bf16.msra.mxu0 %v15544_v48  ;;  %10436 = vmatpush.bf16.msra.mxu1 %v15672_v54  ;;  %v10171_v48 = vpop.f32.mrf.mxu0  ;;  %v10184_v54 = vpop.f32.mrf.mxu1  ;;  %v19164_v57 = vld [vmem:[%s20282_s11 + $0x1b24] sm:$0xf]  ;;  %v15624_v25 = vor.u32 %v19132_v21, %v15621_v47  ;;  %v15605_v29 = vld [vmem:[%s20282_s11 + $0x1a10] sm:$0xf0] }
 0x296   : > { %10449 = vmatpush.bf16.msra.mxu2 %v15800_v62  ;;  %v21689_v62 = vadd.f32 %v10208_v13, %v10196_v22  ;;  %v19196_v24 = vld [vmem:[%s20282_s11 + $0x1c24] sm:$0xf]  ;;  %v15752_v58 = vor.u32 %v19164_v57, %v15749_v53  ;;  %v15733_v59 = vld [vmem:[%s20282_s11 + $0x1b10] sm:$0xf0]  ;;  %v10210_v54 = vpop.f32.mrf.mxu3 }
 0x297   : > { %10462 = vmatpush.bf16.msra.mxu3 %v15928_v61  ;;  %v15493_v61 = vld [vmem:[%s20282_s11 + $0x1930] sm:$0xf0]  ;;  %v19160_v44 = vld [vmem:[%s20282_s11 + $0x1b04] sm:$0xf] }
 0x298   : > { %v19192_v22 = vld [vmem:[%s20282_s11 + $0x1c04] sm:$0xf]  ;;  %v15861_v13 = vld [vmem:[%s20282_s11 + $0x1c10] sm:$0xf0] }
 0x299   : > { %10424 = vmatpush.bf16.msra.mxu0 %v15528_v15  ;;  %10437 = vmatpush.bf16.msra.mxu1 %v15656_v31  ;;  %v15877_v15 = vld [vmem:[%s20282_s11 + $0x1c30] sm:$0xf0]  ;;  %v15496_v31 = vor.u32 %v19100_v1, %v15493_v61  ;;  %v19252_v55 = vld [vmem:[%s20282_s11 + $0x1de4] sm:$0xf]  ;;  %v15864_v53 = vor.u32 %v19192_v22, %v15861_v13 }
 0x29a   : > { %10450 = vmatpush.bf16.msra.mxu2 %v15784_v20  ;;  %v19096_v20 = vld [vmem:[%s20282_s11 + $0x1904] sm:$0xf]  ;;  %v15880_v45 = vor.u32 %v19196_v24, %v15877_v15  ;;  %v16101_v48 = vld [vmem:[%s20282_s11 + $0x1df0] sm:$0xf0] }
 0x29b   : > { %10463 = vmatpush.bf16.msra.mxu3 %v15912_v50  ;;  %v19128_v50 = vld [vmem:[%s20282_s11 + $0x1a04] sm:$0xf]  ;;  %v10197_v14 = vpop.f32.mrf.mxu2  ;;  %v16357_v61 = vld [vmem:[%s20282_s11 + $0x1ff0] sm:$0xf0]  ;;  %v16104_v24 = vor.u32 %v19252_v55, %v16101_v48 }
 0x29c   : > { %v19316_v1 = vld [vmem:[%s20282_s11 + $0x1fe4] sm:$0xf]  ;;  %v15608_v21 = vor.u32 %v19128_v50, %v15605_v29  ;;  %v16485_v57 = vld [vmem:[%s20282_s11 + $0x20f0] sm:$0xf0] }
 0x29d   : > { %10425 = vmatpush.bf16.msra.mxu0 %v15512_v40  ;;  %10438 = vmatpush.bf16.msra.mxu1 %v15640_v60  ;;  %v19284_v40 = vld [vmem:[%s20282_s11 + $0x1ee4] sm:$0xf]  ;;  %v15480_v60 = vor.u32 %v19096_v20, %v15477_v49  ;;  %v16085_v49 = vld [vmem:[%s20282_s11 + $0x1dd0] sm:$0xf0] }
 0x29e   : > { %10451 = vmatpush.bf16.msra.mxu2 %v15768_v63  ;;  %v16229_v63 = vld [vmem:[%s20282_s11 + $0x1ef0] sm:$0xf0]  ;;  %v19348_v47 = vld [vmem:[%s20282_s11 + $0x20e4] sm:$0xf] }
 0x29f   : > { %10464 = vmatpush.bf16.msra.mxu3 %v15896_v26  ;;  %v15736_v26 = vor.u32 %v19160_v44, %v15733_v59  ;;  %v16232_v15 = vor.u32 %v19284_v40, %v16229_v63  ;;  %v19248_v20 = vld [vmem:[%s20282_s11 + $0x1dc4] sm:$0xf]  ;;  %v16341_v29 = vld [vmem:[%s20282_s11 + $0x1fd0] sm:$0xf0] }
 0x2a0   : > { %v19280_v14 = vld [vmem:[%s20282_s11 + $0x1ec4] sm:$0xf]  ;;  %v16088_v59 = vor.u32 %v19248_v20, %v16085_v49  ;;  %v16069_v48 = vld [vmem:[%s20282_s11 + $0x1db0] sm:$0xf0] }
 0x2a1   : > { %10426 = vmatpush.bf16.msra.mxu0 %v15496_v31  ;;  %10439 = vmatpush.bf16.msra.mxu1 %v15624_v25  ;;  %v16360_v31 = vor.u32 %v19316_v1, %v16357_v61  ;;  %v16488_v25 = vor.u32 %v19348_v47, %v16485_v57  ;;  %v19312_v50 = vld [vmem:[%s20282_s11 + $0x1fc4] sm:$0xf]  ;;  %v16325_v1 = vld [vmem:[%s20282_s11 + $0x1fb0] sm:$0xf0] }
 0x2a2   : > { %10452 = vmatpush.bf16.msra.mxu2 %v15752_v58  ;;  %v16213_v58 = vld [vmem:[%s20282_s11 + $0x1ed0] sm:$0xf0]  ;;  %v19344_v44 = vld [vmem:[%s20282_s11 + $0x20c4] sm:$0xf]  ;;  %v16344_v13 = vor.u32 %v19312_v50, %v16341_v29 }
 0x2a3   : > { %10465 = vmatpush.bf16.msra.mxu3 %v15880_v45  ;;  %v16469_v45 = vld [vmem:[%s20282_s11 + $0x20d0] sm:$0xf0]  ;;  %v16216_v22 = vor.u32 %v19280_v14, %v16213_v58  ;;  %v19244_v55 = vld [vmem:[%s20282_s11 + $0x1da4] sm:$0xf] }
 0x2a4   : > { %v19276_v40 = vld [vmem:[%s20282_s11 + $0x1ea4] sm:$0xf]  ;;  %v16472_v54 = vor.u32 %v19344_v44, %v16469_v45  ;;  %v16181_v20 = vld [vmem:[%s20282_s11 + $0x1e90] sm:$0xf0] }
 0x2a5   : > { %10427 = vmatpush.bf16.msra.mxu0 %v15480_v60  ;;  %10440 = vmatpush.bf16.msra.mxu1 %v15608_v21  ;;  %v16197_v60 = vld [vmem:[%s20282_s11 + $0x1eb0] sm:$0xf0]  ;;  %v19308_v63 = vld [vmem:[%s20282_s11 + $0x1fa4] sm:$0xf]  ;;  %v10234_v45 = vpop.f32.mrf.mxu1 }
 0x2a6   : > { %10453 = vmatpush.bf16.msra.mxu2 %v15736_v26  ;;  %v19340_v61 = vld [vmem:[%s20282_s11 + $0x20a4] sm:$0xf]  ;;  %v16453_v21 = vld [vmem:[%s20282_s11 + $0x20b0] sm:$0xf0]  ;;  %v16072_v26 = vor.u32 %v19244_v55, %v16069_v48  ;;  %v16200_v47 = vor.u32 %v19276_v40, %v16197_v60  ;;  %v16328_v57 = vor.u32 %v19308_v63, %v16325_v1 }
 0x2a7   : > { %10466 = vmatpush.bf16.msra.mxu3 %v15864_v53  ;;  %v19240_v53 = vld [vmem:[%s20282_s11 + $0x1d84] sm:$0xf]  ;;  %v16309_v14 = vld [vmem:[%s20282_s11 + $0x1f90] sm:$0xf0] }
 0x2a8   : > { %10428 = vmatmul.bf16.vlgmr.msra.gmra.mxu0 %v20843_v52  ;;  %10441 = vmatmul.bf16.vlgmr.msra.gmra.mxu1 %v20841_v51  ;;  %v19304_v49 = vld [vmem:[%s20282_s11 + $0x1f84] sm:$0xf]  ;;  %v16437_v50 = vld [vmem:[%s20282_s11 + $0x2090] sm:$0xf0] }
 0x2a9   : > { %10472 = vmatpush.bf16.msrb.mxu0 %v16104_v24  ;;  %10485 = vmatpush.bf16.msrb.mxu1 %v16232_v15  ;;  %v16053_v24 = vld [vmem:[%s20282_s11 + $0x1d90] sm:$0xf0]  ;;  %v19272_v15 = vld [vmem:[%s20282_s11 + $0x1e84] sm:$0xf] }
 0x2aa   : > { %10498 = vmatpush.bf16.msrb.mxu2 %v16360_v31  ;;  %10467 = vmatmul.bf16.vlgmr.msra.gmra.mxu3 %v20855_v0  ;;  %v16456_v31 = vor.u32 %v19340_v61, %v16453_v21  ;;  %v19336_v58 = vld [vmem:[%s20282_s11 + $0x2084] sm:$0xf]  ;;  %v16056_v44 = vor.u32 %v19240_v53, %v16053_v24  ;;  %v16037_v55 = vld [vmem:[%s20282_s11 + $0x1d70] sm:$0xf0] }
 0x2ab   : > { %10511 = vmatpush.bf16.msrb.mxu3 %v16488_v25  ;;  %10454 = vmatmul.bf16.vlgmr.msra.gmra.mxu2 %v20848_v56  ;;  %v10221_v25 = vpop.f32.mrf.mxu0  ;;  %v19268_v48 = vld [vmem:[%s20282_s11 + $0x1e64] sm:$0xf]  ;;  %v16440_v40 = vor.u32 %v19336_v58, %v16437_v50  ;;  %v16165_v60 = vld [vmem:[%s20282_s11 + $0x1e70] sm:$0xf0] }
 0x2ac   : > { %v10222_v29 = vadd.f32 %v10221_v25, %v21689_v62  ;;  %v19300_v63 = vld [vmem:[%s20282_s11 + $0x1f64] sm:$0xf]  ;;  %v16293_v62 = vld [vmem:[%s20282_s11 + $0x1f70] sm:$0xf0] }
 0x2ad   : > { %10473 = vmatpush.bf16.msrb.mxu0 %v16088_v59  ;;  %10486 = vmatpush.bf16.msrb.mxu1 %v16216_v22  ;;  %v16184_v59 = vor.u32 %v19272_v15, %v16181_v20  ;;  %v16312_v22 = vor.u32 %v19304_v49, %v16309_v14  ;;  %v19332_v1 = vld [vmem:[%s20282_s11 + $0x2064] sm:$0xf]  ;;  %v16421_v61 = vld [vmem:[%s20282_s11 + $0x2070] sm:$0xf0]  ;;  %v10260_v58 = vpop.f32.mrf.mxu3 }
 0x2ae   : > { %10499 = vmatpush.bf16.msrb.mxu2 %v16344_v13  ;;  %v19236_v13 = vld [vmem:[%s20282_s11 + $0x1d64] sm:$0xf]  ;;  %v16021_v53 = vld [vmem:[%s20282_s11 + $0x1d50] sm:$0xf0]  ;;  %v16424_v15 = vor.u32 %v19332_v1, %v16421_v61 }
 0x2af   : > { %10512 = vmatpush.bf16.msrb.mxu3 %v16472_v54  ;;  %v10235_v54 = vadd.f32 %v10234_v45, %v10222_v29  ;;  %v16040_v21 = vor.u32 %v19236_v13, %v16037_v55  ;;  %v19264_v24 = vld [vmem:[%s20282_s11 + $0x1e44] sm:$0xf]  ;;  %v16149_v20 = vld [vmem:[%s20282_s11 + $0x1e50] sm:$0xf0] }
 0x2b0   : > { %v19296_v49 = vld [vmem:[%s20282_s11 + $0x1f44] sm:$0xf]  ;;  %v16277_v14 = vld [vmem:[%s20282_s11 + $0x1f50] sm:$0xf0]  ;;  %v16152_v13 = vor.u32 %v19264_v24, %v16149_v20 }
 0x2b1   : > { %10474 = vmatpush.bf16.msrb.mxu0 %v16072_v26  ;;  %10487 = vmatpush.bf16.msrb.mxu1 %v16200_v47  ;;  %v16168_v26 = vor.u32 %v19268_v48, %v16165_v60  ;;  %v16296_v47 = vor.u32 %v19300_v63, %v16293_v62  ;;  %v19328_v50 = vld [vmem:[%s20282_s11 + $0x2044] sm:$0xf]  ;;  %v16405_v29 = vld [vmem:[%s20282_s11 + $0x2050] sm:$0xf0]  ;;  %v16280_v55 = vor.u32 %v19296_v49, %v16277_v14 }
 0x2b2   : > { %10500 = vmatpush.bf16.msrb.mxu2 %v16328_v57  ;;  %v19232_v57 = vld [vmem:[%s20282_s11 + $0x1d44] sm:$0xf]  ;;  %v16408_v60 = vor.u32 %v19328_v50, %v16405_v29  ;;  %v16133_v63 = vld [vmem:[%s20282_s11 + $0x1e30] sm:$0xf0] }
 0x2b3   : > { %10513 = vmatpush.bf16.msrb.mxu3 %v16456_v31  ;;  %v10247_v31 = vpop.f32.mrf.mxu2  ;;  %v16024_v45 = vor.u32 %v19232_v57, %v16021_v53  ;;  %v19228_v48 = vld [vmem:[%s20282_s11 + $0x1d24] sm:$0xf]  ;;  %v16261_v1 = vld [vmem:[%s20282_s11 + $0x1f30] sm:$0xf0] }
 0x2b4   : > { %v10248_v25 = vadd.f32 %v10247_v31, %v10235_v54  ;;  %v19260_v54 = vld [vmem:[%s20282_s11 + $0x1e24] sm:$0xf]  ;;  %v15989_v57 = vld [vmem:[%s20282_s11 + $0x1d10] sm:$0xf0] }
 0x2b5   : > { %10475 = vmatpush.bf16.msrb.mxu0 %v16056_v44  ;;  %10488 = vmatpush.bf16.msrb.mxu1 %v16184_v59  ;;  %v10223_v44 = vpop.f32.mrf.mxu0  ;;  %v10236_v59 = vpop.f32.mrf.mxu1  ;;  %v19292_v62 = vld [vmem:[%s20282_s11 + $0x1f24] sm:$0xf]  ;;  %v16136_v53 = vor.u32 %v19260_v54, %v16133_v63  ;;  %v16117_v31 = vld [vmem:[%s20282_s11 + $0x1e10] sm:$0xf0] }
 0x2b6   : > { %10501 = vmatpush.bf16.msrb.mxu2 %v16312_v22  ;;  %v21760_v22 = vadd.f32 %v10260_v58, %v10248_v25  ;;  %v19324_v61 = vld [vmem:[%s20282_s11 + $0x2024] sm:$0xf]  ;;  %v16264_v24 = vor.u32 %v19292_v62, %v16261_v1  ;;  %v16245_v14 = vld [vmem:[%s20282_s11 + $0x1f10] sm:$0xf0]  ;;  %v10262_v59 = vpop.f32.mrf.mxu3 }
 0x2b7   : > { %10514 = vmatpush.bf16.msrb.mxu3 %v16440_v40  ;;  %v16005_v40 = vld [vmem:[%s20282_s11 + $0x1d30] sm:$0xf0]  ;;  %v19288_v20 = vld [vmem:[%s20282_s11 + $0x1f04] sm:$0xf] }
 0x2b8   : > { %v19320_v25 = vld [vmem:[%s20282_s11 + $0x2004] sm:$0xf]  ;;  %v16373_v58 = vld [vmem:[%s20282_s11 + $0x2010] sm:$0xf0] }
 0x2b9   : > { %10476 = vmatpush.bf16.msrb.mxu0 %v16040_v21  ;;  %10489 = vmatpush.bf16.msrb.mxu1 %v16168_v26  ;;  %v16389_v21 = vld [vmem:[%s20282_s11 + $0x2030] sm:$0xf0]  ;;  %v16008_v26 = vor.u32 %v19228_v48, %v16005_v40  ;;  %v19380_v29 = vld [vmem:[%s20282_s11 + $0x21e4] sm:$0xf]  ;;  %v16376_v1 = vor.u32 %v19320_v25, %v16373_v58 }
 0x2ba   : > { %10502 = vmatpush.bf16.msrb.mxu2 %v16296_v47  ;;  %v19224_v47 = vld [vmem:[%s20282_s11 + $0x1d04] sm:$0xf]  ;;  %v16392_v49 = vor.u32 %v19324_v61, %v16389_v21  ;;  %v16613_v44 = vld [vmem:[%s20282_s11 + $0x21f0] sm:$0xf0] }
 0x2bb   : > { %10515 = vmatpush.bf16.msrb.mxu3 %v16424_v15  ;;  %v19256_v15 = vld [vmem:[%s20282_s11 + $0x1e04] sm:$0xf]  ;;  %v10249_v50 = vpop.f32.mrf.mxu2  ;;  %v16869_v40 = vld [vmem:[%s20282_s11 + $0x23f0] sm:$0xf0]  ;;  %v16616_v61 = vor.u32 %v19380_v29, %v16613_v44 }
 0x2bc   : > { %v19444_v48 = vld [vmem:[%s20282_s11 + $0x23e4] sm:$0xf]  ;;  %v16120_v54 = vor.u32 %v19256_v15, %v16117_v31  ;;  %v16997_v62 = vld [vmem:[%s20282_s11 + $0x24f0] sm:$0xf0] }
 0x2bd   : > { %10477 = vmatpush.bf16.msrb.mxu0 %v16024_v45  ;;  %10490 = vmatpush.bf16.msrb.mxu1 %v16152_v13  ;;  %v19412_v45 = vld [vmem:[%s20282_s11 + $0x22e4] sm:$0xf]  ;;  %v15992_v13 = vor.u32 %v19224_v47, %v15989_v57  ;;  %v16597_v57 = vld [vmem:[%s20282_s11 + $0x21d0] sm:$0xf0] }
 0x2be   : > { %10503 = vmatpush.bf16.msrb.mxu2 %v16280_v55  ;;  %v16741_v55 = vld [vmem:[%s20282_s11 + $0x22f0] sm:$0xf0]  ;;  %v19476_v63 = vld [vmem:[%s20282_s11 + $0x24e4] sm:$0xf] }
 0x2bf   : > { %10516 = vmatpush.bf16.msrb.mxu3 %v16408_v60  ;;  %v16248_v60 = vor.u32 %v19288_v20, %v16245_v14  ;;  %v16744_v21 = vor.u32 %v19412_v45, %v16741_v55  ;;  %v19376_v47 = vld [vmem:[%s20282_s11 + $0x21c4] sm:$0xf]  ;;  %v16853_v31 = vld [vmem:[%s20282_s11 + $0x23d0] sm:$0xf0] }
 0x2c0   : > { %v19408_v50 = vld [vmem:[%s20282_s11 + $0x22c4] sm:$0xf]  ;;  %v16600_v14 = vor.u32 %v19376_v47, %v16597_v57  ;;  %v16581_v44 = vld [vmem:[%s20282_s11 + $0x21b0] sm:$0xf0] }
 0x2c1   : > { %10478 = vmatpush.bf16.msrb.mxu0 %v16008_v26  ;;  %10491 = vmatpush.bf16.msrb.mxu1 %v16136_v53  ;;  %v16872_v26 = vor.u32 %v19444_v48, %v16869_v40  ;;  %v17000_v53 = vor.u32 %v19476_v63, %v16997_v62  ;;  %v19440_v15 = vld [vmem:[%s20282_s11 + $0x23c4] sm:$0xf]  ;;  %v16837_v48 = vld [vmem:[%s20282_s11 + $0x23b0] sm:$0xf0] }
 0x2c2   : > { %10504 = vmatpush.bf16.msrb.mxu2 %v16264_v24  ;;  %v16725_v24 = vld [vmem:[%s20282_s11 + $0x22d0] sm:$0xf0]  ;;  %v19472_v20 = vld [vmem:[%s20282_s11 + $0x24c4] sm:$0xf]  ;;  %v16856_v58 = vor.u32 %v19440_v15, %v16853_v31 }
 0x2c3   : > { %10517 = vmatpush.bf16.msrb.mxu3 %v16392_v49  ;;  %v16981_v49 = vld [vmem:[%s20282_s11 + $0x24d0] sm:$0xf0]  ;;  %v16728_v25 = vor.u32 %v19408_v50, %v16725_v24  ;;  %v19372_v29 = vld [vmem:[%s20282_s11 + $0x21a4] sm:$0xf] }
 0x2c4   : > { %v19404_v45 = vld [vmem:[%s20282_s11 + $0x22a4] sm:$0xf]  ;;  %v16984_v59 = vor.u32 %v19472_v20, %v16981_v49  ;;  %v16584_v63 = vor.u32 %v19372_v29, %v16581_v44  ;;  %v16693_v57 = vld [vmem:[%s20282_s11 + $0x2290] sm:$0xf0] }
 0x2c5   : > { %10479 = vmatpush.bf16.msrb.mxu0 %v15992_v13  ;;  %10492 = vmatpush.bf16.msrb.mxu1 %v16120_v54  ;;  %v16709_v13 = vld [vmem:[%s20282_s11 + $0x22b0] sm:$0xf0]  ;;  %v19436_v55 = vld [vmem:[%s20282_s11 + $0x23a4] sm:$0xf]  ;;  %v10273_v24 = vpop.f32.mrf.mxu0 }
 0x2c6   : > { %10505 = vmatpush.bf16.msrb.mxu2 %v16248_v60  ;;  %v19468_v40 = vld [vmem:[%s20282_s11 + $0x24a4] sm:$0xf]  ;;  %v16965_v54 = vld [vmem:[%s20282_s11 + $0x24b0] sm:$0xf0]  ;;  %v23943_v60 = vld [vmem:[#allocation17_spill] sm:$0xff]  ;;  %v16712_v62 = vor.u32 %v19404_v45, %v16709_v13  ;;  %v10274_v20 = vadd.f32 %v10273_v24, %v21760_v22 }
 0x2c7   : > { %10518 = vmatpush.bf16.msrb.mxu3 %v16376_v1  ;;  %v16840_v1 = vor.u32 %v19436_v55, %v16837_v48  ;;  %v16968_v47 = vor.u32 %v19468_v40, %v16965_v54  ;;  %v19432_v50 = vld [vmem:[%s20282_s11 + $0x2384] sm:$0xf]  ;;  %v16949_v31 = vld [vmem:[%s20282_s11 + $0x2490] sm:$0xf0] }
 0x2c8   : > { %10480 = vmatmul.bf16.vlgmr.msrb.gmra.mxu0 %v20859_v4  ;;  %10493 = vmatmul.bf16.vlgmr.msrb.gmra.mxu1 %v20857_v3  ;;  %v19464_v15 = vld [vmem:[%s20282_s11 + $0x2484] sm:$0xf]  ;;  %v16549_v44 = vld [vmem:[%s20282_s11 + $0x2170] sm:$0xf0] }
 0x2c9   : > { %10524 = vmatpush.bf16.msra.mxu0 %v16616_v61  ;;  %10537 = vmatpush.bf16.msra.mxu1 %v16744_v21  ;;  %v19368_v61 = vld [vmem:[%s20282_s11 + $0x2184] sm:$0xf]  ;;  %v16565_v21 = vld [vmem:[%s20282_s11 + $0x2190] sm:$0xf0] }
 0x2ca   : > { %10550 = vmatpush.bf16.msra.mxu2 %v16872_v26  ;;  %10519 = vmatmul.bf16.vlgmr.msrb.gmra.mxu3 %v23943_v60  ;;  %v19400_v26 = vld [vmem:[%s20282_s11 + $0x2284] sm:$0xf]  ;;  %v16568_v49 = vor.u32 %v19368_v61, %v16565_v21  ;;  %v16677_v55 = vld [vmem:[%s20282_s11 + $0x2270] sm:$0xf0] }
 0x2cb   : > { %10563 = vmatpush.bf16.msra.mxu3 %v17000_v53  ;;  %10506 = vmatmul.bf16.vlgmr.msrb.gmra.mxu2 %v20861_v5  ;;  %v16821_v53 = vld [vmem:[%s20282_s11 + $0x2390] sm:$0xf0]  ;;  %v19364_v29 = vld [vmem:[%s20282_s11 + $0x2164] sm:$0xf] }
 0x2cc   : > { %v19396_v45 = vld [vmem:[%s20282_s11 + $0x2264] sm:$0xf]  ;;  %v16805_v22 = vld [vmem:[%s20282_s11 + $0x2370] sm:$0xf0] }
 0x2cd   : > { %10525 = vmatpush.bf16.msra.mxu0 %v16600_v14  ;;  %10538 = vmatpush.bf16.msra.mxu1 %v16728_v25  ;;  %v10286_v14 = vpop.f32.mrf.mxu1  ;;  %v16696_v25 = vor.u32 %v19400_v26, %v16693_v57  ;;  %v19428_v48 = vld [vmem:[%s20282_s11 + $0x2364] sm:$0xf]  ;;  %v16933_v54 = vld [vmem:[%s20282_s11 + $0x2470] sm:$0xf0] }
 0x2ce   : > { %10551 = vmatpush.bf16.msra.mxu2 %v16856_v58  ;;  %v16824_v58 = vor.u32 %v19432_v50, %v16821_v53  ;;  %v10287_v13 = vadd.f32 %v10286_v14, %v10274_v20  ;;  %v19460_v40 = vld [vmem:[%s20282_s11 + $0x2464] sm:$0xf]  ;;  %v16533_v21 = vld [vmem:[%s20282_s11 + $0x2150] sm:$0xf0]  ;;  %v10299_v57 = vpop.f32.mrf.mxu2  ;;  %v10275_v14 = vpop.f32.mrf.mxu0 }
 0x2cf   : > { %10564 = vmatpush.bf16.msra.mxu3 %v16984_v59  ;;  %v16952_v59 = vor.u32 %v19464_v15, %v16949_v31  ;;  %v19360_v61 = vld [vmem:[%s20282_s11 + $0x2144] sm:$0xf]  ;;  %v16661_v50 = vld [vmem:[%s20282_s11 + $0x2250] sm:$0xf0]  ;;  %v10312_v31 = vpop.f32.mrf.mxu3 }
 0x2d0   : > { %v19392_v26 = vld [vmem:[%s20282_s11 + $0x2244] sm:$0xf]  ;;  %v16789_v24 = vld [vmem:[%s20282_s11 + $0x2350] sm:$0xf0]  ;;  %v10300_v15 = vadd.f32 %v10299_v57, %v10287_v13 }
 0x2d1   : > { %10526 = vmatpush.bf16.msra.mxu0 %v16584_v63  ;;  %10539 = vmatpush.bf16.msra.mxu1 %v16712_v62  ;;  %v16552_v63 = vor.u32 %v19364_v29, %v16549_v44  ;;  %v16680_v62 = vor.u32 %v19396_v45, %v16677_v55  ;;  %v19424_v53 = vld [vmem:[%s20282_s11 + $0x2344] sm:$0xf]  ;;  %v16664_v44 = vor.u32 %v19392_v26, %v16661_v50  ;;  %v16517_v13 = vld [vmem:[%s20282_s11 + $0x2130] sm:$0xf0] }
 0x2d2   : > { %10552 = vmatpush.bf16.msra.mxu2 %v16840_v1  ;;  %v16808_v1 = vor.u32 %v19428_v48, %v16805_v22  ;;  %v19456_v20 = vld [vmem:[%s20282_s11 + $0x2444] sm:$0xf]  ;;  %v21831_v29 = vadd.f32 %v10312_v31, %v10300_v15  ;;  %v16792_v45 = vor.u32 %v19424_v53, %v16789_v24  ;;  %v16645_v22 = vld [vmem:[%s20282_s11 + $0x2230] sm:$0xf0] }
 0x2d3   : > { %10565 = vmatpush.bf16.msra.mxu3 %v16968_v47  ;;  %v16936_v47 = vor.u32 %v19460_v40, %v16933_v54  ;;  %v19388_v55 = vld [vmem:[%s20282_s11 + $0x2224] sm:$0xf]  ;;  %v16773_v54 = vld [vmem:[%s20282_s11 + $0x2330] sm:$0xf0] }
 0x2d4   : > { %v19420_v40 = vld [vmem:[%s20282_s11 + $0x2324] sm:$0xf]  ;;  %v16648_v26 = vor.u32 %v19388_v55, %v16645_v22  ;;  %v16629_v50 = vld [vmem:[%s20282_s11 + $0x2210] sm:$0xf0] }
 0x2d5   : > { %10527 = vmatpush.bf16.msra.mxu0 %v16568_v49  ;;  %10540 = vmatpush.bf16.msra.mxu1 %v16696_v25  ;;  %v16917_v49 = vld [vmem:[%s20282_s11 + $0x2450] sm:$0xf0]  ;;  %v16536_v25 = vor.u32 %v19360_v61, %v16533_v21  ;;  %v19352_v61 = vld [vmem:[%s20282_s11 + $0x2104] sm:$0xf] }
 0x2d6   : > { %10553 = vmatpush.bf16.msra.mxu2 %v16824_v58  ;;  %v10288_v58 = vpop.f32.mrf.mxu1  ;;  %v16920_v48 = vor.u32 %v19456_v20, %v16917_v49  ;;  %v16501_v21 = vld [vmem:[%s20282_s11 + $0x2110] sm:$0xf0]  ;;  %v19384_v57 = vld [vmem:[%s20282_s11 + $0x2204] sm:$0xf]  ;;  %v10301_v49 = vpop.f32.mrf.mxu2 }
 0x2d7   : > { %10566 = vmatpush.bf16.msra.mxu3 %v16952_v59  ;;  %v19356_v59 = vld [vmem:[%s20282_s11 + $0x2124] sm:$0xf]  ;;  %v16757_v15 = vld [vmem:[%s20282_s11 + $0x2310] sm:$0xf0] }
 0x2d8   : > { %v19416_v53 = vld [vmem:[%s20282_s11 + $0x2304] sm:$0xf]  ;;  %v16885_v20 = vld [vmem:[%s20282_s11 + $0x2410] sm:$0xf0] }
 0x2d9   : > { %10528 = vmatpush.bf16.msra.mxu0 %v16552_v63  ;;  %10541 = vmatpush.bf16.msra.mxu1 %v16680_v62  ;;  %v19452_v63 = vld [vmem:[%s20282_s11 + $0x2424] sm:$0xf]  ;;  %v16901_v62 = vld [vmem:[%s20282_s11 + $0x2430] sm:$0xf0]  ;;  %v16760_v22 = vor.u32 %v19416_v53, %v16757_v15 }
 0x2da   : > { %10554 = vmatpush.bf16.msra.mxu2 %v16808_v1  ;;  %v16520_v1 = vor.u32 %v19356_v59, %v16517_v13  ;;  %v16904_v24 = vor.u32 %v19452_v63, %v16901_v62  ;;  %v19448_v31 = vld [vmem:[%s20282_s11 + $0x2404] sm:$0xf]  ;;  %v17253_v59 = vld [vmem:[%s20282_s11 + $0x26f0] sm:$0xf0] }
 0x2db   : > { %10567 = vmatpush.bf16.msra.mxu3 %v16936_v47  ;;  %v16776_v47 = vor.u32 %v19420_v40, %v16773_v54  ;;  %v19508_v14 = vld [vmem:[%s20282_s11 + $0x25e4] sm:$0xf]  ;;  %v17381_v55 = vld [vmem:[%s20282_s11 + $0x27f0] sm:$0xf0]  ;;  %v16888_v63 = vor.u32 %v19448_v31, %v16885_v20 }
 0x2dc   : > { %v19540_v58 = vld [vmem:[%s20282_s11 + $0x26e4] sm:$0xf]  ;;  %v17509_v54 = vld [vmem:[%s20282_s11 + $0x28f0] sm:$0xf0] }
 0x2dd   : > { %10529 = vmatpush.bf16.msra.mxu0 %v16536_v25  ;;  %10542 = vmatpush.bf16.msra.mxu1 %v16664_v44  ;;  %v17125_v25 = vld [vmem:[%s20282_s11 + $0x25f0] sm:$0xf0]  ;;  %v10314_v44 = vpop.f32.mrf.mxu3  ;;  %v19572_v13 = vld [vmem:[%s20282_s11 + $0x27e4] sm:$0xf] }
 0x2de   : > { %10555 = vmatpush.bf16.msra.mxu2 %v16792_v45  ;;  %v16504_v45 = vor.u32 %v19352_v61, %v16501_v21  ;;  %v19604_v40 = vld [vmem:[%s20282_s11 + $0x28e4] sm:$0xf]  ;;  %v17128_v62 = vor.u32 %v19508_v14, %v17125_v25  ;;  %v17384_v61 = vor.u32 %v19572_v13, %v17381_v55  ;;  %v17109_v49 = vld [vmem:[%s20282_s11 + $0x25d0] sm:$0xf0] }
 0x2df   : > { %10568 = vmatpush.bf16.msra.mxu3 %v16920_v48  ;;  %v16632_v48 = vor.u32 %v19384_v57, %v16629_v50  ;;  %v19504_v21 = vld [vmem:[%s20282_s11 + $0x25c4] sm:$0xf]  ;;  %v17365_v50 = vld [vmem:[%s20282_s11 + $0x27d0] sm:$0xf0] }
 0x2e0   : > { %v19536_v44 = vld [vmem:[%s20282_s11 + $0x26c4] sm:$0xf]  ;;  %v17112_v15 = vor.u32 %v19504_v21, %v17109_v49  ;;  %v17093_v25 = vld [vmem:[%s20282_s11 + $0x25b0] sm:$0xf0] }
 0x2e1   : > { %10530 = vmatpush.bf16.msra.mxu0 %v16520_v1  ;;  %10543 = vmatpush.bf16.msra.mxu1 %v16648_v26  ;;  %v17256_v1 = vor.u32 %v19540_v58, %v17253_v59  ;;  %v17512_v26 = vor.u32 %v19604_v40, %v17509_v54  ;;  %v19568_v57 = vld [vmem:[%s20282_s11 + $0x27c4] sm:$0xf]  ;;  %v17221_v13 = vld [vmem:[%s20282_s11 + $0x26b0] sm:$0xf0] }
 0x2e2   : > { %10556 = vmatpush.bf16.msra.mxu2 %v16776_v47  ;;  %v17237_v47 = vld [vmem:[%s20282_s11 + $0x26d0] sm:$0xf0]  ;;  %v19600_v53 = vld [vmem:[%s20282_s11 + $0x28c4] sm:$0xf]  ;;  %v17368_v20 = vor.u32 %v19568_v57, %v17365_v50 }
 0x2e3   : > { %10569 = vmatpush.bf16.msra.mxu3 %v16904_v24  ;;  %v17493_v24 = vld [vmem:[%s20282_s11 + $0x28d0] sm:$0xf0]  ;;  %v17240_v31 = vor.u32 %v19536_v44, %v17237_v47  ;;  %v19500_v14 = vld [vmem:[%s20282_s11 + $0x25a4] sm:$0xf] }
 0x2e4   : > { %v19532_v58 = vld [vmem:[%s20282_s11 + $0x26a4] sm:$0xf]  ;;  %v17496_v59 = vor.u32 %v19600_v53, %v17493_v24  ;;  %v23946_v40 = vld [vmem:[#allocation18_spill] sm:$0xff] }
 0x2e5   : > { %10531 = vmatpush.bf16.msra.mxu0 %v16504_v45  ;;  %10544 = vmatpush.bf16.msra.mxu1 %v16632_v48  ;;  %v23944_v45 = vld [vmem:[#allocation19_spill] sm:$0xff]  ;;  %v19564_v55 = vld [vmem:[%s20282_s11 + $0x27a4] sm:$0xf]  ;;  %v17349_v48 = vld [vmem:[%s20282_s11 + $0x27b0] sm:$0xf0]  ;;  %v10325_v53 = vpop.f32.mrf.mxu0 }
 0x2e6   : > { %10557 = vmatpush.bf16.msra.mxu2 %v16760_v22  ;;  %v23945_v22 = vld [vmem:[#allocation20_spill] sm:$0xff]  ;;  %v17077_v49 = vld [vmem:[%s20282_s11 + $0x2590] sm:$0xf0] }
 0x2e7   : > { %10570 = vmatpush.bf16.msra.mxu3 %v16888_v63  ;;  %v19596_v54 = vld [vmem:[%s20282_s11 + $0x28a4] sm:$0xf]  ;;  %v17477_v63 = vld [vmem:[%s20282_s11 + $0x28b0] sm:$0xf0] }
 0x2e8   : > { %10532 = vmatmul.bf16.vlgmr.msra.gmra.mxu0 %v23944_v45  ;;  %10545 = vmatmul.bf16.vlgmr.msra.gmra.mxu1 %v23946_v40  ;;  %v19496_v21 = vld [vmem:[%s20282_s11 + $0x2584] sm:$0xf]  ;;  %v17205_v47 = vld [vmem:[%s20282_s11 + $0x2690] sm:$0xf0] }
 0x2e9   : > { %10576 = vmatpush.bf16.msrb.mxu0 %v17128_v62  ;;  %10589 = vmatpush.bf16.msrb.mxu1 %v17256_v1  ;;  %v17096_v62 = vor.u32 %v19500_v14, %v17093_v25  ;;  %v17224_v1 = vor.u32 %v19532_v58, %v17221_v13  ;;  %v19528_v44 = vld [vmem:[%s20282_s11 + $0x2684] sm:$0xf]  ;;  %v17333_v50 = vld [vmem:[%s20282_s11 + $0x2790] sm:$0xf0]  ;;  %v10338_v14 = vpop.f32.mrf.mxu1 }
 0x2ea   : > { %10602 = vmatpush.bf16.msrb.mxu2 %v17384_v61  ;;  %10571 = vmatmul.bf16.vlgmr.msra.gmra.mxu3 %v21014_v28  ;;  %v17352_v61 = vor.u32 %v19564_v55, %v17349_v48  ;;  %v19560_v57 = vld [vmem:[%s20282_s11 + $0x2784] sm:$0xf]  ;;  %v17208_v25 = vor.u32 %v19528_v44, %v17205_v47  ;;  %v17061_v13 = vld [vmem:[%s20282_s11 + $0x2570] sm:$0xf0] }
 0x2eb   : > { %10615 = vmatpush.bf16.msrb.mxu3 %v17512_v26  ;;  %10558 = vmatmul.bf16.vlgmr.msra.gmra.mxu2 %v23945_v22  ;;  %v17480_v26 = vor.u32 %v19596_v54, %v17477_v63  ;;  %v19592_v24 = vld [vmem:[%s20282_s11 + $0x2884] sm:$0xf]  ;;  %v17336_v58 = vor.u32 %v19560_v57, %v17333_v50  ;;  %v17189_v63 = vld [vmem:[%s20282_s11 + $0x2670] sm:$0xf0] }
 0x2ec   : > { %v19524_v55 = vld [vmem:[%s20282_s11 + $0x2664] sm:$0xf]  ;;  %v17045_v47 = vld [vmem:[%s20282_s11 + $0x2550] sm:$0xf0] }
 0x2ed   : > { %10577 = vmatpush.bf16.msrb.mxu0 %v17112_v15  ;;  %10590 = vmatpush.bf16.msrb.mxu1 %v17240_v31  ;;  %v17461_v15 = vld [vmem:[%s20282_s11 + $0x2890] sm:$0xf0]  ;;  %v10326_v31 = vadd.f32 %v10325_v53, %v21831_v29  ;;  %v19520_v57 = vld [vmem:[%s20282_s11 + $0x2644] sm:$0xf] }
 0x2ee   : > { %10603 = vmatpush.bf16.msrb.mxu2 %v17368_v20  ;;  %v17080_v20 = vor.u32 %v19496_v21, %v17077_v49  ;;  %v17464_v48 = vor.u32 %v19592_v24, %v17461_v15  ;;  %v17317_v29 = vld [vmem:[%s20282_s11 + $0x2770] sm:$0xf0]  ;;  %v19588_v21 = vld [vmem:[%s20282_s11 + $0x2864] sm:$0xf]  ;;  %v17192_v49 = vor.u32 %v19524_v55, %v17189_v63  ;;  %v10351_v53 = vpop.f32.mrf.mxu2 }
 0x2ef   : > { %10616 = vmatpush.bf16.msrb.mxu3 %v17496_v59  ;;  %v19492_v59 = vld [vmem:[%s20282_s11 + $0x2564] sm:$0xf]  ;;  %v10339_v54 = vadd.f32 %v10338_v14, %v10326_v31  ;;  %v17173_v24 = vld [vmem:[%s20282_s11 + $0x2650] sm:$0xf0]  ;;  %v10364_v14 = vpop.f32.mrf.mxu3 }
 0x2f0   : > { %v19552_v15 = vld [vmem:[%s20282_s11 + $0x2744] sm:$0xf]  ;;  %v17301_v31 = vld [vmem:[%s20282_s11 + $0x2750] sm:$0xf0]  ;;  %v17176_v63 = vor.u32 %v19520_v57, %v17173_v24 }
 0x2f1   : > { %10578 = vmatpush.bf16.msrb.mxu0 %v17096_v62  ;;  %10591 = vmatpush.bf16.msrb.mxu1 %v17224_v1  ;;  %v19556_v62 = vld [vmem:[%s20282_s11 + $0x2764] sm:$0xf]  ;;  %v17445_v1 = vld [vmem:[%s20282_s11 + $0x2870] sm:$0xf0]  ;;  %v10340_v55 = vpop.f32.mrf.mxu1 }
 0x2f2   : > { %10604 = vmatpush.bf16.msrb.mxu2 %v17352_v61  ;;  %v17064_v61 = vor.u32 %v19492_v59, %v17061_v13  ;;  %v17320_v44 = vor.u32 %v19556_v62, %v17317_v29  ;;  %v17448_v50 = vor.u32 %v19588_v21, %v17445_v1  ;;  %v19584_v59 = vld [vmem:[%s20282_s11 + $0x2844] sm:$0xf]  ;;  %v17029_v29 = vld [vmem:[%s20282_s11 + $0x2530] sm:$0xf0] }
 0x2f3   : > { %10617 = vmatpush.bf16.msrb.mxu3 %v17480_v26  ;;  %v19488_v26 = vld [vmem:[%s20282_s11 + $0x2544] sm:$0xf]  ;;  %v17013_v24 = vld [vmem:[%s20282_s11 + $0x2510] sm:$0xf0] }
 0x2f4   : > { %v17048_v13 = vor.u32 %v19488_v26, %v17045_v47  ;;  %v19484_v62 = vld [vmem:[%s20282_s11 + $0x2524] sm:$0xf]  ;;  %v17285_v47 = vld [vmem:[%s20282_s11 + $0x2730] sm:$0xf0] }
 0x2f5   : > { %10579 = vmatpush.bf16.msrb.mxu0 %v17080_v20  ;;  %10592 = vmatpush.bf16.msrb.mxu1 %v17208_v25  ;;  %v10352_v20 = vadd.f32 %v10351_v53, %v10339_v54  ;;  %v17429_v25 = vld [vmem:[%s20282_s11 + $0x2850] sm:$0xf0]  ;;  %v17304_v54 = vor.u32 %v19552_v15, %v17301_v31  ;;  %v19516_v21 = vld [vmem:[%s20282_s11 + $0x2624] sm:$0xf]  ;;  %v17032_v53 = vor.u32 %v19484_v62, %v17029_v29 }
 0x2f6   : > { %10605 = vmatpush.bf16.msrb.mxu2 %v17336_v58  ;;  %v10327_v58 = vpop.f32.mrf.mxu0  ;;  %v17432_v1 = vor.u32 %v19584_v59, %v17429_v25  ;;  %v19548_v26 = vld [vmem:[%s20282_s11 + $0x2724] sm:$0xf]  ;;  %v17269_v25 = vld [vmem:[%s20282_s11 + $0x2710] sm:$0xf0]  ;;  %v10353_v55 = vpop.f32.mrf.mxu2 }
 0x2f7   : > { %10618 = vmatpush.bf16.msrb.mxu3 %v17464_v48  ;;  %v21902_v48 = vadd.f32 %v10364_v14, %v10352_v20  ;;  %v19480_v57 = vld [vmem:[%s20282_s11 + $0x2504] sm:$0xf]  ;;  %v17288_v15 = vor.u32 %v19548_v26, %v17285_v47  ;;  %v17141_v20 = vld [vmem:[%s20282_s11 + $0x2610] sm:$0xf0] }
 0x2f8   : > { %v19512_v31 = vld [vmem:[%s20282_s11 + $0x2604] sm:$0xf]  ;;  %v17637_v29 = vld [vmem:[%s20282_s11 + $0x29f0] sm:$0xf0] }
 0x2f9   : > { %10580 = vmatpush.bf16.msrb.mxu0 %v17064_v61  ;;  %10593 = vmatpush.bf16.msrb.mxu1 %v17192_v49  ;;  %v17157_v61 = vld [vmem:[%s20282_s11 + $0x2630] sm:$0xf0]  ;;  %v19580_v49 = vld [vmem:[%s20282_s11 + $0x2824] sm:$0xf] }
 0x2fa   : > { %10606 = vmatpush.bf16.msrb.mxu2 %v17320_v44  ;;  %v17413_v44 = vld [vmem:[%s20282_s11 + $0x2830] sm:$0xf0]  ;;  %v19544_v14 = vld [vmem:[%s20282_s11 + $0x2704] sm:$0xf] }
 0x2fb   : > { %10619 = vmatpush.bf16.msrb.mxu3 %v17448_v50  ;;  %v17160_v50 = vor.u32 %v19516_v21, %v17157_v61  ;;  %v17416_v59 = vor.u32 %v19580_v49, %v17413_v44  ;;  %v19576_v58 = vld [vmem:[%s20282_s11 + $0x2804] sm:$0xf]  ;;  %v17016_v21 = vor.u32 %v19480_v57, %v17013_v24  ;;  %v17765_v61 = vld [vmem:[%s20282_s11 + $0x2af0] sm:$0xf0]  ;;  %v17272_v49 = vor.u32 %v19544_v14, %v17269_v25 }
 0x2fc   : > { %v19636_v62 = vld [vmem:[%s20282_s11 + $0x29e4] sm:$0xf]  ;;  %v17893_v47 = vld [vmem:[%s20282_s11 + $0x2bf0] sm:$0xf0] }
 0x2fd   : > { %10581 = vmatpush.bf16.msrb.mxu0 %v17048_v13  ;;  %10594 = vmatpush.bf16.msrb.mxu1 %v17176_v63  ;;  %v17397_v13 = vld [vmem:[%s20282_s11 + $0x2810] sm:$0xf0]  ;;  %v19668_v63 = vld [vmem:[%s20282_s11 + $0x2ae4] sm:$0xf] }
 0x2fe   : > { %10607 = vmatpush.bf16.msrb.mxu2 %v17304_v54  ;;  %v10366_v54 = vpop.f32.mrf.mxu3  ;;  %v19700_v26 = vld [vmem:[%s20282_s11 + $0x2be4] sm:$0xf]  ;;  %v18021_v55 = vld [vmem:[%s20282_s11 + $0x2cf0] sm:$0xf0]  ;;  %v17768_v57 = vor.u32 %v19668_v63, %v17765_v61 }
 0x2ff   : > { %10620 = vmatpush.bf16.msrb.mxu3 %v17432_v1  ;;  %v17144_v1 = vor.u32 %v19512_v31, %v17141_v20  ;;  %v19732_v44 = vld [vmem:[%s20282_s11 + $0x2ce4] sm:$0xf]  ;;  %v17640_v54 = vor.u32 %v19636_v62, %v17637_v29  ;;  %v17896_v24 = vor.u32 %v19700_v26, %v17893_v47  ;;  %v17621_v28 = vld [vmem:[%s20282_s11 + $0x29d0] sm:$0xf0] }
 0x300   : > { %v19632_v22 = vld [vmem:[%s20282_s11 + $0x29c4] sm:$0xf]  ;;  %v17877_v20 = vld [vmem:[%s20282_s11 + $0x2bd0] sm:$0xf0] }
 0x301   : > { %10582 = vmatpush.bf16.msrb.mxu0 %v17032_v53  ;;  %10595 = vmatpush.bf16.msrb.mxu1 %v17160_v50  ;;  %v17400_v53 = vor.u32 %v19576_v58, %v17397_v13  ;;  %v19664_v40 = vld [vmem:[%s20282_s11 + $0x2ac4] sm:$0xf]  ;;  %v18024_v50 = vor.u32 %v19732_v44, %v18021_v55  ;;  %v17624_v25 = vor.u32 %v19632_v22, %v17621_v28  ;;  %v17605_v29 = vld [vmem:[%s20282_s11 + $0x29b0] sm:$0xf0] }
 0x302   : > { %10608 = vmatpush.bf16.msrb.mxu2 %v17288_v15  ;;  %v17749_v15 = vld [vmem:[%s20282_s11 + $0x2ad0] sm:$0xf0]  ;;  %v19696_v31 = vld [vmem:[%s20282_s11 + $0x2bc4] sm:$0xf] }
 0x303   : > { %10621 = vmatpush.bf16.msrb.mxu3 %v17416_v59  ;;  %v19728_v14 = vld [vmem:[%s20282_s11 + $0x2cc4] sm:$0xf]  ;;  %v18005_v59 = vld [vmem:[%s20282_s11 + $0x2cd0] sm:$0xf0]  ;;  %v17752_v58 = vor.u32 %v19664_v40, %v17749_v15  ;;  %v17880_v13 = vor.u32 %v19696_v31, %v17877_v20 }
 0x304   : > { %v19628_v62 = vld [vmem:[%s20282_s11 + $0x29a4] sm:$0xf]  ;;  %v17733_v61 = vld [vmem:[%s20282_s11 + $0x2ab0] sm:$0xf0] }
 0x305   : > { %10583 = vmatpush.bf16.msrb.mxu0 %v17016_v21  ;;  %10596 = vmatpush.bf16.msrb.mxu1 %v17144_v1  ;;  %v19660_v63 = vld [vmem:[%s20282_s11 + $0x2aa4] sm:$0xf]  ;;  %v18008_v21 = vor.u32 %v19728_v14, %v18005_v59  ;;  %v17861_v47 = vld [vmem:[%s20282_s11 + $0x2bb0] sm:$0xf0]  ;;  %v17608_v44 = vor.u32 %v19628_v62, %v17605_v29  ;;  %v10377_v14 = vpop.f32.mrf.mxu0  ;;  %v10390_v62 = vpop.f32.mrf.mxu1 }
 0x306   : > { %10609 = vmatpush.bf16.msrb.mxu2 %v17272_v49  ;;  %v19692_v26 = vld [vmem:[%s20282_s11 + $0x2ba4] sm:$0xf]  ;;  %v23948_v22 = vld [vmem:[#allocation22_spill] sm:$0xff]  ;;  %v17736_v55 = vor.u32 %v19660_v63, %v17733_v61 }
 0x307   : > { %10622 = vmatpush.bf16.msrb.mxu3 %v17400_v53  ;;  %v23947_v28 = vld [vmem:[#allocation24_spill] sm:$0xff]  ;;  %v17989_v1 = vld [vmem:[%s20282_s11 + $0x2cb0] sm:$0xf0]  ;;  %v17864_v53 = vor.u32 %v19692_v26, %v17861_v47 }
 0x308   : > { %10584 = vmatmul.bf16.vlgmr.msrb.gmra.mxu0 %v21018_v16  ;;  %10597 = vmatmul.bf16.vlgmr.msrb.gmra.mxu1 %v23948_v22  ;;  %v19724_v40 = vld [vmem:[%s20282_s11 + $0x2ca4] sm:$0xf]  ;;  %v17717_v15 = vld [vmem:[%s20282_s11 + $0x2a90] sm:$0xf0] }
 0x309   : > { %10628 = vmatpush.bf16.msra.mxu0 %v17640_v54  ;;  %10641 = vmatpush.bf16.msra.mxu1 %v17768_v57  ;;  %v19899_v49 = vld [vmem:[#allocation1] sm:$0xff]  ;;  %v17589_v57 = vld [vmem:[%s20282_s11 + $0x2990] sm:$0xf0] }
 0x30a   : > { %10654 = vmatpush.bf16.msra.mxu2 %v17896_v24  ;;  %10623 = vmatmul.bf16.vlgmr.msrb.gmra.mxu3 %v19899_v49  ;;  %v19624_v54 = vld [vmem:[%s20282_s11 + $0x2984] sm:$0xf]  ;;  %v17845_v20 = vld [vmem:[%s20282_s11 + $0x2b90] sm:$0xf0] }
 0x30b   : > { %10667 = vmatpush.bf16.msra.mxu3 %v18024_v50  ;;  %10610 = vmatmul.bf16.vlgmr.msrb.gmra.mxu2 %v23947_v28  ;;  %v19656_v24 = vld [vmem:[%s20282_s11 + $0x2a84] sm:$0xf]  ;;  %v17992_v50 = vor.u32 %v19724_v40, %v17989_v1  ;;  %v17573_v61 = vld [vmem:[%s20282_s11 + $0x2970] sm:$0xf0] }
 0x30c   : > { %v19688_v31 = vld [vmem:[%s20282_s11 + $0x2b84] sm:$0xf]  ;;  %v17720_v29 = vor.u32 %v19656_v24, %v17717_v15  ;;  %v17701_v1 = vld [vmem:[%s20282_s11 + $0x2a70] sm:$0xf0] }
 0x30d   : > { %10629 = vmatpush.bf16.msra.mxu0 %v17624_v25  ;;  %10642 = vmatpush.bf16.msra.mxu1 %v17752_v58  ;;  %v19720_v59 = vld [vmem:[%s20282_s11 + $0x2c84] sm:$0xf]  ;;  %v17973_v25 = vld [vmem:[%s20282_s11 + $0x2c90] sm:$0xf0]  ;;  %v10378_v58 = vadd.f32 %v10377_v14, %v21902_v48  ;;  %v17848_v63 = vor.u32 %v19688_v31, %v17845_v20 }
 0x30e   : > { %10655 = vmatpush.bf16.msra.mxu2 %v17880_v13  ;;  %v17592_v13 = vor.u32 %v19624_v54, %v17589_v57  ;;  %v19652_v26 = vld [vmem:[%s20282_s11 + $0x2a64] sm:$0xf]  ;;  %v17976_v47 = vor.u32 %v19720_v59, %v17973_v25  ;;  %v17829_v48 = vld [vmem:[%s20282_s11 + $0x2b70] sm:$0xf0]  ;;  %v10403_v20 = vpop.f32.mrf.mxu2 }
 0x30f   : > { %10668 = vmatpush.bf16.msra.mxu3 %v18008_v21  ;;  %v19620_v21 = vld [vmem:[%s20282_s11 + $0x2964] sm:$0xf]  ;;  %v10391_v40 = vadd.f32 %v10390_v62, %v10378_v58  ;;  %v17704_v54 = vor.u32 %v19652_v26, %v17701_v1  ;;  %v17685_v14 = vld [vmem:[%s20282_s11 + $0x2a50] sm:$0xf0] }
 0x310   : > { %v19684_v49 = vld [vmem:[%s20282_s11 + $0x2b64] sm:$0xf]  ;;  %v17813_v25 = vld [vmem:[%s20282_s11 + $0x2b50] sm:$0xf0] }
 0x311   : > { %10630 = vmatpush.bf16.msra.mxu0 %v17608_v44  ;;  %10643 = vmatpush.bf16.msra.mxu1 %v17736_v55  ;;  %v19716_v44 = vld [vmem:[%s20282_s11 + $0x2c64] sm:$0xf]  ;;  %v17957_v55 = vld [vmem:[%s20282_s11 + $0x2c70] sm:$0xf0]  ;;  %v17832_v57 = vor.u32 %v19684_v49, %v17829_v48  ;;  %v10404_v58 = vadd.f32 %v10403_v20, %v10391_v40 }
 0x312   : > { %10656 = vmatpush.bf16.msra.mxu2 %v17864_v53  ;;  %v17576_v53 = vor.u32 %v19620_v21, %v17573_v61  ;;  %v19616_v24 = vld [vmem:[%s20282_s11 + $0x2944] sm:$0xf]  ;;  %v17960_v31 = vor.u32 %v19716_v44, %v17957_v55  ;;  %v10392_v61 = vpop.f32.mrf.mxu1  ;;  %v17541_v49 = vld [vmem:[%s20282_s11 + $0x2930] sm:$0xf0] }
 0x313   : > { %10669 = vmatpush.bf16.msra.mxu3 %v17992_v50  ;;  %v17557_v50 = vld [vmem:[%s20282_s11 + $0x2950] sm:$0xf0]  ;;  %v19648_v15 = vld [vmem:[%s20282_s11 + $0x2a44] sm:$0xf] }
 0x314   : > { %v19680_v59 = vld [vmem:[%s20282_s11 + $0x2b44] sm:$0xf]  ;;  %v17560_v21 = vor.u32 %v19616_v24, %v17557_v50  ;;  %v17669_v55 = vld [vmem:[%s20282_s11 + $0x2a30] sm:$0xf0] }
 0x315   : > { %10631 = vmatpush.bf16.msra.mxu0 %v17592_v13  ;;  %10644 = vmatpush.bf16.msra.mxu1 %v17720_v29  ;;  %v10416_v13 = vpop.f32.mrf.mxu3  ;;  %v19712_v62 = vld [vmem:[%s20282_s11 + $0x2c44] sm:$0xf]  ;;  %v17941_v29 = vld [vmem:[%s20282_s11 + $0x2c50] sm:$0xf0]  ;;  %v17816_v40 = vor.u32 %v19680_v59, %v17813_v25 }
 0x316   : > { %10657 = vmatpush.bf16.msra.mxu2 %v17848_v63  ;;  %v10379_v63 = vpop.f32.mrf.mxu0  ;;  %v21972_v26 = vadd.f32 %v10416_v13, %v10404_v58  ;;  %v19612_v1 = vld [vmem:[%s20282_s11 + $0x2924] sm:$0xf]  ;;  %v17944_v44 = vor.u32 %v19712_v62, %v17941_v29  ;;  %v17797_v24 = vld [vmem:[%s20282_s11 + $0x2b30] sm:$0xf0] }
 0x317   : > { %10670 = vmatpush.bf16.msra.mxu3 %v17976_v47  ;;  %v17688_v47 = vor.u32 %v19648_v15, %v17685_v14  ;;  %v19644_v48 = vld [vmem:[%s20282_s11 + $0x2a24] sm:$0xf]  ;;  %v17544_v50 = vor.u32 %v19612_v1, %v17541_v49  ;;  %v17525_v20 = vld [vmem:[%s20282_s11 + $0x2910] sm:$0xf0] }
 0x318   : > { %v19608_v15 = vld [vmem:[%s20282_s11 + $0x2904] sm:$0xf]  ;;  %v17653_v25 = vld [vmem:[%s20282_s11 + $0x2a10] sm:$0xf0] }
 0x319   : > { %10632 = vmatpush.bf16.msra.mxu0 %v17576_v53  ;;  %10645 = vmatpush.bf16.msra.mxu1 %v17704_v54  ;;  %v19676_v53 = vld [vmem:[%s20282_s11 + $0x2b24] sm:$0xf]  ;;  %v17781_v62 = vld [vmem:[%s20282_s11 + $0x2b10] sm:$0xf0]  ;;  %v17528_v49 = vor.u32 %v19608_v15, %v17525_v20 }
 0x31a   : > { %10658 = vmatpush.bf16.msra.mxu2 %v17832_v57  ;;  %v19708_v54 = vld [vmem:[%s20282_s11 + $0x2c24] sm:$0xf]  ;;  %v17925_v57 = vld [vmem:[%s20282_s11 + $0x2c30] sm:$0xf0]  ;;  %v17800_v14 = vor.u32 %v19676_v53, %v17797_v24  ;;  %v18327_v53 = vld [vmem:[%s20282_s11 + $0xf4] sm:$0xf0] }
 0x31b   : > { %10671 = vmatpush.bf16.msra.mxu3 %v17960_v31  ;;  %v17672_v31 = vor.u32 %v19644_v48, %v17669_v55  ;;  %v19640_v59 = vld [vmem:[%s20282_s11 + $0x2a04] sm:$0xf]  ;;  %v17928_v13 = vor.u32 %v19708_v54, %v17925_v57  ;;  %v17909_v63 = vld [vmem:[%s20282_s11 + $0x2c10] sm:$0xf0]  ;;  %v12395_v55 = vld [vmem:[%s20282_s11 + $0xe8] sm:$0xf] }
 0x31c   : > { %v19672_v58 = vld [vmem:[%s20282_s11 + $0x2b04] sm:$0xf]  ;;  %v18149_v1 = vld [vmem:[%s20282_s11 + $0x2df0] sm:$0xf0]  ;;  %v12523_v54 = vld [vmem:[%s20282_s11 + $0x1e8] sm:$0xf]  ;;  %v12396_v20 = vor.u32 %v18327_v53, %v12395_v55 }
 0x31d   : > { %10633 = vmatpush.bf16.msra.mxu0 %v17560_v21  ;;  %10646 = vmatpush.bf16.msra.mxu1 %v17688_v47  ;;  %v19704_v29 = vld [vmem:[%s20282_s11 + $0x2c04] sm:$0xf]  ;;  %v10405_v21 = vpop.f32.mrf.mxu2  ;;  %v18277_v48 = vld [vmem:[%s20282_s11 + $0x2ef0] sm:$0xf0]  ;;  %v17784_v24 = vor.u32 %v19672_v58, %v17781_v62  ;;  %v18359_v57 = vld [vmem:[%s20282_s11 + $0x1f4] sm:$0xf0] }
 0x31e   : > { %10659 = vmatpush.bf16.msra.mxu2 %v17816_v40  ;;  %v19764_v61 = vld [vmem:[%s20282_s11 + $0x2de4] sm:$0xf]  ;;  %v10418_v40 = vpop.f32.mrf.mxu3  ;;  %v18133_v28 = vld [vmem:[%s20282_s11 + $0x2dd0] sm:$0xf0]  ;;  %v12507_v58 = vld [vmem:[%s20282_s11 + $0x1c8] sm:$0xf] }
 0x31f   : > { %10672 = vmatpush.bf16.msra.mxu3 %v17944_v44  ;;  %v19796_v47 = vld [vmem:[%s20282_s11 + $0x2ee4] sm:$0xf]  ;;  %v17656_v44 = vor.u32 %v19640_v59, %v17653_v25  ;;  %v18152_v21 = vor.u32 %v19764_v61, %v18149_v1  ;;  %v12379_v59 = vld [vmem:[%s20282_s11 + $0xc8] sm:$0xf]  ;;  %v18323_v25 = vld [vmem:[%s20282_s11 + $0xd4] sm:$0xf0] }
 0x320   : > { %v18280_v15 = vor.u32 %v19796_v47, %v18277_v48  ;;  %v19760_v40 = vld [vmem:[%s20282_s11 + $0x2dc4] sm:$0xf]  ;;  %v18117_v1 = vld [vmem:[%s20282_s11 + $0x2db0] sm:$0xf0]  ;;  %v12363_v53 = vld [vmem:[%s20282_s11 + $0xa8] sm:$0xf] }
 0x321   : > { %10634 = vmatpush.bf16.msra.mxu0 %v17544_v50  ;;  %10647 = vmatpush.bf16.msra.mxu1 %v17672_v31  ;;  %v17912_v50 = vor.u32 %v19704_v29, %v17909_v63  ;;  %v19792_v22 = vld [vmem:[%s20282_s11 + $0x2ec4] sm:$0xf]  ;;  %v12524_v31 = vor.u32 %v18359_v57, %v12523_v54  ;;  %v18136_v62 = vor.u32 %v19760_v40, %v18133_v28  ;;  %v18245_v55 = vld [vmem:[%s20282_s11 + $0x2eb0] sm:$0xf0]  ;;  %v18351_v54 = vld [vmem:[%s20282_s11 + $0x1b4] sm:$0xf0] }
 0x322   : > { %10660 = vmatpush.bf16.msra.mxu2 %v17800_v14  ;;  %v18261_v14 = vld [vmem:[%s20282_s11 + $0x2ed0] sm:$0xf0]  ;;  %v12380_v63 = vor.u32 %v18323_v25, %v12379_v59  ;;  %v19756_v61 = vld [vmem:[%s20282_s11 + $0x2da4] sm:$0xf]  ;;  %v19903_v57 = vld [vmem:[#allocation1 + $0x24] sm:$0xff] }
 0x323   : > { %10673 = vmatpush.bf16.msra.mxu3 %v17928_v13  ;;  %v18355_v13 = vld [vmem:[%s20282_s11 + $0x1d4] sm:$0xf0]  ;;  %v18264_v29 = vor.u32 %v19792_v22, %v18261_v14  ;;  %v19788_v47 = vld [vmem:[%s20282_s11 + $0x2ea4] sm:$0xf]  ;;  %v12491_v22 = vld [vmem:[%s20282_s11 + $0x1a8] sm:$0xf] }
 0x324   : > { %v12508_v48 = vor.u32 %v18355_v13, %v12507_v58  ;;  %v19902_v28 = vld [vmem:[#allocation1 + $0x12] sm:$0xff]  ;;  %v12492_v14 = vor.u32 %v18351_v54, %v12491_v22  ;;  %v12347_v25 = vld [vmem:[%s20282_s11 + $0x88] sm:$0xf] }
 0x325   : > { %10635 = vmatpush.bf16.msra.mxu0 %v17528_v49  ;;  %10648 = vmatpush.bf16.msra.mxu1 %v17656_v44  ;;  %v19900_v49 = vld [vmem:[#allocation1 + $0x9] sm:$0xff]  ;;  %v18319_v44 = vld [vmem:[%s20282_s11 + $0xb4] sm:$0xf0]  ;;  %v10429_v13 = vpop.f32.mrf.mxu0  ;;  %v12331_v22 = vld [vmem:[%s20282_s11 + $0x68] sm:$0xf] }
 0x326   : > { %10661 = vmatpush.bf16.msra.mxu2 %v17784_v24  ;;  %v19901_v24 = vld [vmem:[#allocation1 + $0x1b] sm:$0xff]  ;;  %v18101_v40 = vld [vmem:[%s20282_s11 + $0x2d90] sm:$0xf0]  ;;  %v18315_v58 = vld [vmem:[%s20282_s11 + $0x94] sm:$0xf0] }
 0x327   : > { %10674 = vmatpush.bf16.msra.mxu3 %v17912_v50  ;;  %v18120_v50 = vor.u32 %v19756_v61, %v18117_v1  ;;  %v18229_v59 = vld [vmem:[%s20282_s11 + $0x2e90] sm:$0xf0]  ;;  %v10442_v61 = vpop.f32.mrf.mxu1  ;;  %v12459_v54 = vld [vmem:[%s20282_s11 + $0x168] sm:$0xf] }
 0x328   : > { %10636 = vmatmul.bf16.vlgmr.msra.gmra.mxu0 %v19900_v49  ;;  %10649 = vmatmul.bf16.vlgmr.msra.gmra.mxu1 %v19902_v28  ;;  %v12475_v49 = vld [vmem:[%s20282_s11 + $0x188] sm:$0xf]  ;;  %v18213_v28 = vld [vmem:[%s20282_s11 + $0x2e70] sm:$0xf0] }
 0x329   : > { %10680 = vmatpush.bf16.msrb.mxu0 %v18152_v21  ;;  %10693 = vmatpush.bf16.msrb.mxu1 %v18280_v15  ;;  %v18248_v21 = vor.u32 %v19788_v47, %v18245_v55  ;;  %v12364_v15 = vor.u32 %v18319_v44, %v12363_v53  ;;  %v12348_v47 = vor.u32 %v18315_v58, %v12347_v25  ;;  %v18085_v55 = vld [vmem:[%s20282_s11 + $0x2d70] sm:$0xf0]  ;;  %v19780_v53 = vld [vmem:[%s20282_s11 + $0x2e64] sm:$0xf]  ;;  %v12315_v58 = vld [vmem:[%s20282_s11 + $0x48] sm:$0xf] }
 0x32a   : > { %10706 = vmatpush.bf16.msrb.mxu2 %v12396_v20  ;;  %10675 = vmatmul.bf16.vlgmr.msra.gmra.mxu3 %v19903_v57  ;;  %v19752_v20 = vld [vmem:[%s20282_s11 + $0x2d84] sm:$0xf]  ;;  %v18343_v57 = vld [vmem:[%s20282_s11 + $0x174] sm:$0xf0]  ;;  %v18197_v25 = vld [vmem:[%s20282_s11 + $0x2e50] sm:$0xf0] }
 0x32b   : > { %10719 = vmatpush.bf16.msrb.mxu3 %v12524_v31  ;;  %10662 = vmatmul.bf16.vlgmr.msra.gmra.mxu2 %v19901_v24  ;;  %v19784_v31 = vld [vmem:[%s20282_s11 + $0x2e84] sm:$0xf] }
 0x32c   : > { %v18232_v1 = vor.u32 %v19784_v31, %v18229_v59  ;;  %v19776_v31 = vld [vmem:[%s20282_s11 + $0x2e44] sm:$0xf] }
 0x32d   : > { %10681 = vmatpush.bf16.msrb.mxu0 %v18136_v62  ;;  %10694 = vmatpush.bf16.msrb.mxu1 %v18264_v29  ;;  %v18347_v62 = vld [vmem:[%s20282_s11 + $0x194] sm:$0xf0]  ;;  %v10430_v29 = vadd.f32 %v10429_v13, %v21972_v26 }
 0x32e   : > { %10707 = vmatpush.bf16.msrb.mxu2 %v12380_v63  ;;  %v18104_v63 = vor.u32 %v19752_v20, %v18101_v40  ;;  %v12476_v44 = vor.u32 %v18347_v62, %v12475_v49  ;;  %v18311_v26 = vld [vmem:[%s20282_s11 + $0x74] sm:$0xf0]  ;;  %v19744_v20 = vld [vmem:[%s20282_s11 + $0x2d44] sm:$0xf]  ;;  %v18069_v40 = vld [vmem:[%s20282_s11 + $0x2d50] sm:$0xf0]  ;;  %v10455_v59 = vpop.f32.mrf.mxu2  ;;  %v10468_v62 = vpop.f32.mrf.mxu3 }
 0x32f   : > { %10720 = vmatpush.bf16.msrb.mxu3 %v12508_v48  ;;  %v19748_v48 = vld [vmem:[%s20282_s11 + $0x2d64] sm:$0xf]  ;;  %v10443_v24 = vadd.f32 %v10442_v61, %v10430_v29  ;;  %v18307_v13 = vld [vmem:[%s20282_s11 + $0x54] sm:$0xf0]  ;;  %v12443_v29 = vld [vmem:[%s20282_s11 + $0x148] sm:$0xf]  ;;  %v10431_v61 = vpop.f32.mrf.mxu0 }
 0x330   : > { %v12651_v61 = vld [vmem:[%s20282_s11 + $0x2e8] sm:$0xf] }
 0x331   : > { %10682 = vmatpush.bf16.msrb.mxu0 %v18120_v50  ;;  %10695 = vmatpush.bf16.msrb.mxu1 %v18248_v21  ;;  %v18088_v50 = vor.u32 %v19748_v48, %v18085_v55  ;;  %v18216_v21 = vor.u32 %v19780_v53, %v18213_v28  ;;  %v10456_v49 = vadd.f32 %v10455_v59, %v10443_v24  ;;  %v18053_v24 = vld [vmem:[%s20282_s11 + $0x2d30] sm:$0xf0]  ;;  %v19772_v28 = vld [vmem:[%s20282_s11 + $0x2e24] sm:$0xf] }
 0x332   : > { %10708 = vmatpush.bf16.msrb.mxu2 %v12364_v15  ;;  %v12332_v15 = vor.u32 %v18311_v26, %v12331_v22  ;;  %v18200_v55 = vor.u32 %v19776_v31, %v18197_v25  ;;  %v12316_v53 = vor.u32 %v18307_v13, %v12315_v58  ;;  %v18181_v26 = vld [vmem:[%s20282_s11 + $0x2e30] sm:$0xf0]  ;;  %v19768_v59 = vld [vmem:[%s20282_s11 + $0x2e04] sm:$0xf]  ;;  %v12283_v58 = vld [vmem:[%s20282_s11 + $0x8] sm:$0xf] }
 0x333   : > { %10721 = vmatpush.bf16.msrb.mxu3 %v12492_v14  ;;  %v12460_v14 = vor.u32 %v18343_v57, %v12459_v54  ;;  %v22039_v48 = vadd.f32 %v10468_v62, %v10456_v49  ;;  %v12299_v54 = vld [vmem:[%s20282_s11 + $0x28] sm:$0xf]  ;;  %v18303_v57 = vld [vmem:[%s20282_s11 + $0x34] sm:$0xf0]  ;;  %v18184_v31 = vor.u32 %v19772_v28, %v18181_v26  ;;  %v18165_v25 = vld [vmem:[%s20282_s11 + $0x2e10] sm:$0xf0] }
 0x334   : > { %v18299_v49 = vld [vmem:[%s20282_s11 + $0x14] sm:$0xf0]  ;;  %v12411_v62 = vld [vmem:[%s20282_s11 + $0x108] sm:$0xf] }
 0x335   : > { %10683 = vmatpush.bf16.msrb.mxu0 %v18104_v63  ;;  %10696 = vmatpush.bf16.msrb.mxu1 %v18232_v1  ;;  %v18339_v63 = vld [vmem:[%s20282_s11 + $0x154] sm:$0xf0]  ;;  %v18072_v1 = vor.u32 %v19744_v20, %v18069_v40  ;;  %v19736_v20 = vld [vmem:[%s20282_s11 + $0x2d04] sm:$0xf]  ;;  %v18037_v40 = vld [vmem:[%s20282_s11 + $0x2d10] sm:$0xf0]  ;;  %v12284_v26 = vor.u32 %v18299_v49, %v12283_v58 }
 0x336   : > { %10709 = vmatpush.bf16.msrb.mxu2 %v12348_v47  ;;  %v10444_v47 = vpop.f32.mrf.mxu1  ;;  %v12444_v22 = vor.u32 %v18339_v63, %v12443_v29  ;;  %v18331_v29 = vld [vmem:[%s20282_s11 + $0x114] sm:$0xf0]  ;;  %v10457_v63 = vpop.f32.mrf.mxu2  ;;  %v13019_v58 = vld [vmem:[%s20282_s11 + $0x5c8] sm:$0xf] }
 0x337   : > { %10722 = vmatpush.bf16.msrb.mxu3 %v12476_v44  ;;  %v19740_v44 = vld [vmem:[%s20282_s11 + $0x2d24] sm:$0xf]  ;;  %v12779_v47 = vld [vmem:[%s20282_s11 + $0x3e8] sm:$0xf]  ;;  %v18455_v28 = vld [vmem:[%s20282_s11 + $0x4f4] sm:$0xf0] }
 0x338   : > { %v18387_v63 = vld [vmem:[%s20282_s11 + $0x2d4] sm:$0xf0] }
 0x339   : > { %10684 = vmatpush.bf16.msrb.mxu0 %v18088_v50  ;;  %10697 = vmatpush.bf16.msrb.mxu1 %v18216_v21  ;;  %v12427_v50 = vld [vmem:[%s20282_s11 + $0x128] sm:$0xf]  ;;  %v18335_v21 = vld [vmem:[%s20282_s11 + $0x134] sm:$0xf0] }
 0x33a   : > { %10710 = vmatpush.bf16.msrb.mxu2 %v12332_v15  ;;  %v18056_v15 = vor.u32 %v19740_v44, %v18053_v24  ;;  %v12428_v13 = vor.u32 %v18335_v21, %v12427_v50  ;;  %v18423_v44 = vld [vmem:[%s20282_s11 + $0x3f4] sm:$0xf0]  ;;  %v12907_v24 = vld [vmem:[%s20282_s11 + $0x4e8] sm:$0xf]  ;;  %v12412_v50 = vor.u32 %v18331_v29, %v12411_v62 }
 0x33b   : > { %10723 = vmatpush.bf16.msrb.mxu3 %v12460_v14  ;;  %v12300_v14 = vor.u32 %v18303_v57, %v12299_v54  ;;  %v13035_v54 = vld [vmem:[%s20282_s11 + $0x5e8] sm:$0xf]  ;;  %v18487_v57 = vld [vmem:[%s20282_s11 + $0x5f4] sm:$0xf0] }
 0x33d   : > { %10685 = vmatpush.bf16.msrb.mxu0 %v18072_v1  ;;  %10698 = vmatpush.bf16.msrb.mxu1 %v18200_v55  ;;  %v18391_v1 = vld [vmem:[%s20282_s11 + $0x2f4] sm:$0xf0]  ;;  %v10470_v55 = vpop.f32.mrf.mxu3 }
 0x33e   : > { %10711 = vmatpush.bf16.msrb.mxu2 %v12316_v53  ;;  %v18040_v53 = vor.u32 %v19736_v20, %v18037_v40  ;;  %v12652_v21 = vor.u32 %v18391_v1, %v12651_v61  ;;  %v12908_v20 = vor.u32 %v18455_v28, %v12907_v24  ;;  %v12635_v40 = vld [vmem:[%s20282_s11 + $0x2c8] sm:$0xf]  ;;  %v18383_v1 = vld [vmem:[%s20282_s11 + $0x2b4] sm:$0xf0] }
 0x33f   : > { %10724 = vmatpush.bf16.msrb.mxu3 %v12444_v22  ;;  %v18168_v22 = vor.u32 %v19768_v59, %v18165_v25  ;;  %v12763_v55 = vld [vmem:[%s20282_s11 + $0x3c8] sm:$0xf]  ;;  %v18451_v25 = vld [vmem:[%s20282_s11 + $0x4d4] sm:$0xf0]  ;;  %v12636_v49 = vor.u32 %v18387_v63, %v12635_v40 }
 0x340   : > { %v12891_v59 = vld [vmem:[%s20282_s11 + $0x4c8] sm:$0xf]  ;;  %v18415_v24 = vld [vmem:[%s20282_s11 + $0x3b4] sm:$0xf0] }
 0x341   : > { %10686 = vmatpush.bf16.msrb.mxu0 %v18056_v15  ;;  %10699 = vmatpush.bf16.msrb.mxu1 %v18184_v31  ;;  %v12780_v15 = vor.u32 %v18423_v44, %v12779_v47  ;;  %v13036_v31 = vor.u32 %v18487_v57, %v13035_v54  ;;  %v12892_v29 = vor.u32 %v18451_v25, %v12891_v59  ;;  %v12619_v61 = vld [vmem:[%s20282_s11 + $0x2a8] sm:$0xf]  ;;  %v18479_v57 = vld [vmem:[%s20282_s11 + $0x5b4] sm:$0xf0] }
 0x342   : > { %10712 = vmatpush.bf16.msrb.mxu2 %v12300_v14  ;;  %v18419_v14 = vld [vmem:[%s20282_s11 + $0x3d4] sm:$0xf0]  ;;  %v12747_v47 = vld [vmem:[%s20282_s11 + $0x3a8] sm:$0xf] }
 0x343   : > { %10725 = vmatpush.bf16.msrb.mxu3 %v12428_v13  ;;  %v18483_v13 = vld [vmem:[%s20282_s11 + $0x5d4] sm:$0xf0]  ;;  %v12764_v62 = vor.u32 %v18419_v14, %v12763_v55  ;;  %v12875_v28 = vld [vmem:[%s20282_s11 + $0x4a8] sm:$0xf] }
 0x344   : > { %v13020_v44 = vor.u32 %v18483_v13, %v13019_v58  ;;  %v13003_v54 = vld [vmem:[%s20282_s11 + $0x5a8] sm:$0xf]  ;;  %v18379_v40 = vld [vmem:[%s20282_s11 + $0x294] sm:$0xf0] }
 0x345   : > { %10687 = vmatpush.bf16.msrb.mxu0 %v18040_v53  ;;  %10700 = vmatpush.bf16.msrb.mxu1 %v18168_v22  ;;  %v19904_v53 = vld [vmem:[#allocation1 + $0x2d] sm:$0xff]  ;;  %v12731_v63 = vld [vmem:[%s20282_s11 + $0x388] sm:$0xf]  ;;  %v13004_v55 = vor.u32 %v18479_v57, %v13003_v54  ;;  %v10481_v25 = vpop.f32.mrf.mxu0 }
 0x346   : > { %10713 = vmatpush.bf16.msrb.mxu2 %v12284_v26  ;;  %v18447_v22 = vld [vmem:[%s20282_s11 + $0x4b4] sm:$0xf0]  ;;  %v12859_v14 = vld [vmem:[%s20282_s11 + $0x488] sm:$0xf] }
 0x347   : > { %10726 = vmatpush.bf16.msrb.mxu3 %v12412_v50  ;;  %v19905_v26 = vld [vmem:[#allocation1 + $0x36] sm:$0xff]  ;;  %v12620_v50 = vor.u32 %v18383_v1, %v12619_v61  ;;  %v12987_v58 = vld [vmem:[%s20282_s11 + $0x588] sm:$0xf] }
 0x348   : > { %10688 = vmatmul.bf16.vlgmr.msrb.gmra.mxu0 %v19904_v53  ;;  %10701 = vmatmul.bf16.vlgmr.msrb.gmra.mxu1 %v19905_v26  ;;  %v18443_v59 = vld [vmem:[%s20282_s11 + $0x494] sm:$0xf0]  ;;  %v12843_v26 = vld [vmem:[%s20282_s11 + $0x468] sm:$0xf] }
 0x349   : > { %10732 = vmatpush.bf16.msra.mxu0 %v12652_v21  ;;  %10745 = vmatpush.bf16.msra.mxu1 %v12780_v15  ;;  %v12748_v21 = vor.u32 %v18415_v24, %v12747_v47  ;;  %v12876_v15 = vor.u32 %v18447_v22, %v12875_v28  ;;  %v18475_v13 = vld [vmem:[%s20282_s11 + $0x594] sm:$0xf0]  ;;  %v12860_v1 = vor.u32 %v18443_v59, %v12859_v14  ;;  %v12587_v47 = vld [vmem:[%s20282_s11 + $0x268] sm:$0xf] }
 0x34a   : > { %10758 = vmatpush.bf16.msra.mxu2 %v12908_v20  ;;  %10727 = vmatmul.bf16.vlgmr.msrb.gmra.mxu3 %v20418_v39  ;;  %v12603_v20 = vld [vmem:[%s20282_s11 + $0x288] sm:$0xf]  ;;  %v18375_v53 = vld [vmem:[%s20282_s11 + $0x274] sm:$0xf0]  ;;  %v12988_v24 = vor.u32 %v18475_v13, %v12987_v58 }
 0x34b   : > { %10771 = vmatpush.bf16.msra.mxu3 %v13036_v31  ;;  %10714 = vmatmul.bf16.vlgmr.msrb.gmra.mxu2 %v20411_v34  ;;  %v18411_v31 = vld [vmem:[%s20282_s11 + $0x394] sm:$0xf0]  ;;  %v12971_v54 = vld [vmem:[%s20282_s11 + $0x568] sm:$0xf] }
 0x34c   : > { %v12732_v61 = vor.u32 %v18411_v31, %v12731_v63  ;;  %v18407_v22 = vld [vmem:[%s20282_s11 + $0x374] sm:$0xf0]  ;;  %v12699_v63 = vld [vmem:[%s20282_s11 + $0x348] sm:$0xf] }
 0x34d   : > { %10733 = vmatpush.bf16.msra.mxu0 %v12636_v49  ;;  %10746 = vmatpush.bf16.msra.mxu1 %v12764_v62  ;;  %v10482_v49 = vadd.f32 %v10481_v25, %v22039_v48  ;;  %v12604_v62 = vor.u32 %v18379_v40, %v12603_v20  ;;  %v18439_v48 = vld [vmem:[%s20282_s11 + $0x474] sm:$0xf0]  ;;  %v12571_v20 = vld [vmem:[%s20282_s11 + $0x248] sm:$0xf]  ;;  %v10520_v13 = vpop.f32.mrf.mxu3 }
 0x34e   : > { %10759 = vmatpush.bf16.msra.mxu2 %v12892_v29  ;;  %v10494_v29 = vpop.f32.mrf.mxu1  ;;  %v18471_v57 = vld [vmem:[%s20282_s11 + $0x574] sm:$0xf0]  ;;  %v10507_v31 = vpop.f32.mrf.mxu2  ;;  %v12827_v59 = vld [vmem:[%s20282_s11 + $0x448] sm:$0xf] }
 0x34f   : > { %10772 = vmatpush.bf16.msra.mxu3 %v13020_v44  ;;  %v12715_v44 = vld [vmem:[%s20282_s11 + $0x368] sm:$0xf]  ;;  %v10495_v28 = vadd.f32 %v10494_v29, %v10482_v49  ;;  %v18371_v40 = vld [vmem:[%s20282_s11 + $0x254] sm:$0xf0]  ;;  %v10483_v29 = vpop.f32.mrf.mxu0 }
 0x350   : > { %v18403_v14 = vld [vmem:[%s20282_s11 + $0x354] sm:$0xf0]  ;;  %v12955_v49 = vld [vmem:[%s20282_s11 + $0x548] sm:$0xf] }
 0x351   : > { %10734 = vmatpush.bf16.msra.mxu0 %v12620_v50  ;;  %10747 = vmatpush.bf16.msra.mxu1 %v12748_v21  ;;  %v12588_v50 = vor.u32 %v18375_v53, %v12587_v47  ;;  %v12716_v21 = vor.u32 %v18407_v22, %v12715_v44  ;;  %v18435_v25 = vld [vmem:[%s20282_s11 + $0x454] sm:$0xf0]  ;;  %v10508_v58 = vadd.f32 %v10507_v31, %v10495_v28  ;;  %v12683_v22 = vld [vmem:[%s20282_s11 + $0x328] sm:$0xf] }
 0x352   : > { %10760 = vmatpush.bf16.msra.mxu2 %v12876_v15  ;;  %v12844_v15 = vor.u32 %v18439_v48, %v12843_v26  ;;  %v12700_v53 = vor.u32 %v18403_v14, %v12699_v63  ;;  %v12828_v44 = vor.u32 %v18435_v25, %v12827_v59  ;;  %v18367_v28 = vld [vmem:[%s20282_s11 + $0x234] sm:$0xf0]  ;;  %v12667_v31 = vld [vmem:[%s20282_s11 + $0x308] sm:$0xf] }
 0x353   : > { %10773 = vmatpush.bf16.msra.mxu3 %v13004_v55  ;;  %v12972_v55 = vor.u32 %v18471_v57, %v12971_v54  ;;  %v22108_v47 = vadd.f32 %v10520_v13, %v10508_v58  ;;  %v18399_v48 = vld [vmem:[%s20282_s11 + $0x334] sm:$0xf0]  ;;  %v12811_v54 = vld [vmem:[%s20282_s11 + $0x428] sm:$0xf] }
 0x354   : > { %v18431_v57 = vld [vmem:[%s20282_s11 + $0x434] sm:$0xf0]  ;;  %v12684_v63 = vor.u32 %v18399_v48, %v12683_v22  ;;  %v12795_v59 = vld [vmem:[%s20282_s11 + $0x408] sm:$0xf] }
 0x355   : > { %10735 = vmatpush.bf16.msra.mxu0 %v12604_v62  ;;  %10748 = vmatpush.bf16.msra.mxu1 %v12732_v61  ;;  %v18467_v62 = vld [vmem:[%s20282_s11 + $0x554] sm:$0xf0]  ;;  %v12572_v61 = vor.u32 %v18371_v40, %v12571_v20  ;;  %v12539_v20 = vld [vmem:[%s20282_s11 + $0x208] sm:$0xf] }
 0x356   : > { %10761 = vmatpush.bf16.msra.mxu2 %v12860_v1  ;;  %v10496_v1 = vpop.f32.mrf.mxu1  ;;  %v12956_v26 = vor.u32 %v18467_v62, %v12955_v49  ;;  %v18363_v40 = vld [vmem:[%s20282_s11 + $0x214] sm:$0xf0]  ;;  %v12923_v13 = vld [vmem:[%s20282_s11 + $0x508] sm:$0xf]  ;;  %v10509_v62 = vpop.f32.mrf.mxu2 }
 0x357   : > { %10774 = vmatpush.bf16.msra.mxu3 %v12988_v24  ;;  %v12555_v24 = vld [vmem:[%s20282_s11 + $0x228] sm:$0xf]  ;;  %v18395_v14 = vld [vmem:[%s20282_s11 + $0x314] sm:$0xf0] }
 0x358   : > { %v18427_v58 = vld [vmem:[%s20282_s11 + $0x414] sm:$0xf0]  ;;  %v13163_v29 = vld [vmem:[%s20282_s11 + $0x6e8] sm:$0xf] }
 0x359   : > { %10736 = vmatpush.bf16.msra.mxu0 %v12588_v50  ;;  %10749 = vmatpush.bf16.msra.mxu1 %v12716_v21  ;;  %v12939_v50 = vld [vmem:[%s20282_s11 + $0x528] sm:$0xf]  ;;  %v18463_v21 = vld [vmem:[%s20282_s11 + $0x534] sm:$0xf0]  ;;  %v12796_v48 = vor.u32 %v18427_v58, %v12795_v59 }
 0x35a   : > { %10762 = vmatpush.bf16.msra.mxu2 %v12844_v15  ;;  %v12556_v15 = vor.u32 %v18367_v28, %v12555_v24  ;;  %v12940_v25 = vor.u32 %v18463_v21, %v12939_v50  ;;  %v18459_v49 = vld [vmem:[%s20282_s11 + $0x514] sm:$0xf0]  ;;  %v13291_v1 = vld [vmem:[%s20282_s11 + $0x7e8] sm:$0xf] }
 0x35b   : > { %10775 = vmatpush.bf16.msra.mxu3 %v12972_v55  ;;  %v12812_v55 = vor.u32 %v18431_v57, %v12811_v54  ;;  %v18551_v24 = vld [vmem:[%s20282_s11 + $0x7f4] sm:$0xf0]  ;;  %v13419_v28 = vld [vmem:[%s20282_s11 + $0x8e8] sm:$0xf]  ;;  %v12924_v50 = vor.u32 %v18459_v49, %v12923_v13 }
 0x35c   : > { %v18583_v22 = vld [vmem:[%s20282_s11 + $0x8f4] sm:$0xf0]  ;;  %v13547_v54 = vld [vmem:[%s20282_s11 + $0x9e8] sm:$0xf] }
 0x35d   : > { %10737 = vmatpush.bf16.msra.mxu0 %v12572_v61  ;;  %10750 = vmatpush.bf16.msra.mxu1 %v12700_v53  ;;  %v18519_v61 = vld [vmem:[%s20282_s11 + $0x6f4] sm:$0xf0]  ;;  %v10522_v53 = vpop.f32.mrf.mxu3  ;;  %v13531_v59 = vld [vmem:[%s20282_s11 + $0x9c8] sm:$0xf] }
 0x35e   : > { %10763 = vmatpush.bf16.msra.mxu2 %v12828_v44  ;;  %v12540_v44 = vor.u32 %v18363_v40, %v12539_v20  ;;  %v18615_v57 = vld [vmem:[%s20282_s11 + $0x9f4] sm:$0xf0]  ;;  %v13164_v21 = vor.u32 %v18519_v61, %v13163_v29  ;;  %v13420_v20 = vor.u32 %v18583_v22, %v13419_v28  ;;  %v13147_v40 = vld [vmem:[%s20282_s11 + $0x6c8] sm:$0xf] }
 0x35f   : > { %10776 = vmatpush.bf16.msra.mxu3 %v12956_v26  ;;  %v12668_v26 = vor.u32 %v18395_v14, %v12667_v31  ;;  %v18515_v62 = vld [vmem:[%s20282_s11 + $0x6d4] sm:$0xf0]  ;;  %v13275_v53 = vld [vmem:[%s20282_s11 + $0x7c8] sm:$0xf] }
 0x360   : > { %v13403_v31 = vld [vmem:[%s20282_s11 + $0x8c8] sm:$0xf]  ;;  %v18579_v14 = vld [vmem:[%s20282_s11 + $0x8d4] sm:$0xf0]  ;;  %v13148_v58 = vor.u32 %v18515_v62, %v13147_v40 }
 0x361   : > { %10738 = vmatpush.bf16.msra.mxu0 %v12556_v15  ;;  %10751 = vmatpush.bf16.msra.mxu1 %v12684_v63  ;;  %v13292_v15 = vor.u32 %v18551_v24, %v13291_v1  ;;  %v13548_v63 = vor.u32 %v18615_v57, %v13547_v54  ;;  %v13404_v49 = vor.u32 %v18579_v14, %v13403_v31  ;;  %v13131_v29 = vld [vmem:[%s20282_s11 + $0x6a8] sm:$0xf]  ;;  %v18511_v61 = vld [vmem:[%s20282_s11 + $0x6b4] sm:$0xf0] }
 0x362   : > { %10764 = vmatpush.bf16.msra.mxu2 %v12812_v55  ;;  %v18547_v55 = vld [vmem:[%s20282_s11 + $0x7d4] sm:$0xf0]  ;;  %v13259_v1 = vld [vmem:[%s20282_s11 + $0x7a8] sm:$0xf]  ;;  %v13132_v54 = vor.u32 %v18511_v61, %v13131_v29 }
 0x363   : > { %10777 = vmatpush.bf16.msra.mxu3 %v12940_v25  ;;  %v18611_v25 = vld [vmem:[%s20282_s11 + $0x9d4] sm:$0xf0]  ;;  %v13276_v13 = vor.u32 %v18547_v55, %v13275_v53  ;;  %v13387_v28 = vld [vmem:[%s20282_s11 + $0x8a8] sm:$0xf] }
 0x364   : > { %v18543_v24 = vld [vmem:[%s20282_s11 + $0x7b4] sm:$0xf0]  ;;  %v13371_v53 = vld [vmem:[%s20282_s11 + $0x888] sm:$0xf] }
 0x365   : > { %10739 = vmatpush.bf16.msra.mxu0 %v12540_v44  ;;  %10752 = vmatpush.bf16.msra.mxu1 %v12668_v26  ;;  %v13532_v44 = vor.u32 %v18611_v25, %v13531_v59  ;;  %v18575_v22 = vld [vmem:[%s20282_s11 + $0x8b4] sm:$0xf0]  ;;  %v13515_v26 = vld [vmem:[%s20282_s11 + $0x9a8] sm:$0xf]  ;;  %v13260_v57 = vor.u32 %v18543_v24, %v13259_v1  ;;  %v10533_v55 = vpop.f32.mrf.mxu0 }
 0x366   : > { %10765 = vmatpush.bf16.msra.mxu2 %v12796_v48  ;;  %v18607_v48 = vld [vmem:[%s20282_s11 + $0x9b4] sm:$0xf0]  ;;  %v13499_v31 = vld [vmem:[%s20282_s11 + $0x988] sm:$0xf]  ;;  %v10534_v59 = vadd.f32 %v10533_v55, %v22108_v47 }
 0x367   : > { %10778 = vmatpush.bf16.msra.mxu3 %v12924_v50  ;;  %v13388_v50 = vor.u32 %v18575_v22, %v13387_v28  ;;  %v13516_v40 = vor.u32 %v18607_v48, %v13515_v26  ;;  %v18539_v62 = vld [vmem:[%s20282_s11 + $0x794] sm:$0xf0]  ;;  %v13099_v29 = vld [vmem:[%s20282_s11 + $0x668] sm:$0xf] }
 0x368   : > { %10740 = vmatmul.bf16.vlgmr.msra.gmra.mxu0 %v20409_v33  ;;  %10753 = vmatmul.bf16.vlgmr.msra.gmra.mxu1 %v20413_v35  ;;  %v18603_v14 = vld [vmem:[%s20282_s11 + $0x994] sm:$0xf0]  ;;  %v13227_v1 = vld [vmem:[%s20282_s11 + $0x768] sm:$0xf] }
 0x369   : > { %10784 = vmatpush.bf16.msrb.mxu0 %v13164_v21  ;;  %10797 = vmatpush.bf16.msrb.mxu1 %v13292_v15  ;;  %v13115_v21 = vld [vmem:[%s20282_s11 + $0x688] sm:$0xf]  ;;  %v18507_v15 = vld [vmem:[%s20282_s11 + $0x694] sm:$0xf0] }
 0x36a   : > { %10810 = vmatpush.bf16.msrb.mxu2 %v13420_v20  ;;  %10779 = vmatmul.bf16.vlgmr.msra.gmra.mxu3 %v20452_v10  ;;  %v13243_v20 = vld [vmem:[%s20282_s11 + $0x788] sm:$0xf]  ;;  %v13116_v25 = vor.u32 %v18507_v15, %v13115_v21  ;;  %v18503_v61 = vld [vmem:[%s20282_s11 + $0x674] sm:$0xf0] }
 0x36b   : > { %10823 = vmatpush.bf16.msrb.mxu3 %v13548_v63  ;;  %10766 = vmatmul.bf16.vlgmr.msra.gmra.mxu2 %v20447_v7  ;;  %v18571_v63 = vld [vmem:[%s20282_s11 + $0x894] sm:$0xf0]  ;;  %v13355_v22 = vld [vmem:[%s20282_s11 + $0x868] sm:$0xf] }
 0x36c   : > { %v18535_v28 = vld [vmem:[%s20282_s11 + $0x774] sm:$0xf0]  ;;  %v13483_v26 = vld [vmem:[%s20282_s11 + $0x968] sm:$0xf] }
 0x36d   : > { %10785 = vmatpush.bf16.msrb.mxu0 %v13148_v58  ;;  %10798 = vmatpush.bf16.msrb.mxu1 %v13276_v13  ;;  %v10546_v58 = vpop.f32.mrf.mxu1  ;;  %v13244_v13 = vor.u32 %v18539_v62, %v13243_v20  ;;  %v18567_v47 = vld [vmem:[%s20282_s11 + $0x874] sm:$0xf0]  ;;  %v13083_v21 = vld [vmem:[%s20282_s11 + $0x648] sm:$0xf] }
 0x36e   : > { %10811 = vmatpush.bf16.msrb.mxu2 %v13404_v49  ;;  %v13372_v49 = vor.u32 %v18571_v63, %v13371_v53  ;;  %v10547_v24 = vadd.f32 %v10546_v58, %v10534_v59  ;;  %v18599_v48 = vld [vmem:[%s20282_s11 + $0x974] sm:$0xf0]  ;;  %v13211_v20 = vld [vmem:[%s20282_s11 + $0x748] sm:$0xf]  ;;  %v10559_v62 = vpop.f32.mrf.mxu2  ;;  %v10535_v58 = vpop.f32.mrf.mxu0 }
 0x36f   : > { %10824 = vmatpush.bf16.msrb.mxu3 %v13532_v44  ;;  %v13500_v44 = vor.u32 %v18603_v14, %v13499_v31  ;;  %v18499_v15 = vld [vmem:[%s20282_s11 + $0x654] sm:$0xf0]  ;;  %v13339_v63 = vld [vmem:[%s20282_s11 + $0x848] sm:$0xf]  ;;  %v10572_v14 = vpop.f32.mrf.mxu3 }
 0x370   : > { %v18531_v53 = vld [vmem:[%s20282_s11 + $0x754] sm:$0xf0]  ;;  %v10560_v31 = vadd.f32 %v10559_v62, %v10547_v24  ;;  %v13467_v59 = vld [vmem:[%s20282_s11 + $0x948] sm:$0xf] }
 0x371   : > { %10786 = vmatpush.bf16.msrb.mxu0 %v13132_v54  ;;  %10799 = vmatpush.bf16.msrb.mxu1 %v13260_v57  ;;  %v13100_v54 = vor.u32 %v18503_v61, %v13099_v29  ;;  %v13228_v57 = vor.u32 %v18535_v28, %v13227_v1  ;;  %v18563_v55 = vld [vmem:[%s20282_s11 + $0x854] sm:$0xf0]  ;;  %v13212_v61 = vor.u32 %v18531_v53, %v13211_v20  ;;  %v13195_v28 = vld [vmem:[%s20282_s11 + $0x728] sm:$0xf] }
 0x372   : > { %10812 = vmatpush.bf16.msrb.mxu2 %v13388_v50  ;;  %v13356_v50 = vor.u32 %v18567_v47, %v13355_v22  ;;  %v22179_v29 = vadd.f32 %v10572_v14, %v10560_v31  ;;  %v13340_v1 = vor.u32 %v18563_v55, %v13339_v63  ;;  %v18495_v24 = vld [vmem:[%s20282_s11 + $0x634] sm:$0xf0]  ;;  %v13179_v62 = vld [vmem:[%s20282_s11 + $0x708] sm:$0xf] }
 0x373   : > { %10825 = vmatpush.bf16.msrb.mxu3 %v13516_v40  ;;  %v13484_v40 = vor.u32 %v18599_v48, %v13483_v26  ;;  %v18527_v47 = vld [vmem:[%s20282_s11 + $0x734] sm:$0xf0]  ;;  %v13323_v26 = vld [vmem:[%s20282_s11 + $0x828] sm:$0xf] }
 0x374   : > { %v18559_v48 = vld [vmem:[%s20282_s11 + $0x834] sm:$0xf0]  ;;  %v13196_v20 = vor.u32 %v18527_v47, %v13195_v28  ;;  %v13307_v63 = vld [vmem:[%s20282_s11 + $0x808] sm:$0xf] }
 0x375   : > { %10787 = vmatpush.bf16.msrb.mxu0 %v13116_v25  ;;  %10800 = vmatpush.bf16.msrb.mxu1 %v13244_v13  ;;  %v18595_v25 = vld [vmem:[%s20282_s11 + $0x954] sm:$0xf0]  ;;  %v13084_v13 = vor.u32 %v18499_v15, %v13083_v21  ;;  %v13051_v21 = vld [vmem:[%s20282_s11 + $0x608] sm:$0xf] }
 0x376   : > { %10813 = vmatpush.bf16.msrb.mxu2 %v13372_v49  ;;  %v10548_v49 = vpop.f32.mrf.mxu1  ;;  %v13468_v22 = vor.u32 %v18595_v25, %v13467_v59  ;;  %v18491_v15 = vld [vmem:[%s20282_s11 + $0x614] sm:$0xf0]  ;;  %v13435_v14 = vld [vmem:[%s20282_s11 + $0x908] sm:$0xf]  ;;  %v10561_v25 = vpop.f32.mrf.mxu2 }
 0x377   : > { %10826 = vmatpush.bf16.msrb.mxu3 %v13500_v44  ;;  %v13067_v44 = vld [vmem:[%s20282_s11 + $0x628] sm:$0xf]  ;;  %v18523_v53 = vld [vmem:[%s20282_s11 + $0x714] sm:$0xf0] }
 0x378   : > { %v18555_v31 = vld [vmem:[%s20282_s11 + $0x814] sm:$0xf0]  ;;  %v13675_v58 = vld [vmem:[%s20282_s11 + $0xae8] sm:$0xf] }
 0x379   : > { %10788 = vmatpush.bf16.msrb.mxu0 %v13100_v54  ;;  %10801 = vmatpush.bf16.msrb.mxu1 %v13228_v57  ;;  %v13451_v54 = vld [vmem:[%s20282_s11 + $0x928] sm:$0xf]  ;;  %v18591_v57 = vld [vmem:[%s20282_s11 + $0x934] sm:$0xf0]  ;;  %v13308_v47 = vor.u32 %v18555_v31, %v13307_v63 }
 0x37a   : > { %10814 = vmatpush.bf16.msrb.mxu2 %v13356_v50  ;;  %v13068_v50 = vor.u32 %v18495_v24, %v13067_v44  ;;  %v13452_v55 = vor.u32 %v18591_v57, %v13451_v54  ;;  %v18587_v59 = vld [vmem:[%s20282_s11 + $0x914] sm:$0xf0]  ;;  %v13803_v49 = vld [vmem:[%s20282_s11 + $0xbe8] sm:$0xf] }
 0x37b   : > { %10827 = vmatpush.bf16.msrb.mxu3 %v13484_v40  ;;  %v13324_v40 = vor.u32 %v18559_v48, %v13323_v26  ;;  %v18679_v44 = vld [vmem:[%s20282_s11 + $0xbf4] sm:$0xf0]  ;;  %v13931_v24 = vld [vmem:[%s20282_s11 + $0xce8] sm:$0xf]  ;;  %v13436_v54 = vor.u32 %v18587_v59, %v13435_v14 }
 0x37c   : > { %v18711_v28 = vld [vmem:[%s20282_s11 + $0xcf4] sm:$0xf0]  ;;  %v14059_v26 = vld [vmem:[%s20282_s11 + $0xde8] sm:$0xf] }
 0x37d   : > { %10789 = vmatpush.bf16.msrb.mxu0 %v13084_v13  ;;  %10802 = vmatpush.bf16.msrb.mxu1 %v13212_v61  ;;  %v18647_v13 = vld [vmem:[%s20282_s11 + $0xaf4] sm:$0xf0]  ;;  %v10574_v61 = vpop.f32.mrf.mxu3  ;;  %v14043_v63 = vld [vmem:[%s20282_s11 + $0xdc8] sm:$0xf] }
 0x37e   : > { %10815 = vmatpush.bf16.msrb.mxu2 %v13340_v1  ;;  %v13052_v1 = vor.u32 %v18491_v15, %v13051_v21  ;;  %v18743_v48 = vld [vmem:[%s20282_s11 + $0xdf4] sm:$0xf0]  ;;  %v13676_v57 = vor.u32 %v18647_v13, %v13675_v58  ;;  %v13932_v21 = vor.u32 %v18711_v28, %v13931_v24  ;;  %v13659_v15 = vld [vmem:[%s20282_s11 + $0xac8] sm:$0xf] }
 0x37f   : > { %10828 = vmatpush.bf16.msrb.mxu3 %v13468_v22  ;;  %v13180_v22 = vor.u32 %v18523_v53, %v13179_v62  ;;  %v18643_v25 = vld [vmem:[%s20282_s11 + $0xad4] sm:$0xf0]  ;;  %v13787_v61 = vld [vmem:[%s20282_s11 + $0xbc8] sm:$0xf] }
 0x380   : > { %v13915_v62 = vld [vmem:[%s20282_s11 + $0xcc8] sm:$0xf]  ;;  %v18707_v53 = vld [vmem:[%s20282_s11 + $0xcd4] sm:$0xf0]  ;;  %v13660_v31 = vor.u32 %v18643_v25, %v13659_v15 }
 0x381   : > { %10790 = vmatpush.bf16.msrb.mxu0 %v13068_v50  ;;  %10803 = vmatpush.bf16.msrb.mxu1 %v13196_v20  ;;  %v13804_v50 = vor.u32 %v18679_v44, %v13803_v49  ;;  %v14060_v20 = vor.u32 %v18743_v48, %v14059_v26  ;;  %v13916_v59 = vor.u32 %v18707_v53, %v13915_v62  ;;  %v13643_v58 = vld [vmem:[%s20282_s11 + $0xaa8] sm:$0xf]  ;;  %v18639_v13 = vld [vmem:[%s20282_s11 + $0xab4] sm:$0xf0] }
 0x382   : > { %10816 = vmatpush.bf16.msrb.mxu2 %v13324_v40  ;;  %v18675_v40 = vld [vmem:[%s20282_s11 + $0xbd4] sm:$0xf0]  ;;  %v13771_v49 = vld [vmem:[%s20282_s11 + $0xba8] sm:$0xf]  ;;  %v13644_v26 = vor.u32 %v18639_v13, %v13643_v58 }
 0x383   : > { %10829 = vmatpush.bf16.msrb.mxu3 %v13452_v55  ;;  %v18739_v55 = vld [vmem:[%s20282_s11 + $0xdd4] sm:$0xf0]  ;;  %v13788_v14 = vor.u32 %v18675_v40, %v13787_v61  ;;  %v13899_v24 = vld [vmem:[%s20282_s11 + $0xca8] sm:$0xf] }
 0x384   : > { %v18671_v44 = vld [vmem:[%s20282_s11 + $0xbb4] sm:$0xf0]  ;;  %v13883_v61 = vld [vmem:[%s20282_s11 + $0xc88] sm:$0xf] }
 0x385   : > { %10791 = vmatpush.bf16.msrb.mxu0 %v13052_v1  ;;  %10804 = vmatpush.bf16.msrb.mxu1 %v13180_v22  ;;  %v14044_v1 = vor.u32 %v18739_v55, %v14043_v63  ;;  %v18703_v28 = vld [vmem:[%s20282_s11 + $0xcb4] sm:$0xf0]  ;;  %v14027_v22 = vld [vmem:[%s20282_s11 + $0xda8] sm:$0xf]  ;;  %v13772_v48 = vor.u32 %v18671_v44, %v13771_v49  ;;  %v10585_v40 = vpop.f32.mrf.mxu0 }
 0x386   : > { %10817 = vmatpush.bf16.msrb.mxu2 %v13308_v47  ;;  %v18735_v47 = vld [vmem:[%s20282_s11 + $0xdb4] sm:$0xf0]  ;;  %v14011_v62 = vld [vmem:[%s20282_s11 + $0xd88] sm:$0xf]  ;;  %v10586_v63 = vadd.f32 %v10585_v40, %v22179_v29 }
 0x387   : > { %10830 = vmatpush.bf16.msrb.mxu3 %v13436_v54  ;;  %v13900_v54 = vor.u32 %v18703_v28, %v13899_v24  ;;  %v14028_v15 = vor.u32 %v18735_v47, %v14027_v22  ;;  %v18667_v25 = vld [vmem:[%s20282_s11 + $0xb94] sm:$0xf0]  ;;  %v13611_v58 = vld [vmem:[%s20282_s11 + $0xa68] sm:$0xf] }
 0x388   : > { %10792 = vmatmul.bf16.vlgmr.msrb.gmra.mxu0 %v20445_v6  ;;  %10805 = vmatmul.bf16.vlgmr.msrb.gmra.mxu1 %v20449_v8  ;;  %v18731_v53 = vld [vmem:[%s20282_s11 + $0xd94] sm:$0xf0]  ;;  %v13739_v49 = vld [vmem:[%s20282_s11 + $0xb68] sm:$0xf] }
 0x389   : > { %10836 = vmatpush.bf16.msra.mxu0 %v13676_v57  ;;  %10849 = vmatpush.bf16.msra.mxu1 %v13804_v50  ;;  %v13627_v57 = vld [vmem:[%s20282_s11 + $0xa88] sm:$0xf]  ;;  %v18635_v50 = vld [vmem:[%s20282_s11 + $0xa94] sm:$0xf0] }
 0x38a   : > { %10862 = vmatpush.bf16.msra.mxu2 %v13932_v21  ;;  %10831 = vmatmul.bf16.vlgmr.msrb.gmra.mxu3 %v20533_v12  ;;  %v13755_v21 = vld [vmem:[%s20282_s11 + $0xb88] sm:$0xf]  ;;  %v13628_v55 = vor.u32 %v18635_v50, %v13627_v57  ;;  %v18631_v13 = vld [vmem:[%s20282_s11 + $0xa74] sm:$0xf0] }
 0x38b   : > { %10875 = vmatpush.bf16.msra.mxu3 %v14060_v20  ;;  %10818 = vmatmul.bf16.vlgmr.msrb.gmra.mxu2 %v20526_v2  ;;  %v18699_v20 = vld [vmem:[%s20282_s11 + $0xc94] sm:$0xf0]  ;;  %v13867_v28 = vld [vmem:[%s20282_s11 + $0xc68] sm:$0xf] }
 0x38c   : > { %v18663_v24 = vld [vmem:[%s20282_s11 + $0xb74] sm:$0xf0]  ;;  %v13995_v22 = vld [vmem:[%s20282_s11 + $0xd68] sm:$0xf] }
 0x38d   : > { %10837 = vmatpush.bf16.msra.mxu0 %v13660_v31  ;;  %10850 = vmatpush.bf16.msra.mxu1 %v13788_v14  ;;  %v10598_v31 = vpop.f32.mrf.mxu1  ;;  %v13756_v14 = vor.u32 %v18667_v25, %v13755_v21  ;;  %v18695_v29 = vld [vmem:[%s20282_s11 + $0xc74] sm:$0xf0]  ;;  %v13595_v57 = vld [vmem:[%s20282_s11 + $0xa48] sm:$0xf] }
 0x38e   : > { %10863 = vmatpush.bf16.msra.mxu2 %v13916_v59  ;;  %v13884_v59 = vor.u32 %v18699_v20, %v13883_v61  ;;  %v10599_v44 = vadd.f32 %v10598_v31, %v10586_v63  ;;  %v18727_v47 = vld [vmem:[%s20282_s11 + $0xd74] sm:$0xf0]  ;;  %v13723_v21 = vld [vmem:[%s20282_s11 + $0xb48] sm:$0xf]  ;;  %v10611_v25 = vpop.f32.mrf.mxu2  ;;  %v10587_v31 = vpop.f32.mrf.mxu0 }
 0x38f   : > { %10876 = vmatpush.bf16.msra.mxu3 %v14044_v1  ;;  %v14012_v1 = vor.u32 %v18731_v53, %v14011_v62  ;;  %v18627_v50 = vld [vmem:[%s20282_s11 + $0xa54] sm:$0xf0]  ;;  %v13851_v20 = vld [vmem:[%s20282_s11 + $0xc48] sm:$0xf]  ;;  %v10624_v53 = vpop.f32.mrf.mxu3 }
 0x390   : > { %v18659_v61 = vld [vmem:[%s20282_s11 + $0xb54] sm:$0xf0]  ;;  %v10612_v62 = vadd.f32 %v10611_v25, %v10599_v44  ;;  %v13979_v63 = vld [vmem:[%s20282_s11 + $0xd48] sm:$0xf] }
 0x391   : > { %10838 = vmatpush.bf16.msra.mxu0 %v13644_v26  ;;  %10851 = vmatpush.bf16.msra.mxu1 %v13772_v48  ;;  %v13612_v26 = vor.u32 %v18631_v13, %v13611_v58  ;;  %v13740_v48 = vor.u32 %v18663_v24, %v13739_v49  ;;  %v18691_v40 = vld [vmem:[%s20282_s11 + $0xc54] sm:$0xf0]  ;;  %v13724_v13 = vor.u32 %v18659_v61, %v13723_v21  ;;  %v13707_v24 = vld [vmem:[%s20282_s11 + $0xb28] sm:$0xf] }
 0x392   : > { %10864 = vmatpush.bf16.msra.mxu2 %v13900_v54  ;;  %v13868_v54 = vor.u32 %v18695_v29, %v13867_v28  ;;  %v22250_v58 = vadd.f32 %v10624_v53, %v10612_v62  ;;  %v13852_v49 = vor.u32 %v18691_v40, %v13851_v20  ;;  %v18623_v44 = vld [vmem:[%s20282_s11 + $0xa34] sm:$0xf0]  ;;  %v13691_v25 = vld [vmem:[%s20282_s11 + $0xb08] sm:$0xf] }
 0x393   : > { %10877 = vmatpush.bf16.msra.mxu3 %v14028_v15  ;;  %v13996_v15 = vor.u32 %v18727_v47, %v13995_v22  ;;  %v18655_v29 = vld [vmem:[%s20282_s11 + $0xb34] sm:$0xf0]  ;;  %v13835_v22 = vld [vmem:[%s20282_s11 + $0xc28] sm:$0xf] }
 0x394   : > { %v18687_v47 = vld [vmem:[%s20282_s11 + $0xc34] sm:$0xf0]  ;;  %v13708_v21 = vor.u32 %v18655_v29, %v13707_v24  ;;  %v13819_v20 = vld [vmem:[%s20282_s11 + $0xc08] sm:$0xf] }
 0x395   : > { %10839 = vmatpush.bf16.msra.mxu0 %v13628_v55  ;;  %10852 = vmatpush.bf16.msra.mxu1 %v13756_v14  ;;  %v18723_v55 = vld [vmem:[%s20282_s11 + $0xd54] sm:$0xf0]  ;;  %v13596_v14 = vor.u32 %v18627_v50, %v13595_v57  ;;  %v13563_v57 = vld [vmem:[%s20282_s11 + $0xa08] sm:$0xf] }
 0x396   : > { %10865 = vmatpush.bf16.msra.mxu2 %v13884_v59  ;;  %v10600_v59 = vpop.f32.mrf.mxu1  ;;  %v13980_v28 = vor.u32 %v18723_v55, %v13979_v63  ;;  %v18619_v50 = vld [vmem:[%s20282_s11 + $0xa14] sm:$0xf0]  ;;  %v13947_v53 = vld [vmem:[%s20282_s11 + $0xd08] sm:$0xf]  ;;  %v10613_v55 = vpop.f32.mrf.mxu2 }
 0x397   : > { %10878 = vmatpush.bf16.msra.mxu3 %v14012_v1  ;;  %v13579_v1 = vld [vmem:[%s20282_s11 + $0xa28] sm:$0xf]  ;;  %v18651_v61 = vld [vmem:[%s20282_s11 + $0xb14] sm:$0xf0] }
 0x398   : > { %v18683_v62 = vld [vmem:[%s20282_s11 + $0xc14] sm:$0xf0]  ;;  %v14187_v31 = vld [vmem:[%s20282_s11 + $0xee8] sm:$0xf] }
 0x399   : > { %10840 = vmatpush.bf16.msra.mxu0 %v13612_v26  ;;  %10853 = vmatpush.bf16.msra.mxu1 %v13740_v48  ;;  %v13963_v26 = vld [vmem:[%s20282_s11 + $0xd28] sm:$0xf]  ;;  %v18719_v48 = vld [vmem:[%s20282_s11 + $0xd34] sm:$0xf0]  ;;  %v13820_v29 = vor.u32 %v18683_v62, %v13819_v20 }
 0x39a   : > { %10866 = vmatpush.bf16.msra.mxu2 %v13868_v54  ;;  %v13580_v54 = vor.u32 %v18623_v44, %v13579_v1  ;;  %v13964_v40 = vor.u32 %v18719_v48, %v13963_v26  ;;  %v18715_v63 = vld [vmem:[%s20282_s11 + $0xd14] sm:$0xf0]  ;;  %v14315_v59 = vld [vmem:[%s20282_s11 + $0xfe8] sm:$0xf] }
 0x39b   : > { %10879 = vmatpush.bf16.msra.mxu3 %v13996_v15  ;;  %v13836_v15 = vor.u32 %v18687_v47, %v13835_v22  ;;  %v18807_v1 = vld [vmem:[%s20282_s11 + $0xff4] sm:$0xf0]  ;;  %v14443_v44 = vld [vmem:[%s20282_s11 + $0x10e8] sm:$0xf]  ;;  %v13948_v26 = vor.u32 %v18715_v63, %v13947_v53 }
 0x39c   : > { %v18839_v24 = vld [vmem:[%s20282_s11 + $0x10f4] sm:$0xf0]  ;;  %v14571_v22 = vld [vmem:[%s20282_s11 + $0x11e8] sm:$0xf] }
 0x39d   : > { %10841 = vmatpush.bf16.msra.mxu0 %v13596_v14  ;;  %10854 = vmatpush.bf16.msra.mxu1 %v13724_v13  ;;  %v18775_v14 = vld [vmem:[%s20282_s11 + $0xef4] sm:$0xf0]  ;;  %v10626_v13 = vpop.f32.mrf.mxu3  ;;  %v14555_v20 = vld [vmem:[%s20282_s11 + $0x11c8] sm:$0xf] }
 0x39e   : > { %10867 = vmatpush.bf16.msra.mxu2 %v13852_v49  ;;  %v13564_v49 = vor.u32 %v18619_v50, %v13563_v57  ;;  %v18871_v47 = vld [vmem:[%s20282_s11 + $0x11f4] sm:$0xf0]  ;;  %v14188_v48 = vor.u32 %v18775_v14, %v14187_v31  ;;  %v14444_v57 = vor.u32 %v18839_v24, %v14443_v44  ;;  %v14171_v50 = vld [vmem:[%s20282_s11 + $0xec8] sm:$0xf] }
 0x39f   : > { %10880 = vmatpush.bf16.msra.mxu3 %v13980_v28  ;;  %v13692_v28 = vor.u32 %v18651_v61, %v13691_v25  ;;  %v18771_v55 = vld [vmem:[%s20282_s11 + $0xed4] sm:$0xf0]  ;;  %v14299_v13 = vld [vmem:[%s20282_s11 + $0xfc8] sm:$0xf] }
 0x3a0   : > { %v14427_v25 = vld [vmem:[%s20282_s11 + $0x10c8] sm:$0xf]  ;;  %v18835_v61 = vld [vmem:[%s20282_s11 + $0x10d4] sm:$0xf0]  ;;  %v14172_v62 = vor.u32 %v18771_v55, %v14171_v50 }
 0x3a1   : > { %10842 = vmatpush.bf16.msra.mxu0 %v13580_v54  ;;  %10855 = vmatpush.bf16.msra.mxu1 %v13708_v21  ;;  %v14316_v54 = vor.u32 %v18807_v1, %v14315_v59  ;;  %v14572_v21 = vor.u32 %v18871_v47, %v14571_v22  ;;  %v14428_v63 = vor.u32 %v18835_v61, %v14427_v25  ;;  %v14155_v31 = vld [vmem:[%s20282_s11 + $0xea8] sm:$0xf]  ;;  %v18767_v14 = vld [vmem:[%s20282_s11 + $0xeb4] sm:$0xf0] }
 0x3a2   : > { %10868 = vmatpush.bf16.msra.mxu2 %v13836_v15  ;;  %v18803_v15 = vld [vmem:[%s20282_s11 + $0xfd4] sm:$0xf0]  ;;  %v14283_v59 = vld [vmem:[%s20282_s11 + $0xfa8] sm:$0xf]  ;;  %v14156_v22 = vor.u32 %v18767_v14, %v14155_v31 }
 0x3a3   : > { %10881 = vmatpush.bf16.msra.mxu3 %v13964_v40  ;;  %v18867_v40 = vld [vmem:[%s20282_s11 + $0x11d4] sm:$0xf0]  ;;  %v14300_v53 = vor.u32 %v18803_v15, %v14299_v13  ;;  %v14411_v44 = vld [vmem:[%s20282_s11 + $0x10a8] sm:$0xf] }
 0x3a4   : > { %v18799_v1 = vld [vmem:[%s20282_s11 + $0xfb4] sm:$0xf0]  ;;  %v14395_v13 = vld [vmem:[%s20282_s11 + $0x1088] sm:$0xf] }
 0x3a5   : > { %10843 = vmatpush.bf16.msra.mxu0 %v13564_v49  ;;  %10856 = vmatpush.bf16.msra.mxu1 %v13692_v28  ;;  %v14556_v49 = vor.u32 %v18867_v40, %v14555_v20  ;;  %v18831_v24 = vld [vmem:[%s20282_s11 + $0x10b4] sm:$0xf0]  ;;  %v14539_v28 = vld [vmem:[%s20282_s11 + $0x11a8] sm:$0xf]  ;;  %v14284_v47 = vor.u32 %v18799_v1, %v14283_v59  ;;  %v10637_v15 = vpop.f32.mrf.mxu0 }
 0x3a6   : > { %10869 = vmatpush.bf16.msra.mxu2 %v13820_v29  ;;  %v18863_v29 = vld [vmem:[%s20282_s11 + $0x11b4] sm:$0xf0]  ;;  %v14523_v25 = vld [vmem:[%s20282_s11 + $0x1188] sm:$0xf]  ;;  %v10638_v20 = vadd.f32 %v10637_v15, %v22250_v58 }
 0x3a7   : > { %10882 = vmatpush.bf16.msra.mxu3 %v13948_v26  ;;  %v14412_v26 = vor.u32 %v18831_v24, %v14411_v44  ;;  %v14540_v50 = vor.u32 %v18863_v29, %v14539_v28  ;;  %v18795_v55 = vld [vmem:[%s20282_s11 + $0xf94] sm:$0xf0]  ;;  %v14123_v31 = vld [vmem:[%s20282_s11 + $0xe68] sm:$0xf] }
 0x3a8   : > { %10844 = vmatmul.bf16.vlgmr.msra.gmra.mxu0 %v20531_v11  ;;  %10857 = vmatmul.bf16.vlgmr.msra.gmra.mxu1 %v20539_v17  ;;  %v18859_v61 = vld [vmem:[%s20282_s11 + $0x1194] sm:$0xf0]  ;;  %v14251_v59 = vld [vmem:[%s20282_s11 + $0xf68] sm:$0xf] }
 0x3a9   : > { %10888 = vmatpush.bf16.msrb.mxu0 %v14188_v48  ;;  %10901 = vmatpush.bf16.msrb.mxu1 %v14316_v54  ;;  %v14139_v48 = vld [vmem:[%s20282_s11 + $0xe88] sm:$0xf]  ;;  %v18763_v54 = vld [vmem:[%s20282_s11 + $0xe94] sm:$0xf0] }
 0x3aa   : > { %10914 = vmatpush.bf16.msrb.mxu2 %v14444_v57  ;;  %10883 = vmatmul.bf16.vlgmr.msra.gmra.mxu3 %v20558_v37  ;;  %v14267_v57 = vld [vmem:[%s20282_s11 + $0xf88] sm:$0xf]  ;;  %v14140_v40 = vor.u32 %v18763_v54, %v14139_v48  ;;  %v18759_v14 = vld [vmem:[%s20282_s11 + $0xe74] sm:$0xf0] }
 0x3ab   : > { %10927 = vmatpush.bf16.msrb.mxu3 %v14572_v21  ;;  %10870 = vmatmul.bf16.vlgmr.msra.gmra.mxu2 %v20552_v32  ;;  %v18827_v21 = vld [vmem:[%s20282_s11 + $0x1094] sm:$0xf0]  ;;  %v14379_v24 = vld [vmem:[%s20282_s11 + $0x1068] sm:$0xf] }
 0x3ac   : > { %v18791_v44 = vld [vmem:[%s20282_s11 + $0xf74] sm:$0xf0]  ;;  %v14507_v28 = vld [vmem:[%s20282_s11 + $0x1168] sm:$0xf] }
 0x3ad   : > { %10889 = vmatpush.bf16.msrb.mxu0 %v14172_v62  ;;  %10902 = vmatpush.bf16.msrb.mxu1 %v14300_v53  ;;  %v10650_v62 = vpop.f32.mrf.mxu1  ;;  %v14268_v53 = vor.u32 %v18795_v55, %v14267_v57  ;;  %v18823_v58 = vld [vmem:[%s20282_s11 + $0x1074] sm:$0xf0]  ;;  %v14107_v48 = vld [vmem:[%s20282_s11 + $0xe48] sm:$0xf] }
 0x3ae   : > { %10915 = vmatpush.bf16.msrb.mxu2 %v14428_v63  ;;  %v14396_v63 = vor.u32 %v18827_v21, %v14395_v13  ;;  %v10651_v1 = vadd.f32 %v10650_v62, %v10638_v20  ;;  %v18855_v29 = vld [vmem:[%s20282_s11 + $0x1174] sm:$0xf0]  ;;  %v14235_v57 = vld [vmem:[%s20282_s11 + $0xf48] sm:$0xf]  ;;  %v10663_v55 = vpop.f32.mrf.mxu2  ;;  %v10639_v62 = vpop.f32.mrf.mxu0 }
 0x3af   : > { %10928 = vmatpush.bf16.msrb.mxu3 %v14556_v49  ;;  %v14524_v49 = vor.u32 %v18859_v61, %v14523_v25  ;;  %v18755_v54 = vld [vmem:[%s20282_s11 + $0xe54] sm:$0xf0]  ;;  %v14363_v21 = vld [vmem:[%s20282_s11 + $0x1048] sm:$0xf]  ;;  %v10676_v61 = vpop.f32.mrf.mxu3 }
 0x3b0   : > { %v18787_v13 = vld [vmem:[%s20282_s11 + $0xf54] sm:$0xf0]  ;;  %v10664_v25 = vadd.f32 %v10663_v55, %v10651_v1  ;;  %v14491_v20 = vld [vmem:[%s20282_s11 + $0x1148] sm:$0xf] }
 0x3b1   : > { %10890 = vmatpush.bf16.msrb.mxu0 %v14156_v22  ;;  %10903 = vmatpush.bf16.msrb.mxu1 %v14284_v47  ;;  %v14124_v22 = vor.u32 %v18759_v14, %v14123_v31  ;;  %v14252_v47 = vor.u32 %v18791_v44, %v14251_v59  ;;  %v18819_v15 = vld [vmem:[%s20282_s11 + $0x1054] sm:$0xf0]  ;;  %v14236_v14 = vor.u32 %v18787_v13, %v14235_v57  ;;  %v14219_v44 = vld [vmem:[%s20282_s11 + $0xf28] sm:$0xf] }
 0x3b2   : > { %10916 = vmatpush.bf16.msrb.mxu2 %v14412_v26  ;;  %v14380_v26 = vor.u32 %v18823_v58, %v14379_v24  ;;  %v22321_v31 = vadd.f32 %v10676_v61, %v10664_v25  ;;  %v14364_v59 = vor.u32 %v18819_v15, %v14363_v21  ;;  %v18751_v1 = vld [vmem:[%s20282_s11 + $0xe34] sm:$0xf0]  ;;  %v14203_v55 = vld [vmem:[%s20282_s11 + $0xf08] sm:$0xf] }
 0x3b3   : > { %10929 = vmatpush.bf16.msrb.mxu3 %v14540_v50  ;;  %v14508_v50 = vor.u32 %v18855_v29, %v14507_v28  ;;  %v18783_v58 = vld [vmem:[%s20282_s11 + $0xf34] sm:$0xf0]  ;;  %v14347_v28 = vld [vmem:[%s20282_s11 + $0x1028] sm:$0xf] }
 0x3b4   : > { %v18815_v29 = vld [vmem:[%s20282_s11 + $0x1034] sm:$0xf0]  ;;  %v14220_v57 = vor.u32 %v18783_v58, %v14219_v44  ;;  %v14331_v21 = vld [vmem:[%s20282_s11 + $0x1008] sm:$0xf] }
 0x3b5   : > { %10891 = vmatpush.bf16.msrb.mxu0 %v14140_v40  ;;  %10904 = vmatpush.bf16.msrb.mxu1 %v14268_v53  ;;  %v18851_v40 = vld [vmem:[%s20282_s11 + $0x1154] sm:$0xf0]  ;;  %v14108_v53 = vor.u32 %v18755_v54, %v14107_v48  ;;  %v14075_v48 = vld [vmem:[%s20282_s11 + $0xe08] sm:$0xf] }
 0x3b6   : > { %10917 = vmatpush.bf16.msrb.mxu2 %v14396_v63  ;;  %v10652_v63 = vpop.f32.mrf.mxu1  ;;  %v14492_v24 = vor.u32 %v18851_v40, %v14491_v20  ;;  %v18747_v54 = vld [vmem:[%s20282_s11 + $0xe14] sm:$0xf0]  ;;  %v14459_v61 = vld [vmem:[%s20282_s11 + $0x1108] sm:$0xf]  ;;  %v10665_v40 = vpop.f32.mrf.mxu2 }
 0x3b7   : > { %10930 = vmatpush.bf16.msrb.mxu3 %v14524_v49  ;;  %v14091_v49 = vld [vmem:[%s20282_s11 + $0xe28] sm:$0xf]  ;;  %v18779_v13 = vld [vmem:[%s20282_s11 + $0xf14] sm:$0xf0] }
 0x3b8   : > { %v18811_v25 = vld [vmem:[%s20282_s11 + $0x1014] sm:$0xf0]  ;;  %v14699_v62 = vld [vmem:[%s20282_s11 + $0x12e8] sm:$0xf] }
 0x3b9   : > { %10892 = vmatpush.bf16.msrb.mxu0 %v14124_v22  ;;  %10905 = vmatpush.bf16.msrb.mxu1 %v14252_v47  ;;  %v14475_v22 = vld [vmem:[%s20282_s11 + $0x1128] sm:$0xf]  ;;  %v18847_v47 = vld [vmem:[%s20282_s11 + $0x1134] sm:$0xf0]  ;;  %v14332_v58 = vor.u32 %v18811_v25, %v14331_v21 }
 0x3ba   : > { %10918 = vmatpush.bf16.msrb.mxu2 %v14380_v26  ;;  %v14092_v26 = vor.u32 %v18751_v1, %v14091_v49  ;;  %v14476_v15 = vor.u32 %v18847_v47, %v14475_v22  ;;  %v18843_v20 = vld [vmem:[%s20282_s11 + $0x1114] sm:$0xf0]  ;;  %v14827_v63 = vld [vmem:[%s20282_s11 + $0x13e8] sm:$0xf] }
 0x3bb   : > { %10931 = vmatpush.bf16.msrb.mxu3 %v14508_v50  ;;  %v14348_v50 = vor.u32 %v18815_v29, %v14347_v28  ;;  %v18935_v49 = vld [vmem:[%s20282_s11 + $0x13f4] sm:$0xf0]  ;;  %v14955_v1 = vld [vmem:[%s20282_s11 + $0x14e8] sm:$0xf]  ;;  %v14460_v22 = vor.u32 %v18843_v20, %v14459_v61 }
 0x3bc   : > { %v18967_v44 = vld [vmem:[%s20282_s11 + $0x14f4] sm:$0xf0]  ;;  %v15083_v28 = vld [vmem:[%s20282_s11 + $0x15e8] sm:$0xf] }
 0x3bd   : > { %10893 = vmatpush.bf16.msrb.mxu0 %v14108_v53  ;;  %10906 = vmatpush.bf16.msrb.mxu1 %v14236_v14  ;;  %v18903_v53 = vld [vmem:[%s20282_s11 + $0x12f4] sm:$0xf0]  ;;  %v10678_v14 = vpop.f32.mrf.mxu3  ;;  %v15067_v21 = vld [vmem:[%s20282_s11 + $0x15c8] sm:$0xf] }
 0x3be   : > { %10919 = vmatpush.bf16.msrb.mxu2 %v14364_v59  ;;  %v14076_v59 = vor.u32 %v18747_v54, %v14075_v48  ;;  %v18999_v29 = vld [vmem:[%s20282_s11 + $0x15f4] sm:$0xf0]  ;;  %v14700_v47 = vor.u32 %v18903_v53, %v14699_v62  ;;  %v14956_v48 = vor.u32 %v18967_v44, %v14955_v1  ;;  %v14683_v54 = vld [vmem:[%s20282_s11 + $0x12c8] sm:$0xf] }
 0x3bf   : > { %10932 = vmatpush.bf16.msrb.mxu3 %v14492_v24  ;;  %v14204_v24 = vor.u32 %v18779_v13, %v14203_v55  ;;  %v18899_v40 = vld [vmem:[%s20282_s11 + $0x12d4] sm:$0xf0]  ;;  %v14811_v14 = vld [vmem:[%s20282_s11 + $0x13c8] sm:$0xf] }
 0x3c0   : > { %v14939_v55 = vld [vmem:[%s20282_s11 + $0x14c8] sm:$0xf]  ;;  %v18963_v13 = vld [vmem:[%s20282_s11 + $0x14d4] sm:$0xf0]  ;;  %v14684_v25 = vor.u32 %v18899_v40, %v14683_v54 }
 0x3c1   : > { %10894 = vmatpush.bf16.msrb.mxu0 %v14092_v26  ;;  %10907 = vmatpush.bf16.msrb.mxu1 %v14220_v57  ;;  %v14828_v26 = vor.u32 %v18935_v49, %v14827_v63  ;;  %v15084_v57 = vor.u32 %v18999_v29, %v15083_v28  ;;  %v14940_v20 = vor.u32 %v18963_v13, %v14939_v55  ;;  %v14667_v62 = vld [vmem:[%s20282_s11 + $0x12a8] sm:$0xf]  ;;  %v18895_v53 = vld [vmem:[%s20282_s11 + $0x12b4] sm:$0xf0] }
 0x3c2   : > { %10920 = vmatpush.bf16.msrb.mxu2 %v14348_v50  ;;  %v18931_v50 = vld [vmem:[%s20282_s11 + $0x13d4] sm:$0xf0]  ;;  %v14795_v63 = vld [vmem:[%s20282_s11 + $0x13a8] sm:$0xf]  ;;  %v14668_v28 = vor.u32 %v18895_v53, %v14667_v62 }
 0x3c3   : > { %10933 = vmatpush.bf16.msrb.mxu3 %v14476_v15  ;;  %v18995_v15 = vld [vmem:[%s20282_s11 + $0x15d4] sm:$0xf0]  ;;  %v14812_v61 = vor.u32 %v18931_v50, %v14811_v14  ;;  %v14923_v1 = vld [vmem:[%s20282_s11 + $0x14a8] sm:$0xf] }
 0x3c4   : > { %v18927_v49 = vld [vmem:[%s20282_s11 + $0x13b4] sm:$0xf0]  ;;  %v14907_v14 = vld [vmem:[%s20282_s11 + $0x1488] sm:$0xf] }
 0x3c5   : > { %10895 = vmatpush.bf16.msrb.mxu0 %v14076_v59  ;;  %10908 = vmatpush.bf16.msrb.mxu1 %v14204_v24  ;;  %v15068_v59 = vor.u32 %v18995_v15, %v15067_v21  ;;  %v18959_v44 = vld [vmem:[%s20282_s11 + $0x14b4] sm:$0xf0]  ;;  %v15051_v24 = vld [vmem:[%s20282_s11 + $0x15a8] sm:$0xf]  ;;  %v14796_v29 = vor.u32 %v18927_v49, %v14795_v63  ;;  %v10689_v50 = vpop.f32.mrf.mxu0 }
 0x3c6   : > { %10921 = vmatpush.bf16.msrb.mxu2 %v14332_v58  ;;  %v18991_v58 = vld [vmem:[%s20282_s11 + $0x15b4] sm:$0xf0]  ;;  %v15035_v55 = vld [vmem:[%s20282_s11 + $0x1588] sm:$0xf]  ;;  %v10690_v21 = vadd.f32 %v10689_v50, %v22321_v31 }
 0x3c7   : > { %10934 = vmatpush.bf16.msrb.mxu3 %v14460_v22  ;;  %v14924_v22 = vor.u32 %v18959_v44, %v14923_v1  ;;  %v15052_v54 = vor.u32 %v18991_v58, %v15051_v24  ;;  %v18923_v40 = vld [vmem:[%s20282_s11 + $0x1394] sm:$0xf0]  ;;  %v14635_v62 = vld [vmem:[%s20282_s11 + $0x1268] sm:$0xf] }
 0x3c8   : > { %10896 = vmatmul.bf16.vlgmr.msrb.gmra.mxu0 %v20556_v36  ;;  %10909 = vmatmul.bf16.vlgmr.msrb.gmra.mxu1 %v20560_v38  ;;  %v18987_v13 = vld [vmem:[%s20282_s11 + $0x1594] sm:$0xf0]  ;;  %v14763_v63 = vld [vmem:[%s20282_s11 + $0x1368] sm:$0xf] }
 0x3c9   : > { %10940 = vmatpush.bf16.msra.mxu0 %v14700_v47  ;;  %10953 = vmatpush.bf16.msra.mxu1 %v14828_v26  ;;  %v14651_v47 = vld [vmem:[%s20282_s11 + $0x1288] sm:$0xf]  ;;  %v18891_v26 = vld [vmem:[%s20282_s11 + $0x1294] sm:$0xf0] }
 0x3ca   : > { %10966 = vmatpush.bf16.msra.mxu2 %v14956_v48  ;;  %10935 = vmatmul.bf16.vlgmr.msrb.gmra.mxu3 %v20688_v19  ;;  %v14779_v48 = vld [vmem:[%s20282_s11 + $0x1388] sm:$0xf]  ;;  %v14652_v15 = vor.u32 %v18891_v26, %v14651_v47  ;;  %v18887_v53 = vld [vmem:[%s20282_s11 + $0x1274] sm:$0xf0] }
 0x3cb   : > { %10979 = vmatpush.bf16.msra.mxu3 %v15084_v57  ;;  %10922 = vmatmul.bf16.vlgmr.msrb.gmra.mxu2 %v20681_v9  ;;  %v18955_v57 = vld [vmem:[%s20282_s11 + $0x1494] sm:$0xf0]  ;;  %v14891_v44 = vld [vmem:[%s20282_s11 + $0x1468] sm:$0xf] }
 0x3cc   : > { %v18919_v1 = vld [vmem:[%s20282_s11 + $0x1374] sm:$0xf0]  ;;  %v15019_v24 = vld [vmem:[%s20282_s11 + $0x1568] sm:$0xf] }
 0x3cd   : > { %10941 = vmatpush.bf16.msra.mxu0 %v14684_v25  ;;  %10954 = vmatpush.bf16.msra.mxu1 %v14812_v61  ;;  %v10702_v25 = vpop.f32.mrf.mxu1  ;;  %v14780_v61 = vor.u32 %v18923_v40, %v14779_v48  ;;  %v18951_v31 = vld [vmem:[%s20282_s11 + $0x1474] sm:$0xf0]  ;;  %v14619_v26 = vld [vmem:[%s20282_s11 + $0x1248] sm:$0xf] }
 0x3ce   : > { %10967 = vmatpush.bf16.msra.mxu2 %v14940_v20  ;;  %v14908_v20 = vor.u32 %v18955_v57, %v14907_v14  ;;  %v10703_v49 = vadd.f32 %v10702_v25, %v10690_v21  ;;  %v18983_v58 = vld [vmem:[%s20282_s11 + $0x1574] sm:$0xf0]  ;;  %v14892_v47 = vor.u32 %v18951_v31, %v14891_v44  ;;  %v14875_v50 = vld [vmem:[%s20282_s11 + $0x1448] sm:$0xf]  ;;  %v10728_v25 = vpop.f32.mrf.mxu3 }
 0x3cf   : > { %10980 = vmatpush.bf16.msra.mxu3 %v15068_v59  ;;  %v15036_v59 = vor.u32 %v18987_v13, %v15035_v55  ;;  %v18883_v48 = vld [vmem:[%s20282_s11 + $0x1254] sm:$0xf0]  ;;  %v15020_v14 = vor.u32 %v18983_v58, %v15019_v24  ;;  %v10715_v13 = vpop.f32.mrf.mxu2  ;;  %v15003_v21 = vld [vmem:[%s20282_s11 + $0x1548] sm:$0xf] }
 0x3d0   : > { %v18915_v57 = vld [vmem:[%s20282_s11 + $0x1354] sm:$0xf0]  ;;  %v14859_v24 = vld [vmem:[%s20282_s11 + $0x1428] sm:$0xf] }
 0x3d1   : > { %10942 = vmatpush.bf16.msra.mxu0 %v14668_v28  ;;  %10955 = vmatpush.bf16.msra.mxu1 %v14796_v29  ;;  %v11932_v28 = vrot.slane %v10703_v49, 6  ;;  %v14636_v29 = vor.u32 %v18887_v53, %v14635_v62  ;;  %v18947_v55 = vld [vmem:[%s20282_s11 + $0x1454] sm:$0xf0] }
 0x3d2   : > { %10968 = vmatpush.bf16.msra.mxu2 %v14924_v22  ;;  %v14764_v22 = vor.u32 %v18919_v1, %v14763_v63  ;;  %v14876_v63 = vor.u32 %v18947_v55, %v14875_v50  ;;  %v18879_v49 = vld [vmem:[%s20282_s11 + $0x1234] sm:$0xf0]  ;;  %v14731_v1 = vld [vmem:[%s20282_s11 + $0x1328] sm:$0xf] }
 0x3d3   : > { %10981 = vmatpush.bf16.msra.mxu3 %v15052_v54  ;;  %v14747_v54 = vld [vmem:[%s20282_s11 + $0x1348] sm:$0xf]  ;;  %v22389_v40 = vsel %vm11935_vm0, %v21543_v27, %v11932_v28  ;;  %v22396_v27 = vadd.f32 %v10728_v25, %v10715_v13  ;;  %v18911_v31 = vld [vmem:[%s20282_s11 + $0x1334] sm:$0xf0] }
 0x3d4   : > { %23949 = vst [vmem:[#allocation17_spill] sm:$0xff] %v22389_v40  ;;  %v14748_v53 = vor.u32 %v18915_v57, %v14747_v54  ;;  %v18943_v58 = vld [vmem:[%s20282_s11 + $0x1434] sm:$0xf0]  ;;  %v14987_v28 = vld [vmem:[%s20282_s11 + $0x1528] sm:$0xf] }
 0x3d5   : > { %10943 = vmatpush.bf16.msra.mxu0 %v14652_v15  ;;  %10956 = vmatpush.bf16.msra.mxu1 %v14780_v61  ;;  %v18979_v15 = vld [vmem:[%s20282_s11 + $0x1554] sm:$0xf0]  ;;  %v10691_v61 = vpop.f32.mrf.mxu0  ;;  %v10704_v62 = vpop.f32.mrf.mxu1  ;;  %v14860_v54 = vor.u32 %v18943_v58, %v14859_v24  ;;  %v14843_v50 = vld [vmem:[%s20282_s11 + $0x1408] sm:$0xf] }
 0x3d6   : > { %10969 = vmatpush.bf16.msra.mxu2 %v14908_v20  ;;  %v14620_v20 = vor.u32 %v18883_v48, %v14619_v26  ;;  %v15004_v44 = vor.u32 %v18979_v15, %v15003_v21  ;;  %v18875_v26 = vld [vmem:[%s20282_s11 + $0x1214] sm:$0xf0]  ;;  %v14732_v48 = vor.u32 %v18911_v31, %v14731_v1  ;;  %v14971_v21 = vld [vmem:[%s20282_s11 + $0x1508] sm:$0xf] }
 0x3d7   : > { %10982 = vmatpush.bf16.msra.mxu3 %v15036_v59  ;;  %v14603_v59 = vld [vmem:[%s20282_s11 + $0x1228] sm:$0xf]  ;;  %v18907_v57 = vld [vmem:[%s20282_s11 + $0x1314] sm:$0xf0]  ;;  %v10717_v25 = vpop.f32.mrf.mxu2 }
 0x3d8   : > { %v18939_v13 = vld [vmem:[%s20282_s11 + $0x1414] sm:$0xf0]  ;;  %v15211_v61 = vld [vmem:[%s20282_s11 + $0x16e8] sm:$0xf] }
 0x3d9   : > { %10944 = vmatpush.bf16.msra.mxu0 %v14636_v29  ;;  %10957 = vmatpush.bf16.msra.mxu1 %v14764_v22  ;;  %v18975_v29 = vld [vmem:[%s20282_s11 + $0x1534] sm:$0xf0]  ;;  %v14604_v22 = vor.u32 %v18879_v49, %v14603_v59  ;;  %v15339_v62 = vld [vmem:[%s20282_s11 + $0x17e8] sm:$0xf]  ;;  %v14844_v31 = vor.u32 %v18939_v13, %v14843_v50 }
 0x3da   : > { %10970 = vmatpush.bf16.msra.mxu2 %v14892_v47  ;;  %v14587_v47 = vld [vmem:[%s20282_s11 + $0x1208] sm:$0xf]  ;;  %v14988_v55 = vor.u32 %v18975_v29, %v14987_v28  ;;  %v18971_v15 = vld [vmem:[%s20282_s11 + $0x1514] sm:$0xf0] }
 0x3db   : > { %10983 = vmatpush.bf16.msra.mxu3 %v15020_v14  ;;  %v14715_v14 = vld [vmem:[%s20282_s11 + $0x1308] sm:$0xf]  ;;  %v19063_v59 = vld [vmem:[%s20282_s11 + $0x17f4] sm:$0xf0]  ;;  %v14972_v28 = vor.u32 %v18971_v15, %v14971_v21 }
 0x3dc   : > { %v15467_v49 = vld [vmem:[%s20282_s11 + $0x18e8] sm:$0xf]  ;;  %v19095_v1 = vld [vmem:[%s20282_s11 + $0x18f4] sm:$0xf0] }
 0x3dd   : > { %10945 = vmatpush.bf16.msra.mxu0 %v14620_v20  ;;  %10958 = vmatpush.bf16.msra.mxu1 %v14748_v53  ;;  %v19031_v20 = vld [vmem:[%s20282_s11 + $0x16f4] sm:$0xf0]  ;;  %v10730_v53 = vpop.f32.mrf.mxu3  ;;  %v15595_v24 = vld [vmem:[%s20282_s11 + $0x19e8] sm:$0xf] }
 0x3de   : > { %10971 = vmatpush.bf16.msra.mxu2 %v14876_v63  ;;  %v14588_v63 = vor.u32 %v18875_v26, %v14587_v47  ;;  %v19127_v58 = vld [vmem:[%s20282_s11 + $0x19f4] sm:$0xf0]  ;;  %v15212_v29 = vor.u32 %v19031_v20, %v15211_v61  ;;  %v15468_v47 = vor.u32 %v19095_v1, %v15467_v49  ;;  %v15195_v26 = vld [vmem:[%s20282_s11 + $0x16c8] sm:$0xf] }
 0x3df   : > { %10984 = vmatpush.bf16.msra.mxu3 %v15004_v44  ;;  %v14716_v44 = vor.u32 %v18907_v57, %v14715_v14  ;;  %v19027_v25 = vld [vmem:[%s20282_s11 + $0x16d4] sm:$0xf0]  ;;  %v15323_v53 = vld [vmem:[%s20282_s11 + $0x17c8] sm:$0xf] }
 0x3e0   : > { %v15451_v14 = vld [vmem:[%s20282_s11 + $0x18c8] sm:$0xf]  ;;  %v19091_v57 = vld [vmem:[%s20282_s11 + $0x18d4] sm:$0xf0]  ;;  %v15196_v13 = vor.u32 %v19027_v25, %v15195_v26 }
 0x3e1   : > { %10946 = vmatpush.bf16.msra.mxu0 %v14604_v22  ;;  %10959 = vmatpush.bf16.msra.mxu1 %v14732_v48  ;;  %v15340_v22 = vor.u32 %v19063_v59, %v15339_v62  ;;  %v15596_v48 = vor.u32 %v19127_v58, %v15595_v24  ;;  %v15579_v50 = vld [vmem:[%s20282_s11 + $0x19c8] sm:$0xf]  ;;  %v15452_v15 = vor.u32 %v19091_v57, %v15451_v14  ;;  %v19023_v20 = vld [vmem:[%s20282_s11 + $0x16b4] sm:$0xf0] }
 0x3e2   : > { %10972 = vmatpush.bf16.msra.mxu2 %v14860_v54  ;;  %v19059_v54 = vld [vmem:[%s20282_s11 + $0x17d4] sm:$0xf0]  ;;  %v15179_v61 = vld [vmem:[%s20282_s11 + $0x16a8] sm:$0xf] }
 0x3e3   : > { %10985 = vmatpush.bf16.msra.mxu3 %v14988_v55  ;;  %v19123_v55 = vld [vmem:[%s20282_s11 + $0x19d4] sm:$0xf0]  ;;  %v15324_v21 = vor.u32 %v19059_v54, %v15323_v53  ;;  %v15307_v62 = vld [vmem:[%s20282_s11 + $0x17a8] sm:$0xf]  ;;  %v15180_v24 = vor.u32 %v19023_v20, %v15179_v61 }
 0x3e4   : > { %v19055_v59 = vld [vmem:[%s20282_s11 + $0x17b4] sm:$0xf0]  ;;  %v15435_v49 = vld [vmem:[%s20282_s11 + $0x18a8] sm:$0xf] }
 0x3e5   : > { %10947 = vmatpush.bf16.msra.mxu0 %v14588_v63  ;;  %10960 = vmatpush.bf16.msra.mxu1 %v14716_v44  ;;  %v15580_v63 = vor.u32 %v19123_v55, %v15579_v50  ;;  %v19087_v1 = vld [vmem:[%s20282_s11 + $0x18b4] sm:$0xf0]  ;;  %v15563_v44 = vld [vmem:[%s20282_s11 + $0x19a8] sm:$0xf]  ;;  %v15308_v58 = vor.u32 %v19055_v59, %v15307_v62  ;;  %v10741_v50 = vpop.f32.mrf.mxu0  ;;  %v10754_v62 = vpop.f32.mrf.mxu1 }
 0x3e6   : > { %10973 = vmatpush.bf16.msra.mxu2 %v14844_v31  ;;  %v19119_v31 = vld [vmem:[%s20282_s11 + $0x19b4] sm:$0xf0]  ;;  %v15419_v53 = vld [vmem:[%s20282_s11 + $0x1888] sm:$0xf]  ;;  %v10742_v20 = vadd.f32 %v10741_v50, %v22396_v27 }
 0x3e7   : > { %10986 = vmatpush.bf16.msra.mxu3 %v14972_v28  ;;  %v15436_v28 = vor.u32 %v19087_v1, %v15435_v49  ;;  %v15564_v26 = vor.u32 %v19119_v31, %v15563_v44  ;;  %v19051_v25 = vld [vmem:[%s20282_s11 + $0x1794] sm:$0xf0]  ;;  %v15547_v54 = vld [vmem:[%s20282_s11 + $0x1988] sm:$0xf] }
 0x3e8   : > { %10948 = vmatmul.bf16.vlgmr.msra.gmra.mxu0 %v20686_v18  ;;  %10961 = vmatmul.bf16.vlgmr.msra.gmra.mxu1 %v20693_v23  ;;  %v19115_v14 = vld [vmem:[%s20282_s11 + $0x1994] sm:$0xf0]  ;;  %v15275_v61 = vld [vmem:[%s20282_s11 + $0x1768] sm:$0xf] }
 0x3e9   : > { %10992 = vmatpush.bf16.msrb.mxu0 %v15212_v29  ;;  %11005 = vmatpush.bf16.msrb.mxu1 %v15340_v22  ;;  %v15163_v29 = vld [vmem:[%s20282_s11 + $0x1688] sm:$0xf]  ;;  %v19019_v22 = vld [vmem:[%s20282_s11 + $0x1694] sm:$0xf0] }
 0x3ea   : > { %11018 = vmatpush.bf16.msrb.mxu2 %v15468_v47  ;;  %10987 = vmatmul.bf16.vlgmr.msra.gmra.mxu3 %v20704_v42  ;;  %v15291_v47 = vld [vmem:[%s20282_s11 + $0x1788] sm:$0xf]  ;;  %v15164_v57 = vor.u32 %v19019_v22, %v15163_v29  ;;  %v19047_v59 = vld [vmem:[%s20282_s11 + $0x1774] sm:$0xf0] }
 0x3eb   : > { %11031 = vmatpush.bf16.msrb.mxu3 %v15596_v48  ;;  %10974 = vmatmul.bf16.vlgmr.msra.gmra.mxu2 %v20700_v30  ;;  %v19083_v48 = vld [vmem:[%s20282_s11 + $0x1894] sm:$0xf0]  ;;  %v15292_v55 = vor.u32 %v19051_v25, %v15291_v47  ;;  %v15403_v49 = vld [vmem:[%s20282_s11 + $0x1868] sm:$0xf]  ;;  %v15276_v27 = vor.u32 %v19047_v59, %v15275_v61 }
 0x3ec   : > { %v19079_v1 = vld [vmem:[%s20282_s11 + $0x1874] sm:$0xf0]  ;;  %v15531_v44 = vld [vmem:[%s20282_s11 + $0x1968] sm:$0xf] }
 0x3ed   : > { %10993 = vmatpush.bf16.msrb.mxu0 %v15196_v13  ;;  %11006 = vmatpush.bf16.msrb.mxu1 %v15324_v21  ;;  %v15420_v13 = vor.u32 %v19083_v48, %v15419_v53  ;;  %v15147_v21 = vld [vmem:[%s20282_s11 + $0x1668] sm:$0xf]  ;;  %v19111_v31 = vld [vmem:[%s20282_s11 + $0x1974] sm:$0xf0] }
 0x3ee   : > { %11019 = vmatpush.bf16.msrb.mxu2 %v15452_v15  ;;  %v19015_v15 = vld [vmem:[%s20282_s11 + $0x1674] sm:$0xf0]  ;;  %v15131_v29 = vld [vmem:[%s20282_s11 + $0x1648] sm:$0xf]  ;;  %v15532_v25 = vor.u32 %v19111_v31, %v15531_v44 }
 0x3ef   : > { %11032 = vmatpush.bf16.msrb.mxu3 %v15580_v63  ;;  %v15548_v63 = vor.u32 %v19115_v14, %v15547_v54  ;;  %v19011_v22 = vld [vmem:[%s20282_s11 + $0x1654] sm:$0xf0]  ;;  %v15259_v47 = vld [vmem:[%s20282_s11 + $0x1748] sm:$0xf] }
 0x3f0   : > { %v19043_v53 = vld [vmem:[%s20282_s11 + $0x1754] sm:$0xf0]  ;;  %v15387_v48 = vld [vmem:[%s20282_s11 + $0x1848] sm:$0xf] }
 0x3f1   : > { %10994 = vmatpush.bf16.msrb.mxu0 %v15180_v24  ;;  %11007 = vmatpush.bf16.msrb.mxu1 %v15308_v58  ;;  %v10755_v24 = vadd.f32 %v10754_v62, %v10742_v20  ;;  %v15148_v58 = vor.u32 %v19015_v15, %v15147_v21  ;;  %v19075_v54 = vld [vmem:[%s20282_s11 + $0x1854] sm:$0xf0]  ;;  %v15515_v50 = vld [vmem:[%s20282_s11 + $0x1948] sm:$0xf]  ;;  %v10743_v15 = vpop.f32.mrf.mxu0  ;;  %v15260_v61 = vor.u32 %v19043_v53, %v15259_v47 }
 0x3f2   : > { %11020 = vmatpush.bf16.msrb.mxu2 %v15436_v28  ;;  %v15404_v28 = vor.u32 %v19079_v1, %v15403_v49  ;;  %v15388_v20 = vor.u32 %v19075_v54, %v15387_v48  ;;  %v15115_v62 = vld [vmem:[%s20282_s11 + $0x1628] sm:$0xf]  ;;  %v10756_v49 = vpop.f32.mrf.mxu1  ;;  %v19039_v44 = vld [vmem:[%s20282_s11 + $0x1734] sm:$0xf0] }
 0x3f3   : > { %11033 = vmatpush.bf16.msrb.mxu3 %v15564_v26  ;;  %v10767_v26 = vpop.f32.mrf.mxu2  ;;  %v15243_v59 = vld [vmem:[%s20282_s11 + $0x1728] sm:$0xf]  ;;  %v19035_v53 = vld [vmem:[%s20282_s11 + $0x1714] sm:$0xf0] }
 0x3f4   : > { %v10768_v14 = vadd.f32 %v10767_v26, %v10755_v24  ;;  %v15371_v31 = vld [vmem:[%s20282_s11 + $0x1828] sm:$0xf]  ;;  %v19071_v24 = vld [vmem:[%s20282_s11 + $0x1834] sm:$0xf0]  ;;  %v15244_v47 = vor.u32 %v19039_v44, %v15243_v59 }
 0x3f5   : > { %10995 = vmatpush.bf16.msrb.mxu0 %v15164_v57  ;;  %11008 = vmatpush.bf16.msrb.mxu1 %v15292_v55  ;;  %v10780_v57 = vpop.f32.mrf.mxu3  ;;  %v19107_v55 = vld [vmem:[%s20282_s11 + $0x1954] sm:$0xf0]  ;;  %v15372_v26 = vor.u32 %v19071_v24, %v15371_v31  ;;  %v15355_v48 = vld [vmem:[%s20282_s11 + $0x1808] sm:$0xf] }
 0x3f6   : > { %11021 = vmatpush.bf16.msrb.mxu2 %v15420_v13  ;;  %v15132_v13 = vor.u32 %v19011_v22, %v15131_v29  ;;  %v22467_v21 = vadd.f32 %v10780_v57, %v10768_v14  ;;  %v15516_v1 = vor.u32 %v19107_v55, %v15515_v50  ;;  %v15099_v29 = vld [vmem:[%s20282_s11 + $0x1608] sm:$0xf]  ;;  %v19003_v22 = vld [vmem:[%s20282_s11 + $0x1614] sm:$0xf0] }
 0x3f7   : > { %11034 = vmatpush.bf16.msrb.mxu3 %v15548_v63  ;;  %v19007_v63 = vld [vmem:[%s20282_s11 + $0x1634] sm:$0xf0]  ;;  %v15483_v50 = vld [vmem:[%s20282_s11 + $0x1908] sm:$0xf] }
 0x3f8   : > { %v19067_v57 = vld [vmem:[%s20282_s11 + $0x1814] sm:$0xf0]  ;;  %v15723_v15 = vld [vmem:[%s20282_s11 + $0x1ae8] sm:$0xf] }
 0x3f9   : > { %10996 = vmatpush.bf16.msrb.mxu0 %v15148_v58  ;;  %11009 = vmatpush.bf16.msrb.mxu1 %v15276_v27  ;;  %v15499_v58 = vld [vmem:[%s20282_s11 + $0x1928] sm:$0xf]  ;;  %v19103_v27 = vld [vmem:[%s20282_s11 + $0x1934] sm:$0xf0]  ;;  %v15356_v44 = vor.u32 %v19067_v57, %v15355_v48 }
 0x3fa   : > { %11022 = vmatpush.bf16.msrb.mxu2 %v15404_v28  ;;  %v15116_v28 = vor.u32 %v19007_v63, %v15115_v62  ;;  %v15500_v14 = vor.u32 %v19103_v27, %v15499_v58  ;;  %v19099_v55 = vld [vmem:[%s20282_s11 + $0x1914] sm:$0xf0]  ;;  %v15100_v62 = vor.u32 %v19003_v22, %v15099_v29  ;;  %v15979_v59 = vld [vmem:[%s20282_s11 + $0x1ce8] sm:$0xf] }
 0x3fb   : > { %11035 = vmatpush.bf16.msrb.mxu3 %v15532_v25  ;;  %v15227_v25 = vld [vmem:[%s20282_s11 + $0x1708] sm:$0xf]  ;;  %v10769_v54 = vpop.f32.mrf.mxu2  ;;  %v19191_v63 = vld [vmem:[%s20282_s11 + $0x1bf4] sm:$0xf0]  ;;  %v15484_v58 = vor.u32 %v19099_v55, %v15483_v50 }
 0x3fc   : > { %v19223_v49 = vld [vmem:[%s20282_s11 + $0x1cf4] sm:$0xf0]  ;;  %v16107_v31 = vld [vmem:[%s20282_s11 + $0x1de8] sm:$0xf] }
 0x3fd   : > { %10997 = vmatpush.bf16.msrb.mxu0 %v15132_v13  ;;  %11010 = vmatpush.bf16.msrb.mxu1 %v15260_v61  ;;  %v10782_v13 = vpop.f32.mrf.mxu3  ;;  %v19159_v61 = vld [vmem:[%s20282_s11 + $0x1af4] sm:$0xf0]  ;;  %v15980_v29 = vor.u32 %v19223_v49, %v15979_v59  ;;  %v15707_v22 = vld [vmem:[%s20282_s11 + $0x1ac8] sm:$0xf] }
 0x3fe   : > { %11023 = vmatpush.bf16.msrb.mxu2 %v15388_v20  ;;  %v15851_v20 = vld [vmem:[%s20282_s11 + $0x1be8] sm:$0xf]  ;;  %v19255_v24 = vld [vmem:[%s20282_s11 + $0x1df4] sm:$0xf0]  ;;  %v15724_v27 = vor.u32 %v19159_v61, %v15723_v15 }
 0x3ff   : > { %11036 = vmatpush.bf16.msrb.mxu3 %v15516_v1  ;;  %v15228_v1 = vor.u32 %v19035_v53, %v15227_v25  ;;  %v19155_v54 = vld [vmem:[%s20282_s11 + $0x1ad4] sm:$0xf0]  ;;  %v15835_v13 = vld [vmem:[%s20282_s11 + $0x1bc8] sm:$0xf] }
 0x400   : > { %v15963_v25 = vld [vmem:[%s20282_s11 + $0x1cc8] sm:$0xf]  ;;  %v19219_v53 = vld [vmem:[%s20282_s11 + $0x1cd4] sm:$0xf0]  ;;  %v15708_v57 = vor.u32 %v19155_v54, %v15707_v22 }
 0x401   : > { %10998 = vmatpush.bf16.msrb.mxu0 %v15116_v28  ;;  %11011 = vmatpush.bf16.msrb.mxu1 %v15244_v47  ;;  %v15852_v28 = vor.u32 %v19191_v63, %v15851_v20  ;;  %v16108_v47 = vor.u32 %v19255_v24, %v16107_v31  ;;  %v16091_v48 = vld [vmem:[%s20282_s11 + $0x1dc8] sm:$0xf]  ;;  %v15964_v55 = vor.u32 %v19219_v53, %v15963_v25  ;;  %v19151_v61 = vld [vmem:[%s20282_s11 + $0x1ab4] sm:$0xf0] }
 0x402   : > { %11024 = vmatpush.bf16.msrb.mxu2 %v15372_v26  ;;  %v19187_v26 = vld [vmem:[%s20282_s11 + $0x1bd4] sm:$0xf0]  ;;  %v15691_v15 = vld [vmem:[%s20282_s11 + $0x1aa8] sm:$0xf] }
 0x403   : > { %11037 = vmatpush.bf16.msrb.mxu3 %v15500_v14  ;;  %v19251_v14 = vld [vmem:[%s20282_s11 + $0x1dd4] sm:$0xf0]  ;;  %v15836_v50 = vor.u32 %v19187_v26, %v15835_v13  ;;  %v15819_v20 = vld [vmem:[%s20282_s11 + $0x1ba8] sm:$0xf]  ;;  %v15692_v31 = vor.u32 %v19151_v61, %v15691_v15 }
 0x404   : > { %v19183_v63 = vld [vmem:[%s20282_s11 + $0x1bb4] sm:$0xf0]  ;;  %v15947_v59 = vld [vmem:[%s20282_s11 + $0x1ca8] sm:$0xf] }
 0x405   : > { %10999 = vmatpush.bf16.msrb.mxu0 %v15100_v62  ;;  %11012 = vmatpush.bf16.msrb.mxu1 %v15228_v1  ;;  %v16092_v62 = vor.u32 %v19251_v14, %v16091_v48  ;;  %v19215_v49 = vld [vmem:[%s20282_s11 + $0x1cb4] sm:$0xf0]  ;;  %v16075_v1 = vld [vmem:[%s20282_s11 + $0x1da8] sm:$0xf]  ;;  %v15820_v24 = vor.u32 %v19183_v63, %v15819_v20  ;;  %v10793_v26 = vpop.f32.mrf.mxu0 }
 0x406   : > { %11025 = vmatpush.bf16.msrb.mxu2 %v15356_v44  ;;  %v19247_v44 = vld [vmem:[%s20282_s11 + $0x1db4] sm:$0xf0]  ;;  %v15931_v13 = vld [vmem:[%s20282_s11 + $0x1c88] sm:$0xf]  ;;  %v10794_v48 = vadd.f32 %v10793_v26, %v22467_v21 }
 0x407   : > { %11038 = vmatpush.bf16.msrb.mxu3 %v15484_v58  ;;  %v15948_v58 = vor.u32 %v19215_v49, %v15947_v59  ;;  %v16076_v22 = vor.u32 %v19247_v44, %v16075_v1  ;;  %v19179_v54 = vld [vmem:[%s20282_s11 + $0x1b94] sm:$0xf0]  ;;  %v16059_v25 = vld [vmem:[%s20282_s11 + $0x1d88] sm:$0xf] }
 0x408   : > { %11000 = vmatmul.bf16.vlgmr.msrb.gmra.mxu0 %v20702_v41  ;;  %11013 = vmatmul.bf16.vlgmr.msrb.gmra.mxu1 %v20706_v43  ;;  %v19243_v53 = vld [vmem:[%s20282_s11 + $0x1d94] sm:$0xf0]  ;;  %v15659_v15 = vld [vmem:[%s20282_s11 + $0x1a68] sm:$0xf] }
 0x409   : > { %11044 = vmatpush.bf16.msra.mxu0 %v15724_v27  ;;  %11057 = vmatpush.bf16.msra.mxu1 %v15852_v28  ;;  %v15675_v27 = vld [vmem:[%s20282_s11 + $0x1a88] sm:$0xf]  ;;  %v19147_v28 = vld [vmem:[%s20282_s11 + $0x1a94] sm:$0xf0] }
 0x40a   : > { %11070 = vmatpush.bf16.msra.mxu2 %v15980_v29  ;;  %11039 = vmatmul.bf16.vlgmr.msrb.gmra.mxu3 %v20843_v52  ;;  %v15803_v29 = vld [vmem:[%s20282_s11 + $0x1b88] sm:$0xf]  ;;  %v15676_v14 = vor.u32 %v19147_v28, %v15675_v27  ;;  %v19143_v61 = vld [vmem:[%s20282_s11 + $0x1a74] sm:$0xf0] }
 0x40b   : > { %11083 = vmatpush.bf16.msra.mxu3 %v16108_v47  ;;  %11026 = vmatmul.bf16.vlgmr.msrb.gmra.mxu2 %v20836_v46  ;;  %v19211_v47 = vld [vmem:[%s20282_s11 + $0x1c94] sm:$0xf0]  ;;  %v15787_v20 = vld [vmem:[%s20282_s11 + $0x1b68] sm:$0xf] }
 0x40c   : > { %v19175_v59 = vld [vmem:[%s20282_s11 + $0x1b74] sm:$0xf0]  ;;  %v15915_v49 = vld [vmem:[%s20282_s11 + $0x1c68] sm:$0xf] }
 0x40d   : > { %11045 = vmatpush.bf16.msra.mxu0 %v15708_v57  ;;  %11058 = vmatpush.bf16.msra.mxu1 %v15836_v50  ;;  %v10806_v57 = vpop.f32.mrf.mxu1  ;;  %v15804_v50 = vor.u32 %v19179_v54, %v15803_v29  ;;  %v19207_v21 = vld [vmem:[%s20282_s11 + $0x1c74] sm:$0xf0]  ;;  %v16043_v1 = vld [vmem:[%s20282_s11 + $0x1d68] sm:$0xf] }
 0x40e   : > { %11071 = vmatpush.bf16.msra.mxu2 %v15964_v55  ;;  %v15932_v55 = vor.u32 %v19211_v47, %v15931_v13  ;;  %v10807_v63 = vadd.f32 %v10806_v57, %v10794_v48  ;;  %v19239_v44 = vld [vmem:[%s20282_s11 + $0x1d74] sm:$0xf0]  ;;  %v15643_v27 = vld [vmem:[%s20282_s11 + $0x1a48] sm:$0xf]  ;;  %v10819_v54 = vpop.f32.mrf.mxu2  ;;  %v10795_v57 = vpop.f32.mrf.mxu0 }
 0x40f   : > { %11084 = vmatpush.bf16.msra.mxu3 %v16092_v62  ;;  %v16060_v62 = vor.u32 %v19243_v53, %v16059_v25  ;;  %v19139_v28 = vld [vmem:[%s20282_s11 + $0x1a54] sm:$0xf0]  ;;  %v15771_v29 = vld [vmem:[%s20282_s11 + $0x1b48] sm:$0xf]  ;;  %v10832_v53 = vpop.f32.mrf.mxu3 }
 0x410   : > { %v19171_v13 = vld [vmem:[%s20282_s11 + $0x1b54] sm:$0xf0]  ;;  %v15899_v47 = vld [vmem:[%s20282_s11 + $0x1c48] sm:$0xf]  ;;  %v10820_v25 = vadd.f32 %v10819_v54, %v10807_v63 }
 0x411   : > { %11046 = vmatpush.bf16.msra.mxu0 %v15692_v31  ;;  %11059 = vmatpush.bf16.msra.mxu1 %v15820_v24  ;;  %v15660_v31 = vor.u32 %v19143_v61, %v15659_v15  ;;  %v15788_v24 = vor.u32 %v19175_v59, %v15787_v20  ;;  %v19203_v26 = vld [vmem:[%s20282_s11 + $0x1c54] sm:$0xf0]  ;;  %v16027_v48 = vld [vmem:[%s20282_s11 + $0x1d48] sm:$0xf]  ;;  %v15772_v61 = vor.u32 %v19171_v13, %v15771_v29 }
 0x412   : > { %11072 = vmatpush.bf16.msra.mxu2 %v15948_v58  ;;  %v15916_v58 = vor.u32 %v19207_v21, %v15915_v49  ;;  %v22538_v15 = vadd.f32 %v10832_v53, %v10820_v25  ;;  %v15900_v20 = vor.u32 %v19203_v26, %v15899_v47  ;;  %v19135_v63 = vld [vmem:[%s20282_s11 + $0x1a34] sm:$0xf0]  ;;  %v15755_v59 = vld [vmem:[%s20282_s11 + $0x1b28] sm:$0xf] }
 0x413   : > { %11085 = vmatpush.bf16.msra.mxu3 %v16076_v22  ;;  %v16044_v22 = vor.u32 %v19239_v44, %v16043_v1  ;;  %v19167_v21 = vld [vmem:[%s20282_s11 + $0x1b34] sm:$0xf0]  ;;  %v15883_v1 = vld [vmem:[%s20282_s11 + $0x1c28] sm:$0xf] }
 0x414   : > { %v19199_v44 = vld [vmem:[%s20282_s11 + $0x1c34] sm:$0xf0]  ;;  %v15756_v29 = vor.u32 %v19167_v21, %v15755_v59  ;;  %v15739_v54 = vld [vmem:[%s20282_s11 + $0x1b08] sm:$0xf] }
 0x415   : > { %11047 = vmatpush.bf16.msra.mxu0 %v15676_v14  ;;  %11060 = vmatpush.bf16.msra.mxu1 %v15804_v50  ;;  %v19235_v14 = vld [vmem:[%s20282_s11 + $0x1d54] sm:$0xf0]  ;;  %v15644_v50 = vor.u32 %v19139_v28, %v15643_v27  ;;  %v15611_v27 = vld [vmem:[%s20282_s11 + $0x1a08] sm:$0xf] }
 0x416   : > { %11073 = vmatpush.bf16.msra.mxu2 %v15932_v55  ;;  %v10808_v55 = vpop.f32.mrf.mxu1  ;;  %v16028_v49 = vor.u32 %v19235_v14, %v16027_v48  ;;  %v19131_v28 = vld [vmem:[%s20282_s11 + $0x1a14] sm:$0xf0]  ;;  %v15867_v47 = vld [vmem:[%s20282_s11 + $0x1c08] sm:$0xf]  ;;  %v10821_v14 = vpop.f32.mrf.mxu2 }
 0x417   : > { %11086 = vmatpush.bf16.msra.mxu3 %v16060_v62  ;;  %v15627_v62 = vld [vmem:[%s20282_s11 + $0x1a28] sm:$0xf]  ;;  %v19163_v13 = vld [vmem:[%s20282_s11 + $0x1b14] sm:$0xf0] }
 0x418   : > { %v19195_v25 = vld [vmem:[%s20282_s11 + $0x1c14] sm:$0xf0]  ;;  %v15995_v53 = vld [vmem:[%s20282_s11 + $0x1d08] sm:$0xf] }
 0x419   : > { %11048 = vmatpush.bf16.msra.mxu0 %v15660_v31  ;;  %11061 = vmatpush.bf16.msra.mxu1 %v15788_v24  ;;  %v16011_v31 = vld [vmem:[%s20282_s11 + $0x1d28] sm:$0xf]  ;;  %v19231_v24 = vld [vmem:[%s20282_s11 + $0x1d34] sm:$0xf0]  ;;  %v15868_v21 = vor.u32 %v19195_v25, %v15867_v47 }
 0x41a   : > { %11074 = vmatpush.bf16.msra.mxu2 %v15916_v58  ;;  %v15628_v58 = vor.u32 %v19135_v63, %v15627_v62  ;;  %v16012_v26 = vor.u32 %v19231_v24, %v16011_v31  ;;  %v19227_v48 = vld [vmem:[%s20282_s11 + $0x1d14] sm:$0xf0]  ;;  %v16235_v57 = vld [vmem:[%s20282_s11 + $0x1ee8] sm:$0xf] }
 0x41b   : > { %11087 = vmatpush.bf16.msra.mxu3 %v16044_v22  ;;  %v15884_v22 = vor.u32 %v19199_v44, %v15883_v1  ;;  %v16363_v55 = vld [vmem:[%s20282_s11 + $0x1fe8] sm:$0xf]  ;;  %v19319_v62 = vld [vmem:[%s20282_s11 + $0x1ff4] sm:$0xf0]  ;;  %v15996_v31 = vor.u32 %v19227_v48, %v15995_v53 }
 0x41c   : > { %v16491_v63 = vld [vmem:[%s20282_s11 + $0x20e8] sm:$0xf]  ;;  %v19351_v59 = vld [vmem:[%s20282_s11 + $0x20f4] sm:$0xf0] }
 0x41d   : > { %11049 = vmatpush.bf16.msra.mxu0 %v15644_v50  ;;  %11062 = vmatpush.bf16.msra.mxu1 %v15772_v61  ;;  %v19287_v50 = vld [vmem:[%s20282_s11 + $0x1ef4] sm:$0xf0]  ;;  %v10834_v61 = vpop.f32.mrf.mxu3  ;;  %v16619_v1 = vld [vmem:[%s20282_s11 + $0x21e8] sm:$0xf] }
 0x41e   : > { %11075 = vmatpush.bf16.msra.mxu2 %v15900_v20  ;;  %v15612_v20 = vor.u32 %v19131_v28, %v15611_v27  ;;  %v19383_v44 = vld [vmem:[%s20282_s11 + $0x21f4] sm:$0xf0]  ;;  %v16236_v24 = vor.u32 %v19287_v50, %v16235_v57  ;;  %v16492_v27 = vor.u32 %v19351_v59, %v16491_v63  ;;  %v16219_v28 = vld [vmem:[%s20282_s11 + $0x1ec8] sm:$0xf] }
 0x41f   : > { %11088 = vmatpush.bf16.msra.mxu3 %v16028_v49  ;;  %v15740_v49 = vor.u32 %v19163_v13, %v15739_v54  ;;  %v19283_v14 = vld [vmem:[%s20282_s11 + $0x1ed4] sm:$0xf0]  ;;  %v16347_v61 = vld [vmem:[%s20282_s11 + $0x1fc8] sm:$0xf] }
 0x420   : > { %v16475_v54 = vld [vmem:[%s20282_s11 + $0x20c8] sm:$0xf]  ;;  %v19347_v13 = vld [vmem:[%s20282_s11 + $0x20d4] sm:$0xf0]  ;;  %v16220_v25 = vor.u32 %v19283_v14, %v16219_v28 }
 0x421   : > { %11050 = vmatpush.bf16.msra.mxu0 %v15628_v58  ;;  %11063 = vmatpush.bf16.msra.mxu1 %v15756_v29  ;;  %v16364_v58 = vor.u32 %v19319_v62, %v16363_v55  ;;  %v16620_v29 = vor.u32 %v19383_v44, %v16619_v1  ;;  %v16603_v47 = vld [vmem:[%s20282_s11 + $0x21c8] sm:$0xf]  ;;  %v16476_v48 = vor.u32 %v19347_v13, %v16475_v54  ;;  %v19279_v50 = vld [vmem:[%s20282_s11 + $0x1eb4] sm:$0xf0] }
 0x422   : > { %11076 = vmatpush.bf16.msra.mxu2 %v15884_v22  ;;  %v19315_v22 = vld [vmem:[%s20282_s11 + $0x1fd4] sm:$0xf0]  ;;  %v16203_v57 = vld [vmem:[%s20282_s11 + $0x1ea8] sm:$0xf] }
 0x423   : > { %11089 = vmatpush.bf16.msra.mxu3 %v16012_v26  ;;  %v19379_v26 = vld [vmem:[%s20282_s11 + $0x21d4] sm:$0xf0]  ;;  %v16348_v53 = vor.u32 %v19315_v22, %v16347_v61  ;;  %v16331_v55 = vld [vmem:[%s20282_s11 + $0x1fa8] sm:$0xf]  ;;  %v16204_v1 = vor.u32 %v19279_v50, %v16203_v57 }
 0x424   : > { %v19311_v62 = vld [vmem:[%s20282_s11 + $0x1fb4] sm:$0xf0]  ;;  %v16459_v63 = vld [vmem:[%s20282_s11 + $0x20a8] sm:$0xf] }
 0x425   : > { %11051 = vmatpush.bf16.msra.mxu0 %v15612_v20  ;;  %11064 = vmatpush.bf16.msra.mxu1 %v15740_v49  ;;  %v16604_v20 = vor.u32 %v19379_v26, %v16603_v47  ;;  %v19343_v59 = vld [vmem:[%s20282_s11 + $0x20b4] sm:$0xf0]  ;;  %v16587_v49 = vld [vmem:[%s20282_s11 + $0x21a8] sm:$0xf]  ;;  %v16332_v44 = vor.u32 %v19311_v62, %v16331_v55  ;;  %v10845_v22 = vpop.f32.mrf.mxu0 }
 0x426   : > { %11077 = vmatpush.bf16.msra.mxu2 %v15868_v21  ;;  %v19375_v21 = vld [vmem:[%s20282_s11 + $0x21b4] sm:$0xf0]  ;;  %v16443_v61 = vld [vmem:[%s20282_s11 + $0x2088] sm:$0xf]  ;;  %v10846_v47 = vadd.f32 %v10845_v22, %v22538_v15 }
 0x427   : > { %11090 = vmatpush.bf16.msra.mxu3 %v15996_v31  ;;  %v16460_v31 = vor.u32 %v19343_v59, %v16459_v63  ;;  %v16588_v28 = vor.u32 %v19375_v21, %v16587_v49  ;;  %v19307_v14 = vld [vmem:[%s20282_s11 + $0x1f94] sm:$0xf0]  ;;  %v16571_v54 = vld [vmem:[%s20282_s11 + $0x2188] sm:$0xf] }
 0x428   : > { %11052 = vmatmul.bf16.vlgmr.msra.gmra.mxu0 %v20841_v51  ;;  %11065 = vmatmul.bf16.vlgmr.msra.gmra.mxu1 %v20848_v56  ;;  %v19371_v13 = vld [vmem:[%s20282_s11 + $0x2194] sm:$0xf0]  ;;  %v16171_v57 = vld [vmem:[%s20282_s11 + $0x1e68] sm:$0xf] }
 0x429   : > { %11096 = vmatpush.bf16.msrb.mxu0 %v16236_v24  ;;  %11109 = vmatpush.bf16.msrb.mxu1 %v16364_v58  ;;  %v16187_v24 = vld [vmem:[%s20282_s11 + $0x1e88] sm:$0xf]  ;;  %v19275_v58 = vld [vmem:[%s20282_s11 + $0x1e94] sm:$0xf0] }
 0x42a   : > { %11122 = vmatpush.bf16.msrb.mxu2 %v16492_v27  ;;  %11091 = vmatmul.bf16.vlgmr.msra.gmra.mxu3 %v20859_v4  ;;  %v16315_v27 = vld [vmem:[%s20282_s11 + $0x1f88] sm:$0xf]  ;;  %v16188_v26 = vor.u32 %v19275_v58, %v16187_v24  ;;  %v19271_v50 = vld [vmem:[%s20282_s11 + $0x1e74] sm:$0xf0] }
 0x42b   : > { %11135 = vmatpush.bf16.msrb.mxu3 %v16620_v29  ;;  %11078 = vmatmul.bf16.vlgmr.msra.gmra.mxu2 %v20855_v0  ;;  %v19339_v29 = vld [vmem:[%s20282_s11 + $0x2094] sm:$0xf0]  ;;  %v16299_v55 = vld [vmem:[%s20282_s11 + $0x1f68] sm:$0xf] }
 0x42c   : > { %v19303_v63 = vld [vmem:[%s20282_s11 + $0x1f74] sm:$0xf0]  ;;  %v16427_v59 = vld [vmem:[%s20282_s11 + $0x2068] sm:$0xf] }
 0x42d   : > { %11097 = vmatpush.bf16.msrb.mxu0 %v16220_v25  ;;  %11110 = vmatpush.bf16.msrb.mxu1 %v16348_v53  ;;  %v10858_v25 = vpop.f32.mrf.mxu1  ;;  %v16316_v53 = vor.u32 %v19307_v14, %v16315_v27  ;;  %v19335_v15 = vld [vmem:[%s20282_s11 + $0x2074] sm:$0xf0]  ;;  %v16555_v49 = vld [vmem:[%s20282_s11 + $0x2168] sm:$0xf] }
 0x42e   : > { %11123 = vmatpush.bf16.msrb.mxu2 %v16476_v48  ;;  %v16444_v48 = vor.u32 %v19339_v29, %v16443_v61  ;;  %v10859_v62 = vadd.f32 %v10858_v25, %v10846_v47  ;;  %v19367_v21 = vld [vmem:[%s20282_s11 + $0x2174] sm:$0xf0]  ;;  %v16155_v24 = vld [vmem:[%s20282_s11 + $0x1e48] sm:$0xf]  ;;  %v10871_v14 = vpop.f32.mrf.mxu2  ;;  %v10847_v25 = vpop.f32.mrf.mxu0 }
 0x42f   : > { %11136 = vmatpush.bf16.msrb.mxu3 %v16604_v20  ;;  %v16572_v20 = vor.u32 %v19371_v13, %v16571_v54  ;;  %v19267_v58 = vld [vmem:[%s20282_s11 + $0x1e54] sm:$0xf0]  ;;  %v16283_v27 = vld [vmem:[%s20282_s11 + $0x1f48] sm:$0xf]  ;;  %v10884_v13 = vpop.f32.mrf.mxu3 }
 0x430   : > { %v19299_v61 = vld [vmem:[%s20282_s11 + $0x1f54] sm:$0xf0]  ;;  %v16411_v29 = vld [vmem:[%s20282_s11 + $0x2048] sm:$0xf]  ;;  %v10872_v54 = vadd.f32 %v10871_v14, %v10859_v62 }
 0x431   : > { %11098 = vmatpush.bf16.msrb.mxu0 %v16204_v1  ;;  %11111 = vmatpush.bf16.msrb.mxu1 %v16332_v44  ;;  %v16172_v1 = vor.u32 %v19271_v50, %v16171_v57  ;;  %v16300_v44 = vor.u32 %v19303_v63, %v16299_v55  ;;  %v19331_v22 = vld [vmem:[%s20282_s11 + $0x2054] sm:$0xf0]  ;;  %v16539_v47 = vld [vmem:[%s20282_s11 + $0x2148] sm:$0xf]  ;;  %v16284_v50 = vor.u32 %v19299_v61, %v16283_v27 }
 0x432   : > { %11124 = vmatpush.bf16.msrb.mxu2 %v16460_v31  ;;  %v16428_v31 = vor.u32 %v19335_v15, %v16427_v59  ;;  %v22609_v57 = vadd.f32 %v10884_v13, %v10872_v54  ;;  %v16412_v55 = vor.u32 %v19331_v22, %v16411_v29  ;;  %v19263_v62 = vld [vmem:[%s20282_s11 + $0x1e34] sm:$0xf0]  ;;  %v16267_v63 = vld [vmem:[%s20282_s11 + $0x1f28] sm:$0xf] }
 0x433   : > { %11137 = vmatpush.bf16.msrb.mxu3 %v16588_v28  ;;  %v16556_v28 = vor.u32 %v19367_v21, %v16555_v49  ;;  %v19295_v15 = vld [vmem:[%s20282_s11 + $0x1f34] sm:$0xf0]  ;;  %v16395_v49 = vld [vmem:[%s20282_s11 + $0x2028] sm:$0xf] }
 0x434   : > { %v19327_v21 = vld [vmem:[%s20282_s11 + $0x2034] sm:$0xf0]  ;;  %v16268_v27 = vor.u32 %v19295_v15, %v16267_v63  ;;  %v16251_v14 = vld [vmem:[%s20282_s11 + $0x1f08] sm:$0xf] }
 0x435   : > { %11099 = vmatpush.bf16.msrb.mxu0 %v16188_v26  ;;  %11112 = vmatpush.bf16.msrb.mxu1 %v16316_v53  ;;  %v19363_v26 = vld [vmem:[%s20282_s11 + $0x2154] sm:$0xf0]  ;;  %v16156_v53 = vor.u32 %v19267_v58, %v16155_v24  ;;  %v16123_v24 = vld [vmem:[%s20282_s11 + $0x1e08] sm:$0xf] }
 0x436   : > { %11125 = vmatpush.bf16.msrb.mxu2 %v16444_v48  ;;  %v10860_v48 = vpop.f32.mrf.mxu1  ;;  %v16540_v59 = vor.u32 %v19363_v26, %v16539_v47  ;;  %v19259_v58 = vld [vmem:[%s20282_s11 + $0x1e14] sm:$0xf0]  ;;  %v16379_v29 = vld [vmem:[%s20282_s11 + $0x2008] sm:$0xf]  ;;  %v10873_v26 = vpop.f32.mrf.mxu2 }
 0x437   : > { %11138 = vmatpush.bf16.msrb.mxu3 %v16572_v20  ;;  %v16139_v20 = vld [vmem:[%s20282_s11 + $0x1e28] sm:$0xf]  ;;  %v19291_v61 = vld [vmem:[%s20282_s11 + $0x1f14] sm:$0xf0] }
 0x438   : > { %v19323_v54 = vld [vmem:[%s20282_s11 + $0x2014] sm:$0xf0]  ;;  %v16507_v13 = vld [vmem:[%s20282_s11 + $0x2108] sm:$0xf] }
 0x439   : > { %11100 = vmatpush.bf16.msrb.mxu0 %v16172_v1  ;;  %11113 = vmatpush.bf16.msrb.mxu1 %v16300_v44  ;;  %v16523_v1 = vld [vmem:[%s20282_s11 + $0x2128] sm:$0xf]  ;;  %v19359_v44 = vld [vmem:[%s20282_s11 + $0x2134] sm:$0xf0]  ;;  %v16380_v15 = vor.u32 %v19323_v54, %v16379_v29 }
 0x43a   : > { %11126 = vmatpush.bf16.msrb.mxu2 %v16428_v31  ;;  %v16140_v31 = vor.u32 %v19263_v62, %v16139_v20  ;;  %v16524_v22 = vor.u32 %v19359_v44, %v16523_v1  ;;  %v19355_v47 = vld [vmem:[%s20282_s11 + $0x2114] sm:$0xf0]  ;;  %v16747_v25 = vld [vmem:[%s20282_s11 + $0x22e8] sm:$0xf] }
 0x43b   : > { %11139 = vmatpush.bf16.msrb.mxu3 %v16556_v28  ;;  %v16396_v28 = vor.u32 %v19327_v21, %v16395_v49  ;;  %v16875_v48 = vld [vmem:[%s20282_s11 + $0x23e8] sm:$0xf]  ;;  %v19447_v20 = vld [vmem:[%s20282_s11 + $0x23f4] sm:$0xf0]  ;;  %v16508_v1 = vor.u32 %v19355_v47, %v16507_v13 }
 0x43c   : > { %v17003_v62 = vld [vmem:[%s20282_s11 + $0x24e8] sm:$0xf]  ;;  %v19479_v63 = vld [vmem:[%s20282_s11 + $0x24f4] sm:$0xf0] }
 0x43d   : > { %11101 = vmatpush.bf16.msrb.mxu0 %v16156_v53  ;;  %11114 = vmatpush.bf16.msrb.mxu1 %v16284_v50  ;;  %v19415_v53 = vld [vmem:[%s20282_s11 + $0x22f4] sm:$0xf0]  ;;  %v10886_v50 = vpop.f32.mrf.mxu3  ;;  %v17131_v49 = vld [vmem:[%s20282_s11 + $0x25e8] sm:$0xf] }
 0x43e   : > { %11127 = vmatpush.bf16.msrb.mxu2 %v16412_v55  ;;  %v16124_v55 = vor.u32 %v19259_v58, %v16123_v24  ;;  %v19511_v21 = vld [vmem:[%s20282_s11 + $0x25f4] sm:$0xf0]  ;;  %v16748_v44 = vor.u32 %v19415_v53, %v16747_v25  ;;  %v17004_v24 = vor.u32 %v19479_v63, %v17003_v62  ;;  %v16731_v58 = vld [vmem:[%s20282_s11 + $0x22c8] sm:$0xf] }
 0x43f   : > { %11140 = vmatpush.bf16.msrb.mxu3 %v16540_v59  ;;  %v16252_v59 = vor.u32 %v19291_v61, %v16251_v14  ;;  %v19411_v26 = vld [vmem:[%s20282_s11 + $0x22d4] sm:$0xf0]  ;;  %v16859_v50 = vld [vmem:[%s20282_s11 + $0x23c8] sm:$0xf] }
 0x440   : > { %v16987_v14 = vld [vmem:[%s20282_s11 + $0x24c8] sm:$0xf]  ;;  %v19475_v61 = vld [vmem:[%s20282_s11 + $0x24d4] sm:$0xf0]  ;;  %v16732_v54 = vor.u32 %v19411_v26, %v16731_v58 }
 0x441   : > { %11102 = vmatpush.bf16.msrb.mxu0 %v16140_v31  ;;  %11115 = vmatpush.bf16.msrb.mxu1 %v16268_v27  ;;  %v16876_v31 = vor.u32 %v19447_v20, %v16875_v48  ;;  %v17132_v27 = vor.u32 %v19511_v21, %v17131_v49  ;;  %v17115_v29 = vld [vmem:[%s20282_s11 + $0x25c8] sm:$0xf]  ;;  %v16988_v47 = vor.u32 %v19475_v61, %v16987_v14  ;;  %v19407_v53 = vld [vmem:[%s20282_s11 + $0x22b4] sm:$0xf0] }
 0x442   : > { %11128 = vmatpush.bf16.msrb.mxu2 %v16396_v28  ;;  %v19443_v28 = vld [vmem:[%s20282_s11 + $0x23d4] sm:$0xf0]  ;;  %v16715_v25 = vld [vmem:[%s20282_s11 + $0x22a8] sm:$0xf] }
 0x443   : > { %11141 = vmatpush.bf16.msrb.mxu3 %v16524_v22  ;;  %v19507_v22 = vld [vmem:[%s20282_s11 + $0x25d4] sm:$0xf0]  ;;  %v16860_v13 = vor.u32 %v19443_v28, %v16859_v50  ;;  %v16843_v48 = vld [vmem:[%s20282_s11 + $0x23a8] sm:$0xf]  ;;  %v16716_v49 = vor.u32 %v19407_v53, %v16715_v25 }
 0x444   : > { %v19439_v20 = vld [vmem:[%s20282_s11 + $0x23b4] sm:$0xf0]  ;;  %v16971_v62 = vld [vmem:[%s20282_s11 + $0x24a8] sm:$0xf] }
 0x445   : > { %11103 = vmatpush.bf16.msrb.mxu0 %v16124_v55  ;;  %11116 = vmatpush.bf16.msrb.mxu1 %v16252_v59  ;;  %v17116_v55 = vor.u32 %v19507_v22, %v17115_v29  ;;  %v19471_v63 = vld [vmem:[%s20282_s11 + $0x24b4] sm:$0xf0]  ;;  %v17099_v59 = vld [vmem:[%s20282_s11 + $0x25a8] sm:$0xf]  ;;  %v16844_v21 = vor.u32 %v19439_v20, %v16843_v48  ;;  %v10897_v28 = vpop.f32.mrf.mxu0 }
 0x446   : > { %11129 = vmatpush.bf16.msrb.mxu2 %v16380_v15  ;;  %v19503_v15 = vld [vmem:[%s20282_s11 + $0x25b4] sm:$0xf0]  ;;  %v16955_v50 = vld [vmem:[%s20282_s11 + $0x2488] sm:$0xf]  ;;  %v10898_v29 = vadd.f32 %v10897_v28, %v22609_v57 }
 0x447   : > { %11142 = vmatpush.bf16.msrb.mxu3 %v16508_v1  ;;  %v16972_v1 = vor.u32 %v19471_v63, %v16971_v62  ;;  %v17100_v58 = vor.u32 %v19503_v15, %v17099_v59  ;;  %v19435_v26 = vld [vmem:[%s20282_s11 + $0x2394] sm:$0xf0]  ;;  %v17083_v14 = vld [vmem:[%s20282_s11 + $0x2588] sm:$0xf] }
 0x448   : > { %11104 = vmatmul.bf16.vlgmr.msrb.gmra.mxu0 %v20857_v3  ;;  %11117 = vmatmul.bf16.vlgmr.msrb.gmra.mxu1 %v20861_v5  ;;  %v19499_v61 = vld [vmem:[%s20282_s11 + $0x2594] sm:$0xf0]  ;;  %v16683_v25 = vld [vmem:[%s20282_s11 + $0x2268] sm:$0xf] }
 0x449   : > { %11148 = vmatpush.bf16.msra.mxu0 %v16748_v44  ;;  %11161 = vmatpush.bf16.msra.mxu1 %v16876_v31  ;;  %v16699_v44 = vld [vmem:[%s20282_s11 + $0x2288] sm:$0xf]  ;;  %v19403_v31 = vld [vmem:[%s20282_s11 + $0x2294] sm:$0xf0] }
 0x44a   : > { %11174 = vmatpush.bf16.msra.mxu2 %v17004_v24  ;;  %11143 = vmatmul.bf16.vlgmr.msrb.gmra.mxu3 %v23944_v45  ;;  %v16827_v24 = vld [vmem:[%s20282_s11 + $0x2388] sm:$0xf]  ;;  %v16700_v22 = vor.u32 %v19403_v31, %v16699_v44  ;;  %v19399_v53 = vld [vmem:[%s20282_s11 + $0x2274] sm:$0xf0] }
 0x44b   : > { %11187 = vmatpush.bf16.msra.mxu3 %v17132_v27  ;;  %11130 = vmatmul.bf16.vlgmr.msrb.gmra.mxu2 %v23943_v60  ;;  %v19467_v27 = vld [vmem:[%s20282_s11 + $0x2494] sm:$0xf0]  ;;  %v16811_v48 = vld [vmem:[%s20282_s11 + $0x2368] sm:$0xf] }
 0x44c   : > { %v19431_v62 = vld [vmem:[%s20282_s11 + $0x2374] sm:$0xf0]  ;;  %v16939_v63 = vld [vmem:[%s20282_s11 + $0x2468] sm:$0xf] }
 0x44d   : > { %11149 = vmatpush.bf16.msra.mxu0 %v16732_v54  ;;  %11162 = vmatpush.bf16.msra.mxu1 %v16860_v13  ;;  %v10910_v54 = vpop.f32.mrf.mxu1  ;;  %v16828_v13 = vor.u32 %v19435_v26, %v16827_v24  ;;  %v19463_v57 = vld [vmem:[%s20282_s11 + $0x2474] sm:$0xf0]  ;;  %v17067_v59 = vld [vmem:[%s20282_s11 + $0x2568] sm:$0xf] }
 0x44e   : > { %11175 = vmatpush.bf16.msra.mxu2 %v16988_v47  ;;  %v16956_v47 = vor.u32 %v19467_v27, %v16955_v50  ;;  %v10911_v20 = vadd.f32 %v10910_v54, %v10898_v29  ;;  %v19495_v15 = vld [vmem:[%s20282_s11 + $0x2574] sm:$0xf0]  ;;  %v16667_v44 = vld [vmem:[%s20282_s11 + $0x2248] sm:$0xf]  ;;  %v10923_v26 = vpop.f32.mrf.mxu2  ;;  %v10899_v54 = vpop.f32.mrf.mxu0 }
 0x44f   : > { %11188 = vmatpush.bf16.msra.mxu3 %v17116_v55  ;;  %v17084_v55 = vor.u32 %v19499_v61, %v17083_v14  ;;  %v19395_v31 = vld [vmem:[%s20282_s11 + $0x2254] sm:$0xf0]  ;;  %v16795_v24 = vld [vmem:[%s20282_s11 + $0x2348] sm:$0xf]  ;;  %v10936_v61 = vpop.f32.mrf.mxu3 }
 0x450   : > { %v19427_v50 = vld [vmem:[%s20282_s11 + $0x2354] sm:$0xf0]  ;;  %v16923_v27 = vld [vmem:[%s20282_s11 + $0x2448] sm:$0xf]  ;;  %v10924_v14 = vadd.f32 %v10923_v26, %v10911_v20 }
 0x451   : > { %11150 = vmatpush.bf16.msra.mxu0 %v16716_v49  ;;  %11163 = vmatpush.bf16.msra.mxu1 %v16844_v21  ;;  %v16684_v49 = vor.u32 %v19399_v53, %v16683_v25  ;;  %v16812_v21 = vor.u32 %v19431_v62, %v16811_v48  ;;  %v19459_v28 = vld [vmem:[%s20282_s11 + $0x2454] sm:$0xf0]  ;;  %v17051_v29 = vld [vmem:[%s20282_s11 + $0x2548] sm:$0xf]  ;;  %v16796_v53 = vor.u32 %v19427_v50, %v16795_v24 }
 0x452   : > { %11176 = vmatpush.bf16.msra.mxu2 %v16972_v1  ;;  %v16940_v1 = vor.u32 %v19463_v57, %v16939_v63  ;;  %v22680_v25 = vadd.f32 %v10936_v61, %v10924_v14  ;;  %v16924_v48 = vor.u32 %v19459_v28, %v16923_v27  ;;  %v19391_v20 = vld [vmem:[%s20282_s11 + $0x2234] sm:$0xf0]  ;;  %v16779_v62 = vld [vmem:[%s20282_s11 + $0x2328] sm:$0xf] }
 0x453   : > { %11189 = vmatpush.bf16.msra.mxu3 %v17100_v58  ;;  %v17068_v58 = vor.u32 %v19495_v15, %v17067_v59  ;;  %v19423_v57 = vld [vmem:[%s20282_s11 + $0x2334] sm:$0xf0]  ;;  %v16907_v59 = vld [vmem:[%s20282_s11 + $0x2428] sm:$0xf] }
 0x454   : > { %v19455_v15 = vld [vmem:[%s20282_s11 + $0x2434] sm:$0xf0]  ;;  %v16780_v24 = vor.u32 %v19423_v57, %v16779_v62  ;;  %v16763_v26 = vld [vmem:[%s20282_s11 + $0x2308] sm:$0xf] }
 0x455   : > { %11151 = vmatpush.bf16.msra.mxu0 %v16700_v22  ;;  %11164 = vmatpush.bf16.msra.mxu1 %v16828_v13  ;;  %v19491_v22 = vld [vmem:[%s20282_s11 + $0x2554] sm:$0xf0]  ;;  %v16668_v13 = vor.u32 %v19395_v31, %v16667_v44  ;;  %v16635_v44 = vld [vmem:[%s20282_s11 + $0x2208] sm:$0xf] }
 0x456   : > { %11177 = vmatpush.bf16.msra.mxu2 %v16956_v47  ;;  %v10912_v47 = vpop.f32.mrf.mxu1  ;;  %v17052_v63 = vor.u32 %v19491_v22, %v17051_v29  ;;  %v19387_v31 = vld [vmem:[%s20282_s11 + $0x2214] sm:$0xf0]  ;;  %v16891_v27 = vld [vmem:[%s20282_s11 + $0x2408] sm:$0xf]  ;;  %v10925_v22 = vpop.f32.mrf.mxu2 }
 0x457   : > { %11190 = vmatpush.bf16.msra.mxu3 %v17084_v55  ;;  %v16651_v55 = vld [vmem:[%s20282_s11 + $0x2228] sm:$0xf]  ;;  %v19419_v50 = vld [vmem:[%s20282_s11 + $0x2314] sm:$0xf0] }
 0x458   : > { %v19451_v14 = vld [vmem:[%s20282_s11 + $0x2414] sm:$0xf0]  ;;  %v17019_v61 = vld [vmem:[%s20282_s11 + $0x2508] sm:$0xf] }
 0x459   : > { %11152 = vmatpush.bf16.msra.mxu0 %v16684_v49  ;;  %11165 = vmatpush.bf16.msra.mxu1 %v16812_v21  ;;  %v17035_v49 = vld [vmem:[%s20282_s11 + $0x2528] sm:$0xf]  ;;  %v19487_v21 = vld [vmem:[%s20282_s11 + $0x2534] sm:$0xf0]  ;;  %v16892_v57 = vor.u32 %v19451_v14, %v16891_v27 }
 0x45a   : > { %11178 = vmatpush.bf16.msra.mxu2 %v16940_v1  ;;  %v16652_v1 = vor.u32 %v19391_v20, %v16651_v55  ;;  %v17036_v28 = vor.u32 %v19487_v21, %v17035_v49  ;;  %v19483_v29 = vld [vmem:[%s20282_s11 + $0x2514] sm:$0xf0]  ;;  %v17259_v54 = vld [vmem:[%s20282_s11 + $0x26e8] sm:$0xf] }
 0x45b   : > { %11191 = vmatpush.bf16.msra.mxu3 %v17068_v58  ;;  %v16908_v58 = vor.u32 %v19455_v15, %v16907_v59  ;;  %v17387_v47 = vld [vmem:[%s20282_s11 + $0x27e8] sm:$0xf]  ;;  %v19575_v55 = vld [vmem:[%s20282_s11 + $0x27f4] sm:$0xf0]  ;;  %v17020_v49 = vor.u32 %v19483_v29, %v17019_v61 }
 0x45c   : > { %v17515_v20 = vld [vmem:[%s20282_s11 + $0x28e8] sm:$0xf]  ;;  %v19607_v62 = vld [vmem:[%s20282_s11 + $0x28f4] sm:$0xf0] }
 0x45d   : > { %11153 = vmatpush.bf16.msra.mxu0 %v16668_v13  ;;  %11166 = vmatpush.bf16.msra.mxu1 %v16796_v53  ;;  %v19543_v13 = vld [vmem:[%s20282_s11 + $0x26f4] sm:$0xf0]  ;;  %v10938_v53 = vpop.f32.mrf.mxu3  ;;  %v17643_v59 = vld [vmem:[%s20282_s11 + $0x29e8] sm:$0xf] }
 0x45e   : > { %11179 = vmatpush.bf16.msra.mxu2 %v16924_v48  ;;  %v16636_v48 = vor.u32 %v19387_v31, %v16635_v44  ;;  %v19639_v15 = vld [vmem:[%s20282_s11 + $0x29f4] sm:$0xf0]  ;;  %v17260_v21 = vor.u32 %v19543_v13, %v17259_v54  ;;  %v17516_v44 = vor.u32 %v19607_v62, %v17515_v20  ;;  %v17243_v31 = vld [vmem:[%s20282_s11 + $0x26c8] sm:$0xf] }
 0x45f   : > { %11192 = vmatpush.bf16.msra.mxu3 %v17052_v63  ;;  %v16764_v63 = vor.u32 %v19419_v50, %v16763_v26  ;;  %v19539_v22 = vld [vmem:[%s20282_s11 + $0x26d4] sm:$0xf0]  ;;  %v17371_v53 = vld [vmem:[%s20282_s11 + $0x27c8] sm:$0xf] }
 0x460   : > { %v17499_v26 = vld [vmem:[%s20282_s11 + $0x28c8] sm:$0xf]  ;;  %v19603_v50 = vld [vmem:[%s20282_s11 + $0x28d4] sm:$0xf0]  ;;  %v17244_v14 = vor.u32 %v19539_v22, %v17243_v31 }
 0x461   : > { %11154 = vmatpush.bf16.msra.mxu0 %v16652_v1  ;;  %11167 = vmatpush.bf16.msra.mxu1 %v16780_v24  ;;  %v17388_v1 = vor.u32 %v19575_v55, %v17387_v47  ;;  %v17644_v24 = vor.u32 %v19639_v15, %v17643_v59  ;;  %v17627_v27 = vld [vmem:[%s20282_s11 + $0x29c8] sm:$0xf]  ;;  %v17500_v29 = vor.u32 %v19603_v50, %v17499_v26  ;;  %v19535_v13 = vld [vmem:[%s20282_s11 + $0x26b4] sm:$0xf0] }
 0x462   : > { %11180 = vmatpush.bf16.msra.mxu2 %v16908_v58  ;;  %v19571_v58 = vld [vmem:[%s20282_s11 + $0x27d4] sm:$0xf0]  ;;  %v17227_v54 = vld [vmem:[%s20282_s11 + $0x26a8] sm:$0xf] }
 0x463   : > { %11193 = vmatpush.bf16.msra.mxu3 %v17036_v28  ;;  %v19635_v28 = vld [vmem:[%s20282_s11 + $0x29d4] sm:$0xf0]  ;;  %v17372_v61 = vor.u32 %v19571_v58, %v17371_v53  ;;  %v17355_v47 = vld [vmem:[%s20282_s11 + $0x27a8] sm:$0xf] }
 0x464   : > { %v17628_v55 = vor.u32 %v19635_v28, %v17627_v27  ;;  %v19567_v20 = vld [vmem:[%s20282_s11 + $0x27b4] sm:$0xf0]  ;;  %v17483_v62 = vld [vmem:[%s20282_s11 + $0x28a8] sm:$0xf] }
 0x465   : > { %11155 = vmatpush.bf16.msra.mxu0 %v16636_v48  ;;  %11168 = vmatpush.bf16.msra.mxu1 %v16764_v63  ;;  %v23950_v48 = vld [vmem:[#allocation18_spill] sm:$0xff]  ;;  %v23952_v59 = vld [vmem:[#allocation20_spill] sm:$0xff]  ;;  %v10949_v27 = vpop.f32.mrf.mxu0 }
 0x466   : > { %11181 = vmatpush.bf16.msra.mxu2 %v16892_v57  ;;  %v19599_v63 = vld [vmem:[%s20282_s11 + $0x28b4] sm:$0xf0]  ;;  %v23951_v57 = vld [vmem:[#allocation21_spill] sm:$0xff] }
 0x467   : > { %11194 = vmatpush.bf16.msra.mxu3 %v17020_v49  ;;  %v17611_v15 = vld [vmem:[%s20282_s11 + $0x29a8] sm:$0xf]  ;;  %v19631_v49 = vld [vmem:[%s20282_s11 + $0x29b4] sm:$0xf0] }
 0x468   : > { %11156 = vmatmul.bf16.vlgmr.msra.gmra.mxu0 %v23950_v48  ;;  %11169 = vmatmul.bf16.vlgmr.msra.gmra.mxu1 %v23952_v59  ;;  %v17211_v31 = vld [vmem:[%s20282_s11 + $0x2688] sm:$0xf]  ;;  %v19531_v22 = vld [vmem:[%s20282_s11 + $0x2694] sm:$0xf0] }
 0x469   : > { %11200 = vmatpush.bf16.msrb.mxu0 %v17260_v21  ;;  %11213 = vmatpush.bf16.msrb.mxu1 %v17388_v1  ;;  %v17228_v21 = vor.u32 %v19535_v13, %v17227_v54  ;;  %v17356_v1 = vor.u32 %v19567_v20, %v17355_v47  ;;  %v17339_v53 = vld [vmem:[%s20282_s11 + $0x2788] sm:$0xf]  ;;  %v19563_v58 = vld [vmem:[%s20282_s11 + $0x2794] sm:$0xf0]  ;;  %v10962_v54 = vpop.f32.mrf.mxu1 }
 0x46a   : > { %11226 = vmatpush.bf16.msrb.mxu2 %v17516_v44  ;;  %11195 = vmatmul.bf16.vlgmr.msra.gmra.mxu3 %v21018_v16  ;;  %v17484_v44 = vor.u32 %v19599_v63, %v17483_v62  ;;  %v17467_v26 = vld [vmem:[%s20282_s11 + $0x2888] sm:$0xf]  ;;  %v19595_v50 = vld [vmem:[%s20282_s11 + $0x2894] sm:$0xf0]  ;;  %v17340_v13 = vor.u32 %v19563_v58, %v17339_v53 }
 0x46b   : > { %11239 = vmatpush.bf16.msrb.mxu3 %v17644_v24  ;;  %11182 = vmatmul.bf16.vlgmr.msra.gmra.mxu2 %v23951_v57  ;;  %v17612_v24 = vor.u32 %v19631_v49, %v17611_v15  ;;  %v17595_v28 = vld [vmem:[%s20282_s11 + $0x2988] sm:$0xf]  ;;  %v17468_v47 = vor.u32 %v19595_v50, %v17467_v26  ;;  %v19527_v20 = vld [vmem:[%s20282_s11 + $0x2674] sm:$0xf0] }
 0x46c   : > { %v17323_v62 = vld [vmem:[%s20282_s11 + $0x2768] sm:$0xf]  ;;  %v19559_v49 = vld [vmem:[%s20282_s11 + $0x2774] sm:$0xf0] }
 0x46d   : > { %11201 = vmatpush.bf16.msrb.mxu0 %v17244_v14  ;;  %11214 = vmatpush.bf16.msrb.mxu1 %v17372_v61  ;;  %v19627_v14 = vld [vmem:[%s20282_s11 + $0x2994] sm:$0xf0]  ;;  %v10950_v61 = vadd.f32 %v10949_v27, %v22680_v25  ;;  %v17307_v26 = vld [vmem:[%s20282_s11 + $0x2748] sm:$0xf] }
 0x46e   : > { %11227 = vmatpush.bf16.msrb.mxu2 %v17500_v29  ;;  %v17212_v29 = vor.u32 %v19531_v22, %v17211_v31  ;;  %v17596_v63 = vor.u32 %v19627_v14, %v17595_v28  ;;  %v19591_v25 = vld [vmem:[%s20282_s11 + $0x2874] sm:$0xf0]  ;;  %v17579_v31 = vld [vmem:[%s20282_s11 + $0x2968] sm:$0xf]  ;;  %v17324_v22 = vor.u32 %v19559_v49, %v17323_v62  ;;  %v10975_v27 = vpop.f32.mrf.mxu2 }
 0x46f   : > { %11240 = vmatpush.bf16.msrb.mxu3 %v17628_v55  ;;  %v17195_v55 = vld [vmem:[%s20282_s11 + $0x2668] sm:$0xf]  ;;  %v10963_v15 = vadd.f32 %v10962_v54, %v10950_v61  ;;  %v19523_v58 = vld [vmem:[%s20282_s11 + $0x2654] sm:$0xf0]  ;;  %v10988_v54 = vpop.f32.mrf.mxu3 }
 0x470   : > { %v19555_v28 = vld [vmem:[%s20282_s11 + $0x2754] sm:$0xf0]  ;;  %v17435_v14 = vld [vmem:[%s20282_s11 + $0x2848] sm:$0xf] }
 0x471   : > { %11202 = vmatpush.bf16.msrb.mxu0 %v17228_v21  ;;  %11215 = vmatpush.bf16.msrb.mxu1 %v17356_v1  ;;  %v17451_v21 = vld [vmem:[%s20282_s11 + $0x2868] sm:$0xf]  ;;  %v19623_v1 = vld [vmem:[%s20282_s11 + $0x2974] sm:$0xf0]  ;;  %v10964_v62 = vpop.f32.mrf.mxu1  ;;  %v17308_v49 = vor.u32 %v19555_v28, %v17307_v26 }
 0x472   : > { %11228 = vmatpush.bf16.msrb.mxu2 %v17484_v44  ;;  %v17196_v44 = vor.u32 %v19527_v20, %v17195_v55  ;;  %v17452_v53 = vor.u32 %v19591_v25, %v17451_v21  ;;  %v17580_v50 = vor.u32 %v19623_v1, %v17579_v31  ;;  %v19587_v61 = vld [vmem:[%s20282_s11 + $0x2854] sm:$0xf0]  ;;  %v17563_v55 = vld [vmem:[%s20282_s11 + $0x2948] sm:$0xf] }
 0x473   : > { %11241 = vmatpush.bf16.msrb.mxu3 %v17612_v24  ;;  %v17179_v24 = vld [vmem:[%s20282_s11 + $0x2648] sm:$0xf]  ;;  %v19519_v25 = vld [vmem:[%s20282_s11 + $0x2634] sm:$0xf0] }
 0x474   : > { %v17180_v20 = vor.u32 %v19523_v58, %v17179_v24  ;;  %v17163_v21 = vld [vmem:[%s20282_s11 + $0x2628] sm:$0xf]  ;;  %v19583_v58 = vld [vmem:[%s20282_s11 + $0x2834] sm:$0xf0] }
 0x475   : > { %11203 = vmatpush.bf16.msrb.mxu0 %v17212_v29  ;;  %11216 = vmatpush.bf16.msrb.mxu1 %v17340_v13  ;;  %v10976_v29 = vadd.f32 %v10975_v27, %v10963_v15  ;;  %v19619_v13 = vld [vmem:[%s20282_s11 + $0x2954] sm:$0xf0]  ;;  %v17436_v15 = vor.u32 %v19587_v61, %v17435_v14  ;;  %v17291_v31 = vld [vmem:[%s20282_s11 + $0x2728] sm:$0xf]  ;;  %v17164_v27 = vor.u32 %v19519_v25, %v17163_v21 }
 0x476   : > { %11229 = vmatpush.bf16.msrb.mxu2 %v17468_v47  ;;  %v10951_v47 = vpop.f32.mrf.mxu0  ;;  %v17564_v1 = vor.u32 %v19619_v13, %v17563_v55  ;;  %v17419_v24 = vld [vmem:[%s20282_s11 + $0x2828] sm:$0xf]  ;;  %v19515_v28 = vld [vmem:[%s20282_s11 + $0x2614] sm:$0xf0]  ;;  %v10977_v62 = vpop.f32.mrf.mxu2 }
 0x477   : > { %11242 = vmatpush.bf16.msrb.mxu3 %v17596_v63  ;;  %v22751_v63 = vadd.f32 %v10988_v54, %v10976_v29  ;;  %v17147_v26 = vld [vmem:[%s20282_s11 + $0x2608] sm:$0xf]  ;;  %v17420_v14 = vor.u32 %v19583_v58, %v17419_v24  ;;  %v19547_v29 = vld [vmem:[%s20282_s11 + $0x2714] sm:$0xf0] }
 0x478   : > { %v17275_v61 = vld [vmem:[%s20282_s11 + $0x2708] sm:$0xf]  ;;  %v19579_v13 = vld [vmem:[%s20282_s11 + $0x2814] sm:$0xf0] }
 0x479   : > { %11204 = vmatpush.bf16.msrb.mxu0 %v17196_v44  ;;  %11217 = vmatpush.bf16.msrb.mxu1 %v17324_v22  ;;  %v19551_v44 = vld [vmem:[%s20282_s11 + $0x2734] sm:$0xf0]  ;;  %v17547_v22 = vld [vmem:[%s20282_s11 + $0x2928] sm:$0xf] }
 0x47a   : > { %11230 = vmatpush.bf16.msrb.mxu2 %v17452_v53  ;;  %v19615_v53 = vld [vmem:[%s20282_s11 + $0x2934] sm:$0xf0]  ;;  %v17403_v54 = vld [vmem:[%s20282_s11 + $0x2808] sm:$0xf] }
 0x47b   : > { %11243 = vmatpush.bf16.msrb.mxu3 %v17580_v50  ;;  %v17292_v50 = vor.u32 %v19551_v44, %v17291_v31  ;;  %v17548_v55 = vor.u32 %v19615_v53, %v17547_v22  ;;  %v17531_v47 = vld [vmem:[%s20282_s11 + $0x2908] sm:$0xf]  ;;  %v19671_v25 = vld [vmem:[%s20282_s11 + $0x2af4] sm:$0xf0]  ;;  %v17148_v31 = vor.u32 %v19515_v28, %v17147_v26  ;;  %v17404_v22 = vor.u32 %v19579_v13, %v17403_v54 }
 0x47c   : > { %v17771_v21 = vld [vmem:[%s20282_s11 + $0x2ae8] sm:$0xf]  ;;  %v19703_v44 = vld [vmem:[%s20282_s11 + $0x2bf4] sm:$0xf0] }
 0x47d   : > { %11205 = vmatpush.bf16.msrb.mxu0 %v17180_v20  ;;  %11218 = vmatpush.bf16.msrb.mxu1 %v17308_v49  ;;  %v19611_v20 = vld [vmem:[%s20282_s11 + $0x2914] sm:$0xf0]  ;;  %v17899_v49 = vld [vmem:[%s20282_s11 + $0x2be8] sm:$0xf] }
 0x47e   : > { %11231 = vmatpush.bf16.msrb.mxu2 %v17436_v15  ;;  %v10990_v15 = vpop.f32.mrf.mxu3  ;;  %v18027_v24 = vld [vmem:[%s20282_s11 + $0x2ce8] sm:$0xf]  ;;  %v19735_v58 = vld [vmem:[%s20282_s11 + $0x2cf4] sm:$0xf0]  ;;  %v17900_v26 = vor.u32 %v19703_v44, %v17899_v49 }
 0x47f   : > { %11244 = vmatpush.bf16.msrb.mxu3 %v17564_v1  ;;  %v17276_v1 = vor.u32 %v19547_v29, %v17275_v61  ;;  %v18155_v53 = vld [vmem:[%s20282_s11 + $0x2de8] sm:$0xf]  ;;  %v19767_v62 = vld [vmem:[%s20282_s11 + $0x2df4] sm:$0xf0]  ;;  %v17772_v15 = vor.u32 %v19671_v25, %v17771_v21  ;;  %v18028_v28 = vor.u32 %v19735_v58, %v18027_v24 }
 0x480   : > { %v17755_v40 = vld [vmem:[%s20282_s11 + $0x2ac8] sm:$0xf]  ;;  %v19667_v57 = vld [vmem:[%s20282_s11 + $0x2ad4] sm:$0xf0] }
 0x481   : > { %11206 = vmatpush.bf16.msrb.mxu0 %v17164_v27  ;;  %11219 = vmatpush.bf16.msrb.mxu1 %v17292_v50  ;;  %v17532_v27 = vor.u32 %v19611_v20, %v17531_v47  ;;  %v17883_v16 = vld [vmem:[%s20282_s11 + $0x2bc8] sm:$0xf]  ;;  %v18156_v50 = vor.u32 %v19767_v62, %v18155_v53  ;;  %v19731_v29 = vld [vmem:[%s20282_s11 + $0x2cd4] sm:$0xf0]  ;;  %v17756_v13 = vor.u32 %v19667_v57, %v17755_v40  ;;  %v19907_v53 = vld [vmem:[#allocation1 + $0x9] sm:$0xff] }
 0x482   : > { %11232 = vmatpush.bf16.msrb.mxu2 %v17420_v14  ;;  %v19699_v14 = vld [vmem:[%s20282_s11 + $0x2bd4] sm:$0xf0]  ;;  %v18011_v61 = vld [vmem:[%s20282_s11 + $0x2cc8] sm:$0xf] }
 0x483   : > { %11245 = vmatpush.bf16.msrb.mxu3 %v17548_v55  ;;  %v18139_v54 = vld [vmem:[%s20282_s11 + $0x2dc8] sm:$0xf]  ;;  %v19763_v55 = vld [vmem:[%s20282_s11 + $0x2dd4] sm:$0xf0]  ;;  %v17884_v47 = vor.u32 %v19699_v14, %v17883_v16  ;;  %v18012_v20 = vor.u32 %v19731_v29, %v18011_v61 }
 0x484   : > { %v17739_v21 = vld [vmem:[%s20282_s11 + $0x2aa8] sm:$0xf]  ;;  %v19663_v25 = vld [vmem:[%s20282_s11 + $0x2ab4] sm:$0xf0]  ;;  %v18140_v44 = vor.u32 %v19763_v55, %v18139_v54 }
 0x485   : > { %11207 = vmatpush.bf16.msrb.mxu0 %v17148_v31  ;;  %11220 = vmatpush.bf16.msrb.mxu1 %v17276_v1  ;;  %v17867_v49 = vld [vmem:[%s20282_s11 + $0x2ba8] sm:$0xf]  ;;  %v23953_v31 = vld [vmem:[#allocation22_spill] sm:$0xff]  ;;  %v17740_v62 = vor.u32 %v19663_v25, %v17739_v21  ;;  %v11001_v55 = vpop.f32.mrf.mxu0  ;;  %v11014_v21 = vpop.f32.mrf.mxu1 }
 0x486   : > { %11233 = vmatpush.bf16.msrb.mxu2 %v17404_v22  ;;  %v19695_v24 = vld [vmem:[%s20282_s11 + $0x2bb4] sm:$0xf0]  ;;  %v17995_v58 = vld [vmem:[%s20282_s11 + $0x2ca8] sm:$0xf] }
 0x487   : > { %11246 = vmatpush.bf16.msrb.mxu3 %v17532_v27  ;;  %v19727_v1 = vld [vmem:[%s20282_s11 + $0x2cb4] sm:$0xf0]  ;;  %v19906_v40 = vld [vmem:[#allocation1] sm:$0xff]  ;;  %v17868_v27 = vor.u32 %v19695_v24, %v17867_v49 }
 0x488   : > { %11208 = vmatmul.bf16.vlgmr.msrb.gmra.mxu0 %v23953_v31  ;;  %v23954_v57 = vld [vmem:[#allocation24_spill] sm:$0xff]  ;;  %v19759_v22 = vld [vmem:[%s20282_s11 + $0x2db4] sm:$0xf0]  ;;  %v18321_v31 = vld [vmem:[%s20282_s11 + $0xcc] sm:$0xf] }
 0x489   : > { %11252 = vmatpush.bf16.msra.mxu0 %v17772_v15  ;;  %11265 = vmatpush.bf16.msra.mxu1 %v17900_v26  ;;  %v18123_v16 = vld [vmem:[%s20282_s11 + $0x2da8] sm:$0xf]  ;;  %v17996_v15 = vor.u32 %v19727_v1, %v17995_v58  ;;  %v19691_v61 = vld [vmem:[%s20282_s11 + $0x2b94] sm:$0xf0] }
 0x48a   : > { %11278 = vmatpush.bf16.msra.mxu2 %v18028_v28  ;;  %11221 = vmatmul.bf16.vlgmr.msrb.gmra.mxu1 %v23954_v57  ;;  %v17723_v26 = vld [vmem:[%s20282_s11 + $0x2a88] sm:$0xf]  ;;  %v19659_v28 = vld [vmem:[%s20282_s11 + $0x2a94] sm:$0xf0]  ;;  %v18124_v14 = vor.u32 %v19759_v22, %v18123_v16 }
 0x48b   : > { %11291 = vmatpush.bf16.msra.mxu3 %v18156_v50  ;;  %11234 = vmatmul.bf16.vlgmr.msrb.gmra.mxu2 %v19906_v40  ;;  %v17851_v50 = vld [vmem:[%s20282_s11 + $0x2b88] sm:$0xf]  ;;  %v19723_v54 = vld [vmem:[%s20282_s11 + $0x2c94] sm:$0xf0] }
 0x48c   : > { %11247 = vmatmul.bf16.vlgmr.msrb.gmra.mxu3 %v19907_v53  ;;  %v17979_v29 = vld [vmem:[%s20282_s11 + $0x2c88] sm:$0xf]  ;;  %v17852_v25 = vor.u32 %v19691_v61, %v17851_v50  ;;  %v19655_v24 = vld [vmem:[%s20282_s11 + $0x2a74] sm:$0xf0] }
 0x48d   : > { %11253 = vmatpush.bf16.msra.mxu0 %v17756_v13  ;;  %11266 = vmatpush.bf16.msra.mxu1 %v17884_v47  ;;  %v18107_v40 = vld [vmem:[%s20282_s11 + $0x2d88] sm:$0xf]  ;;  %v19755_v13 = vld [vmem:[%s20282_s11 + $0x2d94] sm:$0xf0]  ;;  %v11002_v47 = vadd.f32 %v11001_v55, %v22751_v63  ;;  %v17980_v49 = vor.u32 %v19723_v54, %v17979_v29 }
 0x48e   : > { %11279 = vmatpush.bf16.msra.mxu2 %v18012_v20  ;;  %v17724_v20 = vor.u32 %v19659_v28, %v17723_v26  ;;  %v17835_v58 = vld [vmem:[%s20282_s11 + $0x2b68] sm:$0xf]  ;;  %v18108_v1 = vor.u32 %v19755_v13, %v18107_v40  ;;  %v19687_v22 = vld [vmem:[%s20282_s11 + $0x2b74] sm:$0xf0]  ;;  %v11027_v54 = vpop.f32.mrf.mxu2 }
 0x48f   : > { %11292 = vmatpush.bf16.msra.mxu3 %v18140_v44  ;;  %v17707_v44 = vld [vmem:[%s20282_s11 + $0x2a68] sm:$0xf]  ;;  %v11015_v16 = vadd.f32 %v11014_v21, %v11002_v47  ;;  %v19719_v63 = vld [vmem:[%s20282_s11 + $0x2c74] sm:$0xf0]  ;;  %v17836_v26 = vor.u32 %v19687_v22, %v17835_v58 }
 0x490   : > { %v17963_v53 = vld [vmem:[%s20282_s11 + $0x2c68] sm:$0xf]  ;;  %v19683_v55 = vld [vmem:[%s20282_s11 + $0x2b54] sm:$0xf0] }
 0x491   : > { %11254 = vmatpush.bf16.msra.mxu0 %v17740_v62  ;;  %11267 = vmatpush.bf16.msra.mxu1 %v17868_v27  ;;  %v18091_v62 = vld [vmem:[%s20282_s11 + $0x2d68] sm:$0xf]  ;;  %v19751_v27 = vld [vmem:[%s20282_s11 + $0x2d74] sm:$0xf0]  ;;  %v17964_v28 = vor.u32 %v19719_v63, %v17963_v53  ;;  %v11028_v47 = vadd.f32 %v11027_v54, %v11015_v16 }
 0x492   : > { %11280 = vmatpush.bf16.msra.mxu2 %v17996_v15  ;;  %v17708_v15 = vor.u32 %v19655_v24, %v17707_v44  ;;  %v17691_v50 = vld [vmem:[%s20282_s11 + $0x2a48] sm:$0xf]  ;;  %v18092_v29 = vor.u32 %v19751_v27, %v18091_v62  ;;  %v19715_v13 = vld [vmem:[%s20282_s11 + $0x2c54] sm:$0xf0]  ;;  %v11016_v24 = vpop.f32.mrf.mxu1 }
 0x493   : > { %11293 = vmatpush.bf16.msra.mxu3 %v18124_v14  ;;  %v19651_v14 = vld [vmem:[%s20282_s11 + $0x2a54] sm:$0xf0]  ;;  %v17819_v61 = vld [vmem:[%s20282_s11 + $0x2b48] sm:$0xf] }
 0x494   : > { %v17947_v40 = vld [vmem:[%s20282_s11 + $0x2c48] sm:$0xf]  ;;  %v17692_v44 = vor.u32 %v19651_v14, %v17691_v50  ;;  %v19647_v53 = vld [vmem:[%s20282_s11 + $0x2a34] sm:$0xf0] }
 0x495   : > { %11255 = vmatpush.bf16.msra.mxu0 %v17724_v20  ;;  %11268 = vmatpush.bf16.msra.mxu1 %v17852_v25  ;;  %v11040_v20 = vpop.f32.mrf.mxu3  ;;  %v18075_v21 = vld [vmem:[%s20282_s11 + $0x2d48] sm:$0xf]  ;;  %v19747_v25 = vld [vmem:[%s20282_s11 + $0x2d54] sm:$0xf0]  ;;  %v17948_v16 = vor.u32 %v19715_v13, %v17947_v40 }
 0x496   : > { %11281 = vmatpush.bf16.msra.mxu2 %v17980_v49  ;;  %v11003_v49 = vpop.f32.mrf.mxu0  ;;  %v22820_v58 = vadd.f32 %v11040_v20, %v11028_v47  ;;  %v17675_v22 = vld [vmem:[%s20282_s11 + $0x2a28] sm:$0xf]  ;;  %v18076_v62 = vor.u32 %v19747_v25, %v18075_v21  ;;  %v19679_v27 = vld [vmem:[%s20282_s11 + $0x2b34] sm:$0xf0] }
 0x497   : > { %11294 = vmatpush.bf16.msra.mxu3 %v18108_v1  ;;  %v17820_v1 = vor.u32 %v19683_v55, %v17819_v61  ;;  %v17803_v63 = vld [vmem:[%s20282_s11 + $0x2b28] sm:$0xf]  ;;  %v19711_v50 = vld [vmem:[%s20282_s11 + $0x2c34] sm:$0xf0]  ;;  %v17676_v14 = vor.u32 %v19647_v53, %v17675_v22 }
 0x498   : > { %v17659_v61 = vld [vmem:[%s20282_s11 + $0x2a08] sm:$0xf]  ;;  %v19643_v54 = vld [vmem:[%s20282_s11 + $0x2a14] sm:$0xf0] }
 0x499   : > { %11256 = vmatpush.bf16.msra.mxu0 %v17708_v15  ;;  %11269 = vmatpush.bf16.msra.mxu1 %v17836_v26  ;;  %v17931_v15 = vld [vmem:[%s20282_s11 + $0x2c28] sm:$0xf]  ;;  %v19675_v13 = vld [vmem:[%s20282_s11 + $0x2b14] sm:$0xf0]  ;;  %v17660_v53 = vor.u32 %v19643_v54, %v17659_v61 }
 0x49a   : > { %11282 = vmatpush.bf16.msra.mxu2 %v17964_v28  ;;  %v18059_v26 = vld [vmem:[%s20282_s11 + $0x2d28] sm:$0xf]  ;;  %v19743_v28 = vld [vmem:[%s20282_s11 + $0x2d34] sm:$0xf0]  ;;  %v17932_v55 = vor.u32 %v19711_v50, %v17931_v15  ;;  %v12525_v15 = vld [vmem:[%s20282_s11 + $0x1f8] sm:$0xf0] }
 0x49b   : > { %11295 = vmatpush.bf16.msra.mxu3 %v18092_v29  ;;  %v17804_v29 = vor.u32 %v19679_v27, %v17803_v63  ;;  %v17787_v40 = vld [vmem:[%s20282_s11 + $0x2b08] sm:$0xf]  ;;  %v18060_v20 = vor.u32 %v19743_v28, %v18059_v26  ;;  %v19707_v21 = vld [vmem:[%s20282_s11 + $0x2c14] sm:$0xf0]  ;;  %v12397_v63 = vld [vmem:[%s20282_s11 + $0xf8] sm:$0xf0] }
 0x49c   : > { %v17915_v47 = vld [vmem:[%s20282_s11 + $0x2c08] sm:$0xf]  ;;  %v19739_v49 = vld [vmem:[%s20282_s11 + $0x2d14] sm:$0xf0]  ;;  %v18357_v27 = vld [vmem:[%s20282_s11 + $0x1ec] sm:$0xf] }
 0x49d   : > { %11257 = vmatpush.bf16.msra.mxu0 %v17692_v44  ;;  %11270 = vmatpush.bf16.msra.mxu1 %v17820_v1  ;;  %v18043_v25 = vld [vmem:[%s20282_s11 + $0x2d08] sm:$0xf]  ;;  %v11029_v44 = vpop.f32.mrf.mxu2  ;;  %v19799_v22 = vld [vmem:[%s20282_s11 + $0x2ef4] sm:$0xf0]  ;;  %v18325_v1 = vld [vmem:[%s20282_s11 + $0xec] sm:$0xf]  ;;  %v17916_v50 = vor.u32 %v19707_v21, %v17915_v47  ;;  %v12528_v54 = vor.u32 %v18357_v27, %v12525_v15 }
 0x49e   : > { %11283 = vmatpush.bf16.msra.mxu2 %v17948_v16  ;;  %v18283_v24 = vld [vmem:[%s20282_s11 + $0x2ee8] sm:$0xf]  ;;  %v11042_v16 = vpop.f32.mrf.mxu3  ;;  %v18389_v26 = vld [vmem:[%s20282_s11 + $0x2ec] sm:$0xf]  ;;  %v12653_v28 = vld [vmem:[%s20282_s11 + $0x2f8] sm:$0xf0]  ;;  %v12400_v61 = vor.u32 %v18325_v1, %v12397_v63 }
 0x49f   : > { %11296 = vmatpush.bf16.msra.mxu3 %v18076_v62  ;;  %v17788_v62 = vor.u32 %v19675_v13, %v17787_v40  ;;  %v18284_v44 = vor.u32 %v19799_v22, %v18283_v24  ;;  %v18267_v16 = vld [vmem:[%s20282_s11 + $0x2ec8] sm:$0xf]  ;;  %v19795_v57 = vld [vmem:[%s20282_s11 + $0x2ed4] sm:$0xf0]  ;;  %v18353_v40 = vld [vmem:[%s20282_s11 + $0x1cc] sm:$0xf] }
 0x4a0   : > { %v12509_v13 = vld [vmem:[%s20282_s11 + $0x1d8] sm:$0xf0]  ;;  %v18385_v47 = vld [vmem:[%s20282_s11 + $0x2cc] sm:$0xf]  ;;  %v18268_v21 = vor.u32 %v19795_v57, %v18267_v16  ;;  %v18251_v24 = vld [vmem:[%s20282_s11 + $0x2ea8] sm:$0xf] }
 0x4a1   : > { %11258 = vmatpush.bf16.msra.mxu0 %v17676_v14  ;;  %11271 = vmatpush.bf16.msra.mxu1 %v17804_v29  ;;  %v18044_v14 = vor.u32 %v19739_v49, %v18043_v25  ;;  %v12656_v29 = vor.u32 %v18389_v26, %v12653_v28  ;;  %v12512_v49 = vor.u32 %v18353_v40, %v12509_v13  ;;  %v19791_v22 = vld [vmem:[%s20282_s11 + $0x2eb4] sm:$0xf0]  ;;  %v18317_v1 = vld [vmem:[%s20282_s11 + $0xac] sm:$0xf]  ;;  %v12365_v27 = vld [vmem:[%s20282_s11 + $0xb8] sm:$0xf0] }
 0x4a2   : > { %11284 = vmatpush.bf16.msra.mxu2 %v17932_v55  ;;  %v12381_v55 = vld [vmem:[%s20282_s11 + $0xd8] sm:$0xf0]  ;;  %v18349_v15 = vld [vmem:[%s20282_s11 + $0x1ac] sm:$0xf]  ;;  %v19911_v28 = vld [vmem:[#allocation1 + $0x2d] sm:$0xff] }
 0x4a3   : > { %11297 = vmatpush.bf16.msra.mxu3 %v18060_v20  ;;  %v12637_v20 = vld [vmem:[%s20282_s11 + $0x2d8] sm:$0xf0]  ;;  %v12384_v25 = vor.u32 %v18321_v31, %v12381_v55  ;;  %v18381_v31 = vld [vmem:[%s20282_s11 + $0x2ac] sm:$0xf]  ;;  %v19787_v16 = vld [vmem:[%s20282_s11 + $0x2e94] sm:$0xf0] }
 0x4a4   : > { %v12640_v63 = vor.u32 %v18385_v47, %v12637_v20  ;;  %v19910_v57 = vld [vmem:[#allocation1 + $0x1b] sm:$0xff]  ;;  %v18345_v13 = vld [vmem:[%s20282_s11 + $0x18c] sm:$0xf] }
 0x4a5   : > { %11259 = vmatpush.bf16.msra.mxu0 %v17660_v53  ;;  %11272 = vmatpush.bf16.msra.mxu1 %v17788_v62  ;;  %v19908_v53 = vld [vmem:[#allocation1 + $0x12] sm:$0xff]  ;;  %v11053_v20 = vpop.f32.mrf.mxu0 }
 0x4a6   : > { %11285 = vmatpush.bf16.msra.mxu2 %v17916_v50  ;;  %v12493_v62 = vld [vmem:[%s20282_s11 + $0x1b8] sm:$0xf0]  ;;  %v19909_v50 = vld [vmem:[#allocation1 + $0x24] sm:$0xff] }
 0x4a7   : > { %11298 = vmatpush.bf16.msra.mxu3 %v18044_v14  ;;  %v12621_v26 = vld [vmem:[%s20282_s11 + $0x2b8] sm:$0xf0]  ;;  %v18252_v14 = vor.u32 %v19791_v22, %v18251_v24  ;;  %v11066_v24 = vpop.f32.mrf.mxu1 }
 0x4a8   : > { %11260 = vmatmul.bf16.vlgmr.msra.gmra.mxu0 %v19908_v53  ;;  %11273 = vmatmul.bf16.vlgmr.msra.gmra.mxu1 %v19910_v57  ;;  %v12624_v55 = vor.u32 %v18381_v31, %v12621_v26  ;;  %v12349_v40 = vld [vmem:[%s20282_s11 + $0x98] sm:$0xf0]  ;;  %v18377_v53 = vld [vmem:[%s20282_s11 + $0x28c] sm:$0xf] }
 0x4a9   : > { %11304 = vmatpush.bf16.msrb.mxu0 %v18284_v44  ;;  %11317 = vmatpush.bf16.msrb.mxu1 %v12400_v61  ;;  %v12368_v44 = vor.u32 %v18317_v1, %v12365_v27  ;;  %v12496_v61 = vor.u32 %v18349_v15, %v12493_v62  ;;  %v12477_v47 = vld [vmem:[%s20282_s11 + $0x198] sm:$0xf0]  ;;  %v19783_v27 = vld [vmem:[%s20282_s11 + $0x2e74] sm:$0xf0]  ;;  %v18309_v15 = vld [vmem:[%s20282_s11 + $0x6c] sm:$0xf] }
 0x4aa   : > { %11330 = vmatpush.bf16.msrb.mxu2 %v12528_v54  ;;  %11299 = vmatmul.bf16.vlgmr.msra.gmra.mxu3 %v19911_v28  ;;  %v18235_v54 = vld [vmem:[%s20282_s11 + $0x2e88] sm:$0xf]  ;;  %v12480_v1 = vor.u32 %v18345_v13, %v12477_v47  ;;  %v12333_v57 = vld [vmem:[%s20282_s11 + $0x78] sm:$0xf0]  ;;  %v18341_v31 = vld [vmem:[%s20282_s11 + $0x16c] sm:$0xf] }
 0x4ab   : > { %11343 = vmatpush.bf16.msrb.mxu3 %v12656_v29  ;;  %11286 = vmatmul.bf16.vlgmr.msra.gmra.mxu2 %v19909_v50  ;;  %v18313_v29 = vld [vmem:[%s20282_s11 + $0x8c] sm:$0xf]  ;;  %v12589_v28 = vld [vmem:[%s20282_s11 + $0x278] sm:$0xf0] }
 0x4ac   : > { %v12352_v22 = vor.u32 %v18313_v29, %v12349_v40  ;;  %v18373_v26 = vld [vmem:[%s20282_s11 + $0x26c] sm:$0xf]  ;;  %v12317_v13 = vld [vmem:[%s20282_s11 + $0x58] sm:$0xf0] }
 0x4ad   : > { %11305 = vmatpush.bf16.msrb.mxu0 %v18268_v21  ;;  %11318 = vmatpush.bf16.msrb.mxu1 %v12384_v25  ;;  %v12605_v21 = vld [vmem:[%s20282_s11 + $0x298] sm:$0xf0]  ;;  %v11054_v25 = vadd.f32 %v11053_v20, %v22820_v58  ;;  %v18305_v29 = vld [vmem:[%s20282_s11 + $0x4c] sm:$0xf] }
 0x4ae   : > { %11331 = vmatpush.bf16.msrb.mxu2 %v12512_v49  ;;  %v18236_v49 = vor.u32 %v19787_v16, %v18235_v54  ;;  %v12608_v62 = vor.u32 %v18377_v53, %v12605_v21  ;;  %v12461_v58 = vld [vmem:[%s20282_s11 + $0x178] sm:$0xf0]  ;;  %v18203_v54 = vld [vmem:[%s20282_s11 + $0x2e48] sm:$0xf]  ;;  %v19779_v16 = vld [vmem:[%s20282_s11 + $0x2e54] sm:$0xf0]  ;;  %v11079_v40 = vpop.f32.mrf.mxu2  ;;  %v11092_v21 = vpop.f32.mrf.mxu3 }
 0x4af   : > { %11344 = vmatpush.bf16.msrb.mxu3 %v12640_v63  ;;  %v18219_v63 = vld [vmem:[%s20282_s11 + $0x2e68] sm:$0xf]  ;;  %v11067_v50 = vadd.f32 %v11066_v24, %v11054_v25  ;;  %v18337_v47 = vld [vmem:[%s20282_s11 + $0x14c] sm:$0xf]  ;;  %v12445_v20 = vld [vmem:[%s20282_s11 + $0x158] sm:$0xf0]  ;;  %v11055_v24 = vpop.f32.mrf.mxu0 }
 0x4b0   : > { %v18369_v25 = vld [vmem:[%s20282_s11 + $0x24c] sm:$0xf] }
 0x4b1   : > { %11306 = vmatpush.bf16.msrb.mxu0 %v18252_v14  ;;  %11319 = vmatpush.bf16.msrb.mxu1 %v12368_v44  ;;  %v18220_v14 = vor.u32 %v19783_v27, %v18219_v63  ;;  %v12336_v44 = vor.u32 %v18309_v15, %v12333_v57  ;;  %v11080_v53 = vadd.f32 %v11079_v40, %v11067_v50  ;;  %v19775_v50 = vld [vmem:[%s20282_s11 + $0x2e34] sm:$0xf0]  ;;  %v18301_v57 = vld [vmem:[%s20282_s11 + $0x2c] sm:$0xf] }
 0x4b2   : > { %11332 = vmatpush.bf16.msrb.mxu2 %v12496_v61  ;;  %v12464_v61 = vor.u32 %v18341_v31, %v12461_v58  ;;  %v12320_v27 = vor.u32 %v18305_v29, %v12317_v13  ;;  %v12448_v15 = vor.u32 %v18337_v47, %v12445_v20  ;;  %v12301_v58 = vld [vmem:[%s20282_s11 + $0x38] sm:$0xf0]  ;;  %v18297_v40 = vld [vmem:[%s20282_s11 + $0xc] sm:$0xf] }
 0x4b3   : > { %11345 = vmatpush.bf16.msrb.mxu3 %v12624_v55  ;;  %v12592_v55 = vor.u32 %v18373_v26, %v12589_v28  ;;  %v22887_v63 = vadd.f32 %v11092_v21, %v11080_v53  ;;  %v18333_v26 = vld [vmem:[%s20282_s11 + $0x12c] sm:$0xf]  ;;  %v12429_v28 = vld [vmem:[%s20282_s11 + $0x138] sm:$0xf0]  ;;  %v12304_v29 = vor.u32 %v18301_v57, %v12301_v58 }
 0x4b4   : > { %v12285_v13 = vld [vmem:[%s20282_s11 + $0x18] sm:$0xf0]  ;;  %v18329_v47 = vld [vmem:[%s20282_s11 + $0x10c] sm:$0xf] }
 0x4b5   : > { %11307 = vmatpush.bf16.msrb.mxu0 %v18236_v49  ;;  %11320 = vmatpush.bf16.msrb.mxu1 %v12352_v22  ;;  %v12573_v49 = vld [vmem:[%s20282_s11 + $0x258] sm:$0xf0]  ;;  %v18204_v22 = vor.u32 %v19779_v16, %v18203_v54  ;;  %v18171_v54 = vld [vmem:[%s20282_s11 + $0x2e08] sm:$0xf]  ;;  %v19771_v16 = vld [vmem:[%s20282_s11 + $0x2e14] sm:$0xf0] }
 0x4b6   : > { %11333 = vmatpush.bf16.msrb.mxu2 %v12480_v1  ;;  %v11068_v1 = vpop.f32.mrf.mxu1  ;;  %v12576_v31 = vor.u32 %v18369_v25, %v12573_v49  ;;  %v12413_v53 = vld [vmem:[%s20282_s11 + $0x118] sm:$0xf0]  ;;  %v18361_v21 = vld [vmem:[%s20282_s11 + $0x20c] sm:$0xf]  ;;  %v11081_v49 = vpop.f32.mrf.mxu2 }
 0x4b7   : > { %11346 = vmatpush.bf16.msrb.mxu3 %v12608_v62  ;;  %v18187_v62 = vld [vmem:[%s20282_s11 + $0x2e28] sm:$0xf]  ;;  %v12541_v25 = vld [vmem:[%s20282_s11 + $0x218] sm:$0xf0]  ;;  %v18421_v24 = vld [vmem:[%s20282_s11 + $0x3ec] sm:$0xf]  ;;  %v12416_v58 = vor.u32 %v18329_v47, %v12413_v53 }
 0x4b8   : > { %v18453_v1 = vld [vmem:[%s20282_s11 + $0x4ec] sm:$0xf]  ;;  %v13037_v57 = vld [vmem:[%s20282_s11 + $0x5f8] sm:$0xf0] }
 0x4b9   : > { %11308 = vmatpush.bf16.msrb.mxu0 %v18220_v14  ;;  %11321 = vmatpush.bf16.msrb.mxu1 %v12336_v44  ;;  %v18365_v14 = vld [vmem:[%s20282_s11 + $0x22c] sm:$0xf]  ;;  %v12557_v44 = vld [vmem:[%s20282_s11 + $0x238] sm:$0xf0] }
 0x4ba   : > { %11334 = vmatpush.bf16.msrb.mxu2 %v12464_v61  ;;  %v18188_v61 = vor.u32 %v19775_v50, %v18187_v62  ;;  %v12560_v20 = vor.u32 %v18365_v14, %v12557_v44  ;;  %v12909_v62 = vld [vmem:[%s20282_s11 + $0x4f8] sm:$0xf0]  ;;  %v18485_v50 = vld [vmem:[%s20282_s11 + $0x5ec] sm:$0xf]  ;;  %v12544_v14 = vor.u32 %v18361_v21, %v12541_v25 }
 0x4bb   : > { %11347 = vmatpush.bf16.msrb.mxu3 %v12592_v55  ;;  %v12432_v55 = vor.u32 %v18333_v26, %v12429_v28  ;;  %v18517_v26 = vld [vmem:[%s20282_s11 + $0x6ec] sm:$0xf]  ;;  %v13165_v28 = vld [vmem:[%s20282_s11 + $0x6f8] sm:$0xf0] }
 0x4bc   : > { %v12765_v49 = vld [vmem:[%s20282_s11 + $0x3d8] sm:$0xf0]  ;;  %v18513_v47 = vld [vmem:[%s20282_s11 + $0x6cc] sm:$0xf] }
 0x4bd   : > { %11309 = vmatpush.bf16.msrb.mxu0 %v18204_v22  ;;  %11322 = vmatpush.bf16.msrb.mxu1 %v12320_v27  ;;  %v12781_v22 = vld [vmem:[%s20282_s11 + $0x3f8] sm:$0xf0]  ;;  %v11094_v27 = vpop.f32.mrf.mxu3 }
 0x4be   : > { %11335 = vmatpush.bf16.msrb.mxu2 %v12448_v15  ;;  %v18172_v15 = vor.u32 %v19771_v16, %v18171_v54  ;;  %v12784_v44 = vor.u32 %v18421_v24, %v12781_v22  ;;  %v13040_v54 = vor.u32 %v18485_v50, %v13037_v57  ;;  %v18417_v16 = vld [vmem:[%s20282_s11 + $0x3cc] sm:$0xf]  ;;  %v12749_v22 = vld [vmem:[%s20282_s11 + $0x3b8] sm:$0xf0] }
 0x4bf   : > { %11348 = vmatpush.bf16.msrb.mxu3 %v12576_v31  ;;  %v12288_v31 = vor.u32 %v18297_v40, %v12285_v13  ;;  %v18449_v27 = vld [vmem:[%s20282_s11 + $0x4cc] sm:$0xf]  ;;  %v13021_v13 = vld [vmem:[%s20282_s11 + $0x5d8] sm:$0xf0]  ;;  %v12768_v53 = vor.u32 %v18417_v16, %v12765_v49 }
 0x4c0   : > { %v18481_v40 = vld [vmem:[%s20282_s11 + $0x5cc] sm:$0xf]  ;;  %v12877_v50 = vld [vmem:[%s20282_s11 + $0x4b8] sm:$0xf0] }
 0x4c1   : > { %11310 = vmatpush.bf16.msrb.mxu0 %v18188_v61  ;;  %11323 = vmatpush.bf16.msrb.mxu1 %v12304_v29  ;;  %v12912_v61 = vor.u32 %v18453_v1, %v12909_v62  ;;  %v13168_v29 = vor.u32 %v18517_v26, %v13165_v28  ;;  %v13024_v25 = vor.u32 %v18481_v40, %v13021_v13  ;;  %v18413_v24 = vld [vmem:[%s20282_s11 + $0x3ac] sm:$0xf]  ;;  %v13133_v26 = vld [vmem:[%s20282_s11 + $0x6b8] sm:$0xf0] }
 0x4c2   : > { %11336 = vmatpush.bf16.msrb.mxu2 %v12432_v55  ;;  %v12893_v55 = vld [vmem:[%s20282_s11 + $0x4d8] sm:$0xf0]  ;;  %v18445_v1 = vld [vmem:[%s20282_s11 + $0x4ac] sm:$0xf]  ;;  %v12752_v28 = vor.u32 %v18413_v24, %v12749_v22 }
 0x4c3   : > { %11349 = vmatpush.bf16.msrb.mxu3 %v12560_v20  ;;  %v13149_v20 = vld [vmem:[%s20282_s11 + $0x6d8] sm:$0xf0]  ;;  %v12896_v21 = vor.u32 %v18449_v27, %v12893_v55  ;;  %v18477_v57 = vld [vmem:[%s20282_s11 + $0x5ac] sm:$0xf] }
 0x4c4   : > { %v13152_v62 = vor.u32 %v18513_v47, %v13149_v20  ;;  %v18441_v16 = vld [vmem:[%s20282_s11 + $0x48c] sm:$0xf]  ;;  %v12989_v27 = vld [vmem:[%s20282_s11 + $0x598] sm:$0xf0] }
 0x4c5   : > { %11311 = vmatpush.bf16.msrb.mxu0 %v18172_v15  ;;  %11324 = vmatpush.bf16.msrb.mxu1 %v12288_v31  ;;  %v19912_v15 = vld [vmem:[#allocation1 + $0x36] sm:$0xff]  ;;  %v18505_v55 = vld [vmem:[%s20282_s11 + $0x68c] sm:$0xf]  ;;  %v11118_v47 = vpop.f32.mrf.mxu1 }
 0x4c6   : > { %11337 = vmatpush.bf16.msrb.mxu2 %v12416_v58  ;;  %v13005_v31 = vld [vmem:[%s20282_s11 + $0x5b8] sm:$0xf0]  ;;  %v18509_v58 = vld [vmem:[%s20282_s11 + $0x6ac] sm:$0xf] }
 0x4c7   : > { %11350 = vmatpush.bf16.msrb.mxu3 %v12544_v14  ;;  %v12880_v14 = vor.u32 %v18445_v1, %v12877_v50  ;;  %v13136_v49 = vor.u32 %v18509_v58, %v13133_v26  ;;  %v13117_v40 = vld [vmem:[%s20282_s11 + $0x698] sm:$0xf0]  ;;  %v18437_v24 = vld [vmem:[%s20282_s11 + $0x46c] sm:$0xf] }
 0x4c8   : > { %11312 = vmatmul.bf16.vlgmr.msrb.gmra.mxu0 %v19912_v15  ;;  %11325 = vmatmul.bf16.vlgmr.msrb.gmra.mxu1 %v20411_v34  ;;  %v13120_v22 = vor.u32 %v18505_v55, %v13117_v40  ;;  %v12845_v15 = vld [vmem:[%s20282_s11 + $0x478] sm:$0xf0]  ;;  %v18501_v50 = vld [vmem:[%s20282_s11 + $0x66c] sm:$0xf] }
 0x4c9   : > { %11356 = vmatpush.bf16.msra.mxu0 %v12784_v44  ;;  %11369 = vmatpush.bf16.msra.mxu1 %v12912_v61  ;;  %v13008_v44 = vor.u32 %v18477_v57, %v13005_v31  ;;  %v18409_v61 = vld [vmem:[%s20282_s11 + $0x38c] sm:$0xf]  ;;  %v13101_v57 = vld [vmem:[%s20282_s11 + $0x678] sm:$0xf0]  ;;  %v12848_v58 = vor.u32 %v18437_v24, %v12845_v15 }
 0x4ca   : > { %11382 = vmatpush.bf16.msra.mxu2 %v13040_v54  ;;  %11351 = vmatmul.bf16.vlgmr.msrb.gmra.mxu3 %v20409_v33  ;;  %v12733_v54 = vld [vmem:[%s20282_s11 + $0x398] sm:$0xf0]  ;;  %v18473_v33 = vld [vmem:[%s20282_s11 + $0x58c] sm:$0xf] }
 0x4cb   : > { %11395 = vmatpush.bf16.msra.mxu3 %v13168_v29  ;;  %11338 = vmatmul.bf16.vlgmr.msrb.gmra.mxu2 %v20418_v39  ;;  %v12861_v39 = vld [vmem:[%s20282_s11 + $0x498] sm:$0xf0]  ;;  %v11105_v29 = vpop.f32.mrf.mxu0  ;;  %v12736_v13 = vor.u32 %v18409_v61, %v12733_v54  ;;  %v13104_v61 = vor.u32 %v18501_v50, %v13101_v57  ;;  %v18429_v24 = vld [vmem:[%s20282_s11 + $0x42c] sm:$0xf] }
 0x4cc   : > { %v11106_v34 = vadd.f32 %v11105_v29, %v22887_v63  ;;  %v12864_v20 = vor.u32 %v18441_v16, %v12861_v39  ;;  %v12973_v63 = vld [vmem:[%s20282_s11 + $0x578] sm:$0xf0]  ;;  %v18497_v29 = vld [vmem:[%s20282_s11 + $0x64c] sm:$0xf] }
 0x4cd   : > { %11357 = vmatpush.bf16.msra.mxu0 %v12768_v53  ;;  %11370 = vmatpush.bf16.msra.mxu1 %v12896_v21  ;;  %v12992_v53 = vor.u32 %v18473_v33, %v12989_v27  ;;  %v18405_v21 = vld [vmem:[%s20282_s11 + $0x36c] sm:$0xf]  ;;  %v12829_v16 = vld [vmem:[%s20282_s11 + $0x458] sm:$0xf0]  ;;  %v11144_v27 = vpop.f32.mrf.mxu3 }
 0x4ce   : > { %11383 = vmatpush.bf16.msra.mxu2 %v13024_v25  ;;  %v12717_v25 = vld [vmem:[%s20282_s11 + $0x378] sm:$0xf0]  ;;  %v11119_v1 = vadd.f32 %v11118_v47, %v11106_v34  ;;  %v11131_v54 = vpop.f32.mrf.mxu2  ;;  %v18461_v15 = vld [vmem:[%s20282_s11 + $0x52c] sm:$0xf] }
 0x4cf   : > { %11396 = vmatpush.bf16.msra.mxu3 %v13152_v62  ;;  %v18469_v62 = vld [vmem:[%s20282_s11 + $0x56c] sm:$0xf]  ;;  %v12720_v31 = vor.u32 %v18405_v21, %v12717_v25  ;;  %v12957_v39 = vld [vmem:[%s20282_s11 + $0x558] sm:$0xf0] }
 0x4d0   : > { %v12976_v26 = vor.u32 %v18469_v62, %v12973_v63  ;;  %v11132_v33 = vadd.f32 %v11131_v54, %v11119_v1  ;;  %v13085_v55 = vld [vmem:[%s20282_s11 + $0x658] sm:$0xf0]  ;;  %v18397_v21 = vld [vmem:[%s20282_s11 + $0x32c] sm:$0xf] }
 0x4d1   : > { %11358 = vmatpush.bf16.msra.mxu0 %v12752_v28  ;;  %11371 = vmatpush.bf16.msra.mxu1 %v12880_v14  ;;  %v18401_v28 = vld [vmem:[%s20282_s11 + $0x34c] sm:$0xf]  ;;  %v12701_v14 = vld [vmem:[%s20282_s11 + $0x358] sm:$0xf0] }
 0x4d2   : > { %11384 = vmatpush.bf16.msra.mxu2 %v13008_v44  ;;  %v18433_v44 = vld [vmem:[%s20282_s11 + $0x44c] sm:$0xf]  ;;  %v12704_v34 = vor.u32 %v18401_v28, %v12701_v14  ;;  %v22957_v47 = vadd.f32 %v11144_v27, %v11132_v33  ;;  %v12685_v25 = vld [vmem:[%s20282_s11 + $0x338] sm:$0xf0] }
 0x4d3   : > { %11397 = vmatpush.bf16.msra.mxu3 %v13136_v49  ;;  %v18465_v49 = vld [vmem:[%s20282_s11 + $0x54c] sm:$0xf]  ;;  %v11107_v40 = vpop.f32.mrf.mxu0  ;;  %v12813_v1 = vld [vmem:[%s20282_s11 + $0x438] sm:$0xf0]  ;;  %v12688_v57 = vor.u32 %v18397_v21, %v12685_v25 }
 0x4d4   : > { %v12941_v62 = vld [vmem:[%s20282_s11 + $0x538] sm:$0xf0]  ;;  %v18493_v63 = vld [vmem:[%s20282_s11 + $0x62c] sm:$0xf] }
 0x4d5   : > { %11359 = vmatpush.bf16.msra.mxu0 %v12736_v13  ;;  %11372 = vmatpush.bf16.msra.mxu1 %v12864_v20  ;;  %v11120_v13 = vpop.f32.mrf.mxu1  ;;  %v12832_v20 = vor.u32 %v18433_v44, %v12829_v16  ;;  %v13069_v50 = vld [vmem:[%s20282_s11 + $0x638] sm:$0xf0]  ;;  %v12944_v28 = vor.u32 %v18461_v15, %v12941_v62  ;;  %v18425_v14 = vld [vmem:[%s20282_s11 + $0x40c] sm:$0xf]  ;;  %v11146_v40 = vpop.f32.mrf.mxu3 }
 0x4d6   : > { %11385 = vmatpush.bf16.msra.mxu2 %v12992_v53  ;;  %v12960_v53 = vor.u32 %v18465_v49, %v12957_v39  ;;  %v12797_v44 = vld [vmem:[%s20282_s11 + $0x418] sm:$0xf0]  ;;  %v13072_v54 = vor.u32 %v18493_v63, %v13069_v50  ;;  %v18489_v49 = vld [vmem:[%s20282_s11 + $0x60c] sm:$0xf]  ;;  %v11133_v33 = vpop.f32.mrf.mxu2 }
 0x4d7   : > { %11398 = vmatpush.bf16.msra.mxu3 %v13120_v22  ;;  %v13088_v22 = vor.u32 %v18497_v29, %v13085_v55  ;;  %v12925_v16 = vld [vmem:[%s20282_s11 + $0x518] sm:$0xf0]  ;;  %v18549_v27 = vld [vmem:[%s20282_s11 + $0x7ec] sm:$0xf]  ;;  %v12800_v21 = vor.u32 %v18425_v14, %v12797_v44 }
 0x4d8   : > { %v13053_v39 = vld [vmem:[%s20282_s11 + $0x618] sm:$0xf0]  ;;  %v18581_v55 = vld [vmem:[%s20282_s11 + $0x8ec] sm:$0xf] }
 0x4d9   : > { %11360 = vmatpush.bf16.msra.mxu0 %v12720_v31  ;;  %11373 = vmatpush.bf16.msra.mxu1 %v12848_v58  ;;  %v18393_v31 = vld [vmem:[%s20282_s11 + $0x30c] sm:$0xf]  ;;  %v12669_v58 = vld [vmem:[%s20282_s11 + $0x318] sm:$0xf0] }
 0x4da   : > { %11386 = vmatpush.bf16.msra.mxu2 %v12976_v26  ;;  %v12816_v26 = vor.u32 %v18429_v24, %v12813_v1  ;;  %v13293_v29 = vld [vmem:[%s20282_s11 + $0x7f8] sm:$0xf0]  ;;  %v18645_v24 = vld [vmem:[%s20282_s11 + $0xaec] sm:$0xf]  ;;  %v13056_v1 = vor.u32 %v18489_v49, %v13053_v39 }
 0x4db   : > { %11399 = vmatpush.bf16.msra.mxu3 %v13104_v61  ;;  %v18457_v61 = vld [vmem:[%s20282_s11 + $0x50c] sm:$0xf]  ;;  %v13421_v13 = vld [vmem:[%s20282_s11 + $0x8f8] sm:$0xf0]  ;;  %v13296_v15 = vor.u32 %v18549_v27, %v13293_v29 }
 0x4dc   : > { %v12928_v25 = vor.u32 %v18457_v61, %v12925_v16  ;;  %v13424_v62 = vor.u32 %v18581_v55, %v13421_v13  ;;  %v18545_v50 = vld [vmem:[%s20282_s11 + $0x7cc] sm:$0xf]  ;;  %v13533_v14 = vld [vmem:[%s20282_s11 + $0x9d8] sm:$0xf0] }
 0x4dd   : > { %11361 = vmatpush.bf16.msra.mxu0 %v12704_v34  ;;  %11374 = vmatpush.bf16.msra.mxu1 %v12832_v20  ;;  %v12672_v34 = vor.u32 %v18393_v31, %v12669_v58  ;;  %v18613_v20 = vld [vmem:[%s20282_s11 + $0x9ec] sm:$0xf]  ;;  %v13661_v61 = vld [vmem:[%s20282_s11 + $0xad8] sm:$0xf0] }
 0x4de   : > { %11387 = vmatpush.bf16.msra.mxu2 %v12960_v53  ;;  %v13549_v53 = vld [vmem:[%s20282_s11 + $0x9f8] sm:$0xf0]  ;;  %v18577_v31 = vld [vmem:[%s20282_s11 + $0x8cc] sm:$0xf] }
 0x4df   : > { %11400 = vmatpush.bf16.msra.mxu3 %v13088_v22  ;;  %v13677_v22 = vld [vmem:[%s20282_s11 + $0xaf8] sm:$0xf0]  ;;  %v13552_v63 = vor.u32 %v18613_v20, %v13549_v53  ;;  %v18641_v44 = vld [vmem:[%s20282_s11 + $0xacc] sm:$0xf] }
 0x4e0   : > { %v13680_v58 = vor.u32 %v18645_v24, %v13677_v22  ;;  %v18541_v39 = vld [vmem:[%s20282_s11 + $0x7ac] sm:$0xf]  ;;  %v13261_v33 = vld [vmem:[%s20282_s11 + $0x7b8] sm:$0xf0]  ;;  %v13664_v29 = vor.u32 %v18641_v44, %v13661_v61 }
 0x4e1   : > { %11362 = vmatpush.bf16.msra.mxu0 %v12688_v57  ;;  %11375 = vmatpush.bf16.msra.mxu1 %v12816_v26  ;;  %v13277_v57 = vld [vmem:[%s20282_s11 + $0x7d8] sm:$0xf0]  ;;  %v18573_v27 = vld [vmem:[%s20282_s11 + $0x8ac] sm:$0xf]  ;;  %v13264_v53 = vor.u32 %v18541_v39, %v13261_v33 }
 0x4e2   : > { %11388 = vmatpush.bf16.msra.mxu2 %v12944_v28  ;;  %v13405_v26 = vld [vmem:[%s20282_s11 + $0x8d8] sm:$0xf0]  ;;  %v18609_v28 = vld [vmem:[%s20282_s11 + $0x9cc] sm:$0xf] }
 0x4e3   : > { %11401 = vmatpush.bf16.msra.mxu3 %v13072_v54  ;;  %v13280_v54 = vor.u32 %v18545_v50, %v13277_v57  ;;  %v13408_v16 = vor.u32 %v18577_v31, %v13405_v26  ;;  %v13536_v49 = vor.u32 %v18609_v28, %v13533_v14  ;;  %v13389_v55 = vld [vmem:[%s20282_s11 + $0x8b8] sm:$0xf0]  ;;  %v18605_v40 = vld [vmem:[%s20282_s11 + $0x9ac] sm:$0xf] }
 0x4e4   : > { %v18637_v13 = vld [vmem:[%s20282_s11 + $0xaac] sm:$0xf]  ;;  %v13645_v20 = vld [vmem:[%s20282_s11 + $0xab8] sm:$0xf0] }
 0x4e5   : > { %11363 = vmatpush.bf16.msra.mxu0 %v12672_v34  ;;  %11376 = vmatpush.bf16.msra.mxu1 %v12800_v21  ;;  %v13517_v34 = vld [vmem:[%s20282_s11 + $0x9b8] sm:$0xf0]  ;;  %v11170_v31 = vpop.f32.mrf.mxu1  ;;  %v18533_v28 = vld [vmem:[%s20282_s11 + $0x76c] sm:$0xf] }
 0x4e6   : > { %11389 = vmatpush.bf16.msra.mxu2 %v12928_v25  ;;  %v13520_v21 = vor.u32 %v18605_v40, %v13517_v34  ;;  %v18537_v25 = vld [vmem:[%s20282_s11 + $0x78c] sm:$0xf]  ;;  %v13245_v24 = vld [vmem:[%s20282_s11 + $0x798] sm:$0xf0] }
 0x4e7   : > { %11402 = vmatpush.bf16.msra.mxu3 %v13056_v1  ;;  %v13373_v22 = vld [vmem:[%s20282_s11 + $0x898] sm:$0xf0]  ;;  %v18601_v1 = vld [vmem:[%s20282_s11 + $0x98c] sm:$0xf]  ;;  %v13248_v57 = vor.u32 %v18537_v25, %v13245_v24 }
 0x4e8   : > { %11364 = vmatmul.bf16.vlgmr.msra.gmra.mxu0 %v20413_v35  ;;  %11377 = vmatmul.bf16.vlgmr.msra.gmra.mxu1 %v20447_v7  ;;  %v18569_v35 = vld [vmem:[%s20282_s11 + $0x88c] sm:$0xf]  ;;  %v13629_v50 = vld [vmem:[%s20282_s11 + $0xa98] sm:$0xf0] }
 0x4e9   : > { %11408 = vmatpush.bf16.msrb.mxu0 %v13296_v15  ;;  %11421 = vmatpush.bf16.msrb.mxu1 %v13424_v62  ;;  %v13501_v15 = vld [vmem:[%s20282_s11 + $0x998] sm:$0xf0]  ;;  %v11157_v62 = vpop.f32.mrf.mxu0  ;;  %v18565_v44 = vld [vmem:[%s20282_s11 + $0x86c] sm:$0xf] }
 0x4ea   : > { %11434 = vmatpush.bf16.msrb.mxu2 %v13552_v63  ;;  %11403 = vmatmul.bf16.vlgmr.msra.gmra.mxu3 %v20445_v6  ;;  %v13648_v6 = vor.u32 %v18637_v13, %v13645_v20  ;;  %v18633_v63 = vld [vmem:[%s20282_s11 + $0xa8c] sm:$0xf]  ;;  %v11158_v7 = vadd.f32 %v11157_v62, %v22957_v47  ;;  %v13504_v26 = vor.u32 %v18601_v1, %v13501_v15  ;;  %v13229_v14 = vld [vmem:[%s20282_s11 + $0x778] sm:$0xf0] }
 0x4eb   : > { %11447 = vmatpush.bf16.msrb.mxu3 %v13680_v58  ;;  %11390 = vmatmul.bf16.vlgmr.msra.gmra.mxu2 %v20452_v10  ;;  %v13392_v10 = vor.u32 %v18573_v27, %v13389_v55  ;;  %v13376_v58 = vor.u32 %v18569_v35, %v13373_v22  ;;  %v13632_v61 = vor.u32 %v18633_v63, %v13629_v50  ;;  %v13485_v47 = vld [vmem:[%s20282_s11 + $0x978] sm:$0xf0]  ;;  %v18629_v39 = vld [vmem:[%s20282_s11 + $0xa6c] sm:$0xf] }
 0x4ec   : > { %v13613_v33 = vld [vmem:[%s20282_s11 + $0xa78] sm:$0xf0]  ;;  %v13232_v27 = vor.u32 %v18533_v28, %v13229_v14  ;;  %v18529_v40 = vld [vmem:[%s20282_s11 + $0x74c] sm:$0xf] }
 0x4ed   : > { %11409 = vmatpush.bf16.msrb.mxu0 %v13280_v54  ;;  %11422 = vmatpush.bf16.msrb.mxu1 %v13408_v16  ;;  %v11171_v54 = vadd.f32 %v11170_v31, %v11158_v7  ;;  %v13357_v16 = vld [vmem:[%s20282_s11 + $0x878] sm:$0xf0]  ;;  %v18561_v13 = vld [vmem:[%s20282_s11 + $0x84c] sm:$0xf]  ;;  %v13616_v20 = vor.u32 %v18629_v39, %v13613_v33  ;;  %v11196_v35 = vpop.f32.mrf.mxu3  ;;  %v11172_v62 = vpop.f32.mrf.mxu1 }
 0x4ee   : > { %11435 = vmatpush.bf16.msrb.mxu2 %v13536_v49  ;;  %v18597_v49 = vld [vmem:[%s20282_s11 + $0x96c] sm:$0xf]  ;;  %v13213_v34 = vld [vmem:[%s20282_s11 + $0x758] sm:$0xf0] }
 0x4ef   : > { %11448 = vmatpush.bf16.msrb.mxu3 %v13664_v29  ;;  %v13360_v29 = vor.u32 %v18565_v44, %v13357_v16  ;;  %v13488_v55 = vor.u32 %v18597_v49, %v13485_v47  ;;  %v13469_v25 = vld [vmem:[%s20282_s11 + $0x958] sm:$0xf0]  ;;  %v13216_v15 = vor.u32 %v18529_v40, %v13213_v34  ;;  %v18589_v14 = vld [vmem:[%s20282_s11 + $0x92c] sm:$0xf] }
 0x4f0   : > { %v13597_v22 = vld [vmem:[%s20282_s11 + $0xa58] sm:$0xf0]  ;;  %v18521_v49 = vld [vmem:[%s20282_s11 + $0x70c] sm:$0xf] }
 0x4f1   : > { %11410 = vmatpush.bf16.msrb.mxu0 %v13264_v53  ;;  %11423 = vmatpush.bf16.msrb.mxu1 %v13392_v10  ;;  %v11183_v53 = vpop.f32.mrf.mxu2  ;;  %v13341_v10 = vld [vmem:[%s20282_s11 + $0x858] sm:$0xf0]  ;;  %v11159_v1 = vpop.f32.mrf.mxu0 }
 0x4f2   : > { %11436 = vmatpush.bf16.msrb.mxu2 %v13520_v21  ;;  %v18593_v21 = vld [vmem:[%s20282_s11 + $0x94c] sm:$0xf]  ;;  %v11184_v24 = vadd.f32 %v11183_v53, %v11171_v54  ;;  %v13344_v50 = vor.u32 %v18561_v13, %v13341_v10  ;;  %v13197_v31 = vld [vmem:[%s20282_s11 + $0x738] sm:$0xf0] }
 0x4f3   : > { %11449 = vmatpush.bf16.msrb.mxu3 %v13648_v6  ;;  %v18625_v6 = vld [vmem:[%s20282_s11 + $0xa4c] sm:$0xf]  ;;  %v13472_v7 = vor.u32 %v18593_v21, %v13469_v25  ;;  %v13325_v28 = vld [vmem:[%s20282_s11 + $0x838] sm:$0xf0] }
 0x4f4   : > { %v23028_v63 = vadd.f32 %v11196_v35, %v11184_v24  ;;  %v13453_v44 = vld [vmem:[%s20282_s11 + $0x938] sm:$0xf0]  ;;  %v18617_v13 = vld [vmem:[%s20282_s11 + $0xa0c] sm:$0xf] }
 0x4f5   : > { %11411 = vmatpush.bf16.msrb.mxu0 %v13248_v57  ;;  %11424 = vmatpush.bf16.msrb.mxu1 %v13376_v58  ;;  %v18525_v57 = vld [vmem:[%s20282_s11 + $0x72c] sm:$0xf]  ;;  %v13581_v54 = vld [vmem:[%s20282_s11 + $0xa38] sm:$0xf0]  ;;  %v13456_v33 = vor.u32 %v18589_v14, %v13453_v44  ;;  %v11198_v24 = vpop.f32.mrf.mxu3 }
 0x4f6   : > { %11437 = vmatpush.bf16.msrb.mxu2 %v13504_v26  ;;  %v18557_v58 = vld [vmem:[%s20282_s11 + $0x82c] sm:$0xf]  ;;  %v13600_v26 = vor.u32 %v18625_v6, %v13597_v22  ;;  %v13200_v16 = vor.u32 %v18525_v57, %v13197_v31  ;;  %v13181_v47 = vld [vmem:[%s20282_s11 + $0x718] sm:$0xf0] }
 0x4f7   : > { %11450 = vmatpush.bf16.msrb.mxu3 %v13632_v61  ;;  %v18621_v61 = vld [vmem:[%s20282_s11 + $0xa2c] sm:$0xf]  ;;  %v13328_v39 = vor.u32 %v18557_v58, %v13325_v28  ;;  %v13437_v34 = vld [vmem:[%s20282_s11 + $0x918] sm:$0xf0]  ;;  %v13184_v35 = vor.u32 %v18521_v49, %v13181_v47 }
 0x4f8   : > { %v13584_v40 = vor.u32 %v18621_v61, %v13581_v54  ;;  %v18677_v10 = vld [vmem:[%s20282_s11 + $0xbec] sm:$0xf]  ;;  %v13805_v21 = vld [vmem:[%s20282_s11 + $0xbf8] sm:$0xf0] }
 0x4f9   : > { %11412 = vmatpush.bf16.msrb.mxu0 %v13232_v27  ;;  %11425 = vmatpush.bf16.msrb.mxu1 %v13360_v29  ;;  %v18553_v27 = vld [vmem:[%s20282_s11 + $0x80c] sm:$0xf]  ;;  %v13309_v29 = vld [vmem:[%s20282_s11 + $0x818] sm:$0xf0]  ;;  %v11185_v53 = vpop.f32.mrf.mxu2  ;;  %v13808_v31 = vor.u32 %v18677_v10, %v13805_v21 }
 0x4fa   : > { %11438 = vmatpush.bf16.msrb.mxu2 %v13488_v55  ;;  %v18585_v55 = vld [vmem:[%s20282_s11 + $0x90c] sm:$0xf]  ;;  %v13933_v6 = vld [vmem:[%s20282_s11 + $0xcf8] sm:$0xf0] }
 0x4fb   : > { %11451 = vmatpush.bf16.msrb.mxu3 %v13616_v20  ;;  %v13565_v20 = vld [vmem:[%s20282_s11 + $0xa18] sm:$0xf0]  ;;  %v18709_v25 = vld [vmem:[%s20282_s11 + $0xcec] sm:$0xf]  ;;  %v13440_v62 = vor.u32 %v18585_v55, %v13437_v34 }
 0x4fc   : > { %v18741_v22 = vld [vmem:[%s20282_s11 + $0xdec] sm:$0xf]  ;;  %v14061_v1 = vld [vmem:[%s20282_s11 + $0xdf8] sm:$0xf0]  ;;  %v13568_v57 = vor.u32 %v18617_v13, %v13565_v20  ;;  %v13936_v58 = vor.u32 %v18709_v25, %v13933_v6 }
 0x4fd   : > { %11413 = vmatpush.bf16.msrb.mxu0 %v13216_v15  ;;  %11426 = vmatpush.bf16.msrb.mxu1 %v13344_v50  ;;  %v13312_v15 = vor.u32 %v18553_v27, %v13309_v29  ;;  %v18773_v50 = vld [vmem:[%s20282_s11 + $0xeec] sm:$0xf]  ;;  %v13789_v14 = vld [vmem:[%s20282_s11 + $0xbd8] sm:$0xf0] }
 0x4fe   : > { %11439 = vmatpush.bf16.msrb.mxu2 %v13472_v7  ;;  %v14189_v7 = vld [vmem:[%s20282_s11 + $0xef8] sm:$0xf0]  ;;  %v18673_v28 = vld [vmem:[%s20282_s11 + $0xbcc] sm:$0xf] }
 0x4ff   : > { %11452 = vmatpush.bf16.msrb.mxu3 %v13600_v26  ;;  %v14064_v26 = vor.u32 %v18741_v22, %v14061_v1  ;;  %v18705_v44 = vld [vmem:[%s20282_s11 + $0xccc] sm:$0xf]  ;;  %v14192_v61 = vor.u32 %v18773_v50, %v14189_v7  ;;  %v13917_v54 = vld [vmem:[%s20282_s11 + $0xcd8] sm:$0xf0] }
 0x500   : > { %v14045_v49 = vld [vmem:[%s20282_s11 + $0xdd8] sm:$0xf0]  ;;  %v18769_v47 = vld [vmem:[%s20282_s11 + $0xecc] sm:$0xf]  ;;  %v13920_v27 = vor.u32 %v18705_v44, %v13917_v54 }
 0x501   : > { %11414 = vmatpush.bf16.msrb.mxu0 %v13200_v16  ;;  %11427 = vmatpush.bf16.msrb.mxu1 %v13328_v39  ;;  %v18737_v16 = vld [vmem:[%s20282_s11 + $0xdcc] sm:$0xf]  ;;  %v14173_v39 = vld [vmem:[%s20282_s11 + $0xed8] sm:$0xf0] }
 0x502   : > { %11440 = vmatpush.bf16.msrb.mxu2 %v13456_v33  ;;  %v13792_v33 = vor.u32 %v18673_v28, %v13789_v14  ;;  %v14048_v29 = vor.u32 %v18737_v16, %v14045_v49  ;;  %v18669_v55 = vld [vmem:[%s20282_s11 + $0xbac] sm:$0xf]  ;;  %v14176_v13 = vor.u32 %v18769_v47, %v14173_v39  ;;  %v13901_v20 = vld [vmem:[%s20282_s11 + $0xcb8] sm:$0xf0] }
 0x503   : > { %11453 = vmatpush.bf16.msrb.mxu3 %v13584_v40  ;;  %v13773_v40 = vld [vmem:[%s20282_s11 + $0xbb8] sm:$0xf0]  ;;  %v18701_v34 = vld [vmem:[%s20282_s11 + $0xcac] sm:$0xf] }
 0x504   : > { %v18733_v53 = vld [vmem:[%s20282_s11 + $0xdac] sm:$0xf]  ;;  %v14029_v10 = vld [vmem:[%s20282_s11 + $0xdb8] sm:$0xf0]  ;;  %v13904_v24 = vor.u32 %v18701_v34, %v13901_v20 }
 0x505   : > { %11415 = vmatpush.bf16.msrb.mxu0 %v13184_v35  ;;  %11428 = vmatpush.bf16.msrb.mxu1 %v13312_v15  ;;  %v18765_v21 = vld [vmem:[%s20282_s11 + $0xeac] sm:$0xf]  ;;  %v14157_v25 = vld [vmem:[%s20282_s11 + $0xeb8] sm:$0xf0]  ;;  %v14032_v35 = vor.u32 %v18733_v53, %v14029_v10 }
 0x506   : > { %11441 = vmatpush.bf16.msrb.mxu2 %v13440_v62  ;;  %v18665_v6 = vld [vmem:[%s20282_s11 + $0xb8c] sm:$0xf]  ;;  %v13757_v22 = vld [vmem:[%s20282_s11 + $0xb98] sm:$0xf0] }
 0x507   : > { %11454 = vmatpush.bf16.msrb.mxu3 %v13568_v57  ;;  %v13885_v1 = vld [vmem:[%s20282_s11 + $0xc98] sm:$0xf0]  ;;  %v18729_v15 = vld [vmem:[%s20282_s11 + $0xd8c] sm:$0xf] }
 0x508   : > { %11416 = vmatmul.bf16.vlgmr.msrb.gmra.mxu0 %v20449_v8  ;;  %11429 = vmatmul.bf16.vlgmr.msrb.gmra.mxu1 %v20526_v2  ;;  %v13776_v8 = vor.u32 %v18669_v55, %v13773_v40  ;;  %v14160_v2 = vor.u32 %v18765_v21, %v14157_v25  ;;  %v14013_v62 = vld [vmem:[%s20282_s11 + $0xd98] sm:$0xf0]  ;;  %v18761_v50 = vld [vmem:[%s20282_s11 + $0xe8c] sm:$0xf] }
 0x509   : > { %11460 = vmatpush.bf16.msra.mxu0 %v13808_v31  ;;  %11473 = vmatpush.bf16.msra.mxu1 %v13936_v58  ;;  %v14141_v7 = vld [vmem:[%s20282_s11 + $0xe98] sm:$0xf0]  ;;  %v13760_v31 = vor.u32 %v18665_v6, %v13757_v22  ;;  %v11222_v58 = vpop.f32.mrf.mxu1  ;;  %v14016_v28 = vor.u32 %v18729_v15, %v14013_v62  ;;  %v18661_v14 = vld [vmem:[%s20282_s11 + $0xb6c] sm:$0xf] }
 0x50a   : > { %11486 = vmatpush.bf16.msra.mxu2 %v14064_v26  ;;  %11455 = vmatmul.bf16.vlgmr.msrb.gmra.mxu3 %v20531_v11  ;;  %v11209_v11 = vpop.f32.mrf.mxu0  ;;  %v13741_v44 = vld [vmem:[%s20282_s11 + $0xb78] sm:$0xf0]  ;;  %v14144_v54 = vor.u32 %v18761_v50, %v14141_v7  ;;  %v18725_v47 = vld [vmem:[%s20282_s11 + $0xd6c] sm:$0xf] }
 0x50b   : > { %11499 = vmatpush.bf16.msra.mxu3 %v14192_v61  ;;  %11442 = vmatmul.bf16.vlgmr.msrb.gmra.mxu2 %v20533_v12  ;;  %v18697_v12 = vld [vmem:[%s20282_s11 + $0xc8c] sm:$0xf]  ;;  %v11210_v57 = vadd.f32 %v11209_v11, %v23028_v63  ;;  %v13869_v49 = vld [vmem:[%s20282_s11 + $0xc78] sm:$0xf0] }
 0x50c   : > { %v13888_v26 = vor.u32 %v18697_v12, %v13885_v1  ;;  %v18693_v61 = vld [vmem:[%s20282_s11 + $0xc6c] sm:$0xf]  ;;  %v13997_v63 = vld [vmem:[%s20282_s11 + $0xd78] sm:$0xf0] }
 0x50d   : > { %11461 = vmatpush.bf16.msra.mxu0 %v13792_v33  ;;  %11474 = vmatpush.bf16.msra.mxu1 %v13920_v27  ;;  %v11223_v16 = vadd.f32 %v11222_v58, %v11210_v57  ;;  %v18757_v39 = vld [vmem:[%s20282_s11 + $0xe6c] sm:$0xf]  ;;  %v14125_v33 = vld [vmem:[%s20282_s11 + $0xe78] sm:$0xf0]  ;;  %v13744_v27 = vor.u32 %v18661_v14, %v13741_v44  ;;  %v14000_v55 = vor.u32 %v18725_v47, %v13997_v63 }
 0x50e   : > { %11487 = vmatpush.bf16.msra.mxu2 %v14048_v29  ;;  %v13872_v29 = vor.u32 %v18693_v61, %v13869_v49  ;;  %v18657_v40 = vld [vmem:[%s20282_s11 + $0xb4c] sm:$0xf]  ;;  %v13725_v34 = vld [vmem:[%s20282_s11 + $0xb58] sm:$0xf0]  ;;  %v14128_v20 = vor.u32 %v18757_v39, %v14125_v33  ;;  %v11235_v53 = vpop.f32.mrf.mxu2 }
 0x50f   : > { %11500 = vmatpush.bf16.msra.mxu3 %v14176_v13  ;;  %v18689_v13 = vld [vmem:[%s20282_s11 + $0xc4c] sm:$0xf]  ;;  %v13853_v10 = vld [vmem:[%s20282_s11 + $0xc58] sm:$0xf0]  ;;  %v13728_v12 = vor.u32 %v18657_v40, %v13725_v34 }
 0x510   : > { %v18721_v21 = vld [vmem:[%s20282_s11 + $0xd4c] sm:$0xf]  ;;  %v13981_v25 = vld [vmem:[%s20282_s11 + $0xd58] sm:$0xf0]  ;;  %v13856_v15 = vor.u32 %v18689_v13, %v13853_v10 }
 0x511   : > { %11462 = vmatpush.bf16.msra.mxu0 %v13776_v8  ;;  %11475 = vmatpush.bf16.msra.mxu1 %v13904_v24  ;;  %v11236_v8 = vadd.f32 %v11235_v53, %v11223_v16  ;;  %v11248_v24 = vpop.f32.mrf.mxu3  ;;  %v14109_v6 = vld [vmem:[%s20282_s11 + $0xe58] sm:$0xf0]  ;;  %v13984_v62 = vor.u32 %v18721_v21, %v13981_v25  ;;  %v18653_v11 = vld [vmem:[%s20282_s11 + $0xb2c] sm:$0xf] }
 0x512   : > { %11488 = vmatpush.bf16.msra.mxu2 %v14032_v35  ;;  %v18753_v35 = vld [vmem:[%s20282_s11 + $0xe4c] sm:$0xf]  ;;  %v11211_v22 = vpop.f32.mrf.mxu0  ;;  %v13709_v50 = vld [vmem:[%s20282_s11 + $0xb38] sm:$0xf0] }
 0x513   : > { %11501 = vmatpush.bf16.msra.mxu3 %v14160_v2  ;;  %v11224_v2 = vpop.f32.mrf.mxu1  ;;  %v23099_v1 = vadd.f32 %v11248_v24, %v11236_v8  ;;  %v18685_v7 = vld [vmem:[%s20282_s11 + $0xc2c] sm:$0xf]  ;;  %v14112_v57 = vor.u32 %v18753_v35, %v14109_v6  ;;  %v14093_v14 = vld [vmem:[%s20282_s11 + $0xe38] sm:$0xf0]  ;;  %v13712_v44 = vor.u32 %v18653_v11, %v13709_v50 }
 0x514   : > { %v18717_v58 = vld [vmem:[%s20282_s11 + $0xd2c] sm:$0xf]  ;;  %v13821_v63 = vld [vmem:[%s20282_s11 + $0xc18] sm:$0xf0] }
 0x515   : > { %11463 = vmatpush.bf16.msra.mxu0 %v13760_v31  ;;  %11476 = vmatpush.bf16.msra.mxu1 %v13888_v26  ;;  %v13837_v31 = vld [vmem:[%s20282_s11 + $0xc38] sm:$0xf0]  ;;  %v18649_v61 = vld [vmem:[%s20282_s11 + $0xb0c] sm:$0xf] }
 0x516   : > { %11489 = vmatpush.bf16.msra.mxu2 %v14016_v28  ;;  %v13965_v26 = vld [vmem:[%s20282_s11 + $0xd38] sm:$0xf0]  ;;  %v18749_v28 = vld [vmem:[%s20282_s11 + $0xe2c] sm:$0xf]  ;;  %v13840_v16 = vor.u32 %v18685_v7, %v13837_v31  ;;  %v11237_v40 = vpop.f32.mrf.mxu2 }
 0x517   : > { %11502 = vmatpush.bf16.msra.mxu3 %v14144_v54  ;;  %v13693_v54 = vld [vmem:[%s20282_s11 + $0xb18] sm:$0xf0]  ;;  %v13968_v49 = vor.u32 %v18717_v58, %v13965_v26  ;;  %v18681_v47 = vld [vmem:[%s20282_s11 + $0xc0c] sm:$0xf]  ;;  %v14096_v33 = vor.u32 %v18749_v28, %v14093_v14 }
 0x518   : > { %v18713_v39 = vld [vmem:[%s20282_s11 + $0xd0c] sm:$0xf]  ;;  %v14317_v13 = vld [vmem:[%s20282_s11 + $0xff8] sm:$0xf0]  ;;  %v13696_v10 = vor.u32 %v18649_v61, %v13693_v54  ;;  %v13824_v24 = vor.u32 %v18681_v47, %v13821_v63 }
 0x519   : > { %11464 = vmatpush.bf16.msra.mxu0 %v13744_v27  ;;  %11477 = vmatpush.bf16.msra.mxu1 %v13872_v29  ;;  %v13949_v27 = vld [vmem:[%s20282_s11 + $0xd18] sm:$0xf0]  ;;  %v18745_v29 = vld [vmem:[%s20282_s11 + $0xe0c] sm:$0xf]  ;;  %v11250_v53 = vpop.f32.mrf.mxu3 }
 0x51a   : > { %11490 = vmatpush.bf16.msra.mxu2 %v14000_v55  ;;  %v14077_v55 = vld [vmem:[%s20282_s11 + $0xe18] sm:$0xf0]  ;;  %v18805_v34 = vld [vmem:[%s20282_s11 + $0xfec] sm:$0xf]  ;;  %v13952_v35 = vor.u32 %v18713_v39, %v13949_v27 }
 0x51b   : > { %11503 = vmatpush.bf16.msra.mxu3 %v14128_v20  ;;  %v18837_v20 = vld [vmem:[%s20282_s11 + $0x10ec] sm:$0xf]  ;;  %v14445_v21 = vld [vmem:[%s20282_s11 + $0x10f8] sm:$0xf0]  ;;  %v14320_v2 = vor.u32 %v18805_v34, %v14317_v13 }
 0x51c   : > { %v18869_v25 = vld [vmem:[%s20282_s11 + $0x11ec] sm:$0xf]  ;;  %v14573_v8 = vld [vmem:[%s20282_s11 + $0x11f8] sm:$0xf0] }
 0x51d   : > { %11465 = vmatpush.bf16.msra.mxu0 %v13728_v12  ;;  %11478 = vmatpush.bf16.msra.mxu1 %v13856_v15  ;;  %v18901_v6 = vld [vmem:[%s20282_s11 + $0x12ec] sm:$0xf]  ;;  %v14701_v22 = vld [vmem:[%s20282_s11 + $0x12f8] sm:$0xf0]  ;;  %v14080_v12 = vor.u32 %v18745_v29, %v14077_v55  ;;  %v14448_v15 = vor.u32 %v18837_v20, %v14445_v21 }
 0x51e   : > { %11491 = vmatpush.bf16.msra.mxu2 %v13984_v62  ;;  %v14576_v62 = vor.u32 %v18869_v25, %v14573_v8  ;;  %v18801_v11 = vld [vmem:[%s20282_s11 + $0xfcc] sm:$0xf]  ;;  %v14301_v50 = vld [vmem:[%s20282_s11 + $0xfd8] sm:$0xf0] }
 0x51f   : > { %11504 = vmatpush.bf16.msra.mxu3 %v14112_v57  ;;  %v18833_v7 = vld [vmem:[%s20282_s11 + $0x10cc] sm:$0xf]  ;;  %v14704_v57 = vor.u32 %v18901_v6, %v14701_v22  ;;  %v14429_v31 = vld [vmem:[%s20282_s11 + $0x10d8] sm:$0xf0] }
 0x520   : > { %v18865_v58 = vld [vmem:[%s20282_s11 + $0x11cc] sm:$0xf]  ;;  %v14557_v26 = vld [vmem:[%s20282_s11 + $0x11d8] sm:$0xf0]  ;;  %v14432_v61 = vor.u32 %v18833_v7, %v14429_v31 }
 0x521   : > { %11466 = vmatpush.bf16.msra.mxu0 %v13712_v44  ;;  %11479 = vmatpush.bf16.msra.mxu1 %v13840_v16  ;;  %v18897_v28 = vld [vmem:[%s20282_s11 + $0x12cc] sm:$0xf]  ;;  %v14685_v14 = vld [vmem:[%s20282_s11 + $0x12d8] sm:$0xf0]  ;;  %v14304_v44 = vor.u32 %v18801_v11, %v14301_v50  ;;  %v14560_v54 = vor.u32 %v18865_v58, %v14557_v26 }
 0x522   : > { %11492 = vmatpush.bf16.msra.mxu2 %v13968_v49  ;;  %v18797_v16 = vld [vmem:[%s20282_s11 + $0xfac] sm:$0xf]  ;;  %v14285_v49 = vld [vmem:[%s20282_s11 + $0xfb8] sm:$0xf0]  ;;  %v14688_v63 = vor.u32 %v18897_v28, %v14685_v14 }
 0x523   : > { %11505 = vmatpush.bf16.msra.mxu3 %v14096_v33  ;;  %v18829_v47 = vld [vmem:[%s20282_s11 + $0x10ac] sm:$0xf]  ;;  %v14413_v39 = vld [vmem:[%s20282_s11 + $0x10b8] sm:$0xf0] }
 0x524   : > { %v18861_v33 = vld [vmem:[%s20282_s11 + $0x11ac] sm:$0xf]  ;;  %v14541_v27 = vld [vmem:[%s20282_s11 + $0x11b8] sm:$0xf0]  ;;  %v14416_v40 = vor.u32 %v18829_v47, %v14413_v39 }
 0x525   : > { %11467 = vmatpush.bf16.msra.mxu0 %v13696_v10  ;;  %11480 = vmatpush.bf16.msra.mxu1 %v13824_v24  ;;  %v18893_v29 = vld [vmem:[%s20282_s11 + $0x12ac] sm:$0xf]  ;;  %v14669_v55 = vld [vmem:[%s20282_s11 + $0x12b8] sm:$0xf0]  ;;  %v14544_v34 = vor.u32 %v18861_v33, %v14541_v27  ;;  %v11274_v6 = vpop.f32.mrf.mxu1 }
 0x526   : > { %11493 = vmatpush.bf16.msra.mxu2 %v13952_v35  ;;  %v18793_v13 = vld [vmem:[%s20282_s11 + $0xf8c] sm:$0xf]  ;;  %v14269_v20 = vld [vmem:[%s20282_s11 + $0xf98] sm:$0xf0] }
 0x527   : > { %11506 = vmatpush.bf16.msra.mxu3 %v14080_v12  ;;  %v14397_v53 = vld [vmem:[%s20282_s11 + $0x1098] sm:$0xf0]  ;;  %v18857_v10 = vld [vmem:[%s20282_s11 + $0x118c] sm:$0xf]  ;;  %v14272_v35 = vor.u32 %v18793_v13, %v14269_v20 }
 0x528   : > { %11468 = vmatmul.bf16.vlgmr.msra.gmra.mxu0 %v20539_v17  ;;  %11481 = vmatmul.bf16.vlgmr.msra.gmra.mxu1 %v20552_v32  ;;  %v14288_v17 = vor.u32 %v18797_v16, %v14285_v49  ;;  %v14672_v32 = vor.u32 %v18893_v29, %v14669_v55  ;;  %v14525_v21 = vld [vmem:[%s20282_s11 + $0x1198] sm:$0xf0]  ;;  %v18889_v25 = vld [vmem:[%s20282_s11 + $0x128c] sm:$0xf] }
 0x529   : > { %11512 = vmatpush.bf16.msrb.mxu0 %v14320_v2  ;;  %11525 = vmatpush.bf16.msrb.mxu1 %v14448_v15  ;;  %v14653_v8 = vld [vmem:[%s20282_s11 + $0x1298] sm:$0xf0]  ;;  %v14528_v12 = vor.u32 %v18857_v10, %v14525_v21  ;;  %v18789_v2 = vld [vmem:[%s20282_s11 + $0xf6c] sm:$0xf] }
 0x52a   : > { %11538 = vmatpush.bf16.msrb.mxu2 %v14576_v62  ;;  %11507 = vmatmul.bf16.vlgmr.msra.gmra.mxu3 %v20556_v36  ;;  %v11261_v36 = vpop.f32.mrf.mxu0  ;;  %v14253_v15 = vld [vmem:[%s20282_s11 + $0xf78] sm:$0xf0]  ;;  %v18821_v62 = vld [vmem:[%s20282_s11 + $0x106c] sm:$0xf]  ;;  %v14656_v11 = vor.u32 %v18889_v25, %v14653_v8 }
 0x52b   : > { %11551 = vmatpush.bf16.msrb.mxu3 %v14704_v57  ;;  %11494 = vmatmul.bf16.vlgmr.msra.gmra.mxu2 %v20558_v37  ;;  %v18825_v37 = vld [vmem:[%s20282_s11 + $0x108c] sm:$0xf]  ;;  %v11262_v24 = vadd.f32 %v11261_v36, %v23099_v1  ;;  %v14381_v7 = vld [vmem:[%s20282_s11 + $0x1078] sm:$0xf0]  ;;  %v14256_v26 = vor.u32 %v18789_v2, %v14253_v15 }
 0x52c   : > { %v14400_v22 = vor.u32 %v18825_v37, %v14397_v53  ;;  %v18853_v57 = vld [vmem:[%s20282_s11 + $0x116c] sm:$0xf]  ;;  %v14509_v1 = vld [vmem:[%s20282_s11 + $0x1178] sm:$0xf0]  ;;  %v14384_v28 = vor.u32 %v18821_v62, %v14381_v7 }
 0x52d   : > { %11513 = vmatpush.bf16.msrb.mxu0 %v14304_v44  ;;  %11526 = vmatpush.bf16.msrb.mxu1 %v14432_v61  ;;  %v11275_v50 = vadd.f32 %v11274_v6, %v11262_v24  ;;  %v18885_v31 = vld [vmem:[%s20282_s11 + $0x126c] sm:$0xf]  ;;  %v14637_v58 = vld [vmem:[%s20282_s11 + $0x1278] sm:$0xf0]  ;;  %v14512_v14 = vor.u32 %v18853_v57, %v14509_v1  ;;  %v11300_v27 = vpop.f32.mrf.mxu3 }
 0x52e   : > { %11539 = vmatpush.bf16.msrb.mxu2 %v14560_v54  ;;  %v18785_v44 = vld [vmem:[%s20282_s11 + $0xf4c] sm:$0xf]  ;;  %v14237_v61 = vld [vmem:[%s20282_s11 + $0xf58] sm:$0xf0]  ;;  %v14640_v16 = vor.u32 %v18885_v31, %v14637_v58  ;;  %v11287_v49 = vpop.f32.mrf.mxu2 }
 0x52f   : > { %11552 = vmatpush.bf16.msrb.mxu3 %v14688_v63  ;;  %v18817_v54 = vld [vmem:[%s20282_s11 + $0x104c] sm:$0xf]  ;;  %v14365_v47 = vld [vmem:[%s20282_s11 + $0x1058] sm:$0xf0]  ;;  %v11288_v33 = vadd.f32 %v11287_v49, %v11275_v50 }
 0x530   : > { %v18849_v63 = vld [vmem:[%s20282_s11 + $0x114c] sm:$0xf]  ;;  %v14493_v39 = vld [vmem:[%s20282_s11 + $0x1158] sm:$0xf0]  ;;  %v14368_v20 = vor.u32 %v18817_v54, %v14365_v47 }
 0x531   : > { %11514 = vmatpush.bf16.msrb.mxu0 %v14288_v17  ;;  %11527 = vmatpush.bf16.msrb.mxu1 %v14416_v40  ;;  %v18881_v29 = vld [vmem:[%s20282_s11 + $0x124c] sm:$0xf]  ;;  %v14621_v55 = vld [vmem:[%s20282_s11 + $0x1258] sm:$0xf0]  ;;  %v14240_v40 = vor.u32 %v18785_v44, %v14237_v61  ;;  %v23170_v13 = vadd.f32 %v11300_v27, %v11288_v33  ;;  %v14496_v37 = vor.u32 %v18849_v63, %v14493_v39 }
 0x532   : > { %11540 = vmatpush.bf16.msrb.mxu2 %v14544_v34  ;;  %v11263_v17 = vpop.f32.mrf.mxu0  ;;  %v11276_v34 = vpop.f32.mrf.mxu1  ;;  %v14221_v53 = vld [vmem:[%s20282_s11 + $0xf38] sm:$0xf0]  ;;  %v18813_v10 = vld [vmem:[%s20282_s11 + $0x102c] sm:$0xf]  ;;  %v14624_v21 = vor.u32 %v18881_v29, %v14621_v55 }
 0x533   : > { %11553 = vmatpush.bf16.msrb.mxu3 %v14672_v32  ;;  %v18781_v32 = vld [vmem:[%s20282_s11 + $0xf2c] sm:$0xf]  ;;  %v14349_v36 = vld [vmem:[%s20282_s11 + $0x1038] sm:$0xf0] }
 0x534   : > { %v18845_v25 = vld [vmem:[%s20282_s11 + $0x112c] sm:$0xf]  ;;  %v14477_v8 = vld [vmem:[%s20282_s11 + $0x1138] sm:$0xf0]  ;;  %v14224_v6 = vor.u32 %v18781_v32, %v14221_v53  ;;  %v14352_v2 = vor.u32 %v18813_v10, %v14349_v36 }
 0x535   : > { %11515 = vmatpush.bf16.msrb.mxu0 %v14272_v35  ;;  %11528 = vmatpush.bf16.msrb.mxu1 %v14400_v22  ;;  %v18877_v24 = vld [vmem:[%s20282_s11 + $0x122c] sm:$0xf]  ;;  %v14605_v35 = vld [vmem:[%s20282_s11 + $0x1238] sm:$0xf0]  ;;  %v14480_v15 = vor.u32 %v18845_v25, %v14477_v8  ;;  %v11302_v44 = vpop.f32.mrf.mxu3 }
 0x536   : > { %11541 = vmatpush.bf16.msrb.mxu2 %v14528_v12  ;;  %v18777_v22 = vld [vmem:[%s20282_s11 + $0xf0c] sm:$0xf]  ;;  %v14205_v12 = vld [vmem:[%s20282_s11 + $0xf18] sm:$0xf0]  ;;  %v14608_v7 = vor.u32 %v18877_v24, %v14605_v35  ;;  %v11289_v58 = vpop.f32.mrf.mxu2 }
 0x537   : > { %11554 = vmatpush.bf16.msrb.mxu3 %v14656_v11  ;;  %v18809_v62 = vld [vmem:[%s20282_s11 + $0x100c] sm:$0xf]  ;;  %v14333_v11 = vld [vmem:[%s20282_s11 + $0x1018] sm:$0xf0]  ;;  %v14208_v61 = vor.u32 %v18777_v22, %v14205_v12 }
 0x538   : > { %v18841_v50 = vld [vmem:[%s20282_s11 + $0x110c] sm:$0xf]  ;;  %v14461_v57 = vld [vmem:[%s20282_s11 + $0x1118] sm:$0xf0]  ;;  %v14336_v47 = vor.u32 %v18809_v62, %v14333_v11 }
 0x539   : > { %11516 = vmatpush.bf16.msrb.mxu0 %v14256_v26  ;;  %11529 = vmatpush.bf16.msrb.mxu1 %v14384_v28  ;;  %v18873_v1 = vld [vmem:[%s20282_s11 + $0x120c] sm:$0xf]  ;;  %v14589_v31 = vld [vmem:[%s20282_s11 + $0x1218] sm:$0xf0]  ;;  %v14464_v63 = vor.u32 %v18841_v50, %v14461_v57 }
 0x53a   : > { %11542 = vmatpush.bf16.msrb.mxu2 %v14512_v14  ;;  %v18933_v26 = vld [vmem:[%s20282_s11 + $0x13ec] sm:$0xf]  ;;  %v14829_v28 = vld [vmem:[%s20282_s11 + $0x13f8] sm:$0xf0]  ;;  %v14592_v27 = vor.u32 %v18873_v1, %v14589_v31 }
 0x53b   : > { %11555 = vmatpush.bf16.msrb.mxu3 %v14640_v16  ;;  %v18965_v14 = vld [vmem:[%s20282_s11 + $0x14ec] sm:$0xf]  ;;  %v14957_v54 = vld [vmem:[%s20282_s11 + $0x14f8] sm:$0xf0]  ;;  %v14832_v29 = vor.u32 %v18933_v26, %v14829_v28 }
 0x53c   : > { %v18997_v16 = vld [vmem:[%s20282_s11 + $0x15ec] sm:$0xf]  ;;  %v15085_v49 = vld [vmem:[%s20282_s11 + $0x15f8] sm:$0xf0]  ;;  %v14960_v55 = vor.u32 %v18965_v14, %v14957_v54 }
 0x53d   : > { %11517 = vmatpush.bf16.msrb.mxu0 %v14240_v40  ;;  %11530 = vmatpush.bf16.msrb.mxu1 %v14368_v20  ;;  %v19029_v39 = vld [vmem:[%s20282_s11 + $0x16ec] sm:$0xf]  ;;  %v15213_v33 = vld [vmem:[%s20282_s11 + $0x16f8] sm:$0xf0]  ;;  %v15088_v17 = vor.u32 %v18997_v16, %v15085_v49 }
 0x53e   : > { %11543 = vmatpush.bf16.msrb.mxu2 %v14496_v37  ;;  %v18929_v40 = vld [vmem:[%s20282_s11 + $0x13cc] sm:$0xf]  ;;  %v14813_v34 = vld [vmem:[%s20282_s11 + $0x13d8] sm:$0xf0]  ;;  %v15216_v37 = vor.u32 %v19029_v39, %v15213_v33 }
 0x53f   : > { %11556 = vmatpush.bf16.msrb.mxu3 %v14624_v21  ;;  %v18961_v20 = vld [vmem:[%s20282_s11 + $0x14cc] sm:$0xf]  ;;  %v14941_v32 = vld [vmem:[%s20282_s11 + $0x14d8] sm:$0xf0]  ;;  %v14816_v25 = vor.u32 %v18929_v40, %v14813_v34 }
 0x540   : > { %v18993_v53 = vld [vmem:[%s20282_s11 + $0x15cc] sm:$0xf]  ;;  %v15069_v10 = vld [vmem:[%s20282_s11 + $0x15d8] sm:$0xf0]  ;;  %v14944_v8 = vor.u32 %v18961_v20, %v14941_v32 }
 0x541   : > { %11518 = vmatpush.bf16.msrb.mxu0 %v14224_v6  ;;  %11531 = vmatpush.bf16.msrb.mxu1 %v14352_v2  ;;  %v19025_v21 = vld [vmem:[%s20282_s11 + $0x16cc] sm:$0xf]  ;;  %v15197_v36 = vld [vmem:[%s20282_s11 + $0x16d8] sm:$0xf0]  ;;  %v15072_v24 = vor.u32 %v18993_v53, %v15069_v10 }
 0x542   : > { %11544 = vmatpush.bf16.msrb.mxu2 %v14480_v15  ;;  %v18925_v35 = vld [vmem:[%s20282_s11 + $0x13ac] sm:$0xf]  ;;  %v14797_v6 = vld [vmem:[%s20282_s11 + $0x13b8] sm:$0xf0]  ;;  %v15200_v12 = vor.u32 %v19025_v21, %v15197_v36 }
 0x543   : > { %11557 = vmatpush.bf16.msrb.mxu3 %v14608_v7  ;;  %v18957_v22 = vld [vmem:[%s20282_s11 + $0x14ac] sm:$0xf]  ;;  %v14925_v2 = vld [vmem:[%s20282_s11 + $0x14b8] sm:$0xf0] }
 0x544   : > { %v18989_v15 = vld [vmem:[%s20282_s11 + $0x15ac] sm:$0xf]  ;;  %v15053_v62 = vld [vmem:[%s20282_s11 + $0x15b8] sm:$0xf0]  ;;  %v14928_v7 = vor.u32 %v18957_v22, %v14925_v2 }
 0x545   : > { %11519 = vmatpush.bf16.msrb.mxu0 %v14208_v61  ;;  %11532 = vmatpush.bf16.msrb.mxu1 %v14336_v47  ;;  %v19021_v11 = vld [vmem:[%s20282_s11 + $0x16ac] sm:$0xf]  ;;  %v15181_v50 = vld [vmem:[%s20282_s11 + $0x16b8] sm:$0xf0]  ;;  %v15056_v57 = vor.u32 %v18989_v15, %v15053_v62  ;;  %v11326_v33 = vpop.f32.mrf.mxu1 }
 0x546   : > { %11545 = vmatpush.bf16.msrb.mxu2 %v14464_v63  ;;  %v18921_v1 = vld [vmem:[%s20282_s11 + $0x138c] sm:$0xf]  ;;  %v14781_v31 = vld [vmem:[%s20282_s11 + $0x1398] sm:$0xf0] }
 0x547   : > { %11558 = vmatpush.bf16.msrb.mxu3 %v14592_v27  ;;  %v14909_v58 = vld [vmem:[%s20282_s11 + $0x1498] sm:$0xf0]  ;;  %v18985_v26 = vld [vmem:[%s20282_s11 + $0x158c] sm:$0xf]  ;;  %v14784_v54 = vor.u32 %v18921_v1, %v14781_v31 }
 0x548   : > { %11520 = vmatmul.bf16.vlgmr.msrb.gmra.mxu0 %v20560_v38  ;;  %11533 = vmatmul.bf16.vlgmr.msrb.gmra.mxu1 %v20681_v9  ;;  %v14800_v38 = vor.u32 %v18925_v35, %v14797_v6  ;;  %v15184_v9 = vor.u32 %v19021_v11, %v15181_v50  ;;  %v15037_v28 = vld [vmem:[%s20282_s11 + $0x1598] sm:$0xf0]  ;;  %v19017_v14 = vld [vmem:[%s20282_s11 + $0x168c] sm:$0xf] }
 0x549   : > { %11564 = vmatpush.bf16.msra.mxu0 %v14832_v29  ;;  %11577 = vmatpush.bf16.msra.mxu1 %v14960_v55  ;;  %v15165_v44 = vld [vmem:[%s20282_s11 + $0x1698] sm:$0xf0]  ;;  %v15040_v49 = vor.u32 %v18985_v26, %v15037_v28  ;;  %v18917_v47 = vld [vmem:[%s20282_s11 + $0x136c] sm:$0xf] }
 0x54a   : > { %11590 = vmatpush.bf16.msra.mxu2 %v15088_v17  ;;  %11559 = vmatmul.bf16.vlgmr.msrb.gmra.mxu3 %v20686_v18  ;;  %v11313_v18 = vpop.f32.mrf.mxu0  ;;  %v14765_v63 = vld [vmem:[%s20282_s11 + $0x1378] sm:$0xf0]  ;;  %v18949_v39 = vld [vmem:[%s20282_s11 + $0x146c] sm:$0xf]  ;;  %v15168_v27 = vor.u32 %v19017_v14, %v15165_v44 }
 0x54b   : > { %11603 = vmatpush.bf16.msra.mxu3 %v15216_v37  ;;  %11546 = vmatmul.bf16.vlgmr.msrb.gmra.mxu2 %v20688_v19  ;;  %v18953_v19 = vld [vmem:[%s20282_s11 + $0x148c] sm:$0xf]  ;;  %v23225_v61 = vadd.f32 %v11313_v18, %v23170_v13  ;;  %v14893_v29 = vld [vmem:[%s20282_s11 + $0x1478] sm:$0xf0]  ;;  %v14768_v34 = vor.u32 %v18917_v47, %v14765_v63 }
 0x54c   : > { %v14912_v16 = vor.u32 %v18953_v19, %v14909_v58  ;;  %v18981_v55 = vld [vmem:[%s20282_s11 + $0x156c] sm:$0xf]  ;;  %v15021_v13 = vld [vmem:[%s20282_s11 + $0x1578] sm:$0xf0]  ;;  %v14896_v20 = vor.u32 %v18949_v39, %v14893_v29 }
 0x54d   : > { %11565 = vmatpush.bf16.msra.mxu0 %v14816_v25  ;;  %11578 = vmatpush.bf16.msra.mxu1 %v14944_v8  ;;  %v19013_v17 = vld [vmem:[%s20282_s11 + $0x166c] sm:$0xf]  ;;  %v15149_v40 = vld [vmem:[%s20282_s11 + $0x1678] sm:$0xf0]  ;;  %v15024_v37 = vor.u32 %v18981_v55, %v15021_v13  ;;  %v11352_v35 = vpop.f32.mrf.mxu3  ;;  %v11328_v1 = vpop.f32.mrf.mxu1 }
 0x54e   : > { %11591 = vmatpush.bf16.msra.mxu2 %v15072_v24  ;;  %v18913_v32 = vld [vmem:[%s20282_s11 + $0x134c] sm:$0xf]  ;;  %v14749_v53 = vld [vmem:[%s20282_s11 + $0x1358] sm:$0xf0]  ;;  %v15152_v21 = vor.u32 %v19013_v17, %v15149_v40  ;;  %v11339_v24 = vpop.f32.mrf.mxu2 }
 0x54f   : > { %11604 = vmatpush.bf16.msra.mxu3 %v15200_v12  ;;  %v18945_v10 = vld [vmem:[%s20282_s11 + $0x144c] sm:$0xf]  ;;  %v14877_v36 = vld [vmem:[%s20282_s11 + $0x1458] sm:$0xf0]  ;;  %v11340_v12 = vadd.f32 %v11339_v24, %v11326_v33  ;;  %v14752_v15 = vor.u32 %v18913_v32, %v14749_v53 }
 0x550   : > { %v18977_v25 = vld [vmem:[%s20282_s11 + $0x154c] sm:$0xf]  ;;  %v15005_v8 = vld [vmem:[%s20282_s11 + $0x1558] sm:$0xf0]  ;;  %v14880_v62 = vor.u32 %v18945_v10, %v14877_v36 }
 0x551   : > { %11566 = vmatpush.bf16.msra.mxu0 %v14800_v38  ;;  %11579 = vmatpush.bf16.msra.mxu1 %v14928_v7  ;;  %v19009_v6 = vld [vmem:[%s20282_s11 + $0x164c] sm:$0xf]  ;;  %v15133_v22 = vld [vmem:[%s20282_s11 + $0x1658] sm:$0xf0]  ;;  %v15008_v11 = vor.u32 %v18977_v25, %v15005_v8 }
 0x552   : > { %11592 = vmatpush.bf16.msra.mxu2 %v15056_v57  ;;  %v11315_v2 = vpop.f32.mrf.mxu0  ;;  %v18909_v50 = vld [vmem:[%s20282_s11 + $0x132c] sm:$0xf]  ;;  %v14733_v38 = vld [vmem:[%s20282_s11 + $0x1338] sm:$0xf0]  ;;  %v23246_v57 = vadd.f32 %v11352_v35, %v11340_v12  ;;  %v15136_v31 = vor.u32 %v19009_v6, %v15133_v22 }
 0x553   : > { %11605 = vmatpush.bf16.msra.mxu3 %v15184_v9  ;;  %v18941_v7 = vld [vmem:[%s20282_s11 + $0x142c] sm:$0xf]  ;;  %v14861_v19 = vld [vmem:[%s20282_s11 + $0x1438] sm:$0xf0]  ;;  %v14736_v18 = vor.u32 %v18909_v50, %v14733_v38 }
 0x554   : > { %v18973_v9 = vld [vmem:[%s20282_s11 + $0x152c] sm:$0xf]  ;;  %v14989_v58 = vld [vmem:[%s20282_s11 + $0x1538] sm:$0xf0] }
 0x555   : > { %11567 = vmatpush.bf16.msra.mxu0 %v14784_v54  ;;  %11580 = vmatpush.bf16.msra.mxu1 %v14912_v16  ;;  %v19005_v26 = vld [vmem:[%s20282_s11 + $0x162c] sm:$0xf]  ;;  %v15117_v28 = vld [vmem:[%s20282_s11 + $0x1638] sm:$0xf0]  ;;  %v14864_v54 = vor.u32 %v18941_v7, %v14861_v19  ;;  %v14992_v16 = vor.u32 %v18973_v9, %v14989_v58  ;;  %v11354_v13 = vpop.f32.mrf.mxu3 }
 0x556   : > { %11593 = vmatpush.bf16.msra.mxu2 %v15040_v49  ;;  %v18905_v14 = vld [vmem:[%s20282_s11 + $0x130c] sm:$0xf]  ;;  %v14717_v44 = vld [vmem:[%s20282_s11 + $0x1318] sm:$0xf0]  ;;  %v15120_v39 = vor.u32 %v19005_v26, %v15117_v28  ;;  %v11341_v55 = vpop.f32.mrf.mxu2 }
 0x557   : > { %11606 = vmatpush.bf16.msra.mxu3 %v15168_v27  ;;  %v18937_v49 = vld [vmem:[%s20282_s11 + $0x140c] sm:$0xf]  ;;  %v14845_v47 = vld [vmem:[%s20282_s11 + $0x1418] sm:$0xf0] }
 0x558   : > { %v18969_v63 = vld [vmem:[%s20282_s11 + $0x150c] sm:$0xf]  ;;  %v14973_v33 = vld [vmem:[%s20282_s11 + $0x1518] sm:$0xf0]  ;;  %v14848_v10 = vor.u32 %v18937_v49, %v14845_v47 }
 0x559   : > { %11568 = vmatpush.bf16.msra.mxu0 %v14768_v34  ;;  %11581 = vmatpush.bf16.msra.mxu1 %v14896_v20  ;;  %v19001_v27 = vld [vmem:[%s20282_s11 + $0x160c] sm:$0xf]  ;;  %v15101_v29 = vld [vmem:[%s20282_s11 + $0x1618] sm:$0xf0]  ;;  %v14720_v20 = vor.u32 %v18905_v14, %v14717_v44 }
 0x55a   : > { %11594 = vmatpush.bf16.msra.mxu2 %v15024_v37  ;;  %v19061_v17 = vld [vmem:[%s20282_s11 + $0x17ec] sm:$0xf]  ;;  %v15341_v40 = vld [vmem:[%s20282_s11 + $0x17f8] sm:$0xf0]  ;;  %v15104_v8 = vor.u32 %v19001_v27, %v15101_v29 }
 0x55b   : > { %11607 = vmatpush.bf16.msra.mxu3 %v15152_v21  ;;  %v19093_v34 = vld [vmem:[%s20282_s11 + $0x18ec] sm:$0xf]  ;;  %v15469_v37 = vld [vmem:[%s20282_s11 + $0x18f8] sm:$0xf0]  ;;  %v14976_v21 = vor.u32 %v18969_v63, %v14973_v33  ;;  %v15344_v24 = vor.u32 %v19061_v17, %v15341_v40 }
 0x55c   : > { %v19125_v32 = vld [vmem:[%s20282_s11 + $0x19ec] sm:$0xf]  ;;  %v15597_v53 = vld [vmem:[%s20282_s11 + $0x19f8] sm:$0xf0]  ;;  %v15472_v35 = vor.u32 %v19093_v34, %v15469_v37 }
 0x55d   : > { %11569 = vmatpush.bf16.msra.mxu0 %v14752_v15  ;;  %11582 = vmatpush.bf16.msra.mxu1 %v14880_v62  ;;  %v19157_v36 = vld [vmem:[%s20282_s11 + $0x1aec] sm:$0xf]  ;;  %v15725_v25 = vld [vmem:[%s20282_s11 + $0x1af8] sm:$0xf0]  ;;  %v15600_v6 = vor.u32 %v19125_v32, %v15597_v53 }
 0x55e   : > { %11595 = vmatpush.bf16.msra.mxu2 %v15008_v11  ;;  %v19057_v22 = vld [vmem:[%s20282_s11 + $0x17cc] sm:$0xf]  ;;  %v15325_v12 = vld [vmem:[%s20282_s11 + $0x17d8] sm:$0xf0]  ;;  %v15728_v15 = vor.u32 %v19157_v36, %v15725_v25 }
 0x55f   : > { %11608 = vmatpush.bf16.msra.mxu3 %v15136_v31  ;;  %v19089_v2 = vld [vmem:[%s20282_s11 + $0x18cc] sm:$0xf]  ;;  %v15453_v62 = vld [vmem:[%s20282_s11 + $0x18d8] sm:$0xf0]  ;;  %v15328_v1 = vor.u32 %v19057_v22, %v15325_v12 }
 0x560   : > { %v19121_v11 = vld [vmem:[%s20282_s11 + $0x19cc] sm:$0xf]  ;;  %v15581_v50 = vld [vmem:[%s20282_s11 + $0x19d8] sm:$0xf0]  ;;  %v15456_v31 = vor.u32 %v19089_v2, %v15453_v62 }
 0x561   : > { %11570 = vmatpush.bf16.msra.mxu0 %v14736_v18  ;;  %11583 = vmatpush.bf16.msra.mxu1 %v14864_v54  ;;  %v19153_v38 = vld [vmem:[%s20282_s11 + $0x1acc] sm:$0xf]  ;;  %v15709_v7 = vld [vmem:[%s20282_s11 + $0x1ad8] sm:$0xf0]  ;;  %v15584_v19 = vor.u32 %v19121_v11, %v15581_v50 }
 0x562   : > { %11596 = vmatpush.bf16.msra.mxu2 %v14992_v16  ;;  %v19053_v9 = vld [vmem:[%s20282_s11 + $0x17ac] sm:$0xf]  ;;  %v15309_v58 = vld [vmem:[%s20282_s11 + $0x17b8] sm:$0xf0]  ;;  %v15712_v28 = vor.u32 %v19153_v38, %v15709_v7 }
 0x563   : > { %11609 = vmatpush.bf16.msra.mxu3 %v15120_v39  ;;  %v19085_v26 = vld [vmem:[%s20282_s11 + $0x18ac] sm:$0xf]  ;;  %v15437_v18 = vld [vmem:[%s20282_s11 + $0x18b8] sm:$0xf0] }
 0x564   : > { %v19117_v14 = vld [vmem:[%s20282_s11 + $0x19ac] sm:$0xf]  ;;  %v15565_v44 = vld [vmem:[%s20282_s11 + $0x19b8] sm:$0xf0]  ;;  %v15440_v49 = vor.u32 %v19085_v26, %v15437_v18 }
 0x565   : > { %11571 = vmatpush.bf16.msra.mxu0 %v14720_v20  ;;  %11584 = vmatpush.bf16.msra.mxu1 %v14848_v10  ;;  %v19149_v54 = vld [vmem:[%s20282_s11 + $0x1aac] sm:$0xf]  ;;  %v15693_v16 = vld [vmem:[%s20282_s11 + $0x1ab8] sm:$0xf0]  ;;  %v15568_v47 = vor.u32 %v19117_v14, %v15565_v44  ;;  %v11365_v17 = vpop.f32.mrf.mxu0  ;;  %v11378_v10 = vpop.f32.mrf.mxu1 }
 0x566   : > { %11597 = vmatpush.bf16.msra.mxu2 %v14976_v21  ;;  %v19049_v63 = vld [vmem:[%s20282_s11 + $0x178c] sm:$0xf]  ;;  %v15293_v39 = vld [vmem:[%s20282_s11 + $0x1798] sm:$0xf0]  ;;  %v11366_v53 = vadd.f32 %v11365_v17, %v23246_v57 }
 0x567   : > { %11610 = vmatpush.bf16.msra.mxu3 %v15104_v8  ;;  %v15421_v33 = vld [vmem:[%s20282_s11 + $0x1898] sm:$0xf0]  ;;  %v19113_v27 = vld [vmem:[%s20282_s11 + $0x198c] sm:$0xf]  ;;  %v15296_v13 = vor.u32 %v19049_v63, %v15293_v39 }
 0x568   : > { %11572 = vmatmul.bf16.vlgmr.msra.gmra.mxu0 %v20693_v23  ;;  %11585 = vmatmul.bf16.vlgmr.msra.gmra.mxu1 %v20700_v30  ;;  %v15312_v23 = vor.u32 %v19053_v9, %v15309_v58  ;;  %v15696_v30 = vor.u32 %v19149_v54, %v15693_v16  ;;  %v15549_v29 = vld [vmem:[%s20282_s11 + $0x1998] sm:$0xf0]  ;;  %v19145_v55 = vld [vmem:[%s20282_s11 + $0x1a8c] sm:$0xf] }
 0x569   : > { %11616 = vmatpush.bf16.msrb.mxu0 %v15344_v24  ;;  %11629 = vmatpush.bf16.msrb.mxu1 %v15472_v35  ;;  %v15552_v34 = vor.u32 %v19113_v27, %v15549_v29  ;;  %v19045_v20 = vld [vmem:[%s20282_s11 + $0x176c] sm:$0xf]  ;;  %v15277_v37 = vld [vmem:[%s20282_s11 + $0x1778] sm:$0xf0] }
 0x56a   : > { %11642 = vmatpush.bf16.msrb.mxu2 %v15600_v6  ;;  %11611 = vmatmul.bf16.vlgmr.msra.gmra.mxu3 %v20702_v41  ;;  %v15677_v41 = vld [vmem:[%s20282_s11 + $0x1a98] sm:$0xf0]  ;;  %v19077_v32 = vld [vmem:[%s20282_s11 + $0x186c] sm:$0xf]  ;;  %v11379_v6 = vadd.f32 %v11378_v10, %v11366_v53  ;;  %v15280_v22 = vor.u32 %v19045_v20, %v15277_v37 }
 0x56b   : > { %11655 = vmatpush.bf16.msrb.mxu3 %v15728_v15  ;;  %11598 = vmatmul.bf16.vlgmr.msra.gmra.mxu2 %v20704_v42  ;;  %v19081_v42 = vld [vmem:[%s20282_s11 + $0x188c] sm:$0xf]  ;;  %v15680_v21 = vor.u32 %v19145_v55, %v15677_v41  ;;  %v15405_v36 = vld [vmem:[%s20282_s11 + $0x1878] sm:$0xf0] }
 0x56c   : > { %v15424_v40 = vor.u32 %v19081_v42, %v15421_v33  ;;  %v19109_v25 = vld [vmem:[%s20282_s11 + $0x196c] sm:$0xf]  ;;  %v15533_v8 = vld [vmem:[%s20282_s11 + $0x1978] sm:$0xf0]  ;;  %v15408_v57 = vor.u32 %v19077_v32, %v15405_v36 }
 0x56d   : > { %11617 = vmatpush.bf16.msrb.mxu0 %v15328_v1  ;;  %11630 = vmatpush.bf16.msrb.mxu1 %v15456_v31  ;;  %v19141_v24 = vld [vmem:[%s20282_s11 + $0x1a6c] sm:$0xf]  ;;  %v15661_v35 = vld [vmem:[%s20282_s11 + $0x1a78] sm:$0xf0]  ;;  %v15536_v12 = vor.u32 %v19109_v25, %v15533_v8  ;;  %v11367_v18 = vpop.f32.mrf.mxu0 }
 0x56e   : > { %11643 = vmatpush.bf16.msrb.mxu2 %v15584_v19  ;;  %v19041_v2 = vld [vmem:[%s20282_s11 + $0x174c] sm:$0xf]  ;;  %v15261_v15 = vld [vmem:[%s20282_s11 + $0x1758] sm:$0xf0]  ;;  %v11391_v11 = vpop.f32.mrf.mxu2  ;;  %v15664_v50 = vor.u32 %v19141_v24, %v15661_v35  ;;  %v11404_v19 = vpop.f32.mrf.mxu3 }
 0x56f   : > { %11656 = vmatpush.bf16.msrb.mxu3 %v15712_v28  ;;  %v19073_v62 = vld [vmem:[%s20282_s11 + $0x184c] sm:$0xf]  ;;  %v15389_v38 = vld [vmem:[%s20282_s11 + $0x1858] sm:$0xf0]  ;;  %v11392_v31 = vadd.f32 %v11391_v11, %v11379_v6  ;;  %v15264_v26 = vor.u32 %v19041_v2, %v15261_v15 }
 0x570   : > { %v19105_v7 = vld [vmem:[%s20282_s11 + $0x194c] sm:$0xf]  ;;  %v15517_v1 = vld [vmem:[%s20282_s11 + $0x1958] sm:$0xf0]  ;;  %v15392_v14 = vor.u32 %v19073_v62, %v15389_v38 }
 0x571   : > { %11618 = vmatpush.bf16.msrb.mxu0 %v15312_v23  ;;  %11631 = vmatpush.bf16.msrb.mxu1 %v15440_v49  ;;  %v19137_v9 = vld [vmem:[%s20282_s11 + $0x1a4c] sm:$0xf]  ;;  %v15645_v58 = vld [vmem:[%s20282_s11 + $0x1a58] sm:$0xf0]  ;;  %v23314_v28 = vadd.f32 %v11404_v19, %v11392_v31  ;;  %v15520_v44 = vor.u32 %v19105_v7, %v15517_v1  ;;  %v11380_v49 = vpop.f32.mrf.mxu1 }
 0x572   : > { %11644 = vmatpush.bf16.msrb.mxu2 %v15568_v47  ;;  %v19037_v54 = vld [vmem:[%s20282_s11 + $0x172c] sm:$0xf]  ;;  %v15245_v16 = vld [vmem:[%s20282_s11 + $0x1738] sm:$0xf0]  ;;  %v15648_v47 = vor.u32 %v19137_v9, %v15645_v58 }
 0x573   : > { %11657 = vmatpush.bf16.msrb.mxu3 %v15696_v30  ;;  %v19069_v23 = vld [vmem:[%s20282_s11 + $0x182c] sm:$0xf]  ;;  %v15373_v63 = vld [vmem:[%s20282_s11 + $0x1838] sm:$0xf0]  ;;  %v15248_v27 = vor.u32 %v19037_v54, %v15245_v16 }
 0x574   : > { %v19101_v39 = vld [vmem:[%s20282_s11 + $0x192c] sm:$0xf]  ;;  %v15501_v42 = vld [vmem:[%s20282_s11 + $0x1938] sm:$0xf0]  ;;  %v15376_v41 = vor.u32 %v19069_v23, %v15373_v63 }
 0x575   : > { %11619 = vmatpush.bf16.msrb.mxu0 %v15296_v13  ;;  %11632 = vmatpush.bf16.msrb.mxu1 %v15424_v40  ;;  %v19133_v30 = vld [vmem:[%s20282_s11 + $0x1a2c] sm:$0xf]  ;;  %v15629_v33 = vld [vmem:[%s20282_s11 + $0x1a38] sm:$0xf0]  ;;  %v15504_v13 = vor.u32 %v19101_v39, %v15501_v42 }
 0x576   : > { %11645 = vmatpush.bf16.msrb.mxu2 %v15552_v34  ;;  %v19033_v29 = vld [vmem:[%s20282_s11 + $0x170c] sm:$0xf]  ;;  %v15229_v55 = vld [vmem:[%s20282_s11 + $0x1718] sm:$0xf0]  ;;  %v11393_v20 = vpop.f32.mrf.mxu2  ;;  %v15632_v37 = vor.u32 %v19133_v30, %v15629_v33 }
 0x577   : > { %11658 = vmatpush.bf16.msrb.mxu3 %v15680_v21  ;;  %v19065_v17 = vld [vmem:[%s20282_s11 + $0x180c] sm:$0xf]  ;;  %v15357_v40 = vld [vmem:[%s20282_s11 + $0x1818] sm:$0xf0]  ;;  %v11406_v21 = vpop.f32.mrf.mxu3  ;;  %v15232_v24 = vor.u32 %v19033_v29, %v15229_v55 }
 0x578   : > { %v19097_v34 = vld [vmem:[%s20282_s11 + $0x190c] sm:$0xf]  ;;  %v15485_v32 = vld [vmem:[%s20282_s11 + $0x1918] sm:$0xf0] }
 0x579   : > { %11620 = vmatpush.bf16.msrb.mxu0 %v15280_v22  ;;  %11633 = vmatpush.bf16.msrb.mxu1 %v15408_v57  ;;  %v19129_v53 = vld [vmem:[%s20282_s11 + $0x1a0c] sm:$0xf]  ;;  %v15613_v10 = vld [vmem:[%s20282_s11 + $0x1a18] sm:$0xf0]  ;;  %v15360_v57 = vor.u32 %v19065_v17, %v15357_v40 }
 0x57a   : > { %11646 = vmatpush.bf16.msrb.mxu2 %v15536_v12  ;;  %v19189_v36 = vld [vmem:[%s20282_s11 + $0x1bec] sm:$0xf]  ;;  %v15853_v25 = vld [vmem:[%s20282_s11 + $0x1bf8] sm:$0xf0]  ;;  %v15488_v12 = vor.u32 %v19097_v34, %v15485_v32  ;;  %v15616_v62 = vor.u32 %v19129_v53, %v15613_v10 }
 0x57b   : > { %11659 = vmatpush.bf16.msrb.mxu3 %v15664_v50  ;;  %v19221_v8 = vld [vmem:[%s20282_s11 + $0x1cec] sm:$0xf]  ;;  %v15981_v35 = vld [vmem:[%s20282_s11 + $0x1cf8] sm:$0xf0]  ;;  %v15856_v11 = vor.u32 %v19189_v36, %v15853_v25 }
 0x57c   : > { %v19253_v6 = vld [vmem:[%s20282_s11 + $0x1dec] sm:$0xf]  ;;  %v16109_v22 = vld [vmem:[%s20282_s11 + $0x1df8] sm:$0xf0]  ;;  %v15984_v50 = vor.u32 %v19221_v8, %v15981_v35 }
 0x57d   : > { %11621 = vmatpush.bf16.msrb.mxu0 %v15264_v26  ;;  %11634 = vmatpush.bf16.msrb.mxu1 %v15392_v14  ;;  %v19285_v2 = vld [vmem:[%s20282_s11 + $0x1eec] sm:$0xf]  ;;  %v16237_v15 = vld [vmem:[%s20282_s11 + $0x1ef8] sm:$0xf0]  ;;  %v16112_v38 = vor.u32 %v19253_v6, %v16109_v22 }
 0x57e   : > { %11647 = vmatpush.bf16.msrb.mxu2 %v15520_v44  ;;  %v19185_v7 = vld [vmem:[%s20282_s11 + $0x1bcc] sm:$0xf]  ;;  %v15837_v1 = vld [vmem:[%s20282_s11 + $0x1bd8] sm:$0xf0]  ;;  %v16240_v19 = vor.u32 %v19285_v2, %v16237_v15 }
 0x57f   : > { %11660 = vmatpush.bf16.msrb.mxu3 %v15648_v47  ;;  %v19217_v31 = vld [vmem:[%s20282_s11 + $0x1ccc] sm:$0xf]  ;;  %v15965_v9 = vld [vmem:[%s20282_s11 + $0x1cd8] sm:$0xf0]  ;;  %v15840_v44 = vor.u32 %v19185_v7, %v15837_v1 }
 0x580   : > { %v19249_v58 = vld [vmem:[%s20282_s11 + $0x1dcc] sm:$0xf]  ;;  %v16093_v26 = vld [vmem:[%s20282_s11 + $0x1dd8] sm:$0xf0]  ;;  %v15968_v54 = vor.u32 %v19217_v31, %v15965_v9 }
 0x581   : > { %11622 = vmatpush.bf16.msrb.mxu0 %v15248_v27  ;;  %11635 = vmatpush.bf16.msrb.mxu1 %v15376_v41  ;;  %v19281_v18 = vld [vmem:[%s20282_s11 + $0x1ecc] sm:$0xf]  ;;  %v16221_v14 = vld [vmem:[%s20282_s11 + $0x1ed8] sm:$0xf0]  ;;  %v16096_v16 = vor.u32 %v19249_v58, %v16093_v26 }
 0x582   : > { %11648 = vmatpush.bf16.msrb.mxu2 %v15504_v13  ;;  %v19181_v23 = vld [vmem:[%s20282_s11 + $0x1bac] sm:$0xf]  ;;  %v15821_v49 = vld [vmem:[%s20282_s11 + $0x1bb8] sm:$0xf0]  ;;  %v16224_v63 = vor.u32 %v19281_v18, %v16221_v14 }
 0x583   : > { %11661 = vmatpush.bf16.msrb.mxu3 %v15632_v37  ;;  %v19213_v47 = vld [vmem:[%s20282_s11 + $0x1cac] sm:$0xf]  ;;  %v15949_v39 = vld [vmem:[%s20282_s11 + $0x1cb8] sm:$0xf0] }
 0x584   : > { %v19245_v42 = vld [vmem:[%s20282_s11 + $0x1dac] sm:$0xf]  ;;  %v16077_v30 = vld [vmem:[%s20282_s11 + $0x1db8] sm:$0xf0]  ;;  %v15952_v29 = vor.u32 %v19213_v47, %v15949_v39 }
 0x585   : > { %11623 = vmatpush.bf16.msrb.mxu0 %v15232_v24  ;;  %11636 = vmatpush.bf16.msrb.mxu1 %v15360_v57  ;;  %v19277_v33 = vld [vmem:[%s20282_s11 + $0x1eac] sm:$0xf]  ;;  %v16205_v27 = vld [vmem:[%s20282_s11 + $0x1eb8] sm:$0xf0]  ;;  %v16080_v55 = vor.u32 %v19245_v42, %v16077_v30  ;;  %v11430_v10 = vpop.f32.mrf.mxu1 }
 0x586   : > { %11649 = vmatpush.bf16.msrb.mxu2 %v15488_v12  ;;  %v19177_v41 = vld [vmem:[%s20282_s11 + $0x1b8c] sm:$0xf]  ;;  %v15805_v13 = vld [vmem:[%s20282_s11 + $0x1b98] sm:$0xf0] }
 0x587   : > { %11662 = vmatpush.bf16.msrb.mxu3 %v15616_v62  ;;  %v15933_v17 = vld [vmem:[%s20282_s11 + $0x1c98] sm:$0xf0]  ;;  %v19241_v40 = vld [vmem:[%s20282_s11 + $0x1d8c] sm:$0xf]  ;;  %v15808_v53 = vor.u32 %v19177_v41, %v15805_v13 }
 0x588   : > { %11624 = vmatmul.bf16.vlgmr.msrb.gmra.mxu0 %v20706_v43  ;;  %11637 = vmatmul.bf16.vlgmr.msrb.gmra.mxu1 %v20836_v46  ;;  %v15824_v43 = vor.u32 %v19181_v23, %v15821_v49  ;;  %v16208_v46 = vor.u32 %v19277_v33, %v16205_v27  ;;  %v16061_v34 = vld [vmem:[%s20282_s11 + $0x1d98] sm:$0xf0]  ;;  %v19273_v20 = vld [vmem:[%s20282_s11 + $0x1e8c] sm:$0xf] }
 0x589   : > { %11668 = vmatpush.bf16.msra.mxu0 %v15856_v11  ;;  %11681 = vmatpush.bf16.msra.mxu1 %v15984_v50  ;;  %v16189_v37 = vld [vmem:[%s20282_s11 + $0x1e98] sm:$0xf0]  ;;  %v16064_v36 = vor.u32 %v19241_v40, %v16061_v34  ;;  %v19173_v25 = vld [vmem:[%s20282_s11 + $0x1b6c] sm:$0xf] }
 0x58a   : > { %11694 = vmatpush.bf16.msra.mxu2 %v16112_v38  ;;  %11663 = vmatmul.bf16.vlgmr.msrb.gmra.mxu3 %v20841_v51  ;;  %v11417_v51 = vpop.f32.mrf.mxu0  ;;  %v15789_v8 = vld [vmem:[%s20282_s11 + $0x1b78] sm:$0xf0]  ;;  %v19205_v24 = vld [vmem:[%s20282_s11 + $0x1c6c] sm:$0xf]  ;;  %v16192_v35 = vor.u32 %v19273_v20, %v16189_v37 }
 0x58b   : > { %11707 = vmatpush.bf16.msra.mxu3 %v16240_v19  ;;  %11650 = vmatmul.bf16.vlgmr.msrb.gmra.mxu2 %v20843_v52  ;;  %v19209_v52 = vld [vmem:[%s20282_s11 + $0x1c8c] sm:$0xf]  ;;  %v11418_v32 = vadd.f32 %v11417_v51, %v23314_v28  ;;  %v15917_v22 = vld [vmem:[%s20282_s11 + $0x1c78] sm:$0xf0]  ;;  %v15792_v15 = vor.u32 %v19173_v25, %v15789_v8 }
 0x58c   : > { %v15936_v21 = vor.u32 %v19209_v52, %v15933_v17  ;;  %v19237_v57 = vld [vmem:[%s20282_s11 + $0x1d6c] sm:$0xf]  ;;  %v16045_v28 = vld [vmem:[%s20282_s11 + $0x1d78] sm:$0xf0]  ;;  %v15920_v62 = vor.u32 %v19205_v24, %v15917_v22 }
 0x58d   : > { %11669 = vmatpush.bf16.msra.mxu0 %v15840_v44  ;;  %11682 = vmatpush.bf16.msra.mxu1 %v15968_v54  ;;  %v11431_v6 = vadd.f32 %v11430_v10, %v11418_v32  ;;  %v19269_v12 = vld [vmem:[%s20282_s11 + $0x1e6c] sm:$0xf]  ;;  %v16173_v2 = vld [vmem:[%s20282_s11 + $0x1e78] sm:$0xf0]  ;;  %v16048_v11 = vor.u32 %v19237_v57, %v16045_v28  ;;  %v11456_v18 = vpop.f32.mrf.mxu3  ;;  %v11432_v23 = vpop.f32.mrf.mxu1 }
 0x58e   : > { %11695 = vmatpush.bf16.msra.mxu2 %v16096_v16  ;;  %v19169_v50 = vld [vmem:[%s20282_s11 + $0x1b4c] sm:$0xf]  ;;  %v15773_v38 = vld [vmem:[%s20282_s11 + $0x1b58] sm:$0xf0]  ;;  %v16176_v1 = vor.u32 %v19269_v12, %v16173_v2  ;;  %v11443_v31 = vpop.f32.mrf.mxu2 }
 0x58f   : > { %11708 = vmatpush.bf16.msra.mxu3 %v16224_v63  ;;  %v19201_v7 = vld [vmem:[%s20282_s11 + $0x1c4c] sm:$0xf]  ;;  %v15901_v19 = vld [vmem:[%s20282_s11 + $0x1c58] sm:$0xf0]  ;;  %v11444_v26 = vadd.f32 %v11443_v31, %v11431_v6  ;;  %v15776_v16 = vor.u32 %v19169_v50, %v15773_v38 }
 0x590   : > { %v19233_v9 = vld [vmem:[%s20282_s11 + $0x1d4c] sm:$0xf]  ;;  %v16029_v58 = vld [vmem:[%s20282_s11 + $0x1d58] sm:$0xf0]  ;;  %v15904_v47 = vor.u32 %v19201_v7, %v15901_v19 }
 0x591   : > { %11670 = vmatpush.bf16.msra.mxu0 %v15824_v43  ;;  %11683 = vmatpush.bf16.msra.mxu1 %v15952_v29  ;;  %v19265_v14 = vld [vmem:[%s20282_s11 + $0x1e4c] sm:$0xf]  ;;  %v16157_v44 = vld [vmem:[%s20282_s11 + $0x1e58] sm:$0xf0]  ;;  %v23385_v49 = vadd.f32 %v11456_v18, %v11444_v26  ;;  %v16032_v63 = vor.u32 %v19233_v9, %v16029_v58 }
 0x592   : > { %11696 = vmatpush.bf16.msra.mxu2 %v16080_v55  ;;  %v11419_v54 = vpop.f32.mrf.mxu0  ;;  %v19165_v39 = vld [vmem:[%s20282_s11 + $0x1b2c] sm:$0xf]  ;;  %v15757_v42 = vld [vmem:[%s20282_s11 + $0x1b38] sm:$0xf0]  ;;  %v16160_v33 = vor.u32 %v19265_v14, %v16157_v44 }
 0x593   : > { %11709 = vmatpush.bf16.msra.mxu3 %v16208_v46  ;;  %v19197_v30 = vld [vmem:[%s20282_s11 + $0x1c2c] sm:$0xf]  ;;  %v15885_v27 = vld [vmem:[%s20282_s11 + $0x1c38] sm:$0xf0]  ;;  %v15760_v13 = vor.u32 %v19165_v39, %v15757_v42 }
 0x594   : > { %v19229_v43 = vld [vmem:[%s20282_s11 + $0x1d2c] sm:$0xf]  ;;  %v16013_v29 = vld [vmem:[%s20282_s11 + $0x1d38] sm:$0xf0]  ;;  %v15888_v17 = vor.u32 %v19197_v30, %v15885_v27 }
 0x595   : > { %11671 = vmatpush.bf16.msra.mxu0 %v15808_v53  ;;  %11684 = vmatpush.bf16.msra.mxu1 %v15936_v21  ;;  %v19261_v55 = vld [vmem:[%s20282_s11 + $0x1e2c] sm:$0xf]  ;;  %v16141_v41 = vld [vmem:[%s20282_s11 + $0x1e38] sm:$0xf0]  ;;  %v16016_v40 = vor.u32 %v19229_v43, %v16013_v29  ;;  %v11458_v24 = vpop.f32.mrf.mxu3 }
 0x596   : > { %11697 = vmatpush.bf16.msra.mxu2 %v16064_v36  ;;  %v19161_v52 = vld [vmem:[%s20282_s11 + $0x1b0c] sm:$0xf]  ;;  %v15741_v46 = vld [vmem:[%s20282_s11 + $0x1b18] sm:$0xf0]  ;;  %v16144_v37 = vor.u32 %v19261_v55, %v16141_v41  ;;  %v11445_v21 = vpop.f32.mrf.mxu2 }
 0x597   : > { %11710 = vmatpush.bf16.msra.mxu3 %v16192_v35  ;;  %v19193_v34 = vld [vmem:[%s20282_s11 + $0x1c0c] sm:$0xf]  ;;  %v15869_v51 = vld [vmem:[%s20282_s11 + $0x1c18] sm:$0xf0]  ;;  %v15744_v35 = vor.u32 %v19161_v52, %v15741_v46 }
 0x598   : > { %v19225_v20 = vld [vmem:[%s20282_s11 + $0x1d0c] sm:$0xf]  ;;  %v15997_v32 = vld [vmem:[%s20282_s11 + $0x1d18] sm:$0xf0]  ;;  %v15872_v28 = vor.u32 %v19193_v34, %v15869_v51 }
 0x599   : > { %11672 = vmatpush.bf16.msra.mxu0 %v15792_v15  ;;  %11685 = vmatpush.bf16.msra.mxu1 %v15920_v62  ;;  %v19257_v53 = vld [vmem:[%s20282_s11 + $0x1e0c] sm:$0xf]  ;;  %v16125_v10 = vld [vmem:[%s20282_s11 + $0x1e18] sm:$0xf0]  ;;  %v16000_v12 = vor.u32 %v19225_v20, %v15997_v32 }
 0x59a   : > { %11698 = vmatpush.bf16.msra.mxu2 %v16048_v11  ;;  %v19317_v36 = vld [vmem:[%s20282_s11 + $0x1fec] sm:$0xf]  ;;  %v16365_v25 = vld [vmem:[%s20282_s11 + $0x1ff8] sm:$0xf0]  ;;  %v16128_v62 = vor.u32 %v19257_v53, %v16125_v10 }
 0x59b   : > { %11711 = vmatpush.bf16.msra.mxu3 %v16176_v1  ;;  %v19349_v8 = vld [vmem:[%s20282_s11 + $0x20ec] sm:$0xf]  ;;  %v16493_v6 = vld [vmem:[%s20282_s11 + $0x20f8] sm:$0xf0]  ;;  %v16368_v11 = vor.u32 %v19317_v36, %v16365_v25 }
 0x59c   : > { %v19381_v22 = vld [vmem:[%s20282_s11 + $0x21ec] sm:$0xf]  ;;  %v16621_v57 = vld [vmem:[%s20282_s11 + $0x21f8] sm:$0xf0]  ;;  %v16496_v50 = vor.u32 %v19349_v8, %v16493_v6 }
 0x59d   : > { %11673 = vmatpush.bf16.msra.mxu0 %v15776_v16  ;;  %11686 = vmatpush.bf16.msra.mxu1 %v15904_v47  ;;  %v19413_v2 = vld [vmem:[%s20282_s11 + $0x22ec] sm:$0xf]  ;;  %v16749_v15 = vld [vmem:[%s20282_s11 + $0x22f8] sm:$0xf0]  ;;  %v16624_v38 = vor.u32 %v19381_v22, %v16621_v57 }
 0x59e   : > { %11699 = vmatpush.bf16.msra.mxu2 %v16032_v63  ;;  %v19313_v7 = vld [vmem:[%s20282_s11 + $0x1fcc] sm:$0xf]  ;;  %v16349_v1 = vld [vmem:[%s20282_s11 + $0x1fd8] sm:$0xf0]  ;;  %v16752_v19 = vor.u32 %v19413_v2, %v16749_v15 }
 0x59f   : > { %11712 = vmatpush.bf16.msra.mxu3 %v16160_v33  ;;  %v19345_v31 = vld [vmem:[%s20282_s11 + $0x20cc] sm:$0xf]  ;;  %v16477_v9 = vld [vmem:[%s20282_s11 + $0x20d8] sm:$0xf0]  ;;  %v16352_v44 = vor.u32 %v19313_v7, %v16349_v1 }
 0x5a0   : > { %v19377_v58 = vld [vmem:[%s20282_s11 + $0x21cc] sm:$0xf]  ;;  %v16605_v26 = vld [vmem:[%s20282_s11 + $0x21d8] sm:$0xf0]  ;;  %v16480_v54 = vor.u32 %v19345_v31, %v16477_v9 }
 0x5a1   : > { %11674 = vmatpush.bf16.msra.mxu0 %v15760_v13  ;;  %11687 = vmatpush.bf16.msra.mxu1 %v15888_v17  ;;  %v19409_v18 = vld [vmem:[%s20282_s11 + $0x22cc] sm:$0xf]  ;;  %v16733_v14 = vld [vmem:[%s20282_s11 + $0x22d8] sm:$0xf0]  ;;  %v16608_v16 = vor.u32 %v19377_v58, %v16605_v26 }
 0x5a2   : > { %11700 = vmatpush.bf16.msra.mxu2 %v16016_v40  ;;  %v19309_v23 = vld [vmem:[%s20282_s11 + $0x1fac] sm:$0xf]  ;;  %v16333_v47 = vld [vmem:[%s20282_s11 + $0x1fb8] sm:$0xf0]  ;;  %v16736_v39 = vor.u32 %v19409_v18, %v16733_v14 }
 0x5a3   : > { %11713 = vmatpush.bf16.msra.mxu3 %v16144_v37  ;;  %v19341_v63 = vld [vmem:[%s20282_s11 + $0x20ac] sm:$0xf]  ;;  %v16461_v42 = vld [vmem:[%s20282_s11 + $0x20b8] sm:$0xf0] }
 0x5a4   : > { %v19373_v30 = vld [vmem:[%s20282_s11 + $0x21ac] sm:$0xf]  ;;  %v16589_v33 = vld [vmem:[%s20282_s11 + $0x21b8] sm:$0xf0]  ;;  %v16464_v29 = vor.u32 %v19341_v63, %v16461_v42 }
 0x5a5   : > { %11675 = vmatpush.bf16.msra.mxu0 %v15744_v35  ;;  %11688 = vmatpush.bf16.msra.mxu1 %v15872_v28  ;;  %v19405_v27 = vld [vmem:[%s20282_s11 + $0x22ac] sm:$0xf]  ;;  %v16717_v43 = vld [vmem:[%s20282_s11 + $0x22b8] sm:$0xf0]  ;;  %v16592_v55 = vor.u32 %v19373_v30, %v16589_v33  ;;  %v11482_v37 = vpop.f32.mrf.mxu1 }
 0x5a6   : > { %11701 = vmatpush.bf16.msra.mxu2 %v16000_v12  ;;  %v19305_v41 = vld [vmem:[%s20282_s11 + $0x1f8c] sm:$0xf]  ;;  %v16317_v13 = vld [vmem:[%s20282_s11 + $0x1f98] sm:$0xf0] }
 0x5a7   : > { %11714 = vmatpush.bf16.msra.mxu3 %v16128_v62  ;;  %v16445_v52 = vld [vmem:[%s20282_s11 + $0x2098] sm:$0xf0]  ;;  %v19369_v46 = vld [vmem:[%s20282_s11 + $0x218c] sm:$0xf]  ;;  %v16320_v20 = vor.u32 %v19305_v41, %v16317_v13 }
 0x5a8   : > { %11676 = vmatmul.bf16.vlgmr.msra.gmra.mxu0 %v20848_v56  ;;  %11689 = vmatmul.bf16.vlgmr.msra.gmra.mxu1 %v20855_v0  ;;  %v16336_v56 = vor.u32 %v19309_v23, %v16333_v47  ;;  %v16720_v0 = vor.u32 %v19405_v27, %v16717_v43  ;;  %v16573_v17 = vld [vmem:[%s20282_s11 + $0x2198] sm:$0xf0]  ;;  %v19401_v40 = vld [vmem:[%s20282_s11 + $0x228c] sm:$0xf] }
 0x5a9   : > { %11720 = vmatpush.bf16.msrb.mxu0 %v16368_v11  ;;  %11733 = vmatpush.bf16.msrb.mxu1 %v16496_v50  ;;  %v16701_v34 = vld [vmem:[%s20282_s11 + $0x2298] sm:$0xf0]  ;;  %v16576_v53 = vor.u32 %v19369_v46, %v16573_v17  ;;  %v19301_v10 = vld [vmem:[%s20282_s11 + $0x1f6c] sm:$0xf] }
 0x5aa   : > { %11746 = vmatpush.bf16.msrb.mxu2 %v16624_v38  ;;  %11715 = vmatmul.bf16.vlgmr.msra.gmra.mxu3 %v20857_v3  ;;  %v11469_v3 = vpop.f32.mrf.mxu0  ;;  %v16301_v21 = vld [vmem:[%s20282_s11 + $0x1f78] sm:$0xf0]  ;;  %v19333_v36 = vld [vmem:[%s20282_s11 + $0x206c] sm:$0xf]  ;;  %v16704_v25 = vor.u32 %v19401_v40, %v16701_v34 }
 0x5ab   : > { %11759 = vmatpush.bf16.msrb.mxu3 %v16752_v19  ;;  %11702 = vmatmul.bf16.vlgmr.msra.gmra.mxu2 %v20859_v4  ;;  %v19337_v4 = vld [vmem:[%s20282_s11 + $0x208c] sm:$0xf]  ;;  %v11470_v51 = vadd.f32 %v11469_v3, %v23385_v49  ;;  %v16429_v24 = vld [vmem:[%s20282_s11 + $0x2078] sm:$0xf0]  ;;  %v16304_v57 = vor.u32 %v19301_v10, %v16301_v21 }
 0x5ac   : > { %v16448_v32 = vor.u32 %v19337_v4, %v16445_v52  ;;  %v19365_v35 = vld [vmem:[%s20282_s11 + $0x216c] sm:$0xf]  ;;  %v16557_v49 = vld [vmem:[%s20282_s11 + $0x2178] sm:$0xf0]  ;;  %v16432_v28 = vor.u32 %v19333_v36, %v16429_v24 }
 0x5ad   : > { %11721 = vmatpush.bf16.msrb.mxu0 %v16352_v44  ;;  %11734 = vmatpush.bf16.msrb.mxu1 %v16480_v54  ;;  %v11483_v8 = vadd.f32 %v11482_v37, %v11470_v51  ;;  %v19397_v6 = vld [vmem:[%s20282_s11 + $0x226c] sm:$0xf]  ;;  %v16685_v22 = vld [vmem:[%s20282_s11 + $0x2278] sm:$0xf0]  ;;  %v16560_v12 = vor.u32 %v19365_v35, %v16557_v49  ;;  %v11508_v19 = vpop.f32.mrf.mxu3  ;;  %v11484_v14 = vpop.f32.mrf.mxu1 }
 0x5ae   : > { %11747 = vmatpush.bf16.msrb.mxu2 %v16608_v16  ;;  %v19297_v2 = vld [vmem:[%s20282_s11 + $0x1f4c] sm:$0xf]  ;;  %v16285_v15 = vld [vmem:[%s20282_s11 + $0x1f58] sm:$0xf0]  ;;  %v16688_v11 = vor.u32 %v19397_v6, %v16685_v22  ;;  %v11495_v50 = vpop.f32.mrf.mxu2 }
 0x5af   : > { %11760 = vmatpush.bf16.msrb.mxu3 %v16736_v39  ;;  %v19329_v62 = vld [vmem:[%s20282_s11 + $0x204c] sm:$0xf]  ;;  %v16413_v38 = vld [vmem:[%s20282_s11 + $0x2058] sm:$0xf0]  ;;  %v11496_v31 = vadd.f32 %v11495_v50, %v11483_v8  ;;  %v16288_v18 = vor.u32 %v19297_v2, %v16285_v15 }
 0x5b0   : > { %v19361_v7 = vld [vmem:[%s20282_s11 + $0x214c] sm:$0xf]  ;;  %v16541_v1 = vld [vmem:[%s20282_s11 + $0x2158] sm:$0xf0]  ;;  %v16416_v54 = vor.u32 %v19329_v62, %v16413_v38 }
 0x5b1   : > { %11722 = vmatpush.bf16.msrb.mxu0 %v16336_v56  ;;  %11735 = vmatpush.bf16.msrb.mxu1 %v16464_v29  ;;  %v19393_v9 = vld [vmem:[%s20282_s11 + $0x224c] sm:$0xf]  ;;  %v16669_v58 = vld [vmem:[%s20282_s11 + $0x2258] sm:$0xf0]  ;;  %v23456_v44 = vadd.f32 %v11508_v19, %v11496_v31  ;;  %v16544_v16 = vor.u32 %v19361_v7, %v16541_v1 }
 0x5b2   : > { %11748 = vmatpush.bf16.msrb.mxu2 %v16592_v55  ;;  %v11471_v26 = vpop.f32.mrf.mxu0  ;;  %v19293_v23 = vld [vmem:[%s20282_s11 + $0x1f2c] sm:$0xf]  ;;  %v16269_v47 = vld [vmem:[%s20282_s11 + $0x1f38] sm:$0xf0]  ;;  %v16672_v39 = vor.u32 %v19393_v9, %v16669_v58 }
 0x5b3   : > { %11761 = vmatpush.bf16.msrb.mxu3 %v16720_v0  ;;  %v19325_v63 = vld [vmem:[%s20282_s11 + $0x202c] sm:$0xf]  ;;  %v16397_v42 = vld [vmem:[%s20282_s11 + $0x2038] sm:$0xf0]  ;;  %v16272_v56 = vor.u32 %v19293_v23, %v16269_v47 }
 0x5b4   : > { %v19357_v30 = vld [vmem:[%s20282_s11 + $0x212c] sm:$0xf]  ;;  %v16525_v33 = vld [vmem:[%s20282_s11 + $0x2138] sm:$0xf0]  ;;  %v16400_v41 = vor.u32 %v19325_v63, %v16397_v42 }
 0x5b5   : > { %11723 = vmatpush.bf16.msrb.mxu0 %v16320_v20  ;;  %11736 = vmatpush.bf16.msrb.mxu1 %v16448_v32  ;;  %v19389_v27 = vld [vmem:[%s20282_s11 + $0x222c] sm:$0xf]  ;;  %v16653_v43 = vld [vmem:[%s20282_s11 + $0x2238] sm:$0xf0]  ;;  %v16528_v13 = vor.u32 %v19357_v30, %v16525_v33  ;;  %v11510_v32 = vpop.f32.mrf.mxu3 }
 0x5b6   : > { %11749 = vmatpush.bf16.msrb.mxu2 %v16576_v53  ;;  %v19289_v29 = vld [vmem:[%s20282_s11 + $0x1f0c] sm:$0xf]  ;;  %v16253_v55 = vld [vmem:[%s20282_s11 + $0x1f18] sm:$0xf0]  ;;  %v16656_v46 = vor.u32 %v19389_v27, %v16653_v43  ;;  %v11497_v34 = vpop.f32.mrf.mxu2 }
 0x5b7   : > { %11762 = vmatpush.bf16.msrb.mxu3 %v16704_v25  ;;  %v19321_v4 = vld [vmem:[%s20282_s11 + $0x200c] sm:$0xf]  ;;  %v16381_v0 = vld [vmem:[%s20282_s11 + $0x2018] sm:$0xf0]  ;;  %v16256_v53 = vor.u32 %v19289_v29, %v16253_v55 }
 0x5b8   : > { %v19353_v52 = vld [vmem:[%s20282_s11 + $0x210c] sm:$0xf]  ;;  %v16509_v17 = vld [vmem:[%s20282_s11 + $0x2118] sm:$0xf0]  ;;  %v16384_v25 = vor.u32 %v19321_v4, %v16381_v0 }
 0x5b9   : > { %11724 = vmatpush.bf16.msrb.mxu0 %v16304_v57  ;;  %11737 = vmatpush.bf16.msrb.mxu1 %v16432_v28  ;;  %v19385_v3 = vld [vmem:[%s20282_s11 + $0x220c] sm:$0xf]  ;;  %v16637_v40 = vld [vmem:[%s20282_s11 + $0x2218] sm:$0xf0]  ;;  %v16512_v8 = vor.u32 %v19353_v52, %v16509_v17 }
 0x5ba   : > { %11750 = vmatpush.bf16.msrb.mxu2 %v16560_v12  ;;  %v19445_v51 = vld [vmem:[%s20282_s11 + $0x23ec] sm:$0xf]  ;;  %v16877_v20 = vld [vmem:[%s20282_s11 + $0x23f8] sm:$0xf0]  ;;  %v16640_v49 = vor.u32 %v19385_v3, %v16637_v40 }
 0x5bb   : > { %11763 = vmatpush.bf16.msrb.mxu3 %v16688_v11  ;;  %v19477_v37 = vld [vmem:[%s20282_s11 + $0x24ec] sm:$0xf]  ;;  %v17005_v10 = vld [vmem:[%s20282_s11 + $0x24f8] sm:$0xf0]  ;;  %v16880_v6 = vor.u32 %v19445_v51, %v16877_v20 }
 0x5bc   : > { %v19509_v21 = vld [vmem:[%s20282_s11 + $0x25ec] sm:$0xf]  ;;  %v17133_v36 = vld [vmem:[%s20282_s11 + $0x25f8] sm:$0xf0]  ;;  %v17008_v22 = vor.u32 %v19477_v37, %v17005_v10 }
 0x5bd   : > { %11725 = vmatpush.bf16.msrb.mxu0 %v16288_v18  ;;  %11738 = vmatpush.bf16.msrb.mxu1 %v16416_v54  ;;  %v19541_v24 = vld [vmem:[%s20282_s11 + $0x26ec] sm:$0xf]  ;;  %v17261_v35 = vld [vmem:[%s20282_s11 + $0x26f8] sm:$0xf0]  ;;  %v17136_v57 = vor.u32 %v19509_v21, %v17133_v36 }
 0x5be   : > { %11751 = vmatpush.bf16.msrb.mxu2 %v16544_v16  ;;  %v19441_v28 = vld [vmem:[%s20282_s11 + $0x23cc] sm:$0xf]  ;;  %v16861_v12 = vld [vmem:[%s20282_s11 + $0x23d8] sm:$0xf0]  ;;  %v17264_v15 = vor.u32 %v19541_v24, %v17261_v35 }
 0x5bf   : > { %11764 = vmatpush.bf16.msrb.mxu3 %v16672_v39  ;;  %v19473_v2 = vld [vmem:[%s20282_s11 + $0x24cc] sm:$0xf]  ;;  %v16989_v62 = vld [vmem:[%s20282_s11 + $0x24d8] sm:$0xf0]  ;;  %v16864_v1 = vor.u32 %v19441_v28, %v16861_v12 }
 0x5c0   : > { %v19505_v11 = vld [vmem:[%s20282_s11 + $0x25cc] sm:$0xf]  ;;  %v17117_v50 = vld [vmem:[%s20282_s11 + $0x25d8] sm:$0xf0]  ;;  %v16992_v31 = vor.u32 %v19473_v2, %v16989_v62 }
 0x5c1   : > { %11726 = vmatpush.bf16.msrb.mxu0 %v16272_v56  ;;  %11739 = vmatpush.bf16.msrb.mxu1 %v16400_v41  ;;  %v19537_v38 = vld [vmem:[%s20282_s11 + $0x26cc] sm:$0xf]  ;;  %v17245_v7 = vld [vmem:[%s20282_s11 + $0x26d8] sm:$0xf0]  ;;  %v17120_v19 = vor.u32 %v19505_v11, %v17117_v50 }
 0x5c2   : > { %11752 = vmatpush.bf16.msrb.mxu2 %v16528_v13  ;;  %v19437_v9 = vld [vmem:[%s20282_s11 + $0x23ac] sm:$0xf]  ;;  %v16845_v58 = vld [vmem:[%s20282_s11 + $0x23b8] sm:$0xf0]  ;;  %v17248_v18 = vor.u32 %v19537_v38, %v17245_v7 }
 0x5c3   : > { %11765 = vmatpush.bf16.msrb.mxu3 %v16656_v46  ;;  %v19469_v26 = vld [vmem:[%s20282_s11 + $0x24ac] sm:$0xf]  ;;  %v16973_v14 = vld [vmem:[%s20282_s11 + $0x24b8] sm:$0xf0] }
 0x5c4   : > { %v19501_v54 = vld [vmem:[%s20282_s11 + $0x25ac] sm:$0xf]  ;;  %v17101_v16 = vld [vmem:[%s20282_s11 + $0x25b8] sm:$0xf0]  ;;  %v16976_v63 = vor.u32 %v19469_v26, %v16973_v14 }
 0x5c5   : > { %11727 = vmatpush.bf16.msrb.mxu0 %v16256_v53  ;;  %11740 = vmatpush.bf16.msrb.mxu1 %v16384_v25  ;;  %v19533_v23 = vld [vmem:[%s20282_s11 + $0x26ac] sm:$0xf]  ;;  %v17229_v47 = vld [vmem:[%s20282_s11 + $0x26b8] sm:$0xf0]  ;;  %v17104_v39 = vor.u32 %v19501_v54, %v17101_v16  ;;  %v11534_v13 = vpop.f32.mrf.mxu1 }
 0x5c6   : > { %11753 = vmatpush.bf16.msrb.mxu2 %v16512_v8  ;;  %v19433_v42 = vld [vmem:[%s20282_s11 + $0x238c] sm:$0xf]  ;;  %v16829_v30 = vld [vmem:[%s20282_s11 + $0x2398] sm:$0xf0] }
 0x5c7   : > { %11766 = vmatpush.bf16.msrb.mxu3 %v16640_v49  ;;  %v16957_v33 = vld [vmem:[%s20282_s11 + $0x2498] sm:$0xf0]  ;;  %v19497_v27 = vld [vmem:[%s20282_s11 + $0x258c] sm:$0xf]  ;;  %v16832_v41 = vor.u32 %v19433_v42, %v16829_v30 }
 0x5c8   : > { %11728 = vmatmul.bf16.vlgmr.msrb.gmra.mxu0 %v20861_v5  ;;  %11741 = vmatmul.bf16.vlgmr.msrb.gmra.mxu1 %v23943_v60  ;;  %v16848_v5 = vor.u32 %v19437_v9, %v16845_v58  ;;  %v17232_v60 = vor.u32 %v19533_v23, %v17229_v47  ;;  %v17085_v43 = vld [vmem:[%s20282_s11 + $0x2598] sm:$0xf0]  ;;  %v19529_v56 = vld [vmem:[%s20282_s11 + $0x268c] sm:$0xf] }
 0x5c9   : > { %11772 = vmatpush.bf16.msra.mxu0 %v16880_v6  ;;  %11785 = vmatpush.bf16.msra.mxu1 %v17008_v22  ;;  %v17213_v29 = vld [vmem:[%s20282_s11 + $0x2698] sm:$0xf0]  ;;  %v17088_v0 = vor.u32 %v19497_v27, %v17085_v43  ;;  %v19429_v52 = vld [vmem:[%s20282_s11 + $0x236c] sm:$0xf] }
 0x5ca   : > { %11798 = vmatpush.bf16.msra.mxu2 %v17136_v57  ;;  %11767 = vmatmul.bf16.vlgmr.msrb.gmra.mxu3 %v23950_v48  ;;  %v11521_v48 = vpop.f32.mrf.mxu0  ;;  %v16813_v46 = vld [vmem:[%s20282_s11 + $0x2378] sm:$0xf0]  ;;  %v19461_v17 = vld [vmem:[%s20282_s11 + $0x246c] sm:$0xf]  ;;  %v17216_v3 = vor.u32 %v19529_v56, %v17213_v29 }
 0x5cb   : > { %11811 = vmatpush.bf16.msra.mxu3 %v17264_v15  ;;  %11754 = vmatmul.bf16.vlgmr.msrb.gmra.mxu2 %v23944_v45  ;;  %v19465_v45 = vld [vmem:[%s20282_s11 + $0x248c] sm:$0xf]  ;;  %v11522_v55 = vadd.f32 %v11521_v48, %v23456_v44  ;;  %v16941_v34 = vld [vmem:[%s20282_s11 + $0x2478] sm:$0xf0]  ;;  %v16816_v32 = vor.u32 %v19429_v52, %v16813_v46 }
 0x5cc   : > { %v16960_v4 = vor.u32 %v19465_v45, %v16957_v33  ;;  %v19493_v51 = vld [vmem:[%s20282_s11 + $0x256c] sm:$0xf]  ;;  %v17069_v44 = vld [vmem:[%s20282_s11 + $0x2578] sm:$0xf0]  ;;  %v16944_v53 = vor.u32 %v19461_v17, %v16941_v34 }
 0x5cd   : > { %11773 = vmatpush.bf16.msra.mxu0 %v16864_v1  ;;  %11786 = vmatpush.bf16.msra.mxu1 %v16992_v31  ;;  %v11535_v40 = vadd.f32 %v11534_v13, %v11522_v55  ;;  %v19525_v20 = vld [vmem:[%s20282_s11 + $0x266c] sm:$0xf]  ;;  %v17197_v37 = vld [vmem:[%s20282_s11 + $0x2678] sm:$0xf0]  ;;  %v17072_v10 = vor.u32 %v19493_v51, %v17069_v44  ;;  %v11560_v57 = vpop.f32.mrf.mxu3  ;;  %v11536_v62 = vpop.f32.mrf.mxu1 }
 0x5ce   : > { %11799 = vmatpush.bf16.msra.mxu2 %v17120_v19  ;;  %v19425_v21 = vld [vmem:[%s20282_s11 + $0x234c] sm:$0xf]  ;;  %v16797_v36 = vld [vmem:[%s20282_s11 + $0x2358] sm:$0xf0]  ;;  %v17200_v8 = vor.u32 %v19525_v20, %v17197_v37  ;;  %v11547_v24 = vpop.f32.mrf.mxu2 }
 0x5cf   : > { %11812 = vmatpush.bf16.msra.mxu3 %v17248_v18  ;;  %v19457_v25 = vld [vmem:[%s20282_s11 + $0x244c] sm:$0xf]  ;;  %v16925_v35 = vld [vmem:[%s20282_s11 + $0x2458] sm:$0xf0]  ;;  %v11548_v22 = vadd.f32 %v11547_v24, %v11535_v40  ;;  %v16800_v15 = vor.u32 %v19425_v21, %v16797_v36 }
 0x5d0   : > { %v19489_v49 = vld [vmem:[%s20282_s11 + $0x254c] sm:$0xf]  ;;  %v17053_v6 = vld [vmem:[%s20282_s11 + $0x2558] sm:$0xf0]  ;;  %v16928_v50 = vor.u32 %v19457_v25, %v16925_v35 }
 0x5d1   : > { %11774 = vmatpush.bf16.msra.mxu0 %v16848_v5  ;;  %11787 = vmatpush.bf16.msra.mxu1 %v16976_v63  ;;  %v19521_v28 = vld [vmem:[%s20282_s11 + $0x264c] sm:$0xf]  ;;  %v17181_v12 = vld [vmem:[%s20282_s11 + $0x2658] sm:$0xf0]  ;;  %v23527_v11 = vadd.f32 %v11560_v57, %v11548_v22  ;;  %v17056_v38 = vor.u32 %v19489_v49, %v17053_v6 }
 0x5d2   : > { %11800 = vmatpush.bf16.msra.mxu2 %v17104_v39  ;;  %v11523_v2 = vpop.f32.mrf.mxu0  ;;  %v19421_v7 = vld [vmem:[%s20282_s11 + $0x232c] sm:$0xf]  ;;  %v16781_v1 = vld [vmem:[%s20282_s11 + $0x2338] sm:$0xf0]  ;;  %v17184_v19 = vor.u32 %v19521_v28, %v17181_v12 }
 0x5d3   : > { %11813 = vmatpush.bf16.msra.mxu3 %v17232_v60  ;;  %v19453_v31 = vld [vmem:[%s20282_s11 + $0x242c] sm:$0xf]  ;;  %v16909_v9 = vld [vmem:[%s20282_s11 + $0x2438] sm:$0xf0]  ;;  %v16784_v54 = vor.u32 %v19421_v7, %v16781_v1  ;;  %v23957_v7 = vld [vmem:[#allocation22_spill] sm:$0xff] }
 0x5d4   : > { %v19485_v58 = vld [vmem:[%s20282_s11 + $0x252c] sm:$0xf]  ;;  %v17037_v26 = vld [vmem:[%s20282_s11 + $0x2538] sm:$0xf0]  ;;  %v16912_v47 = vor.u32 %v19453_v31, %v16909_v9 }
 0x5d5   : > { %11775 = vmatpush.bf16.msra.mxu0 %v16832_v41  ;;  %11788 = vmatpush.bf16.msra.mxu1 %v16960_v4  ;;  %v19517_v18 = vld [vmem:[%s20282_s11 + $0x262c] sm:$0xf]  ;;  %v17165_v14 = vld [vmem:[%s20282_s11 + $0x2638] sm:$0xf0]  ;;  %v17040_v5 = vor.u32 %v19485_v58, %v17037_v26  ;;  %v11562_v29 = vpop.f32.mrf.mxu3 }
 0x5d6   : > { %11801 = vmatpush.bf16.msra.mxu2 %v17088_v0  ;;  %v19417_v16 = vld [vmem:[%s20282_s11 + $0x230c] sm:$0xf]  ;;  %v16765_v23 = vld [vmem:[%s20282_s11 + $0x2318] sm:$0xf0]  ;;  %v17168_v30 = vor.u32 %v19517_v18, %v17165_v14  ;;  %v11549_v27 = vpop.f32.mrf.mxu2 }
 0x5d7   : > { %11814 = vmatpush.bf16.msra.mxu3 %v17216_v3  ;;  %v19449_v63 = vld [vmem:[%s20282_s11 + $0x240c] sm:$0xf]  ;;  %v16893_v39 = vld [vmem:[%s20282_s11 + $0x2418] sm:$0xf0]  ;;  %v16768_v55 = vor.u32 %v19417_v16, %v16765_v23 }
 0x5d8   : > { %v19481_v42 = vld [vmem:[%s20282_s11 + $0x250c] sm:$0xf]  ;;  %v17021_v45 = vld [vmem:[%s20282_s11 + $0x2518] sm:$0xf0]  ;;  %v16896_v0 = vor.u32 %v19449_v63, %v16893_v39 }
 0x5d9   : > { %11776 = vmatpush.bf16.msra.mxu0 %v16816_v32  ;;  %11789 = vmatpush.bf16.msra.mxu1 %v16944_v53  ;;  %v19513_v60 = vld [vmem:[%s20282_s11 + $0x260c] sm:$0xf]  ;;  %v17149_v33 = vld [vmem:[%s20282_s11 + $0x2618] sm:$0xf0]  ;;  %v17024_v52 = vor.u32 %v19481_v42, %v17021_v45 }
 0x5da   : > { %11802 = vmatpush.bf16.msra.mxu2 %v17072_v10  ;;  %v19573_v43 = vld [vmem:[%s20282_s11 + $0x27ec] sm:$0xf]  ;;  %v17389_v48 = vld [vmem:[%s20282_s11 + $0x27f8] sm:$0xf0]  ;;  %v17152_v3 = vor.u32 %v19513_v60, %v17149_v33 }
 0x5db   : > { %11815 = vmatpush.bf16.msra.mxu3 %v17200_v8  ;;  %v19605_v56 = vld [vmem:[%s20282_s11 + $0x28ec] sm:$0xf]  ;;  %v17517_v41 = vld [vmem:[%s20282_s11 + $0x28f8] sm:$0xf0]  ;;  %v17392_v40 = vor.u32 %v19573_v43, %v17389_v48 }
 0x5dc   : > { %v19637_v13 = vld [vmem:[%s20282_s11 + $0x29ec] sm:$0xf]  ;;  %v17645_v4 = vld [vmem:[%s20282_s11 + $0x29f8] sm:$0xf0]  ;;  %v17520_v34 = vor.u32 %v19605_v56, %v17517_v41 }
 0x5dd   : > { %11777 = vmatpush.bf16.msra.mxu0 %v16800_v15  ;;  %11790 = vmatpush.bf16.msra.mxu1 %v16928_v50  ;;  %v19669_v46 = vld [vmem:[%s20282_s11 + $0x2aec] sm:$0xf]  ;;  %v17773_v17 = vld [vmem:[%s20282_s11 + $0x2af8] sm:$0xf0]  ;;  %v17648_v51 = vor.u32 %v19637_v13, %v17645_v4 }
 0x5de   : > { %11803 = vmatpush.bf16.msra.mxu2 %v17056_v38  ;;  %v19569_v44 = vld [vmem:[%s20282_s11 + $0x27cc] sm:$0xf]  ;;  %v17373_v20 = vld [vmem:[%s20282_s11 + $0x27d8] sm:$0xf0]  ;;  %v17776_v32 = vor.u32 %v19669_v46, %v17773_v17 }
 0x5df   : > { %11816 = vmatpush.bf16.msra.mxu3 %v17184_v19  ;;  %v19601_v37 = vld [vmem:[%s20282_s11 + $0x28cc] sm:$0xf]  ;;  %v17501_v53 = vld [vmem:[%s20282_s11 + $0x28d8] sm:$0xf0]  ;;  %v17376_v8 = vor.u32 %v19569_v44, %v17373_v20 }
 0x5e0   : > { %v19633_v10 = vld [vmem:[%s20282_s11 + $0x29cc] sm:$0xf]  ;;  %v17629_v21 = vld [vmem:[%s20282_s11 + $0x29d8] sm:$0xf0]  ;;  %v17504_v24 = vor.u32 %v19601_v37, %v17501_v53 }
 0x5e1   : > { %11778 = vmatpush.bf16.msra.mxu0 %v16784_v54  ;;  %11791 = vmatpush.bf16.msra.mxu1 %v16912_v47  ;;  %v19665_v36 = vld [vmem:[%s20282_s11 + $0x2acc] sm:$0xf]  ;;  %v17757_v25 = vld [vmem:[%s20282_s11 + $0x2ad8] sm:$0xf0]  ;;  %v17632_v35 = vor.u32 %v19633_v10, %v17629_v21 }
 0x5e2   : > { %11804 = vmatpush.bf16.msra.mxu2 %v17040_v5  ;;  %v19565_v49 = vld [vmem:[%s20282_s11 + $0x27ac] sm:$0xf]  ;;  %v17357_v6 = vld [vmem:[%s20282_s11 + $0x27b8] sm:$0xf0]  ;;  %v17760_v57 = vor.u32 %v19665_v36, %v17757_v25 }
 0x5e3   : > { %11817 = vmatpush.bf16.msra.mxu3 %v17168_v30  ;;  %v19597_v22 = vld [vmem:[%s20282_s11 + $0x28ac] sm:$0xf]  ;;  %v17485_v28 = vld [vmem:[%s20282_s11 + $0x28b8] sm:$0xf0] }
 0x5e4   : > { %v19629_v12 = vld [vmem:[%s20282_s11 + $0x29ac] sm:$0xf]  ;;  %v17613_v2 = vld [vmem:[%s20282_s11 + $0x29b8] sm:$0xf0]  ;;  %v17488_v1 = vor.u32 %v19597_v22, %v17485_v28 }
 0x5e5   : > { %11779 = vmatpush.bf16.msra.mxu0 %v16768_v55  ;;  %11792 = vmatpush.bf16.msra.mxu1 %v16896_v0  ;;  %v23955_v15 = vld [vmem:[#allocation23_spill] sm:$0xff]  ;;  %v23956_v62 = vld [vmem:[#allocation21_spill] sm:$0xff]  ;;  %v17616_v31 = vor.u32 %v19629_v12, %v17613_v2  ;;  %v11573_v16 = vpop.f32.mrf.mxu0  ;;  %v11586_v39 = vpop.f32.mrf.mxu1 }
 0x5e6   : > { %11805 = vmatpush.bf16.msra.mxu2 %v17024_v52  ;;  %v19661_v50 = vld [vmem:[%s20282_s11 + $0x2aac] sm:$0xf]  ;;  %v17741_v38 = vld [vmem:[%s20282_s11 + $0x2ab8] sm:$0xf0]  ;;  %v11574_v5 = vadd.f32 %v11573_v16, %v23527_v11 }
 0x5e7   : > { %11818 = vmatpush.bf16.msra.mxu3 %v17152_v3  ;;  %v19561_v19 = vld [vmem:[%s20282_s11 + $0x278c] sm:$0xf]  ;;  %v17341_v9 = vld [vmem:[%s20282_s11 + $0x2798] sm:$0xf0]  ;;  %v17744_v26 = vor.u32 %v19661_v50, %v17741_v38 }
 0x5e8   : > { %11780 = vmatmul.bf16.vlgmr.msra.gmra.mxu0 %v23952_v59  ;;  %11793 = vmatmul.bf16.vlgmr.msra.gmra.mxu1 %v23956_v62  ;;  %v17360_v59 = vor.u32 %v19565_v49, %v17357_v6  ;;  %v19593_v58 = vld [vmem:[%s20282_s11 + $0x288c] sm:$0xf]  ;;  %v17469_v18 = vld [vmem:[%s20282_s11 + $0x2898] sm:$0xf0]  ;;  %v17344_v63 = vor.u32 %v19561_v19, %v17341_v9  ;;  %v11587_v43 = vadd.f32 %v11586_v39, %v11574_v5 }
 0x5e9   : > { %11824 = vmatpush.bf16.msrb.mxu0 %v17392_v40  ;;  %11837 = vmatpush.bf16.msrb.mxu1 %v17520_v34  ;;  %v19625_v14 = vld [vmem:[%s20282_s11 + $0x298c] sm:$0xf]  ;;  %v17597_v54 = vld [vmem:[%s20282_s11 + $0x2998] sm:$0xf0]  ;;  %v17472_v42 = vor.u32 %v19593_v58, %v17469_v18 }
 0x5ea   : > { %11850 = vmatpush.bf16.msrb.mxu2 %v17648_v51  ;;  %11819 = vmatmul.bf16.vlgmr.msra.gmra.mxu3 %v23957_v7  ;;  %v19657_v23 = vld [vmem:[%s20282_s11 + $0x2a8c] sm:$0xf]  ;;  %v17725_v47 = vld [vmem:[%s20282_s11 + $0x2a98] sm:$0xf0]  ;;  %v17600_v30 = vor.u32 %v19625_v14, %v17597_v54 }
 0x5eb   : > { %11863 = vmatpush.bf16.msrb.mxu3 %v17776_v32  ;;  %11806 = vmatmul.bf16.vlgmr.msra.gmra.mxu2 %v23955_v15  ;;  %v19557_v45 = vld [vmem:[%s20282_s11 + $0x276c] sm:$0xf]  ;;  %v17325_v60 = vld [vmem:[%s20282_s11 + $0x2778] sm:$0xf0]  ;;  %v17728_v27 = vor.u32 %v19657_v23, %v17725_v47 }
 0x5ec   : > { %v19589_v33 = vld [vmem:[%s20282_s11 + $0x286c] sm:$0xf]  ;;  %v17453_v48 = vld [vmem:[%s20282_s11 + $0x2878] sm:$0xf0]  ;;  %v17328_v41 = vor.u32 %v19557_v45, %v17325_v60 }
 0x5ed   : > { %11825 = vmatpush.bf16.msrb.mxu0 %v17376_v8  ;;  %11838 = vmatpush.bf16.msrb.mxu1 %v17504_v24  ;;  %v19621_v56 = vld [vmem:[%s20282_s11 + $0x296c] sm:$0xf]  ;;  %v17581_v11 = vld [vmem:[%s20282_s11 + $0x2978] sm:$0xf0]  ;;  %v17456_v13 = vor.u32 %v19589_v33, %v17453_v48  ;;  %v11612_v20 = vpop.f32.mrf.mxu3  ;;  %v11575_v53 = vpop.f32.mrf.mxu0 }
 0x5ee   : > { %11851 = vmatpush.bf16.msrb.mxu2 %v17632_v35  ;;  %v19653_v29 = vld [vmem:[%s20282_s11 + $0x2a6c] sm:$0xf]  ;;  %v17709_v55 = vld [vmem:[%s20282_s11 + $0x2a78] sm:$0xf0]  ;;  %v17584_v4 = vor.u32 %v19621_v56, %v17581_v11  ;;  %v11599_v3 = vpop.f32.mrf.mxu2  ;;  %v11588_v21 = vpop.f32.mrf.mxu1 }
 0x5ef   : > { %11864 = vmatpush.bf16.msrb.mxu3 %v17760_v57  ;;  %v19553_v0 = vld [vmem:[%s20282_s11 + $0x274c] sm:$0xf]  ;;  %v17309_v52 = vld [vmem:[%s20282_s11 + $0x2758] sm:$0xf0]  ;;  %v17712_v17 = vor.u32 %v19653_v29, %v17709_v55  ;;  %v11600_v44 = vadd.f32 %v11599_v3, %v11587_v43  ;;  %v19914_v21 = vld [vmem:[#allocation1] sm:$0xff] }
 0x5f0   : > { %v19585_v46 = vld [vmem:[%s20282_s11 + $0x284c] sm:$0xf]  ;;  %v17437_v40 = vld [vmem:[%s20282_s11 + $0x2858] sm:$0xf0]  ;;  %v17312_v10 = vor.u32 %v19553_v0, %v17309_v52 }
 0x5f1   : > { %11826 = vmatpush.bf16.msrb.mxu0 %v17360_v59  ;;  %11839 = vmatpush.bf16.msrb.mxu1 %v17488_v1  ;;  %v19617_v34 = vld [vmem:[%s20282_s11 + $0x294c] sm:$0xf]  ;;  %v17565_v51 = vld [vmem:[%s20282_s11 + $0x2958] sm:$0xf0]  ;;  %v23598_v36 = vadd.f32 %v11612_v20, %v11600_v44  ;;  %v17440_v25 = vor.u32 %v19585_v46, %v17437_v40  ;;  %v23958_v44 = vld [vmem:[#allocation24_spill] sm:$0xff] }
 0x5f2   : > { %11852 = vmatpush.bf16.msrb.mxu2 %v17616_v31  ;;  %v19649_v37 = vld [vmem:[%s20282_s11 + $0x2a4c] sm:$0xf]  ;;  %v17693_v32 = vld [vmem:[%s20282_s11 + $0x2a58] sm:$0xf0]  ;;  %v17568_v8 = vor.u32 %v19617_v34, %v17565_v51 }
 0x5f3   : > { %11865 = vmatpush.bf16.msrb.mxu3 %v17744_v26  ;;  %v19549_v24 = vld [vmem:[%s20282_s11 + $0x272c] sm:$0xf]  ;;  %v17293_v35 = vld [vmem:[%s20282_s11 + $0x2738] sm:$0xf0]  ;;  %v17696_v6 = vor.u32 %v19649_v37, %v17693_v32 }
 0x5f4   : > { %v19581_v49 = vld [vmem:[%s20282_s11 + $0x282c] sm:$0xf]  ;;  %v17421_v22 = vld [vmem:[%s20282_s11 + $0x2838] sm:$0xf0]  ;;  %v17296_v15 = vor.u32 %v19549_v24, %v17293_v35 }
 0x5f5   : > { %11827 = vmatpush.bf16.msrb.mxu0 %v17344_v63  ;;  %11840 = vmatpush.bf16.msrb.mxu1 %v17472_v42  ;;  %v19613_v57 = vld [vmem:[%s20282_s11 + $0x292c] sm:$0xf]  ;;  %v17549_v28 = vld [vmem:[%s20282_s11 + $0x2938] sm:$0xf0]  ;;  %v17424_v38 = vor.u32 %v19581_v49, %v17421_v22  ;;  %v11614_v23 = vpop.f32.mrf.mxu3 }
 0x5f6   : > { %11853 = vmatpush.bf16.msrb.mxu2 %v17600_v30  ;;  %v19645_v12 = vld [vmem:[%s20282_s11 + $0x2a2c] sm:$0xf]  ;;  %v17677_v2 = vld [vmem:[%s20282_s11 + $0x2a38] sm:$0xf0]  ;;  %v17552_v7 = vor.u32 %v19613_v57, %v17549_v28  ;;  %v11601_v18 = vpop.f32.mrf.mxu2 }
 0x5f7   : > { %11866 = vmatpush.bf16.msrb.mxu3 %v17728_v27  ;;  %v19545_v62 = vld [vmem:[%s20282_s11 + $0x270c] sm:$0xf]  ;;  %v17277_v50 = vld [vmem:[%s20282_s11 + $0x2718] sm:$0xf0]  ;;  %v17680_v19 = vor.u32 %v19645_v12, %v17677_v2 }
 0x5f8   : > { %v19577_v59 = vld [vmem:[%s20282_s11 + $0x280c] sm:$0xf]  ;;  %v17405_v1 = vld [vmem:[%s20282_s11 + $0x2818] sm:$0xf0]  ;;  %v17280_v47 = vor.u32 %v19545_v62, %v17277_v50 }
 0x5f9   : > { %11828 = vmatpush.bf16.msrb.mxu0 %v17328_v41  ;;  %11841 = vmatpush.bf16.msrb.mxu1 %v17456_v13  ;;  %v19609_v31 = vld [vmem:[%s20282_s11 + $0x290c] sm:$0xf]  ;;  %v17533_v9 = vld [vmem:[%s20282_s11 + $0x2918] sm:$0xf0]  ;;  %v17408_v42 = vor.u32 %v19577_v59, %v17405_v1 }
 0x5fa   : > { %11854 = vmatpush.bf16.msrb.mxu2 %v17584_v4  ;;  %v19641_v58 = vld [vmem:[%s20282_s11 + $0x2a0c] sm:$0xf]  ;;  %v17661_v26 = vld [vmem:[%s20282_s11 + $0x2a18] sm:$0xf0]  ;;  %v17536_v30 = vor.u32 %v19609_v31, %v17533_v9 }
 0x5fb   : > { %11867 = vmatpush.bf16.msrb.mxu3 %v17712_v17  ;;  %v19701_v14 = vld [vmem:[%s20282_s11 + $0x2bec] sm:$0xf]  ;;  %v17901_v54 = vld [vmem:[%s20282_s11 + $0x2bf8] sm:$0xf0]  ;;  %v17664_v33 = vor.u32 %v19641_v58, %v17661_v26 }
 0x5fc   : > { %v19733_v16 = vld [vmem:[%s20282_s11 + $0x2cec] sm:$0xf]  ;;  %v18029_v5 = vld [vmem:[%s20282_s11 + $0x2cf8] sm:$0xf0]  ;;  %v17904_v27 = vor.u32 %v19701_v14, %v17901_v54 }
 0x5fd   : > { %11829 = vmatpush.bf16.msrb.mxu0 %v17312_v10  ;;  %11842 = vmatpush.bf16.msrb.mxu1 %v17440_v25  ;;  %v19765_v63 = vld [vmem:[%s20282_s11 + $0x2dec] sm:$0xf]  ;;  %v18157_v39 = vld [vmem:[%s20282_s11 + $0x2df8] sm:$0xf0]  ;;  %v18032_v43 = vor.u32 %v19733_v16, %v18029_v5 }
 0x5fe   : > { %11855 = vmatpush.bf16.msrb.mxu2 %v17568_v8  ;;  %v19797_v45 = vld [vmem:[%s20282_s11 + $0x2eec] sm:$0xf]  ;;  %v18285_v60 = vld [vmem:[%s20282_s11 + $0x2ef8] sm:$0xf0]  ;;  %v18160_v48 = vor.u32 %v19765_v63, %v18157_v39 }
 0x5ff   : > { %11868 = vmatpush.bf16.msrb.mxu3 %v17696_v6  ;;  %v19697_v56 = vld [vmem:[%s20282_s11 + $0x2bcc] sm:$0xf]  ;;  %v17885_v11 = vld [vmem:[%s20282_s11 + $0x2bd8] sm:$0xf0]  ;;  %v18288_v55 = vor.u32 %v19797_v45, %v18285_v60 }
 0x600   : > { %v19729_v29 = vld [vmem:[%s20282_s11 + $0x2ccc] sm:$0xf]  ;;  %v18013_v41 = vld [vmem:[%s20282_s11 + $0x2cd8] sm:$0xf0]  ;;  %v17888_v46 = vor.u32 %v19697_v56, %v17885_v11 }
 0x601   : > { %11830 = vmatpush.bf16.msrb.mxu0 %v17296_v15  ;;  %11843 = vmatpush.bf16.msrb.mxu1 %v17424_v38  ;;  %v19761_v13 = vld [vmem:[%s20282_s11 + $0x2dcc] sm:$0xf]  ;;  %v18141_v4 = vld [vmem:[%s20282_s11 + $0x2dd8] sm:$0xf0]  ;;  %v18016_v17 = vor.u32 %v19729_v29, %v18013_v41 }
 0x602   : > { %11856 = vmatpush.bf16.msrb.mxu2 %v17552_v7  ;;  %v19793_v0 = vld [vmem:[%s20282_s11 + $0x2ecc] sm:$0xf]  ;;  %v18269_v52 = vld [vmem:[%s20282_s11 + $0x2ed8] sm:$0xf0]  ;;  %v18144_v3 = vor.u32 %v19761_v13, %v18141_v4 }
 0x603   : > { %11869 = vmatpush.bf16.msrb.mxu3 %v17680_v19  ;;  %v19693_v40 = vld [vmem:[%s20282_s11 + $0x2bac] sm:$0xf]  ;;  %v17869_v34 = vld [vmem:[%s20282_s11 + $0x2bb8] sm:$0xf0]  ;;  %v18272_v20 = vor.u32 %v19793_v0, %v18269_v52 }
 0x604   : > { %v19725_v51 = vld [vmem:[%s20282_s11 + $0x2cac] sm:$0xf]  ;;  %v17997_v37 = vld [vmem:[%s20282_s11 + $0x2cb8] sm:$0xf0]  ;;  %v17872_v35 = vor.u32 %v19693_v40, %v17869_v34 }
 0x605   : > { %11831 = vmatpush.bf16.msrb.mxu0 %v17280_v47  ;;  %11844 = vmatpush.bf16.msrb.mxu1 %v17408_v42  ;;  %v19757_v32 = vld [vmem:[%s20282_s11 + $0x2dac] sm:$0xf]  ;;  %v18125_v53 = vld [vmem:[%s20282_s11 + $0x2db8] sm:$0xf0]  ;;  %v18000_v49 = vor.u32 %v19725_v51, %v17997_v37  ;;  %v11625_v50 = vpop.f32.mrf.mxu0  ;;  %v11638_v31 = vpop.f32.mrf.mxu1 }
 0x606   : > { %11857 = vmatpush.bf16.msrb.mxu2 %v17536_v30  ;;  %v19913_v10 = vld [vmem:[#allocation1 + $0x9] sm:$0xff]  ;;  %v18253_v8 = vld [vmem:[%s20282_s11 + $0x2eb8] sm:$0xf0]  ;;  %v18128_v6 = vor.u32 %v19757_v32, %v18125_v53  ;;  %v11626_v59 = vadd.f32 %v11625_v50, %v23598_v36 }
 0x607   : > { %11870 = vmatpush.bf16.msrb.mxu3 %v17664_v33  ;;  %v19789_v25 = vld [vmem:[%s20282_s11 + $0x2eac] sm:$0xf]  ;;  %v19915_v24 = vld [vmem:[#allocation1 + $0x12] sm:$0xff] }
 0x608   : > { %11832 = vmatmul.bf16.vlgmr.msrb.gmra.mxu0 %v23958_v44  ;;  %11845 = vmatmul.bf16.vlgmr.msrb.gmra.mxu1 %v19914_v21  ;;  %v19689_v22 = vld [vmem:[%s20282_s11 + $0x2b8c] sm:$0xf]  ;;  %v17853_v57 = vld [vmem:[%s20282_s11 + $0x2b98] sm:$0xf0]  ;;  %v18256_v12 = vor.u32 %v19789_v25, %v18253_v8  ;;  %v11639_v54 = vadd.f32 %v11638_v31, %v11626_v59  ;;  %v19918_v31 = vld [vmem:[#allocation1 + $0x2d] sm:$0xff] }
 0x609   : > { %11876 = vmatpush.bf16.msra.mxu0 %v17904_v27  ;;  %11889 = vmatpush.bf16.msra.mxu1 %v18032_v43  ;;  %v19721_v28 = vld [vmem:[%s20282_s11 + $0x2c8c] sm:$0xf]  ;;  %v17981_v2 = vld [vmem:[%s20282_s11 + $0x2c98] sm:$0xf0]  ;;  %v17856_v1 = vor.u32 %v19689_v22, %v17853_v57 }
 0x60a   : > { %11902 = vmatpush.bf16.msra.mxu2 %v18160_v48  ;;  %11871 = vmatmul.bf16.vlgmr.msrb.gmra.mxu3 %v19915_v24  ;;  %v19753_v15 = vld [vmem:[%s20282_s11 + $0x2d8c] sm:$0xf]  ;;  %v18109_v62 = vld [vmem:[%s20282_s11 + $0x2d98] sm:$0xf0]  ;;  %v17984_v19 = vor.u32 %v19721_v28, %v17981_v2 }
 0x60b   : > { %11915 = vmatpush.bf16.msra.mxu3 %v18288_v55  ;;  %11858 = vmatmul.bf16.vlgmr.msrb.gmra.mxu2 %v19913_v10  ;;  %v19785_v38 = vld [vmem:[%s20282_s11 + $0x2e8c] sm:$0xf]  ;;  %v18237_v7 = vld [vmem:[%s20282_s11 + $0x2e98] sm:$0xf0]  ;;  %v18112_v9 = vor.u32 %v19753_v15, %v18109_v62 }
 0x60c   : > { %v19685_v58 = vld [vmem:[%s20282_s11 + $0x2b6c] sm:$0xf]  ;;  %v17837_v26 = vld [vmem:[%s20282_s11 + $0x2b78] sm:$0xf0]  ;;  %v18240_v14 = vor.u32 %v19785_v38, %v18237_v7 }
 0x60d   : > { %11877 = vmatpush.bf16.msra.mxu0 %v17888_v46  ;;  %11890 = vmatpush.bf16.msra.mxu1 %v18016_v17  ;;  %v19717_v18 = vld [vmem:[%s20282_s11 + $0x2c6c] sm:$0xf]  ;;  %v17965_v16 = vld [vmem:[%s20282_s11 + $0x2c78] sm:$0xf0]  ;;  %v17840_v63 = vor.u32 %v19685_v58, %v17837_v26  ;;  %v11664_v29 = vpop.f32.mrf.mxu3  ;;  %v11627_v13 = vpop.f32.mrf.mxu0 }
 0x60e   : > { %11903 = vmatpush.bf16.msra.mxu2 %v18144_v3  ;;  %v19749_v23 = vld [vmem:[%s20282_s11 + $0x2d6c] sm:$0xf]  ;;  %v18093_v36 = vld [vmem:[%s20282_s11 + $0x2d78] sm:$0xf0]  ;;  %v17968_v39 = vor.u32 %v19717_v18, %v17965_v16  ;;  %v11651_v27 = vpop.f32.mrf.mxu2  ;;  %v11640_v0 = vpop.f32.mrf.mxu1 }
 0x60f   : > { %11916 = vmatpush.bf16.msra.mxu3 %v18272_v20  ;;  %v19781_v47 = vld [vmem:[%s20282_s11 + $0x2e6c] sm:$0xf]  ;;  %v18221_v5 = vld [vmem:[%s20282_s11 + $0x2e78] sm:$0xf0]  ;;  %v18096_v42 = vor.u32 %v19749_v23, %v18093_v36  ;;  %v11652_v11 = vadd.f32 %v11651_v27, %v11639_v54 }
 0x610   : > { %v19681_v30 = vld [vmem:[%s20282_s11 + $0x2b4c] sm:$0xf]  ;;  %v17821_v45 = vld [vmem:[%s20282_s11 + $0x2b58] sm:$0xf0]  ;;  %v18224_v33 = vor.u32 %v19781_v47, %v18221_v5 }
 0x611   : > { %11878 = vmatpush.bf16.msra.mxu0 %v17872_v35  ;;  %11891 = vmatpush.bf16.msra.mxu1 %v18000_v49  ;;  %v19713_v60 = vld [vmem:[%s20282_s11 + $0x2c4c] sm:$0xf]  ;;  %v17949_v43 = vld [vmem:[%s20282_s11 + $0x2c58] sm:$0xf0]  ;;  %v17824_v4 = vor.u32 %v19681_v30, %v17821_v45  ;;  %v11665_v52 = vadd.f32 %v11664_v29, %v11652_v11 }
 0x612   : > { %11904 = vmatpush.bf16.msra.mxu2 %v18128_v6  ;;  %v19745_v48 = vld [vmem:[%s20282_s11 + $0x2d4c] sm:$0xf]  ;;  %v18077_v56 = vld [vmem:[%s20282_s11 + $0x2d58] sm:$0xf0]  ;;  %v17952_v46 = vor.u32 %v19713_v60, %v17949_v43 }
 0x613   : > { %11917 = vmatpush.bf16.msra.mxu3 %v18256_v12  ;;  %v19777_v55 = vld [vmem:[%s20282_s11 + $0x2e4c] sm:$0xf]  ;;  %v18205_v41 = vld [vmem:[%s20282_s11 + $0x2e58] sm:$0xf0]  ;;  %v18080_v17 = vor.u32 %v19745_v48, %v18077_v56 }
 0x614   : > { %v19677_v3 = vld [vmem:[%s20282_s11 + $0x2b2c] sm:$0xf]  ;;  %v17805_v40 = vld [vmem:[%s20282_s11 + $0x2b38] sm:$0xf0]  ;;  %v18208_v51 = vor.u32 %v19777_v55, %v18205_v41 }
 0x615   : > { %11879 = vmatpush.bf16.msra.mxu0 %v17856_v1  ;;  %11892 = vmatpush.bf16.msra.mxu1 %v17984_v19  ;;  %v19709_v34 = vld [vmem:[%s20282_s11 + $0x2c2c] sm:$0xf]  ;;  %v17933_v44 = vld [vmem:[%s20282_s11 + $0x2c38] sm:$0xf0]  ;;  %v17808_v10 = vor.u32 %v19677_v3, %v17805_v40  ;;  %v11666_v15 = vpop.f32.mrf.mxu3 }
 0x616   : > { %11905 = vmatpush.bf16.msra.mxu2 %v18112_v9  ;;  %v19741_v20 = vld [vmem:[%s20282_s11 + $0x2d2c] sm:$0xf]  ;;  %v18061_v37 = vld [vmem:[%s20282_s11 + $0x2d38] sm:$0xf0]  ;;  %v17936_v21 = vor.u32 %v19709_v34, %v17933_v44  ;;  %v11653_v28 = vpop.f32.mrf.mxu2 }
 0x617   : > { %11918 = vmatpush.bf16.msra.mxu3 %v18240_v14  ;;  %v19773_v32 = vld [vmem:[%s20282_s11 + $0x2e2c] sm:$0xf]  ;;  %v18189_v53 = vld [vmem:[%s20282_s11 + $0x2e38] sm:$0xf0]  ;;  %v18064_v25 = vor.u32 %v19741_v20, %v18061_v37 }
 0x618   : > { %v19673_v8 = vld [vmem:[%s20282_s11 + $0x2b0c] sm:$0xf]  ;;  %v17789_v24 = vld [vmem:[%s20282_s11 + $0x2b18] sm:$0xf0]  ;;  %v18192_v49 = vor.u32 %v19773_v32, %v18189_v53 }
 0x619   : > { %11880 = vmatpush.bf16.msra.mxu0 %v17840_v63  ;;  %11893 = vmatpush.bf16.msra.mxu1 %v17968_v39  ;;  %v19705_v35 = vld [vmem:[%s20282_s11 + $0x2c0c] sm:$0xf]  ;;  %v17917_v6 = vld [vmem:[%s20282_s11 + $0x2c18] sm:$0xf0]  ;;  %v17792_v62 = vor.u32 %v19673_v8, %v17789_v24 }
 0x61a   : > { %11906 = vmatpush.bf16.msra.mxu2 %v18096_v42  ;;  %v19737_v22 = vld [vmem:[%s20282_s11 + $0x2d0c] sm:$0xf]  ;;  %v18045_v57 = vld [vmem:[%s20282_s11 + $0x2d18] sm:$0xf0]  ;;  %v17920_v50 = vor.u32 %v19705_v35, %v17917_v6 }
 0x61b   : > { %11919 = vmatpush.bf16.msra.mxu3 %v18224_v33  ;;  %v19769_v12 = vld [vmem:[%s20282_s11 + $0x2e0c] sm:$0xf]  ;;  %v18173_v2 = vld [vmem:[%s20282_s11 + $0x2e18] sm:$0xf0]  ;;  %v18048_v38 = vor.u32 %v19737_v22, %v18045_v57 }
 0x61c   : > { %v18176_v7 = vor.u32 %v19769_v12, %v18173_v2  ;;  %v19916_v59 = vld [vmem:[#allocation1 + $0x1b] sm:$0xff]  ;;  %v19917_v1 = vld [vmem:[#allocation1 + $0x24] sm:$0xff] }
 0x61d   : > { %11881 = vmatpush.bf16.msra.mxu0 %v17824_v4  ;;  %11894 = vmatpush.bf16.msra.mxu1 %v17952_v46  ;;  %v19919_v19 = vld [vmem:[#allocation1 + $0x36] sm:$0xff] }
 0x61e   : > { %11907 = vmatpush.bf16.msra.mxu2 %v18080_v17 }
 0x61f   : > { %11920 = vmatpush.bf16.msra.mxu3 %v18208_v51 }
 0x621   : > { %11882 = vmatpush.bf16.msra.mxu0 %v17808_v10  ;;  %11895 = vmatpush.bf16.msra.mxu1 %v17936_v21 }
 0x622   : > { %11908 = vmatpush.bf16.msra.mxu2 %v18064_v25 }
 0x623   : > { %11921 = vmatpush.bf16.msra.mxu3 %v18192_v49 }
 0x625   : > { %11883 = vmatpush.bf16.msra.mxu0 %v17792_v62  ;;  %11896 = vmatpush.bf16.msra.mxu1 %v17920_v50  ;;  %v11677_v9 = vpop.f32.mrf.mxu0  ;;  %v11690_v26 = vpop.f32.mrf.mxu1 }
 0x626   : > { %11909 = vmatpush.bf16.msra.mxu2 %v18048_v38  ;;  %v11678_v58 = vadd.f32 %v11677_v9, %v11665_v52 }
 0x627   : > { %11922 = vmatpush.bf16.msra.mxu3 %v18176_v7  ;;  %v11933_v7 = vrot.slane %v23225_v61, 4 }
 0x628   : > { %11884 = vmatmul.bf16.vlgmr.msra.gmra.mxu0 %v19916_v59  ;;  %11897 = vmatmul.bf16.vlgmr.msra.gmra.mxu1 %v19917_v1  ;;  %v11691_v18 = vadd.f32 %v11690_v26, %v11678_v58  ;;  %v353_v1 = vld [vmem:[#allocation2] sm:$0xff] }
 0x629   : > { %11910 = vmatmul.bf16.vlgmr.msra.gmra.mxu2 %v19918_v31 }
 0x62a   : > { %11923 = vmatmul.bf16.vlgmr.msra.gmra.mxu3 %v19919_v19  ;;  %v23959_v19 = vld [vmem:[#allocation17_spill] sm:$0xff] }
 0x62d   : > { %v11716_v16 = vpop.f32.mrf.mxu3  ;;  %v11679_v23 = vpop.f32.mrf.mxu0 }
 0x62e   : > { %v11703_v14 = vpop.f32.mrf.mxu2  ;;  %v11692_v36 = vpop.f32.mrf.mxu1 }
 0x62f   : > { %v11704_v54 = vadd.f32 %v11703_v14, %v11691_v18 }
 0x631   : > { %v11717_v47 = vadd.f32 %v11716_v16, %v11704_v54 }
 0x635   : > { %v11718_v63 = vpop.f32.mrf.mxu3 }
 0x636   : > { %v11705_v5 = vpop.f32.mrf.mxu2 }
 0x645   : > { %v11729_v39 = vpop.f32.mrf.mxu0  ;;  %v11742_v30 = vpop.f32.mrf.mxu1 }
 0x646   : > { %v11730_v42 = vadd.f32 %v11729_v39, %v11717_v47 }
 0x648   : > { %v11743_v45 = vadd.f32 %v11742_v30, %v11730_v42 }
 0x64d   : > { %v11768_v27 = vpop.f32.mrf.mxu3  ;;  %v11731_v43 = vpop.f32.mrf.mxu0 }
 0x64e   : > { %v11755_v60 = vpop.f32.mrf.mxu2  ;;  %v11744_v48 = vpop.f32.mrf.mxu1 }
 0x64f   : > { %v11756_v33 = vadd.f32 %v11755_v60, %v11743_v45 }
 0x651   : > { %v11769_v56 = vadd.f32 %v11768_v27, %v11756_v33 }
 0x655   : > { %v11770_v29 = vpop.f32.mrf.mxu3 }
 0x656   : > { %v11757_v11 = vpop.f32.mrf.mxu2 }
 0x665   : > { %v11781_v55 = vpop.f32.mrf.mxu0  ;;  %v11794_v41 = vpop.f32.mrf.mxu1 }
 0x666   : > { %v11782_v34 = vadd.f32 %v11781_v55, %v11769_v56 }
 0x668   : > { %v11795_v32 = vadd.f32 %v11794_v41, %v11782_v34 }
 0x66d   : > { %v11820_v4 = vpop.f32.mrf.mxu3  ;;  %v11783_v0 = vpop.f32.mrf.mxu0 }
 0x66e   : > { %v11807_v13 = vpop.f32.mrf.mxu2  ;;  %v11796_v52 = vpop.f32.mrf.mxu1 }
 0x66f   : > { %v11808_v53 = vadd.f32 %v11807_v13, %v11795_v32 }
 0x671   : > { %v11821_v25 = vadd.f32 %v11820_v4, %v11808_v53 }
 0x675   : > { %v11822_v17 = vpop.f32.mrf.mxu3 }
 0x676   : > { %v11809_v46 = vpop.f32.mrf.mxu2 }
 0x685   : > { %v11833_v3 = vpop.f32.mrf.mxu0  ;;  %v11846_v40 = vpop.f32.mrf.mxu1 }
 0x686   : > { %v11834_v8 = vadd.f32 %v11833_v3, %v11821_v25 }
 0x688   : > { %v11847_v24 = vadd.f32 %v11846_v40, %v11834_v8 }
 0x68d   : > { %v11872_v44 = vpop.f32.mrf.mxu3  ;;  %v11835_v20 = vpop.f32.mrf.mxu0 }
 0x68e   : > { %v11859_v51 = vpop.f32.mrf.mxu2  ;;  %v11848_v37 = vpop.f32.mrf.mxu1 }
 0x68f   : > { %v11860_v35 = vadd.f32 %v11859_v51, %v11847_v24 }
 0x691   : > { %v11873_v49 = vadd.f32 %v11872_v44, %v11860_v35 }
 0x695   : > { %v11874_v21 = vpop.f32.mrf.mxu3 }
 0x696   : > { %v11861_v10 = vpop.f32.mrf.mxu2 }
 0x6a5   : > { %v11885_v6 = vpop.f32.mrf.mxu0  ;;  %v11898_v22 = vpop.f32.mrf.mxu1 }
 0x6a6   : > { %v11886_v57 = vadd.f32 %v11885_v6, %v11873_v49 }
 0x6a8   : > { %v11899_v28 = vadd.f32 %v11898_v22, %v11886_v57 }
 0x6ac   : > { %v11911_v12 = vpop.f32.mrf.mxu2 }
 0x6ad   : > { %v11912_v2 = vadd.f32 %v11911_v12, %v11899_v28  ;;  %v11924_v15 = vpop.f32.mrf.mxu3  ;;  %v11887_v62 = vpop.f32.mrf.mxu0 }
 0x6ae   : > { %v11900_v50 = vpop.f32.mrf.mxu1 }
 0x6af   : > { %v11925_v38 = vadd.f32 %v11924_v15, %v11912_v2 }
 0x6b1   : > { %v11934_v59 = vrot.slane %v11925_v38, 2 }
 0x6b3   : > { %v11938_v31 = vsel %vm11937_vm1, %v11933_v7, %v11934_v59  ;;  %11947 = sbr.rel (%p18289_p2) target bundleno = 1891 (0x763), region = 64 }
 0x6b4   : > { %v11940_v9 = vsel %vm11939_vm2, %v23959_v19, %v11938_v31  ;;  %v11913_v58 = vpop.f32.mrf.mxu2 }
 0x6b5   : > { %v11942_v26 = vadd.f32 %v11940_v9, %v353_v1  ;;  %v11926_v18 = vpop.f32.mrf.mxu3 }
 0x6b7   : > { %11943 = vst [vmem:[#allocation2] sm:$0xff] %v11942_v26 }
 0x6b8   : > { %v12024_v14 = vld [vmem:[%s23911_s4 + $0x178] sm:$0xff]  ;;  %v12023_v61 = vld [vmem:[%s23911_s4 + $0x170] sm:$0xff]  ;;  %v12022_v36 = vld [vmem:[%s23911_s4 + $0x168] sm:$0xff]  ;;  %vm12131_vm3 = vcmask 918528  }
 0x6b9   : > { %v12040_v54 = vld [vmem:[%s23911_s4 + $0x1f8] sm:$0xff]  ;;  %12091 = vmatpush.msra.mxu2 %v12024_v14  ;;  %v12039_v47 = vld [vmem:[%s23911_s4 + $0x1f0] sm:$0xff]  ;;  %v12038_v39 = vld [vmem:[%s23911_s4 + $0x1e8] sm:$0xff] }
 0x6ba   : > { %12111 = vmatpush.msra.mxu3 %v12040_v54  ;;  %v11992_v16 = vld [vmem:[%s23911_s4 + $0x78] sm:$0xff]  ;;  %v11991_v5 = vld [vmem:[%s23911_s4 + $0x70] sm:$0xff]  ;;  %v11990_v42 = vld [vmem:[%s23911_s4 + $0x68] sm:$0xff] }
 0x6bb   : > { %v12008_v23 = vld [vmem:[%s23911_s4 + $0xf8] sm:$0xff]  ;;  %12051 = vmatpush.msra.mxu0 %v11992_v16  ;;  %v12007_v63 = vld [vmem:[%s23911_s4 + $0xf0] sm:$0xff]  ;;  %12092 = vmatpush.msra.mxu2 %v12023_v61  ;;  %v12021_v30 = vld [vmem:[%s23911_s4 + $0x160] sm:$0xff] }
 0x6bc   : > { %12071 = vmatpush.msra.mxu1 %v12008_v23  ;;  %12112 = vmatpush.msra.mxu3 %v12039_v47  ;;  %v12006_v45 = vld [vmem:[%s23911_s4 + $0xe8] sm:$0xff]  ;;  %v12037_v60 = vld [vmem:[%s23911_s4 + $0x1e0] sm:$0xff]  ;;  %v12020_v43 = vld [vmem:[%s23911_s4 + $0x158] sm:$0xff] }
 0x6bd   : > { %12052 = vmatpush.msra.mxu0 %v11991_v5  ;;  %12093 = vmatpush.msra.mxu2 %v12022_v36  ;;  %v11989_v33 = vld [vmem:[%s23911_s4 + $0x60] sm:$0xff]  ;;  %v12036_v48 = vld [vmem:[%s23911_s4 + $0x1d8] sm:$0xff]  ;;  %v12019_v29 = vld [vmem:[%s23911_s4 + $0x150] sm:$0xff] }
 0x6be   : > { %12072 = vmatpush.msra.mxu1 %v12007_v63  ;;  %12113 = vmatpush.msra.mxu3 %v12038_v39  ;;  %v12005_v27 = vld [vmem:[%s23911_s4 + $0xe0] sm:$0xff]  ;;  %v11988_v56 = vld [vmem:[%s23911_s4 + $0x58] sm:$0xff]  ;;  %v12035_v55 = vld [vmem:[%s23911_s4 + $0x1d0] sm:$0xff] }
 0x6bf   : > { %12053 = vmatpush.msra.mxu0 %v11990_v42  ;;  %12094 = vmatpush.msra.mxu2 %v12021_v30  ;;  %v12004_v11 = vld [vmem:[%s23911_s4 + $0xd8] sm:$0xff]  ;;  %v11987_v41 = vld [vmem:[%s23911_s4 + $0x50] sm:$0xff]  ;;  %v12018_v4 = vld [vmem:[%s23911_s4 + $0x148] sm:$0xff] }
 0x6c0   : > { %12073 = vmatpush.msra.mxu1 %v12006_v45  ;;  %12114 = vmatpush.msra.mxu3 %v12037_v60  ;;  %v12003_v13 = vld [vmem:[%s23911_s4 + $0xd0] sm:$0xff]  ;;  %v12034_v0 = vld [vmem:[%s23911_s4 + $0x1c8] sm:$0xff]  ;;  %v12017_v17 = vld [vmem:[%s23911_s4 + $0x140] sm:$0xff] }
 0x6c1   : > { %12054 = vmatpush.msra.mxu0 %v11989_v33  ;;  %12095 = vmatpush.msra.mxu2 %v12020_v43  ;;  %v11986_v52 = vld [vmem:[%s23911_s4 + $0x48] sm:$0xff]  ;;  %v12033_v3 = vld [vmem:[%s23911_s4 + $0x1c0] sm:$0xff]  ;;  %v12016_v51 = vld [vmem:[%s23911_s4 + $0x138] sm:$0xff] }
 0x6c2   : > { %12074 = vmatpush.msra.mxu1 %v12005_v27  ;;  %12115 = vmatpush.msra.mxu3 %v12036_v48  ;;  %v12002_v46 = vld [vmem:[%s23911_s4 + $0xc8] sm:$0xff]  ;;  %v11985_v40 = vld [vmem:[%s23911_s4 + $0x40] sm:$0xff]  ;;  %v12032_v44 = vld [vmem:[%s23911_s4 + $0x1b8] sm:$0xff] }
 0x6c3   : > { %12055 = vmatpush.msra.mxu0 %v11988_v56  ;;  %12096 = vmatpush.msra.mxu2 %v12019_v29  ;;  %v12001_v34 = vld [vmem:[%s23911_s4 + $0xc0] sm:$0xff]  ;;  %v11984_v20 = vld [vmem:[%s23911_s4 + $0x38] sm:$0xff]  ;;  %v12015_v32 = vld [vmem:[%s23911_s4 + $0x130] sm:$0xff] }
 0x6c4   : > { %12075 = vmatpush.msra.mxu1 %v12004_v11  ;;  %12116 = vmatpush.msra.mxu3 %v12035_v55  ;;  %v12000_v37 = vld [vmem:[%s23911_s4 + $0xb8] sm:$0xff]  ;;  %v12031_v53 = vld [vmem:[%s23911_s4 + $0x1b0] sm:$0xff]  ;;  %v12014_v25 = vld [vmem:[%s23911_s4 + $0x128] sm:$0xff] }
 0x6c5   : > { %12056 = vmatpush.msra.mxu0 %v11987_v41  ;;  %12097 = vmatpush.msra.mxu2 %v12018_v4  ;;  %v11983_v10 = vld [vmem:[%s23911_s4 + $0x30] sm:$0xff]  ;;  %v12030_v8 = vld [vmem:[%s23911_s4 + $0x1a8] sm:$0xff]  ;;  %v12013_v24 = vld [vmem:[%s23911_s4 + $0x120] sm:$0xff] }
 0x6c6   : > { %12076 = vmatpush.msra.mxu1 %v12003_v13  ;;  %12117 = vmatpush.msra.mxu3 %v12034_v0  ;;  %v11999_v21 = vld [vmem:[%s23911_s4 + $0xb0] sm:$0xff]  ;;  %v11982_v35 = vld [vmem:[%s23911_s4 + $0x28] sm:$0xff]  ;;  %v12029_v6 = vld [vmem:[%s23911_s4 + $0x1a0] sm:$0xff] }
 0x6c7   : > { %12057 = vmatpush.msra.mxu0 %v11986_v52  ;;  %12098 = vmatpush.msra.mxu2 %v12017_v17  ;;  %v11998_v49 = vld [vmem:[%s23911_s4 + $0xa8] sm:$0xff]  ;;  %v11949_v22 = vld [vmem:[#allocation8] sm:$0xf]  ;;  %v11963_v57 = vld [vmem:[#allocation9] sm:$0xf] }
 0x6c8   : > { %12077 = vmatpush.msra.mxu1 %v12002_v46  ;;  %12118 = vmatpush.msra.mxu3 %v12033_v3  ;;  %v11981_v28 = vld [vmem:[%s23911_s4 + $0x20] sm:$0xff]  ;;  %v11951_v2 = vperm.slane %v11949_v22, 0  ;;  %v11952_v15 = vperm.slane %v11949_v22, 1  ;;  %v11953_v62 = vperm.slane %v11949_v22, 2  ;;  %v11954_v50 = vperm.slane %v11949_v22, 3  ;;  %v12012_v38 = vld [vmem:[%s23911_s4 + $0x118] sm:$0xff] }
 0x6c9   : > { %12058 = vmatpush.msra.mxu0 %v11985_v40  ;;  %12099 = vmatpush.msra.mxu2 %v12016_v51  ;;  %v11997_v12 = vld [vmem:[%s23911_s4 + $0xa0] sm:$0xff]  ;;  %v12028_v7 = vld [vmem:[%s23911_s4 + $0x198] sm:$0xff]  ;;  %v11965_v59 = vperm.slane %v11963_v57, 0  ;;  %v11966_v1 = vperm.slane %v11963_v57, 1  ;;  %v11967_v31 = vperm.slane %v11963_v57, 2  ;;  %v11968_v19 = vperm.slane %v11963_v57, 3 }
 0x6ca   : > { %12078 = vmatpush.msra.mxu1 %v12001_v34  ;;  %12119 = vmatpush.msra.mxu3 %v12032_v44  ;;  %v11980_v9 = vld [vmem:[%s23911_s4 + $0x18] sm:$0xff]  ;;  %v11955_v26 = vrot.slane %v11952_v15, 6  ;;  %v11956_v18 = vrot.slane %v11953_v62, 4  ;;  %v11957_v14 = vrot.slane %v11954_v50, 2  ;;  %v12011_v61 = vld [vmem:[%s23911_s4 + $0x110] sm:$0xff]  ;;  %v11948_v16 = vld [vmem:[#allocation2] sm:$0xff] }
 0x6cb   : > { %12059 = vmatpush.msra.mxu0 %v11984_v20  ;;  %12100 = vmatpush.msra.mxu2 %v12015_v32  ;;  %v11996_v58 = vld [vmem:[%s23911_s4 + $0x98] sm:$0xff]  ;;  %v12027_v54 = vld [vmem:[%s23911_s4 + $0x190] sm:$0xff]  ;;  %v11969_v23 = vrot.slane %v11966_v1, 6  ;;  %v11970_v36 = vrot.slane %v11967_v31, 4  ;;  %v11971_v47 = vrot.slane %v11968_v19, 2  ;;  %v12010_v30 = vld [vmem:[%s23911_s4 + $0x108] sm:$0xff] }
 0x6cc   : > { %12079 = vmatpush.msra.mxu1 %v12000_v37  ;;  %12120 = vmatpush.msra.mxu3 %v12031_v53  ;;  %v11979_v5 = vld [vmem:[%s23911_s4 + $0x10] sm:$0xff]  ;;  %v11958_v39 = vsel %vm11935_vm0, %v11951_v2, %v11955_v26  ;;  %v11959_v42 = vsel %vm11937_vm1, %v11956_v18, %v11957_v14  ;;  %v12026_v45 = vld [vmem:[%s23911_s4 + $0x188] sm:$0xff]  ;;  %v12009_v29 = vld [vmem:[%s23911_s4 + $0x100] sm:$0xff] }
 0x6cd   : > { %12060 = vmatpush.msra.mxu0 %v11983_v10  ;;  %12101 = vmatpush.msra.mxu2 %v12014_v25  ;;  %v11995_v63 = vld [vmem:[%s23911_s4 + $0x90] sm:$0xff]  ;;  %v11960_v60 = vsel %vm11939_vm2, %v11958_v39, %v11959_v42  ;;  %v11972_v33 = vsel %vm11935_vm0, %v11965_v59, %v11969_v23  ;;  %v11973_v27 = vsel %vm11937_vm1, %v11970_v36, %v11971_v47  ;;  %v11978_v56 = vld [vmem:[%s23911_s4 + $0x8] sm:$0xff]  ;;  %v12025_v55 = vld [vmem:[%s23911_s4 + $0x180] sm:$0xff] }
 0x6ce   : > { %12080 = vmatpush.msra.mxu1 %v11999_v21  ;;  %12121 = vmatpush.msra.mxu3 %v12030_v8  ;;  %v11962_v43 = vmul.f32 %v11960_v60, %v11948_v16  ;;  %v11974_v48 = vsel %vm11939_vm2, %v11972_v33, %v11973_v27  ;;  %v11994_v11 = vld [vmem:[%s23911_s4 + $0x88] sm:$0xff]  ;;  %v11977_v13 = vld [vmem:[%s23911_s4] sm:$0xff] }
 0x6cf   : > { %12061 = vmatpush.msra.mxu0 %v11982_v35  ;;  %12102 = vmatpush.msra.mxu2 %v12013_v24  ;;  %v11993_v4 = vld [vmem:[%s23911_s4 + $0x80] sm:$0xff] }
 0x6d0   : > { %12081 = vmatpush.msra.mxu1 %v11998_v49  ;;  %12122 = vmatpush.msra.mxu3 %v12029_v6  ;;  %v11976_v41 = vadd.f32 %v11974_v48, %v11962_v43 }
 0x6d1   : > { %12062 = vmatpush.msra.mxu0 %v11981_v28  ;;  %12103 = vmatpush.msra.mxu2 %v12012_v38 }
 0x6d2   : > { %12082 = vmatpush.msra.mxu1 %v11997_v12  ;;  %12123 = vmatpush.msra.mxu3 %v12028_v7  ;;  %12042 = vst [vmem:[#allocation1] ss:$4 sm:$0xff] %v11976_v41 }
 0x6d3   : > { %12063 = vmatpush.msra.mxu0 %v11980_v9  ;;  %12104 = vmatpush.msra.mxu2 %v12011_v61 }
 0x6d4   : > { %12083 = vmatpush.msra.mxu1 %v11996_v58  ;;  %12124 = vmatpush.msra.mxu3 %v12027_v54 }
 0x6d5   : > { %12064 = vmatpush.msra.mxu0 %v11979_v5  ;;  %12105 = vmatpush.msra.mxu2 %v12010_v30 }
 0x6d6   : > { %12084 = vmatpush.msra.mxu1 %v11995_v63  ;;  %12125 = vmatpush.msra.mxu3 %v12026_v45 }
 0x6d7   : > { %12065 = vmatpush.msra.mxu0 %v11978_v56  ;;  %12106 = vmatpush.msra.mxu2 %v12009_v29 }
 0x6d8   : > { %12085 = vmatpush.msra.mxu1 %v11994_v11  ;;  %12126 = vmatpush.msra.mxu3 %v12025_v55 }
 0x6d9   : > { %12066 = vmatpush.msra.mxu0 %v11977_v13  ;;  %v12045_v0 = vld.sshfl [vmem:[#allocation1 + $0x10] sm:$0xff pattern:$0x73625140]  ;;  %v12046_v52 = vld.sshfl [vmem:[#allocation1 + $0x18] sm:$0xff pattern:$0x73625140] }
 0x6da   : > { %12086 = vmatpush.msra.mxu1 %v11993_v4  ;;  %12107 = vmatmul.f32.vlgmr.msra.gmra.mxu2 %v12045_v0  ;;  %v12043_v46 = vld.sshfl [vmem:[#allocation1] sm:$0xff pattern:$0x73625140]  ;;  %v12044_v17 = vld.sshfl [vmem:[#allocation1 + $0x8] sm:$0xff pattern:$0x73625140] }
 0x6db   : > { %12127 = vmatmul.f32.vlgmr.msra.gmra.mxu3 %v12046_v52  ;;  %12067 = vmatmul.f32.vlgmr.msra.gmra.mxu0 %v12043_v46 }
 0x6dc   : > { %12087 = vmatmul.f32.vlgmr.msra.gmra.mxu1 %v12044_v17 }
 0x758   : > { %v12068_v3 = vpop.f32.mrf.mxu0 }
 0x759   : > { %v12088_v40 = vpop.f32.mrf.mxu1 }
 0x75a   : > { %v12089_v34 = vadd.f32 %v12088_v40, %v12068_v3 }
 0x75d   : > { %v12108_v51 = vpop.f32.mrf.mxu2 }
 0x75e   : > { %v12128_v44 = vpop.f32.mrf.mxu3  ;;  %v12109_v20 = vadd.f32 %v12108_v51, %v12089_v34 }
 0x760   : > { %v12129_v37 = vadd.f32 %v12128_v44, %v12109_v20 }
 0x762   : > { %12132 = vst.msk [vmem:[#allocation11] sm:$0x3] %vm12131_vm3, %v12129_v37 }
 0x763 PF: > { %p19842_p3 = scmp.eq.s32.totalorder %s20202_s24, 4  ;;  %s12143_s0 = sshll.u32 %s23912_s5, 4  ;;  %s12144_s0 = int_to_ptr.hbm [resolvable:$true] %s12143_s0 }
 0x764   : > { %s20142_s27 = smov [#allocation11]  }
 0x765   : > { %s12141_s6 = sshll.u32 %s20142_s27, 4  ;;  %s12142_s6 = int_to_ptr.vmem [resolvable:$true] %s12141_s6 }
 0x766   : > { %19818 = dma.vmem_to_hbm [thread:$0]  (%p19842_p3), %s12142_s6, 32, %s12144_s0, [#allocation5]  }
 0x767   : > { %20109 = dma.done.wait (%p19842_p3), [#allocation5], 32  }
 0x768   : > { %20111 = vsyncadd (%p19842_p3), [#allocation5], 4294967264 }
 0x769 PF: > { %s21_s23 = sadd.s32 1, %s20134_s23   ;;  %s23960_s10 = smov %s20270_s18 }
 0x76a   : > { %p18_p4 = scmp.ge.s32.totalorder %s21_s23, 7   ;;  %s23961_s18 = smov %s20118_s19 }
 0x76b   : > { %s23962_s19 = smov %s20122_s20  ;;  %s23963_s20 = smov %s23960_s10 }
 0x76c   : > { %s23964_s21 = smov %s20130_s22  ;;  %s23965_s22 = smov %s23967_s29 }
 0x76d   :  { %20 = sbr.rel (!%p18_p4) target bundleno = 9 (0x9), region = 105 }
 0x772   :  { %12157 = vsyncpa [#allocation4], 1 }
 0x773   :  { %12159 = vsyncpa [#allocation4 + $0x1], 1 }
 0x774   :  { %12160 = vsyncpa [#allocation7], 1 }
 0x775   :  { %12162 = vsyncpa [#allocation7 + $0x1], 1 }
 0x776   :  { %12163 = vsyncpa [#allocation10], 1 }
 0x777   :  { %12164 = vsyncpa [#allocation5], 1 }
 0x778   :  { %12166 = vsyncpa [#allocation5 + $0x1], 1 }

</bundles_post_ra>
